<compile_context>
chip_gen: v6e
topology: v6e:2x2x1
jax: 0.10.0
libtpu: 0.0.40
codegen_flags: <defaults>
</compile_context>

<pallas_src>
import jax
import jax.numpy as jnp
from jax.experimental import pallas as pl
from jax.experimental.pallas import tpu as pltpu

EPS = 1e-5
PAD = 16  # halo on each side of the length axis; multiple of the bf16 sublane tile (16)

_VMEM = pl.BlockSpec(memory_space=pltpu.MemorySpace.VMEM)


# ------------------------------ Pallas kernel ------------------------------ #

def _bn(y, gamma, beta, relu):
    """Training-mode BatchNorm1d over (N, L): two-pass mean/var (biased), f32, opt. ReLU."""
    n = y.shape[0] * y.shape[1]
    mean = jnp.sum(y, axis=(0, 1), keepdims=True) * (1.0 / n)
    d = y - mean
    var = jnp.sum(d * d, axis=(0, 1), keepdims=True) * (1.0 / n)
    out = d * jax.lax.rsqrt(var + EPS) * gamma + beta
    return jnp.maximum(out, 0.0) if relu else out


def _conv_same(h, w_flat, K, pad_ref, col_ref):
    """Conv1d(padding='same') as ONE deep-contraction MXU matmul via in-VMEM im2col.

    h: (N, L, C) activations (f32 or bf16); w_flat: (K*C, Cout') bf16, row index k*C + ci.
    pad_ref: zero-bordered (N, L+2*PAD, Cmax) bf16 scratch (borders pre-zeroed once);
    col_ref: (N, L, 8*Cmax) bf16 im2col staging scratch.
    """
    N, L, C = h.shape
    CO = w_flat.shape[-1]
    off = PAD - (K - 1) // 2                    # PyTorch 'same': left pad = (K-1)//2
    pad_ref[:, PAD:PAD + L, :C] = h.astype(jnp.bfloat16)   # tile-aligned interior store
    for k in range(K):                          # static unrolled tap gather into im2col
        col_ref[:, :, k * C:(k + 1) * C] = pad_ref[:, off + k:off + k + L, :C]
    m = col_ref[:, :, :K * C].reshape(N * L, K * C)
    acc = jnp.dot(m, w_flat, preferred_element_type=jnp.float32)
    return acc.reshape(N, L, CO)


def _block(h, prm, pad_ref, col_ref):
    """One ResNetBlock; all intermediates stay in registers/VMEM."""
    w8sc, w5, w3, g8, be8, g5, be5, g3, be3 = prm
    co = w5.shape[-1]
    # conv_8 and the 1x1 shortcut share one matmul (wsc folded into extra RHS columns).
    y = _conv_same(h, w8sc[...], 8, pad_ref, col_ref)            # (N, L, 2*co) f32
    a = _bn(y[:, :, :co], g8[...], be8[...], relu=True)          # conv_8 -> bn_8 -> act
    s = _bn(y[:, :, co:], g8[...], be8[...], relu=False)         # shortcut -> bn_8 (fresh stats)
    c = _bn(_conv_same(a, w5[...], 5, pad_ref, col_ref), g5[...], be5[...], relu=True)
    z = _bn(_conv_same(c, w3[...], 8, pad_ref, col_ref), g3[...], be3[...], relu=False)
    return jnp.maximum(s + z, 0.0)                               # residual add + act (f32)


def _resnet_kernel(x_ref, *refs):
    """Whole ResNet: 3 blocks + GAP1d fused; refs = 27 params, o_ref, 2 scratch."""
    o_ref, pad_ref, col_ref = refs[27], refs[28], refs[29]

    # Zero ONLY the halo borders, once; interiors are fully overwritten by every conv.
    N, Lp, Cm = pad_ref.shape
    zero = jnp.zeros((N, PAD, Cm), jnp.bfloat16)
    pad_ref[:, :PAD, :] = zero
    pad_ref[:, Lp - PAD:, :] = zero

    h = x_ref[...]                                               # (N, L, Cin) bf16 (NLC)
    for b in range(3):
        h = _block(h, refs[9 * b: 9 * (b + 1)], pad_ref, col_ref)
    o_ref[...] = jnp.mean(h, axis=1)                             # GAP1d -> (N, Cout) f32


# ------------------------------ JAX wrapper -------------------------------- #

def resnet_forward(x_ncl, kparams):
    """x_ncl: (N, C, L) PyTorch layout -> (N, 2*out_channels) f32.  ONE pallas_call."""
    N, C, L = x_ncl.shape
    couts = [kparams[9 * b + 1].shape[-1] for b in range(3)]     # per-block out channels
    cmax = max(C, *couts)
    x = jnp.transpose(x_ncl, (0, 2, 1)).astype(jnp.bfloat16)     # tiny NCL->NLC, once
    return pl.pallas_call(
        _resnet_kernel,
        out_shape=jax.ShapeDtypeStruct((N, couts[-1]), jnp.float32),
        in_specs=[_VMEM] * (1 + len(kparams)),
        out_specs=_VMEM,
        scratch_shapes=[
            pltpu.VMEM((N, L + 2 * PAD, cmax), jnp.bfloat16),    # zero-bordered pad buffer
            pltpu.VMEM((N, L, 8 * cmax), jnp.bfloat16),          # im2col staging buffer
        ],
        # Headroom if shapes ever scale (raises v5e's 16 MiB default; still <= half of
        # v7x's 64 MiB physical VMEM).  Current working set is a few KiB.
        compiler_params=pltpu.CompilerParams(vmem_limit_bytes=32 * 1024 * 1024),
    )(x, *kparams)


# --------------------------- parameter init / pack -------------------------- #

def _conv_weight(key, K, cin, cout):
    # PyTorch Conv1d default init bound; stored bf16 (same rounded values feed the
    # reference, so weight quantization is not part of the error budget).
    # Conv bias omitted: exactly cancelled by training-mode BN mean subtraction.
    bound = 1.0 / float(cin * K) ** 0.5
    w = jax.random.uniform(key, (K, cin, cout), jnp.float32, -bound, bound)
    return w.astype(jnp.bfloat16)


def init_block(key, cin, cout):
    k8, k5, k3, ksc = jax.random.split(key, 4)
    ones = jnp.ones((1, 1, cout), jnp.float32)
    zeros = jnp.zeros((1, 1, cout), jnp.float32)
    return {
        "w8": _conv_weight(k8, 8, cin, cout), "g8": ones, "be8": zeros,
        "w5": _conv_weight(k5, 5, cout, cout), "g5": ones, "be5": zeros,
        "w3": _conv_weight(k3, 8, cout, cout), "g3": ones, "be3": zeros,  # conv_3: K=8
        "wsc": _conv_weight(ksc, 1, cin, cout),
    }


def init_resnet(key, dimension_num, out_channels):
    k1, k2, k3 = jax.random.split(key, 3)
    return {
        "block1": init_block(k1, dimension_num, out_channels),
        "block2": init_block(k2, out_channels, out_channels * 2),
        "block3": init_block(k3, out_channels * 2, out_channels * 2),
    }


def pack_kernel_params(params):
    """One-time weight pre-layout for the fused kernel (done eagerly, outside jit).

    Per block: [w8sc (8*Cin, 2*Cout) with the 1x1 shortcut folded into the center-tap
    rows of the right Cout columns, w5 (5*Cout, Cout), w3 (8*Cout, Cout), g8, be8, g5,
    be5, g3, be3].  All weights bf16, BN params f32.
    """
    out = []
    for name in ("block1", "block2", "block3"):
        p = params[name]
        K8, cin, cout = p["w8"].shape
        w8_flat = p["w8"].reshape(K8 * cin, cout)
        ktap = (K8 - 1) // 2                      # center tap <-> unshifted x
        sc_cols = jnp.zeros((K8 * cin, cout), p["w8"].dtype)
        sc_cols = sc_cols.at[ktap * cin:(ktap + 1) * cin, :].set(p["wsc"][0])
        w8sc = jnp.concatenate([w8_flat, sc_cols], axis=1).astype(jnp.bfloat16)
        w5 = p["w5"].reshape(-1, cout).astype(jnp.bfloat16)
        w3 = p["w3"].reshape(-1, cout).astype(jnp.bfloat16)
        out += [w8sc, w5, w3, p["g8"], p["be8"], p["g5"], p["be5"], p["g3"], p["be3"]]
    return out


# --------------------------- pure-JAX f32 reference -------------------------- #

def _ref_conv_bn(x, w, gamma, beta, relu):
    K, _, cout = w.shape
    L = x.shape[1]
    p_l = (K - 1) // 2
    p_r = (K - 1) - p_l
    xp = jnp.pad(x, ((0, 0), (p_l, p_r), (0, 0)))
    y = jnp.zeros(x.shape[:2] + (cout,), jnp.float32)
    for k in range(K):
        y = y + jnp.einsum("nlc,cd->nld", xp[:, k:k + L, :], w[k])
    mean = jnp.mean(y, axis=(0, 1), keepdims=True)
    var = jnp.mean((y - mean) ** 2, axis=(0, 1), keepdims=True)
    y = (y - mean) * jax.lax.rsqrt(var + EPS) * gamma + beta
    return jnp.maximum(y, 0.0) if relu else y


def _ref_block(x, p, with_gap=False):
    f32 = lambda name: p[name].astype(jnp.float32)
    a = _ref_conv_bn(x, f32("w8"), p["g8"], p["be8"], True)
    c = _ref_conv_bn(a, f32("w5"), p["g5"], p["be5"], True)
    z = _ref_conv_bn(c, f32("w3"), p["g3"], p["be3"], False)
    s = _ref_conv_bn(x, f32("wsc"), p["g8"], p["be8"], False)
    out = jnp.maximum(s + z, 0.0)
    return jnp.mean(out, axis=1) if with_gap else out


def resnet_reference(x_ncl, params):
    x = jnp.transpose(x_ncl, (0, 2, 1)).astype(jnp.float32)
    h = _ref_block(x, params["block1"])
    h = _ref_block(h, params["block2"])
    return _ref_block(h, params["block3"], with_gap=True)


# ---------------------------------- main ------------------------------------ #

if __name__ == "__main__":
    N, C_IN, L = 2, 4, 16          # batch, dimension_num, sequence length
    OUT_CH = 8                     # out_channels -> final feature dim = 16

    key = jax.random.PRNGKey(0)
    kx, kp = jax.random.split(key)
    x = jax.random.normal(kx, (N, C_IN, L), jnp.float32)   # PyTorch NCL layout
    params = init_resnet(kp, C_IN, OUT_CH)
    kparams = pack_kernel_params(params)                   # one-time weight pre-layout

    out = jax.block_until_ready(jax.jit(resnet_forward)(x, kparams))
    assert out.shape == (N, OUT_CH * 2), out.shape
    assert bool(jnp.all(jnp.isfinite(out)))

    ref = resnet_reference(x, params)
    err = float(jnp.max(jnp.abs(out.astype(jnp.float32) - ref)))
    assert err < 0.1, f"max |pallas - reference| = {err}"
    print("KERNEL_OK")
</pallas_src>

<mosaic_0001>
module attributes {stable_mosaic.version = 11 : i64} {
  func.func @_resnet_kernel(%arg0: memref<2x16x4xbf16, #tpu.memory_space<vmem>>, %arg1: memref<32x16xbf16, #tpu.memory_space<vmem>>, %arg2: memref<40x8xbf16, #tpu.memory_space<vmem>>, %arg3: memref<64x8xbf16, #tpu.memory_space<vmem>>, %arg4: memref<1x1x8xf32, #tpu.memory_space<vmem>>, %arg5: memref<1x1x8xf32, #tpu.memory_space<vmem>>, %arg6: memref<1x1x8xf32, #tpu.memory_space<vmem>>, %arg7: memref<1x1x8xf32, #tpu.memory_space<vmem>>, %arg8: memref<1x1x8xf32, #tpu.memory_space<vmem>>, %arg9: memref<1x1x8xf32, #tpu.memory_space<vmem>>, %arg10: memref<64x32xbf16, #tpu.memory_space<vmem>>, %arg11: memref<80x16xbf16, #tpu.memory_space<vmem>>, %arg12: memref<128x16xbf16, #tpu.memory_space<vmem>>, %arg13: memref<1x1x16xf32, #tpu.memory_space<vmem>>, %arg14: memref<1x1x16xf32, #tpu.memory_space<vmem>>, %arg15: memref<1x1x16xf32, #tpu.memory_space<vmem>>, %arg16: memref<1x1x16xf32, #tpu.memory_space<vmem>>, %arg17: memref<1x1x16xf32, #tpu.memory_space<vmem>>, %arg18: memref<1x1x16xf32, #tpu.memory_space<vmem>>, %arg19: memref<128x32xbf16, #tpu.memory_space<vmem>>, %arg20: memref<80x16xbf16, #tpu.memory_space<vmem>>, %arg21: memref<128x16xbf16, #tpu.memory_space<vmem>>, %arg22: memref<1x1x16xf32, #tpu.memory_space<vmem>>, %arg23: memref<1x1x16xf32, #tpu.memory_space<vmem>>, %arg24: memref<1x1x16xf32, #tpu.memory_space<vmem>>, %arg25: memref<1x1x16xf32, #tpu.memory_space<vmem>>, %arg26: memref<1x1x16xf32, #tpu.memory_space<vmem>>, %arg27: memref<1x1x16xf32, #tpu.memory_space<vmem>>, %arg28: memref<2x16xf32, #tpu.memory_space<vmem>>, %arg29: memref<2x48x16xbf16, #tpu.memory_space<vmem>>, %arg30: memref<2x16x128xbf16, #tpu.memory_space<vmem>>) attributes {dimension_semantics = [], scalar_prefetch = 0 : i64, scratch_operands = 2 : i64, tpu.core_type = #tpu.core_type<tc>} {
    %cst = arith.constant 0.000000e+00 : bf16
    %0 = vector.broadcast %cst : bf16 to vector<2x16x16xbf16>
    %c0 = arith.constant 0 : index
    %c0_0 = arith.constant 0 : index
    %c0_1 = arith.constant 0 : index
    %1 = vector.load %arg29[%c0, %c0_0, %c0_1] : memref<2x48x16xbf16, #tpu.memory_space<vmem>>, vector<2x16x16xbf16>
    tpu.vector_store %arg29[%c0, %c0_0, %c0_1], %0 {strides = array<i32>} : memref<2x48x16xbf16, #tpu.memory_space<vmem>>, vector<2x16x16xbf16>,
    %c0_2 = arith.constant 0 : index
    %c32 = arith.constant 32 : index
    %c0_3 = arith.constant 0 : index
    %2 = vector.load %arg29[%c0_2, %c32, %c0_3] : memref<2x48x16xbf16, #tpu.memory_space<vmem>>, vector<2x16x16xbf16>
    tpu.vector_store %arg29[%c0_2, %c32, %c0_3], %0 {strides = array<i32>} : memref<2x48x16xbf16, #tpu.memory_space<vmem>>, vector<2x16x16xbf16>,
    %c0_4 = arith.constant 0 : index
    %c0_5 = arith.constant 0 : index
    %c0_6 = arith.constant 0 : index
    %3 = vector.load %arg0[%c0_4, %c0_5, %c0_6] : memref<2x16x4xbf16, #tpu.memory_space<vmem>>, vector<2x16x4xbf16>
    %c0_7 = arith.constant 0 : index
    %c0_8 = arith.constant 0 : index
    %4 = vector.load %arg1[%c0_7, %c0_8] : memref<32x16xbf16, #tpu.memory_space<vmem>>, vector<32x16xbf16>
    %c0_9 = arith.constant 0 : index
    %c16 = arith.constant 16 : index
    %c0_10 = arith.constant 0 : index
    %5 = vector.load %arg29[%c0_9, %c16, %c0_10] : memref<2x48x16xbf16, #tpu.memory_space<vmem>>, vector<2x16x4xbf16>
    tpu.vector_store %arg29[%c0_9, %c16, %c0_10], %3 {strides = array<i32>} : memref<2x48x16xbf16, #tpu.memory_space<vmem>>, vector<2x16x4xbf16>,
    %c0_11 = arith.constant 0 : index
    %c13 = arith.constant 13 : index
    %c0_12 = arith.constant 0 : index
    %6 = vector.load %arg29[%c0_11, %c13, %c0_12] : memref<2x48x16xbf16, #tpu.memory_space<vmem>>, vector<2x16x4xbf16>
    %c0_13 = arith.constant 0 : index
    %c0_14 = arith.constant 0 : index
    %c0_15 = arith.constant 0 : index
    %7 = vector.load %arg30[%c0_13, %c0_14, %c0_15] : memref<2x16x128xbf16, #tpu.memory_space<vmem>>, vector<2x16x4xbf16>
    tpu.vector_store %arg30[%c0_13, %c0_14, %c0_15], %6 {strides = array<i32>} : memref<2x16x128xbf16, #tpu.memory_space<vmem>>, vector<2x16x4xbf16>,
    %c0_16 = arith.constant 0 : index
    %c14 = arith.constant 14 : index
    %c0_17 = arith.constant 0 : index
    %8 = vector.load %arg29[%c0_16, %c14, %c0_17] : memref<2x48x16xbf16, #tpu.memory_space<vmem>>, vector<2x16x4xbf16>
    %c0_18 = arith.constant 0 : index
    %c0_19 = arith.constant 0 : index
    %c4 = arith.constant 4 : index
    %9 = vector.load %arg30[%c0_18, %c0_19, %c4] : memref<2x16x128xbf16, #tpu.memory_space<vmem>>, vector<2x16x4xbf16>
    tpu.vector_store %arg30[%c0_18, %c0_19, %c4], %8 {strides = array<i32>} : memref<2x16x128xbf16, #tpu.memory_space<vmem>>, vector<2x16x4xbf16>,
    %c0_20 = arith.constant 0 : index
    %c15 = arith.constant 15 : index
    %c0_21 = arith.constant 0 : index
    %10 = vector.load %arg29[%c0_20, %c15, %c0_21] : memref<2x48x16xbf16, #tpu.memory_space<vmem>>, vector<2x16x4xbf16>
    %c0_22 = arith.constant 0 : index
    %c0_23 = arith.constant 0 : index
    %c8 = arith.constant 8 : index
    %11 = vector.load %arg30[%c0_22, %c0_23, %c8] : memref<2x16x128xbf16, #tpu.memory_space<vmem>>, vector<2x16x4xbf16>
    tpu.vector_store %arg30[%c0_22, %c0_23, %c8], %10 {strides = array<i32>} : memref<2x16x128xbf16, #tpu.memory_space<vmem>>, vector<2x16x4xbf16>,
    %c0_24 = arith.constant 0 : index
    %c16_25 = arith.constant 16 : index
    %c0_26 = arith.constant 0 : index
    %12 = vector.load %arg29[%c0_24, %c16_25, %c0_26] : memref<2x48x16xbf16, #tpu.memory_space<vmem>>, vector<2x16x4xbf16>
    %c0_27 = arith.constant 0 : index
    %c0_28 = arith.constant 0 : index
    %c12 = arith.constant 12 : index
    %13 = vector.load %arg30[%c0_27, %c0_28, %c12] : memref<2x16x128xbf16, #tpu.memory_space<vmem>>, vector<2x16x4xbf16>
    tpu.vector_store %arg30[%c0_27, %c0_28, %c12], %12 {strides = array<i32>} : memref<2x16x128xbf16, #tpu.memory_space<vmem>>, vector<2x16x4xbf16>,
    %c0_29 = arith.constant 0 : index
    %c17 = arith.constant 17 : index
    %c0_30 = arith.constant 0 : index
    %14 = vector.load %arg29[%c0_29, %c17, %c0_30] : memref<2x48x16xbf16, #tpu.memory_space<vmem>>, vector<2x16x4xbf16>
    %c0_31 = arith.constant 0 : index
    %c0_32 = arith.constant 0 : index
    %c16_33 = arith.constant 16 : index
    %15 = vector.load %arg30[%c0_31, %c0_32, %c16_33] : memref<2x16x128xbf16, #tpu.memory_space<vmem>>, vector<2x16x4xbf16>
    tpu.vector_store %arg30[%c0_31, %c0_32, %c16_33], %14 {strides = array<i32>} : memref<2x16x128xbf16, #tpu.memory_space<vmem>>, vector<2x16x4xbf16>,
    %c0_34 = arith.constant 0 : index
    %c18 = arith.constant 18 : index
    %c0_35 = arith.constant 0 : index
    %16 = vector.load %arg29[%c0_34, %c18, %c0_35] : memref<2x48x16xbf16, #tpu.memory_space<vmem>>, vector<2x16x4xbf16>
    %c0_36 = arith.constant 0 : index
    %c0_37 = arith.constant 0 : index
    %c20 = arith.constant 20 : index
    %17 = vector.load %arg30[%c0_36, %c0_37, %c20] : memref<2x16x128xbf16, #tpu.memory_space<vmem>>, vector<2x16x4xbf16>
    tpu.vector_store %arg30[%c0_36, %c0_37, %c20], %16 {strides = array<i32>} : memref<2x16x128xbf16, #tpu.memory_space<vmem>>, vector<2x16x4xbf16>,
    %c0_38 = arith.constant 0 : index
    %c19 = arith.constant 19 : index
    %c0_39 = arith.constant 0 : index
    %18 = vector.load %arg29[%c0_38, %c19, %c0_39] : memref<2x48x16xbf16, #tpu.memory_space<vmem>>, vector<2x16x4xbf16>
    %c0_40 = arith.constant 0 : index
    %c0_41 = arith.constant 0 : index
    %c24 = arith.constant 24 : index
    %19 = vector.load %arg30[%c0_40, %c0_41, %c24] : memref<2x16x128xbf16, #tpu.memory_space<vmem>>, vector<2x16x4xbf16>
    tpu.vector_store %arg30[%c0_40, %c0_41, %c24], %18 {strides = array<i32>} : memref<2x16x128xbf16, #tpu.memory_space<vmem>>, vector<2x16x4xbf16>,
    %c0_42 = arith.constant 0 : index
    %c20_43 = arith.constant 20 : index
    %c0_44 = arith.constant 0 : index
    %20 = vector.load %arg29[%c0_42, %c20_43, %c0_44] : memref<2x48x16xbf16, #tpu.memory_space<vmem>>, vector<2x16x4xbf16>
    %c0_45 = arith.constant 0 : index
    %c0_46 = arith.constant 0 : index
    %c28 = arith.constant 28 : index
    %21 = vector.load %arg30[%c0_45, %c0_46, %c28] : memref<2x16x128xbf16, #tpu.memory_space<vmem>>, vector<2x16x4xbf16>
    tpu.vector_store %arg30[%c0_45, %c0_46, %c28], %20 {strides = array<i32>} : memref<2x16x128xbf16, #tpu.memory_space<vmem>>, vector<2x16x4xbf16>,
    %c0_47 = arith.constant 0 : index
    %c0_48 = arith.constant 0 : index
    %c0_49 = arith.constant 0 : index
    %22 = vector.load %arg30[%c0_47, %c0_48, %c0_49] : memref<2x16x128xbf16, #tpu.memory_space<vmem>>, vector<2x16x32xbf16>
    %23 = vector.shape_cast %22 : vector<2x16x32xbf16> to vector<32x32xbf16>
    %cst_50 = arith.constant dense<0.000000e+00> : vector<32x16xf32>
    %24 = tpu.matmul %23, %4, %cst_50 {dimension_numbers = #tpu.dot_dimension_numbers<[1], [0], [0], [1], [0, 0, 1, 1], [], []>} : vector<32x32xbf16>, vector<32x16xbf16>, vector<32x16xf32> -> vector<32x16xf32>
    %25 = vector.shape_cast %24 : vector<32x16xf32> to vector<2x16x16xf32>
    %26 = vector.extract_strided_slice %25 {offsets = [0, 0, 0], sizes = [2, 16, 8], strides = [1, 1, 1]} : vector<2x16x16xf32> to vector<2x16x8xf32>
    %c0_51 = arith.constant 0 : index
    %c0_52 = arith.constant 0 : index
    %c0_53 = arith.constant 0 : index
    %27 = vector.load %arg4[%c0_51, %c0_52, %c0_53] : memref<1x1x8xf32, #tpu.memory_space<vmem>>, vector<1x1x8xf32>
    %c0_54 = arith.constant 0 : index
    %c0_55 = arith.constant 0 : index
    %c0_56 = arith.constant 0 : index
    %28 = vector.load %arg5[%c0_54, %c0_55, %c0_56] : memref<1x1x8xf32, #tpu.memory_space<vmem>>, vector<1x1x8xf32>
    %cst_57 = arith.constant dense<0.000000e+00> : vector<8xf32>
    %29 = vector.multi_reduction <add>, %26, %cst_57 [0, 1] : vector<2x16x8xf32> to vector<8xf32>
    %30 = vector.shape_cast %29 : vector<8xf32> to vector<1x1x8xf32>
    %cst_58 = arith.constant 3.125000e-02 : f32
    %31 = vector.broadcast %cst_58 : f32 to vector<1x1x8xf32>
    %32 = arith.mulf %30, %31 : vector<1x1x8xf32>
    %33 = vector.broadcast %32 : vector<1x1x8xf32> to vector<2x16x8xf32>
    %34 = arith.subf %26, %33 : vector<2x16x8xf32>
    %35 = arith.mulf %34, %34 : vector<2x16x8xf32>
    %cst_59 = arith.constant dense<0.000000e+00> : vector<8xf32>
    %36 = vector.multi_reduction <add>, %35, %cst_59 [0, 1] : vector<2x16x8xf32> to vector<8xf32>
    %37 = vector.shape_cast %36 : vector<8xf32> to vector<1x1x8xf32>
    %cst_60 = arith.constant 3.125000e-02 : f32
    %38 = vector.broadcast %cst_60 : f32 to vector<1x1x8xf32>
    %39 = arith.mulf %37, %38 : vector<1x1x8xf32>
    %cst_61 = arith.constant 9.99999974E-6 : f32
    %40 = vector.broadcast %cst_61 : f32 to vector<1x1x8xf32>
    %41 = arith.addf %39, %40 : vector<1x1x8xf32>
    %42 = math.rsqrt %41 : vector<1x1x8xf32>
    %43 = vector.broadcast %42 : vector<1x1x8xf32> to vector<2x16x8xf32>
    %44 = arith.mulf %34, %43 : vector<2x16x8xf32>
    %45 = vector.broadcast %27 : vector<1x1x8xf32> to vector<2x16x8xf32>
    %46 = arith.mulf %44, %45 : vector<2x16x8xf32>
    %47 = vector.broadcast %28 : vector<1x1x8xf32> to vector<2x16x8xf32>
    %48 = arith.addf %46, %47 : vector<2x16x8xf32>
    %cst_62 = arith.constant 0.000000e+00 : f32
    %49 = vector.broadcast %cst_62 : f32 to vector<2x16x8xf32>
    %50 = arith.maximumf %48, %49 : vector<2x16x8xf32>
    %51 = vector.extract_strided_slice %25 {offsets = [0, 0, 8], sizes = [2, 16, 8], strides = [1, 1, 1]} : vector<2x16x16xf32> to vector<2x16x8xf32>
    %c0_63 = arith.constant 0 : index
    %c0_64 = arith.constant 0 : index
    %c0_65 = arith.constant 0 : index
    %52 = vector.load %arg4[%c0_63, %c0_64, %c0_65] : memref<1x1x8xf32, #tpu.memory_space<vmem>>, vector<1x1x8xf32>
    %c0_66 = arith.constant 0 : index
    %c0_67 = arith.constant 0 : index
    %c0_68 = arith.constant 0 : index
    %53 = vector.load %arg5[%c0_66, %c0_67, %c0_68] : memref<1x1x8xf32, #tpu.memory_space<vmem>>, vector<1x1x8xf32>
    %cst_69 = arith.constant dense<0.000000e+00> : vector<8xf32>
    %54 = vector.multi_reduction <add>, %51, %cst_69 [0, 1] : vector<2x16x8xf32> to vector<8xf32>
    %55 = vector.shape_cast %54 : vector<8xf32> to vector<1x1x8xf32>
    %cst_70 = arith.constant 3.125000e-02 : f32
    %56 = vector.broadcast %cst_70 : f32 to vector<1x1x8xf32>
    %57 = arith.mulf %55, %56 : vector<1x1x8xf32>
    %58 = vector.broadcast %57 : vector<1x1x8xf32> to vector<2x16x8xf32>
    %59 = arith.subf %51, %58 : vector<2x16x8xf32>
    %60 = arith.mulf %59, %59 : vector<2x16x8xf32>
    %cst_71 = arith.constant dense<0.000000e+00> : vector<8xf32>
    %61 = vector.multi_reduction <add>, %60, %cst_71 [0, 1] : vector<2x16x8xf32> to vector<8xf32>
    %62 = vector.shape_cast %61 : vector<8xf32> to vector<1x1x8xf32>
    %cst_72 = arith.constant 3.125000e-02 : f32
    %63 = vector.broadcast %cst_72 : f32 to vector<1x1x8xf32>
    %64 = arith.mulf %62, %63 : vector<1x1x8xf32>
    %cst_73 = arith.constant 9.99999974E-6 : f32
    %65 = vector.broadcast %cst_73 : f32 to vector<1x1x8xf32>
    %66 = arith.addf %64, %65 : vector<1x1x8xf32>
    %67 = math.rsqrt %66 : vector<1x1x8xf32>
    %68 = vector.broadcast %67 : vector<1x1x8xf32> to vector<2x16x8xf32>
    %69 = arith.mulf %59, %68 : vector<2x16x8xf32>
    %70 = vector.broadcast %52 : vector<1x1x8xf32> to vector<2x16x8xf32>
    %71 = arith.mulf %69, %70 : vector<2x16x8xf32>
    %72 = vector.broadcast %53 : vector<1x1x8xf32> to vector<2x16x8xf32>
    %73 = arith.addf %71, %72 : vector<2x16x8xf32>
    %c0_74 = arith.constant 0 : index
    %c0_75 = arith.constant 0 : index
    %74 = vector.load %arg2[%c0_74, %c0_75] : memref<40x8xbf16, #tpu.memory_space<vmem>>, vector<40x8xbf16>
    %75 = arith.truncf %50 : vector<2x16x8xf32> to vector<2x16x8xbf16>
    %c0_76 = arith.constant 0 : index
    %c16_77 = arith.constant 16 : index
    %c0_78 = arith.constant 0 : index
    %76 = vector.load %arg29[%c0_76, %c16_77, %c0_78] : memref<2x48x16xbf16, #tpu.memory_space<vmem>>, vector<2x16x8xbf16>
    tpu.vector_store %arg29[%c0_76, %c16_77, %c0_78], %75 {strides = array<i32>} : memref<2x48x16xbf16, #tpu.memory_space<vmem>>, vector<2x16x8xbf16>,
    %c0_79 = arith.constant 0 : index
    %c14_80 = arith.constant 14 : index
    %c0_81 = arith.constant 0 : index
    %77 = vector.load %arg29[%c0_79, %c14_80, %c0_81] : memref<2x48x16xbf16, #tpu.memory_space<vmem>>, vector<2x16x8xbf16>
    %c0_82 = arith.constant 0 : index
    %c0_83 = arith.constant 0 : index
    %c0_84 = arith.constant 0 : index
    %78 = vector.load %arg30[%c0_82, %c0_83, %c0_84] : memref<2x16x128xbf16, #tpu.memory_space<vmem>>, vector<2x16x8xbf16>
    tpu.vector_store %arg30[%c0_82, %c0_83, %c0_84], %77 {strides = array<i32>} : memref<2x16x128xbf16, #tpu.memory_space<vmem>>, vector<2x16x8xbf16>,
    %c0_85 = arith.constant 0 : index
    %c15_86 = arith.constant 15 : index
    %c0_87 = arith.constant 0 : index
    %79 = vector.load %arg29[%c0_85, %c15_86, %c0_87] : memref<2x48x16xbf16, #tpu.memory_space<vmem>>, vector<2x16x8xbf16>
    %c0_88 = arith.constant 0 : index
    %c0_89 = arith.constant 0 : index
    %c8_90 = arith.constant 8 : index
    %80 = vector.load %arg30[%c0_88, %c0_89, %c8_90] : memref<2x16x128xbf16, #tpu.memory_space<vmem>>, vector<2x16x8xbf16>
    tpu.vector_store %arg30[%c0_88, %c0_89, %c8_90], %79 {strides = array<i32>} : memref<2x16x128xbf16, #tpu.memory_space<vmem>>, vector<2x16x8xbf16>,
    %c0_91 = arith.constant 0 : index
    %c16_92 = arith.constant 16 : index
    %c0_93 = arith.constant 0 : index
    %81 = vector.load %arg29[%c0_91, %c16_92, %c0_93] : memref<2x48x16xbf16, #tpu.memory_space<vmem>>, vector<2x16x8xbf16>
    %c0_94 = arith.constant 0 : index
    %c0_95 = arith.constant 0 : index
    %c16_96 = arith.constant 16 : index
    %82 = vector.load %arg30[%c0_94, %c0_95, %c16_96] : memref<2x16x128xbf16, #tpu.memory_space<vmem>>, vector<2x16x8xbf16>
    tpu.vector_store %arg30[%c0_94, %c0_95, %c16_96], %81 {strides = array<i32>} : memref<2x16x128xbf16, #tpu.memory_space<vmem>>, vector<2x16x8xbf16>,
    %c0_97 = arith.constant 0 : index
    %c17_98 = arith.constant 17 : index
    %c0_99 = arith.constant 0 : index
    %83 = vector.load %arg29[%c0_97, %c17_98, %c0_99] : memref<2x48x16xbf16, #tpu.memory_space<vmem>>, vector<2x16x8xbf16>
    %c0_100 = arith.constant 0 : index
    %c0_101 = arith.constant 0 : index
    %c24_102 = arith.constant 24 : index
    %84 = vector.load %arg30[%c0_100, %c0_101, %c24_102] : memref<2x16x128xbf16, #tpu.memory_space<vmem>>, vector<2x16x8xbf16>
    tpu.vector_store %arg30[%c0_100, %c0_101, %c24_102], %83 {strides = array<i32>} : memref<2x16x128xbf16, #tpu.memory_space<vmem>>, vector<2x16x8xbf16>,
    %c0_103 = arith.constant 0 : index
    %c18_104 = arith.constant 18 : index
    %c0_105 = arith.constant 0 : index
    %85 = vector.load %arg29[%c0_103, %c18_104, %c0_105] : memref<2x48x16xbf16, #tpu.memory_space<vmem>>, vector<2x16x8xbf16>
    %c0_106 = arith.constant 0 : index
    %c0_107 = arith.constant 0 : index
    %c32_108 = arith.constant 32 : index
    %86 = vector.load %arg30[%c0_106, %c0_107, %c32_108] : memref<2x16x128xbf16, #tpu.memory_space<vmem>>, vector<2x16x8xbf16>
    tpu.vector_store %arg30[%c0_106, %c0_107, %c32_108], %85 {strides = array<i32>} : memref<2x16x128xbf16, #tpu.memory_space<vmem>>, vector<2x16x8xbf16>,
    %c0_109 = arith.constant 0 : index
    %c0_110 = arith.constant 0 : index
    %c0_111 = arith.constant 0 : index
    %87 = vector.load %arg30[%c0_109, %c0_110, %c0_111] : memref<2x16x128xbf16, #tpu.memory_space<vmem>>, vector<2x16x40xbf16>
    %88 = vector.shape_cast %87 : vector<2x16x40xbf16> to vector<32x40xbf16>
    %cst_112 = arith.constant dense<0.000000e+00> : vector<32x8xf32>
    %89 = tpu.matmul %88, %74, %cst_112 {dimension_numbers = #tpu.dot_dimension_numbers<[1], [0], [0], [1], [0, 0, 1, 1], [], []>} : vector<32x40xbf16>, vector<40x8xbf16>, vector<32x8xf32> -> vector<32x8xf32>
    %90 = vector.shape_cast %89 : vector<32x8xf32> to vector<2x16x8xf32>
    %c0_113 = arith.constant 0 : index
    %c0_114 = arith.constant 0 : index
    %c0_115 = arith.constant 0 : index
    %91 = vector.load %arg6[%c0_113, %c0_114, %c0_115] : memref<1x1x8xf32, #tpu.memory_space<vmem>>, vector<1x1x8xf32>
    %c0_116 = arith.constant 0 : index
    %c0_117 = arith.constant 0 : index
    %c0_118 = arith.constant 0 : index
    %92 = vector.load %arg7[%c0_116, %c0_117, %c0_118] : memref<1x1x8xf32, #tpu.memory_space<vmem>>, vector<1x1x8xf32>
    %cst_119 = arith.constant dense<0.000000e+00> : vector<8xf32>
    %93 = vector.multi_reduction <add>, %90, %cst_119 [0, 1] : vector<2x16x8xf32> to vector<8xf32>
    %94 = vector.shape_cast %93 : vector<8xf32> to vector<1x1x8xf32>
    %cst_120 = arith.constant 3.125000e-02 : f32
    %95 = vector.broadcast %cst_120 : f32 to vector<1x1x8xf32>
    %96 = arith.mulf %94, %95 : vector<1x1x8xf32>
    %97 = vector.broadcast %96 : vector<1x1x8xf32> to vector<2x16x8xf32>
    %98 = arith.subf %90, %97 : vector<2x16x8xf32>
    %99 = arith.mulf %98, %98 : vector<2x16x8xf32>
    %cst_121 = arith.constant dense<0.000000e+00> : vector<8xf32>
    %100 = vector.multi_reduction <add>, %99, %cst_121 [0, 1] : vector<2x16x8xf32> to vector<8xf32>
    %101 = vector.shape_cast %100 : vector<8xf32> to vector<1x1x8xf32>
    %cst_122 = arith.constant 3.125000e-02 : f32
    %102 = vector.broadcast %cst_122 : f32 to vector<1x1x8xf32>
    %103 = arith.mulf %101, %102 : vector<1x1x8xf32>
    %cst_123 = arith.constant 9.99999974E-6 : f32
    %104 = vector.broadcast %cst_123 : f32 to vector<1x1x8xf32>
    %105 = arith.addf %103, %104 : vector<1x1x8xf32>
    %106 = math.rsqrt %105 : vector<1x1x8xf32>
    %107 = vector.broadcast %106 : vector<1x1x8xf32> to vector<2x16x8xf32>
    %108 = arith.mulf %98, %107 : vector<2x16x8xf32>
    %109 = vector.broadcast %91 : vector<1x1x8xf32> to vector<2x16x8xf32>
    %110 = arith.mulf %108, %109 : vector<2x16x8xf32>
    %111 = vector.broadcast %92 : vector<1x1x8xf32> to vector<2x16x8xf32>
    %112 = arith.addf %110, %111 : vector<2x16x8xf32>
    %cst_124 = arith.constant 0.000000e+00 : f32
    %113 = vector.broadcast %cst_124 : f32 to vector<2x16x8xf32>
    %114 = arith.maximumf %112, %113 : vector<2x16x8xf32>
    %c0_125 = arith.constant 0 : index
    %c0_126 = arith.constant 0 : index
    %115 = vector.load %arg3[%c0_125, %c0_126] : memref<64x8xbf16, #tpu.memory_space<vmem>>, vector<64x8xbf16>
    %116 = arith.truncf %114 : vector<2x16x8xf32> to vector<2x16x8xbf16>
    %c0_127 = arith.constant 0 : index
    %c16_128 = arith.constant 16 : index
    %c0_129 = arith.constant 0 : index
    %117 = vector.load %arg29[%c0_127, %c16_128, %c0_129] : memref<2x48x16xbf16, #tpu.memory_space<vmem>>, vector<2x16x8xbf16>
    tpu.vector_store %arg29[%c0_127, %c16_128, %c0_129], %116 {strides = array<i32>} : memref<2x48x16xbf16, #tpu.memory_space<vmem>>, vector<2x16x8xbf16>,
    %c0_130 = arith.constant 0 : index
    %c13_131 = arith.constant 13 : index
    %c0_132 = arith.constant 0 : index
    %118 = vector.load %arg29[%c0_130, %c13_131, %c0_132] : memref<2x48x16xbf16, #tpu.memory_space<vmem>>, vector<2x16x8xbf16>
    %c0_133 = arith.constant 0 : index
    %c0_134 = arith.constant 0 : index
    %c0_135 = arith.constant 0 : index
    %119 = vector.load %arg30[%c0_133, %c0_134, %c0_135] : memref<2x16x128xbf16, #tpu.memory_space<vmem>>, vector<2x16x8xbf16>
    tpu.vector_store %arg30[%c0_133, %c0_134, %c0_135], %118 {strides = array<i32>} : memref<2x16x128xbf16, #tpu.memory_space<vmem>>, vector<2x16x8xbf16>,
    %c0_136 = arith.constant 0 : index
    %c14_137 = arith.constant 14 : index
    %c0_138 = arith.constant 0 : index
    %120 = vector.load %arg29[%c0_136, %c14_137, %c0_138] : memref<2x48x16xbf16, #tpu.memory_space<vmem>>, vector<2x16x8xbf16>
    %c0_139 = arith.constant 0 : index
    %c0_140 = arith.constant 0 : index
    %c8_141 = arith.constant 8 : index
    %121 = vector.load %arg30[%c0_139, %c0_140, %c8_141] : memref<2x16x128xbf16, #tpu.memory_space<vmem>>, vector<2x16x8xbf16>
    tpu.vector_store %arg30[%c0_139, %c0_140, %c8_141], %120 {strides = array<i32>} : memref<2x16x128xbf16, #tpu.memory_space<vmem>>, vector<2x16x8xbf16>,
    %c0_142 = arith.constant 0 : index
    %c15_143 = arith.constant 15 : index
    %c0_144 = arith.constant 0 : index
    %122 = vector.load %arg29[%c0_142, %c15_143, %c0_144] : memref<2x48x16xbf16, #tpu.memory_space<vmem>>, vector<2x16x8xbf16>
    %c0_145 = arith.constant 0 : index
    %c0_146 = arith.constant 0 : index
    %c16_147 = arith.constant 16 : index
    %123 = vector.load %arg30[%c0_145, %c0_146, %c16_147] : memref<2x16x128xbf16, #tpu.memory_space<vmem>>, vector<2x16x8xbf16>
    tpu.vector_store %arg30[%c0_145, %c0_146, %c16_147], %122 {strides = array<i32>} : memref<2x16x128xbf16, #tpu.memory_space<vmem>>, vector<2x16x8xbf16>,
    %c0_148 = arith.constant 0 : index
    %c16_149 = arith.constant 16 : index
    %c0_150 = arith.constant 0 : index
    %124 = vector.load %arg29[%c0_148, %c16_149, %c0_150] : memref<2x48x16xbf16, #tpu.memory_space<vmem>>, vector<2x16x8xbf16>
    %c0_151 = arith.constant 0 : index
    %c0_152 = arith.constant 0 : index
    %c24_153 = arith.constant 24 : index
    %125 = vector.load %arg30[%c0_151, %c0_152, %c24_153] : memref<2x16x128xbf16, #tpu.memory_space<vmem>>, vector<2x16x8xbf16>
    tpu.vector_store %arg30[%c0_151, %c0_152, %c24_153], %124 {strides = array<i32>} : memref<2x16x128xbf16, #tpu.memory_space<vmem>>, vector<2x16x8xbf16>,
    %c0_154 = arith.constant 0 : index
    %c17_155 = arith.constant 17 : index
    %c0_156 = arith.constant 0 : index
    %126 = vector.load %arg29[%c0_154, %c17_155, %c0_156] : memref<2x48x16xbf16, #tpu.memory_space<vmem>>, vector<2x16x8xbf16>
    %c0_157 = arith.constant 0 : index
    %c0_158 = arith.constant 0 : index
    %c32_159 = arith.constant 32 : index
    %127 = vector.load %arg30[%c0_157, %c0_158, %c32_159] : memref<2x16x128xbf16, #tpu.memory_space<vmem>>, vector<2x16x8xbf16>
    tpu.vector_store %arg30[%c0_157, %c0_158, %c32_159], %126 {strides = array<i32>} : memref<2x16x128xbf16, #tpu.memory_space<vmem>>, vector<2x16x8xbf16>,
    %c0_160 = arith.constant 0 : index
    %c18_161 = arith.constant 18 : index
    %c0_162 = arith.constant 0 : index
    %128 = vector.load %arg29[%c0_160, %c18_161, %c0_162] : memref<2x48x16xbf16, #tpu.memory_space<vmem>>, vector<2x16x8xbf16>
    %c0_163 = arith.constant 0 : index
    %c0_164 = arith.constant 0 : index
    %c40 = arith.constant 40 : index
    %129 = vector.load %arg30[%c0_163, %c0_164, %c40] : memref<2x16x128xbf16, #tpu.memory_space<vmem>>, vector<2x16x8xbf16>
    tpu.vector_store %arg30[%c0_163, %c0_164, %c40], %128 {strides = array<i32>} : memref<2x16x128xbf16, #tpu.memory_space<vmem>>, vector<2x16x8xbf16>,
    %c0_165 = arith.constant 0 : index
    %c19_166 = arith.constant 19 : index
    %c0_167 = arith.constant 0 : index
    %130 = vector.load %arg29[%c0_165, %c19_166, %c0_167] : memref<2x48x16xbf16, #tpu.memory_space<vmem>>, vector<2x16x8xbf16>
    %c0_168 = arith.constant 0 : index
    %c0_169 = arith.constant 0 : index
    %c48 = arith.constant 48 : index
    %131 = vector.load %arg30[%c0_168, %c0_169, %c48] : memref<2x16x128xbf16, #tpu.memory_space<vmem>>, vector<2x16x8xbf16>
    tpu.vector_store %arg30[%c0_168, %c0_169, %c48], %130 {strides = array<i32>} : memref<2x16x128xbf16, #tpu.memory_space<vmem>>, vector<2x16x8xbf16>,
    %c0_170 = arith.constant 0 : index
    %c20_171 = arith.constant 20 : index
    %c0_172 = arith.constant 0 : index
    %132 = vector.load %arg29[%c0_170, %c20_171, %c0_172] : memref<2x48x16xbf16, #tpu.memory_space<vmem>>, vector<2x16x8xbf16>
    %c0_173 = arith.constant 0 : index
    %c0_174 = arith.constant 0 : index
    %c56 = arith.constant 56 : index
    %133 = vector.load %arg30[%c0_173, %c0_174, %c56] : memref<2x16x128xbf16, #tpu.memory_space<vmem>>, vector<2x16x8xbf16>
    tpu.vector_store %arg30[%c0_173, %c0_174, %c56], %132 {strides = array<i32>} : memref<2x16x128xbf16, #tpu.memory_space<vmem>>, vector<2x16x8xbf16>,
    %c0_175 = arith.constant 0 : index
    %c0_176 = arith.constant 0 : index
    %c0_177 = arith.constant 0 : index
    %134 = vector.load %arg30[%c0_175, %c0_176, %c0_177] : memref<2x16x128xbf16, #tpu.memory_space<vmem>>, vector<2x16x64xbf16>
    %135 = vector.shape_cast %134 : vector<2x16x64xbf16> to vector<32x64xbf16>
    %cst_178 = arith.constant dense<0.000000e+00> : vector<32x8xf32>
    %136 = tpu.matmul %135, %115, %cst_178 {dimension_numbers = #tpu.dot_dimension_numbers<[1], [0], [0], [1], [0, 0, 1, 1], [], []>} : vector<32x64xbf16>, vector<64x8xbf16>, vector<32x8xf32> -> vector<32x8xf32>
    %137 = vector.shape_cast %136 : vector<32x8xf32> to vector<2x16x8xf32>
    %c0_179 = arith.constant 0 : index
    %c0_180 = arith.constant 0 : index
    %c0_181 = arith.constant 0 : index
    %138 = vector.load %arg8[%c0_179, %c0_180, %c0_181] : memref<1x1x8xf32, #tpu.memory_space<vmem>>, vector<1x1x8xf32>
    %c0_182 = arith.constant 0 : index
    %c0_183 = arith.constant 0 : index
    %c0_184 = arith.constant 0 : index
    %139 = vector.load %arg9[%c0_182, %c0_183, %c0_184] : memref<1x1x8xf32, #tpu.memory_space<vmem>>, vector<1x1x8xf32>
    %cst_185 = arith.constant dense<0.000000e+00> : vector<8xf32>
    %140 = vector.multi_reduction <add>, %137, %cst_185 [0, 1] : vector<2x16x8xf32> to vector<8xf32>
    %141 = vector.shape_cast %140 : vector<8xf32> to vector<1x1x8xf32>
    %cst_186 = arith.constant 3.125000e-02 : f32
    %142 = vector.broadcast %cst_186 : f32 to vector<1x1x8xf32>
    %143 = arith.mulf %141, %142 : vector<1x1x8xf32>
    %144 = vector.broadcast %143 : vector<1x1x8xf32> to vector<2x16x8xf32>
    %145 = arith.subf %137, %144 : vector<2x16x8xf32>
    %146 = arith.mulf %145, %145 : vector<2x16x8xf32>
    %cst_187 = arith.constant dense<0.000000e+00> : vector<8xf32>
    %147 = vector.multi_reduction <add>, %146, %cst_187 [0, 1] : vector<2x16x8xf32> to vector<8xf32>
    %148 = vector.shape_cast %147 : vector<8xf32> to vector<1x1x8xf32>
    %cst_188 = arith.constant 3.125000e-02 : f32
    %149 = vector.broadcast %cst_188 : f32 to vector<1x1x8xf32>
    %150 = arith.mulf %148, %149 : vector<1x1x8xf32>
    %cst_189 = arith.constant 9.99999974E-6 : f32
    %151 = vector.broadcast %cst_189 : f32 to vector<1x1x8xf32>
    %152 = arith.addf %150, %151 : vector<1x1x8xf32>
    %153 = math.rsqrt %152 : vector<1x1x8xf32>
    %154 = vector.broadcast %153 : vector<1x1x8xf32> to vector<2x16x8xf32>
    %155 = arith.mulf %145, %154 : vector<2x16x8xf32>
    %156 = vector.broadcast %138 : vector<1x1x8xf32> to vector<2x16x8xf32>
    %157 = arith.mulf %155, %156 : vector<2x16x8xf32>
    %158 = vector.broadcast %139 : vector<1x1x8xf32> to vector<2x16x8xf32>
    %159 = arith.addf %157, %158 : vector<2x16x8xf32>
    %160 = arith.addf %73, %159 : vector<2x16x8xf32>
    %cst_190 = arith.constant 0.000000e+00 : f32
    %161 = vector.broadcast %cst_190 : f32 to vector<2x16x8xf32>
    %162 = arith.maximumf %160, %161 : vector<2x16x8xf32>
    %c0_191 = arith.constant 0 : index
    %c0_192 = arith.constant 0 : index
    %163 = vector.load %arg10[%c0_191, %c0_192] : memref<64x32xbf16, #tpu.memory_space<vmem>>, vector<64x32xbf16>
    %164 = arith.truncf %162 : vector<2x16x8xf32> to vector<2x16x8xbf16>
    %c0_193 = arith.constant 0 : index
    %c16_194 = arith.constant 16 : index
    %c0_195 = arith.constant 0 : index
    %165 = vector.load %arg29[%c0_193, %c16_194, %c0_195] : memref<2x48x16xbf16, #tpu.memory_space<vmem>>, vector<2x16x8xbf16>
    tpu.vector_store %arg29[%c0_193, %c16_194, %c0_195], %164 {strides = array<i32>} : memref<2x48x16xbf16, #tpu.memory_space<vmem>>, vector<2x16x8xbf16>,
    %c0_196 = arith.constant 0 : index
    %c13_197 = arith.constant 13 : index
    %c0_198 = arith.constant 0 : index
    %166 = vector.load %arg29[%c0_196, %c13_197, %c0_198] : memref<2x48x16xbf16, #tpu.memory_space<vmem>>, vector<2x16x8xbf16>
    %c0_199 = arith.constant 0 : index
    %c0_200 = arith.constant 0 : index
    %c0_201 = arith.constant 0 : index
    %167 = vector.load %arg30[%c0_199, %c0_200, %c0_201] : memref<2x16x128xbf16, #tpu.memory_space<vmem>>, vector<2x16x8xbf16>
    tpu.vector_store %arg30[%c0_199, %c0_200, %c0_201], %166 {strides = array<i32>} : memref<2x16x128xbf16, #tpu.memory_space<vmem>>, vector<2x16x8xbf16>,
    %c0_202 = arith.constant 0 : index
    %c14_203 = arith.constant 14 : index
    %c0_204 = arith.constant 0 : index
    %168 = vector.load %arg29[%c0_202, %c14_203, %c0_204] : memref<2x48x16xbf16, #tpu.memory_space<vmem>>, vector<2x16x8xbf16>
    %c0_205 = arith.constant 0 : index
    %c0_206 = arith.constant 0 : index
    %c8_207 = arith.constant 8 : index
    %169 = vector.load %arg30[%c0_205, %c0_206, %c8_207] : memref<2x16x128xbf16, #tpu.memory_space<vmem>>, vector<2x16x8xbf16>
    tpu.vector_store %arg30[%c0_205, %c0_206, %c8_207], %168 {strides = array<i32>} : memref<2x16x128xbf16, #tpu.memory_space<vmem>>, vector<2x16x8xbf16>,
    %c0_208 = arith.constant 0 : index
    %c15_209 = arith.constant 15 : index
    %c0_210 = arith.constant 0 : index
    %170 = vector.load %arg29[%c0_208, %c15_209, %c0_210] : memref<2x48x16xbf16, #tpu.memory_space<vmem>>, vector<2x16x8xbf16>
    %c0_211 = arith.constant 0 : index
    %c0_212 = arith.constant 0 : index
    %c16_213 = arith.constant 16 : index
    %171 = vector.load %arg30[%c0_211, %c0_212, %c16_213] : memref<2x16x128xbf16, #tpu.memory_space<vmem>>, vector<2x16x8xbf16>
    tpu.vector_store %arg30[%c0_211, %c0_212, %c16_213], %170 {strides = array<i32>} : memref<2x16x128xbf16, #tpu.memory_space<vmem>>, vector<2x16x8xbf16>,
    %c0_214 = arith.constant 0 : index
    %c16_215 = arith.constant 16 : index
    %c0_216 = arith.constant 0 : index
    %172 = vector.load %arg29[%c0_214, %c16_215, %c0_216] : memref<2x48x16xbf16, #tpu.memory_space<vmem>>, vector<2x16x8xbf16>
    %c0_217 = arith.constant 0 : index
    %c0_218 = arith.constant 0 : index
    %c24_219 = arith.constant 24 : index
    %173 = vector.load %arg30[%c0_217, %c0_218, %c24_219] : memref<2x16x128xbf16, #tpu.memory_space<vmem>>, vector<2x16x8xbf16>
    tpu.vector_store %arg30[%c0_217, %c0_218, %c24_219], %172 {strides = array<i32>} : memref<2x16x128xbf16, #tpu.memory_space<vmem>>, vector<2x16x8xbf16>,
    %c0_220 = arith.constant 0 : index
    %c17_221 = arith.constant 17 : index
    %c0_222 = arith.constant 0 : index
    %174 = vector.load %arg29[%c0_220, %c17_221, %c0_222] : memref<2x48x16xbf16, #tpu.memory_space<vmem>>, vector<2x16x8xbf16>
    %c0_223 = arith.constant 0 : index
    %c0_224 = arith.constant 0 : index
    %c32_225 = arith.constant 32 : index
    %175 = vector.load %arg30[%c0_223, %c0_224, %c32_225] : memref<2x16x128xbf16, #tpu.memory_space<vmem>>, vector<2x16x8xbf16>
    tpu.vector_store %arg30[%c0_223, %c0_224, %c32_225], %174 {strides = array<i32>} : memref<2x16x128xbf16, #tpu.memory_space<vmem>>, vector<2x16x8xbf16>,
    %c0_226 = arith.constant 0 : index
    %c18_227 = arith.constant 18 : index
    %c0_228 = arith.constant 0 : index
    %176 = vector.load %arg29[%c0_226, %c18_227, %c0_228] : memref<2x48x16xbf16, #tpu.memory_space<vmem>>, vector<2x16x8xbf16>
    %c0_229 = arith.constant 0 : index
    %c0_230 = arith.constant 0 : index
    %c40_231 = arith.constant 40 : index
    %177 = vector.load %arg30[%c0_229, %c0_230, %c40_231] : memref<2x16x128xbf16, #tpu.memory_space<vmem>>, vector<2x16x8xbf16>
    tpu.vector_store %arg30[%c0_229, %c0_230, %c40_231], %176 {strides = array<i32>} : memref<2x16x128xbf16, #tpu.memory_space<vmem>>, vector<2x16x8xbf16>,
    %c0_232 = arith.constant 0 : index
    %c19_233 = arith.constant 19 : index
    %c0_234 = arith.constant 0 : index
    %178 = vector.load %arg29[%c0_232, %c19_233, %c0_234] : memref<2x48x16xbf16, #tpu.memory_space<vmem>>, vector<2x16x8xbf16>
    %c0_235 = arith.constant 0 : index
    %c0_236 = arith.constant 0 : index
    %c48_237 = arith.constant 48 : index
    %179 = vector.load %arg30[%c0_235, %c0_236, %c48_237] : memref<2x16x128xbf16, #tpu.memory_space<vmem>>, vector<2x16x8xbf16>
    tpu.vector_store %arg30[%c0_235, %c0_236, %c48_237], %178 {strides = array<i32>} : memref<2x16x128xbf16, #tpu.memory_space<vmem>>, vector<2x16x8xbf16>,
    %c0_238 = arith.constant 0 : index
    %c20_239 = arith.constant 20 : index
    %c0_240 = arith.constant 0 : index
    %180 = vector.load %arg29[%c0_238, %c20_239, %c0_240] : memref<2x48x16xbf16, #tpu.memory_space<vmem>>, vector<2x16x8xbf16>
    %c0_241 = arith.constant 0 : index
    %c0_242 = arith.constant 0 : index
    %c56_243 = arith.constant 56 : index
    %181 = vector.load %arg30[%c0_241, %c0_242, %c56_243] : memref<2x16x128xbf16, #tpu.memory_space<vmem>>, vector<2x16x8xbf16>
    tpu.vector_store %arg30[%c0_241, %c0_242, %c56_243], %180 {strides = array<i32>} : memref<2x16x128xbf16, #tpu.memory_space<vmem>>, vector<2x16x8xbf16>,
    %c0_244 = arith.constant 0 : index
    %c0_245 = arith.constant 0 : index
    %c0_246 = arith.constant 0 : index
    %182 = vector.load %arg30[%c0_244, %c0_245, %c0_246] : memref<2x16x128xbf16, #tpu.memory_space<vmem>>, vector<2x16x64xbf16>
    %183 = vector.shape_cast %182 : vector<2x16x64xbf16> to vector<32x64xbf16>
    %cst_247 = arith.constant dense<0.000000e+00> : vector<32x32xf32>
    %184 = tpu.matmul %183, %163, %cst_247 {dimension_numbers = #tpu.dot_dimension_numbers<[1], [0], [0], [1], [0, 0, 1, 1], [], []>} : vector<32x64xbf16>, vector<64x32xbf16>, vector<32x32xf32> -> vector<32x32xf32>
    %185 = vector.shape_cast %184 : vector<32x32xf32> to vector<2x16x32xf32>
    %186 = vector.extract_strided_slice %185 {offsets = [0, 0, 0], sizes = [2, 16, 16], strides = [1, 1, 1]} : vector<2x16x32xf32> to vector<2x16x16xf32>
    %c0_248 = arith.constant 0 : index
    %c0_249 = arith.constant 0 : index
    %c0_250 = arith.constant 0 : index
    %187 = vector.load %arg13[%c0_248, %c0_249, %c0_250] : memref<1x1x16xf32, #tpu.memory_space<vmem>>, vector<1x1x16xf32>
    %c0_251 = arith.constant 0 : index
    %c0_252 = arith.constant 0 : index
    %c0_253 = arith.constant 0 : index
    %188 = vector.load %arg14[%c0_251, %c0_252, %c0_253] : memref<1x1x16xf32, #tpu.memory_space<vmem>>, vector<1x1x16xf32>
    %cst_254 = arith.constant dense<0.000000e+00> : vector<16xf32>
    %189 = vector.multi_reduction <add>, %186, %cst_254 [0, 1] : vector<2x16x16xf32> to vector<16xf32>
    %190 = vector.shape_cast %189 : vector<16xf32> to vector<1x1x16xf32>
    %cst_255 = arith.constant 3.125000e-02 : f32
    %191 = vector.broadcast %cst_255 : f32 to vector<1x1x16xf32>
    %192 = arith.mulf %190, %191 : vector<1x1x16xf32>
    %193 = vector.broadcast %192 : vector<1x1x16xf32> to vector<2x16x16xf32>
    %194 = arith.subf %186, %193 : vector<2x16x16xf32>
    %195 = arith.mulf %194, %194 : vector<2x16x16xf32>
    %cst_256 = arith.constant dense<0.000000e+00> : vector<16xf32>
    %196 = vector.multi_reduction <add>, %195, %cst_256 [0, 1] : vector<2x16x16xf32> to vector<16xf32>
    %197 = vector.shape_cast %196 : vector<16xf32> to vector<1x1x16xf32>
    %cst_257 = arith.constant 3.125000e-02 : f32
    %198 = vector.broadcast %cst_257 : f32 to vector<1x1x16xf32>
    %199 = arith.mulf %197, %198 : vector<1x1x16xf32>
    %cst_258 = arith.constant 9.99999974E-6 : f32
    %200 = vector.broadcast %cst_258 : f32 to vector<1x1x16xf32>
    %201 = arith.addf %199, %200 : vector<1x1x16xf32>
    %202 = math.rsqrt %201 : vector<1x1x16xf32>
    %203 = vector.broadcast %202 : vector<1x1x16xf32> to vector<2x16x16xf32>
    %204 = arith.mulf %194, %203 : vector<2x16x16xf32>
    %205 = vector.broadcast %187 : vector<1x1x16xf32> to vector<2x16x16xf32>
    %206 = arith.mulf %204, %205 : vector<2x16x16xf32>
    %207 = vector.broadcast %188 : vector<1x1x16xf32> to vector<2x16x16xf32>
    %208 = arith.addf %206, %207 : vector<2x16x16xf32>
    %cst_259 = arith.constant 0.000000e+00 : f32
    %209 = vector.broadcast %cst_259 : f32 to vector<2x16x16xf32>
    %210 = arith.maximumf %208, %209 : vector<2x16x16xf32>
    %211 = vector.extract_strided_slice %185 {offsets = [0, 0, 16], sizes = [2, 16, 16], strides = [1, 1, 1]} : vector<2x16x32xf32> to vector<2x16x16xf32>
    %c0_260 = arith.constant 0 : index
    %c0_261 = arith.constant 0 : index
    %c0_262 = arith.constant 0 : index
    %212 = vector.load %arg13[%c0_260, %c0_261, %c0_262] : memref<1x1x16xf32, #tpu.memory_space<vmem>>, vector<1x1x16xf32>
    %c0_263 = arith.constant 0 : index
    %c0_264 = arith.constant 0 : index
    %c0_265 = arith.constant 0 : index
    %213 = vector.load %arg14[%c0_263, %c0_264, %c0_265] : memref<1x1x16xf32, #tpu.memory_space<vmem>>, vector<1x1x16xf32>
    %cst_266 = arith.constant dense<0.000000e+00> : vector<16xf32>
    %214 = vector.multi_reduction <add>, %211, %cst_266 [0, 1] : vector<2x16x16xf32> to vector<16xf32>
    %215 = vector.shape_cast %214 : vector<16xf32> to vector<1x1x16xf32>
    %cst_267 = arith.constant 3.125000e-02 : f32
    %216 = vector.broadcast %cst_267 : f32 to vector<1x1x16xf32>
    %217 = arith.mulf %215, %216 : vector<1x1x16xf32>
    %218 = vector.broadcast %217 : vector<1x1x16xf32> to vector<2x16x16xf32>
    %219 = arith.subf %211, %218 : vector<2x16x16xf32>
    %220 = arith.mulf %219, %219 : vector<2x16x16xf32>
    %cst_268 = arith.constant dense<0.000000e+00> : vector<16xf32>
    %221 = vector.multi_reduction <add>, %220, %cst_268 [0, 1] : vector<2x16x16xf32> to vector<16xf32>
    %222 = vector.shape_cast %221 : vector<16xf32> to vector<1x1x16xf32>
    %cst_269 = arith.constant 3.125000e-02 : f32
    %223 = vector.broadcast %cst_269 : f32 to vector<1x1x16xf32>
    %224 = arith.mulf %222, %223 : vector<1x1x16xf32>
    %cst_270 = arith.constant 9.99999974E-6 : f32
    %225 = vector.broadcast %cst_270 : f32 to vector<1x1x16xf32>
    %226 = arith.addf %224, %225 : vector<1x1x16xf32>
    %227 = math.rsqrt %226 : vector<1x1x16xf32>
    %228 = vector.broadcast %227 : vector<1x1x16xf32> to vector<2x16x16xf32>
    %229 = arith.mulf %219, %228 : vector<2x16x16xf32>
    %230 = vector.broadcast %212 : vector<1x1x16xf32> to vector<2x16x16xf32>
    %231 = arith.mulf %229, %230 : vector<2x16x16xf32>
    %232 = vector.broadcast %213 : vector<1x1x16xf32> to vector<2x16x16xf32>
    %233 = arith.addf %231, %232 : vector<2x16x16xf32>
    %c0_271 = arith.constant 0 : index
    %c0_272 = arith.constant 0 : index
    %234 = vector.load %arg11[%c0_271, %c0_272] : memref<80x16xbf16, #tpu.memory_space<vmem>>, vector<80x16xbf16>
    %235 = arith.truncf %210 : vector<2x16x16xf32> to vector<2x16x16xbf16>
    %c0_273 = arith.constant 0 : index
    %c16_274 = arith.constant 16 : index
    %c0_275 = arith.constant 0 : index
    %236 = vector.load %arg29[%c0_273, %c16_274, %c0_275] : memref<2x48x16xbf16, #tpu.memory_space<vmem>>, vector<2x16x16xbf16>
    tpu.vector_store %arg29[%c0_273, %c16_274, %c0_275], %235 {strides = array<i32>} : memref<2x48x16xbf16, #tpu.memory_space<vmem>>, vector<2x16x16xbf16>,
    %c0_276 = arith.constant 0 : index
    %c14_277 = arith.constant 14 : index
    %c0_278 = arith.constant 0 : index
    %237 = vector.load %arg29[%c0_276, %c14_277, %c0_278] : memref<2x48x16xbf16, #tpu.memory_space<vmem>>, vector<2x16x16xbf16>
    %c0_279 = arith.constant 0 : index
    %c0_280 = arith.constant 0 : index
    %c0_281 = arith.constant 0 : index
    %238 = vector.load %arg30[%c0_279, %c0_280, %c0_281] : memref<2x16x128xbf16, #tpu.memory_space<vmem>>, vector<2x16x16xbf16>
    tpu.vector_store %arg30[%c0_279, %c0_280, %c0_281], %237 {strides = array<i32>} : memref<2x16x128xbf16, #tpu.memory_space<vmem>>, vector<2x16x16xbf16>,
    %c0_282 = arith.constant 0 : index
    %c15_283 = arith.constant 15 : index
    %c0_284 = arith.constant 0 : index
    %239 = vector.load %arg29[%c0_282, %c15_283, %c0_284] : memref<2x48x16xbf16, #tpu.memory_space<vmem>>, vector<2x16x16xbf16>
    %c0_285 = arith.constant 0 : index
    %c0_286 = arith.constant 0 : index
    %c16_287 = arith.constant 16 : index
    %240 = vector.load %arg30[%c0_285, %c0_286, %c16_287] : memref<2x16x128xbf16, #tpu.memory_space<vmem>>, vector<2x16x16xbf16>
    tpu.vector_store %arg30[%c0_285, %c0_286, %c16_287], %239 {strides = array<i32>} : memref<2x16x128xbf16, #tpu.memory_space<vmem>>, vector<2x16x16xbf16>,
    %c0_288 = arith.constant 0 : index
    %c16_289 = arith.constant 16 : index
    %c0_290 = arith.constant 0 : index
    %241 = vector.load %arg29[%c0_288, %c16_289, %c0_290] : memref<2x48x16xbf16, #tpu.memory_space<vmem>>, vector<2x16x16xbf16>
    %c0_291 = arith.constant 0 : index
    %c0_292 = arith.constant 0 : index
    %c32_293 = arith.constant 32 : index
    %242 = vector.load %arg30[%c0_291, %c0_292, %c32_293] : memref<2x16x128xbf16, #tpu.memory_space<vmem>>, vector<2x16x16xbf16>
    tpu.vector_store %arg30[%c0_291, %c0_292, %c32_293], %241 {strides = array<i32>} : memref<2x16x128xbf16, #tpu.memory_space<vmem>>, vector<2x16x16xbf16>,
    %c0_294 = arith.constant 0 : index
    %c17_295 = arith.constant 17 : index
    %c0_296 = arith.constant 0 : index
    %243 = vector.load %arg29[%c0_294, %c17_295, %c0_296] : memref<2x48x16xbf16, #tpu.memory_space<vmem>>, vector<2x16x16xbf16>
    %c0_297 = arith.constant 0 : index
    %c0_298 = arith.constant 0 : index
    %c48_299 = arith.constant 48 : index
    %244 = vector.load %arg30[%c0_297, %c0_298, %c48_299] : memref<2x16x128xbf16, #tpu.memory_space<vmem>>, vector<2x16x16xbf16>
    tpu.vector_store %arg30[%c0_297, %c0_298, %c48_299], %243 {strides = array<i32>} : memref<2x16x128xbf16, #tpu.memory_space<vmem>>, vector<2x16x16xbf16>,
    %c0_300 = arith.constant 0 : index
    %c18_301 = arith.constant 18 : index
    %c0_302 = arith.constant 0 : index
    %245 = vector.load %arg29[%c0_300, %c18_301, %c0_302] : memref<2x48x16xbf16, #tpu.memory_space<vmem>>, vector<2x16x16xbf16>
    %c0_303 = arith.constant 0 : index
    %c0_304 = arith.constant 0 : index
    %c64 = arith.constant 64 : index
    %246 = vector.load %arg30[%c0_303, %c0_304, %c64] : memref<2x16x128xbf16, #tpu.memory_space<vmem>>, vector<2x16x16xbf16>
    tpu.vector_store %arg30[%c0_303, %c0_304, %c64], %245 {strides = array<i32>} : memref<2x16x128xbf16, #tpu.memory_space<vmem>>, vector<2x16x16xbf16>,
    %c0_305 = arith.constant 0 : index
    %c0_306 = arith.constant 0 : index
    %c0_307 = arith.constant 0 : index
    %247 = vector.load %arg30[%c0_305, %c0_306, %c0_307] : memref<2x16x128xbf16, #tpu.memory_space<vmem>>, vector<2x16x80xbf16>
    %248 = vector.shape_cast %247 : vector<2x16x80xbf16> to vector<32x80xbf16>
    %cst_308 = arith.constant dense<0.000000e+00> : vector<32x16xf32>
    %249 = tpu.matmul %248, %234, %cst_308 {dimension_numbers = #tpu.dot_dimension_numbers<[1], [0], [0], [1], [0, 0, 1, 1], [], []>} : vector<32x80xbf16>, vector<80x16xbf16>, vector<32x16xf32> -> vector<32x16xf32>
    %250 = vector.shape_cast %249 : vector<32x16xf32> to vector<2x16x16xf32>
    %c0_309 = arith.constant 0 : index
    %c0_310 = arith.constant 0 : index
    %c0_311 = arith.constant 0 : index
    %251 = vector.load %arg15[%c0_309, %c0_310, %c0_311] : memref<1x1x16xf32, #tpu.memory_space<vmem>>, vector<1x1x16xf32>
    %c0_312 = arith.constant 0 : index
    %c0_313 = arith.constant 0 : index
    %c0_314 = arith.constant 0 : index
    %252 = vector.load %arg16[%c0_312, %c0_313, %c0_314] : memref<1x1x16xf32, #tpu.memory_space<vmem>>, vector<1x1x16xf32>
    %cst_315 = arith.constant dense<0.000000e+00> : vector<16xf32>
    %253 = vector.multi_reduction <add>, %250, %cst_315 [0, 1] : vector<2x16x16xf32> to vector<16xf32>
    %254 = vector.shape_cast %253 : vector<16xf32> to vector<1x1x16xf32>
    %cst_316 = arith.constant 3.125000e-02 : f32
    %255 = vector.broadcast %cst_316 : f32 to vector<1x1x16xf32>
    %256 = arith.mulf %254, %255 : vector<1x1x16xf32>
    %257 = vector.broadcast %256 : vector<1x1x16xf32> to vector<2x16x16xf32>
    %258 = arith.subf %250, %257 : vector<2x16x16xf32>
    %259 = arith.mulf %258, %258 : vector<2x16x16xf32>
    %cst_317 = arith.constant dense<0.000000e+00> : vector<16xf32>
    %260 = vector.multi_reduction <add>, %259, %cst_317 [0, 1] : vector<2x16x16xf32> to vector<16xf32>
    %261 = vector.shape_cast %260 : vector<16xf32> to vector<1x1x16xf32>
    %cst_318 = arith.constant 3.125000e-02 : f32
    %262 = vector.broadcast %cst_318 : f32 to vector<1x1x16xf32>
    %263 = arith.mulf %261, %262 : vector<1x1x16xf32>
    %cst_319 = arith.constant 9.99999974E-6 : f32
    %264 = vector.broadcast %cst_319 : f32 to vector<1x1x16xf32>
    %265 = arith.addf %263, %264 : vector<1x1x16xf32>
    %266 = math.rsqrt %265 : vector<1x1x16xf32>
    %267 = vector.broadcast %266 : vector<1x1x16xf32> to vector<2x16x16xf32>
    %268 = arith.mulf %258, %267 : vector<2x16x16xf32>
    %269 = vector.broadcast %251 : vector<1x1x16xf32> to vector<2x16x16xf32>
    %270 = arith.mulf %268, %269 : vector<2x16x16xf32>
    %271 = vector.broadcast %252 : vector<1x1x16xf32> to vector<2x16x16xf32>
    %272 = arith.addf %270, %271 : vector<2x16x16xf32>
    %cst_320 = arith.constant 0.000000e+00 : f32
    %273 = vector.broadcast %cst_320 : f32 to vector<2x16x16xf32>
    %274 = arith.maximumf %272, %273 : vector<2x16x16xf32>
    %c0_321 = arith.constant 0 : index
    %c0_322 = arith.constant 0 : index
    %275 = vector.load %arg12[%c0_321, %c0_322] : memref<128x16xbf16, #tpu.memory_space<vmem>>, vector<128x16xbf16>
    %276 = arith.truncf %274 : vector<2x16x16xf32> to vector<2x16x16xbf16>
    %c0_323 = arith.constant 0 : index
    %c16_324 = arith.constant 16 : index
    %c0_325 = arith.constant 0 : index
    %277 = vector.load %arg29[%c0_323, %c16_324, %c0_325] : memref<2x48x16xbf16, #tpu.memory_space<vmem>>, vector<2x16x16xbf16>
    tpu.vector_store %arg29[%c0_323, %c16_324, %c0_325], %276 {strides = array<i32>} : memref<2x48x16xbf16, #tpu.memory_space<vmem>>, vector<2x16x16xbf16>,
    %c0_326 = arith.constant 0 : index
    %c13_327 = arith.constant 13 : index
    %c0_328 = arith.constant 0 : index
    %278 = vector.load %arg29[%c0_326, %c13_327, %c0_328] : memref<2x48x16xbf16, #tpu.memory_space<vmem>>, vector<2x16x16xbf16>
    %c0_329 = arith.constant 0 : index
    %c0_330 = arith.constant 0 : index
    %c0_331 = arith.constant 0 : index
    %279 = vector.load %arg30[%c0_329, %c0_330, %c0_331] : memref<2x16x128xbf16, #tpu.memory_space<vmem>>, vector<2x16x16xbf16>
    tpu.vector_store %arg30[%c0_329, %c0_330, %c0_331], %278 {strides = array<i32>} : memref<2x16x128xbf16, #tpu.memory_space<vmem>>, vector<2x16x16xbf16>,
    %c0_332 = arith.constant 0 : index
    %c14_333 = arith.constant 14 : index
    %c0_334 = arith.constant 0 : index
    %280 = vector.load %arg29[%c0_332, %c14_333, %c0_334] : memref<2x48x16xbf16, #tpu.memory_space<vmem>>, vector<2x16x16xbf16>
    %c0_335 = arith.constant 0 : index
    %c0_336 = arith.constant 0 : index
    %c16_337 = arith.constant 16 : index
    %281 = vector.load %arg30[%c0_335, %c0_336, %c16_337] : memref<2x16x128xbf16, #tpu.memory_space<vmem>>, vector<2x16x16xbf16>
    tpu.vector_store %arg30[%c0_335, %c0_336, %c16_337], %280 {strides = array<i32>} : memref<2x16x128xbf16, #tpu.memory_space<vmem>>, vector<2x16x16xbf16>,
    %c0_338 = arith.constant 0 : index
    %c15_339 = arith.constant 15 : index
    %c0_340 = arith.constant 0 : index
    %282 = vector.load %arg29[%c0_338, %c15_339, %c0_340] : memref<2x48x16xbf16, #tpu.memory_space<vmem>>, vector<2x16x16xbf16>
    %c0_341 = arith.constant 0 : index
    %c0_342 = arith.constant 0 : index
    %c32_343 = arith.constant 32 : index
    %283 = vector.load %arg30[%c0_341, %c0_342, %c32_343] : memref<2x16x128xbf16, #tpu.memory_space<vmem>>, vector<2x16x16xbf16>
    tpu.vector_store %arg30[%c0_341, %c0_342, %c32_343], %282 {strides = array<i32>} : memref<2x16x128xbf16, #tpu.memory_space<vmem>>, vector<2x16x16xbf16>,
    %c0_344 = arith.constant 0 : index
    %c16_345 = arith.constant 16 : index
    %c0_346 = arith.constant 0 : index
    %284 = vector.load %arg29[%c0_344, %c16_345, %c0_346] : memref<2x48x16xbf16, #tpu.memory_space<vmem>>, vector<2x16x16xbf16>
    %c0_347 = arith.constant 0 : index
    %c0_348 = arith.constant 0 : index
    %c48_349 = arith.constant 48 : index
    %285 = vector.load %arg30[%c0_347, %c0_348, %c48_349] : memref<2x16x128xbf16, #tpu.memory_space<vmem>>, vector<2x16x16xbf16>
    tpu.vector_store %arg30[%c0_347, %c0_348, %c48_349], %284 {strides = array<i32>} : memref<2x16x128xbf16, #tpu.memory_space<vmem>>, vector<2x16x16xbf16>,
    %c0_350 = arith.constant 0 : index
    %c17_351 = arith.constant 17 : index
    %c0_352 = arith.constant 0 : index
    %286 = vector.load %arg29[%c0_350, %c17_351, %c0_352] : memref<2x48x16xbf16, #tpu.memory_space<vmem>>, vector<2x16x16xbf16>
    %c0_353 = arith.constant 0 : index
    %c0_354 = arith.constant 0 : index
    %c64_355 = arith.constant 64 : index
    %287 = vector.load %arg30[%c0_353, %c0_354, %c64_355] : memref<2x16x128xbf16, #tpu.memory_space<vmem>>, vector<2x16x16xbf16>
    tpu.vector_store %arg30[%c0_353, %c0_354, %c64_355], %286 {strides = array<i32>} : memref<2x16x128xbf16, #tpu.memory_space<vmem>>, vector<2x16x16xbf16>,
    %c0_356 = arith.constant 0 : index
    %c18_357 = arith.constant 18 : index
    %c0_358 = arith.constant 0 : index
    %288 = vector.load %arg29[%c0_356, %c18_357, %c0_358] : memref<2x48x16xbf16, #tpu.memory_space<vmem>>, vector<2x16x16xbf16>
    %c0_359 = arith.constant 0 : index
    %c0_360 = arith.constant 0 : index
    %c80 = arith.constant 80 : index
    %289 = vector.load %arg30[%c0_359, %c0_360, %c80] : memref<2x16x128xbf16, #tpu.memory_space<vmem>>, vector<2x16x16xbf16>
    tpu.vector_store %arg30[%c0_359, %c0_360, %c80], %288 {strides = array<i32>} : memref<2x16x128xbf16, #tpu.memory_space<vmem>>, vector<2x16x16xbf16>,
    %c0_361 = arith.constant 0 : index
    %c19_362 = arith.constant 19 : index
    %c0_363 = arith.constant 0 : index
    %290 = vector.load %arg29[%c0_361, %c19_362, %c0_363] : memref<2x48x16xbf16, #tpu.memory_space<vmem>>, vector<2x16x16xbf16>
    %c0_364 = arith.constant 0 : index
    %c0_365 = arith.constant 0 : index
    %c96 = arith.constant 96 : index
    %291 = vector.load %arg30[%c0_364, %c0_365, %c96] : memref<2x16x128xbf16, #tpu.memory_space<vmem>>, vector<2x16x16xbf16>
    tpu.vector_store %arg30[%c0_364, %c0_365, %c96], %290 {strides = array<i32>} : memref<2x16x128xbf16, #tpu.memory_space<vmem>>, vector<2x16x16xbf16>,
    %c0_366 = arith.constant 0 : index
    %c20_367 = arith.constant 20 : index
    %c0_368 = arith.constant 0 : index
    %292 = vector.load %arg29[%c0_366, %c20_367, %c0_368] : memref<2x48x16xbf16, #tpu.memory_space<vmem>>, vector<2x16x16xbf16>
    %c0_369 = arith.constant 0 : index
    %c0_370 = arith.constant 0 : index
    %c112 = arith.constant 112 : index
    %293 = vector.load %arg30[%c0_369, %c0_370, %c112] : memref<2x16x128xbf16, #tpu.memory_space<vmem>>, vector<2x16x16xbf16>
    tpu.vector_store %arg30[%c0_369, %c0_370, %c112], %292 {strides = array<i32>} : memref<2x16x128xbf16, #tpu.memory_space<vmem>>, vector<2x16x16xbf16>,
    %c0_371 = arith.constant 0 : index
    %c0_372 = arith.constant 0 : index
    %c0_373 = arith.constant 0 : index
    %294 = vector.load %arg30[%c0_371, %c0_372, %c0_373] : memref<2x16x128xbf16, #tpu.memory_space<vmem>>, vector<2x16x128xbf16>
    %295 = vector.shape_cast %294 : vector<2x16x128xbf16> to vector<32x128xbf16>
    %cst_374 = arith.constant dense<0.000000e+00> : vector<32x16xf32>
    %296 = tpu.matmul %295, %275, %cst_374 {dimension_numbers = #tpu.dot_dimension_numbers<[1], [0], [0], [1], [0, 0, 1, 1], [], []>} : vector<32x128xbf16>, vector<128x16xbf16>, vector<32x16xf32> -> vector<32x16xf32>
    %297 = vector.shape_cast %296 : vector<32x16xf32> to vector<2x16x16xf32>
    %c0_375 = arith.constant 0 : index
    %c0_376 = arith.constant 0 : index
    %c0_377 = arith.constant 0 : index
    %298 = vector.load %arg17[%c0_375, %c0_376, %c0_377] : memref<1x1x16xf32, #tpu.memory_space<vmem>>, vector<1x1x16xf32>
    %c0_378 = arith.constant 0 : index
    %c0_379 = arith.constant 0 : index
    %c0_380 = arith.constant 0 : index
    %299 = vector.load %arg18[%c0_378, %c0_379, %c0_380] : memref<1x1x16xf32, #tpu.memory_space<vmem>>, vector<1x1x16xf32>
    %cst_381 = arith.constant dense<0.000000e+00> : vector<16xf32>
    %300 = vector.multi_reduction <add>, %297, %cst_381 [0, 1] : vector<2x16x16xf32> to vector<16xf32>
    %301 = vector.shape_cast %300 : vector<16xf32> to vector<1x1x16xf32>
    %cst_382 = arith.constant 3.125000e-02 : f32
    %302 = vector.broadcast %cst_382 : f32 to vector<1x1x16xf32>
    %303 = arith.mulf %301, %302 : vector<1x1x16xf32>
    %304 = vector.broadcast %303 : vector<1x1x16xf32> to vector<2x16x16xf32>
    %305 = arith.subf %297, %304 : vector<2x16x16xf32>
    %306 = arith.mulf %305, %305 : vector<2x16x16xf32>
    %cst_383 = arith.constant dense<0.000000e+00> : vector<16xf32>
    %307 = vector.multi_reduction <add>, %306, %cst_383 [0, 1] : vector<2x16x16xf32> to vector<16xf32>
    %308 = vector.shape_cast %307 : vector<16xf32> to vector<1x1x16xf32>
    %cst_384 = arith.constant 3.125000e-02 : f32
    %309 = vector.broadcast %cst_384 : f32 to vector<1x1x16xf32>
    %310 = arith.mulf %308, %309 : vector<1x1x16xf32>
    %cst_385 = arith.constant 9.99999974E-6 : f32
    %311 = vector.broadcast %cst_385 : f32 to vector<1x1x16xf32>
    %312 = arith.addf %310, %311 : vector<1x1x16xf32>
    %313 = math.rsqrt %312 : vector<1x1x16xf32>
    %314 = vector.broadcast %313 : vector<1x1x16xf32> to vector<2x16x16xf32>
    %315 = arith.mulf %305, %314 : vector<2x16x16xf32>
    %316 = vector.broadcast %298 : vector<1x1x16xf32> to vector<2x16x16xf32>
    %317 = arith.mulf %315, %316 : vector<2x16x16xf32>
    %318 = vector.broadcast %299 : vector<1x1x16xf32> to vector<2x16x16xf32>
    %319 = arith.addf %317, %318 : vector<2x16x16xf32>
    %320 = arith.addf %233, %319 : vector<2x16x16xf32>
    %cst_386 = arith.constant 0.000000e+00 : f32
    %321 = vector.broadcast %cst_386 : f32 to vector<2x16x16xf32>
    %322 = arith.maximumf %320, %321 : vector<2x16x16xf32>
    %c0_387 = arith.constant 0 : index
    %c0_388 = arith.constant 0 : index
    %323 = vector.load %arg19[%c0_387, %c0_388] : memref<128x32xbf16, #tpu.memory_space<vmem>>, vector<128x32xbf16>
    %324 = arith.truncf %322 : vector<2x16x16xf32> to vector<2x16x16xbf16>
    %c0_389 = arith.constant 0 : index
    %c16_390 = arith.constant 16 : index
    %c0_391 = arith.constant 0 : index
    %325 = vector.load %arg29[%c0_389, %c16_390, %c0_391] : memref<2x48x16xbf16, #tpu.memory_space<vmem>>, vector<2x16x16xbf16>
    tpu.vector_store %arg29[%c0_389, %c16_390, %c0_391], %324 {strides = array<i32>} : memref<2x48x16xbf16, #tpu.memory_space<vmem>>, vector<2x16x16xbf16>,
    %c0_392 = arith.constant 0 : index
    %c13_393 = arith.constant 13 : index
    %c0_394 = arith.constant 0 : index
    %326 = vector.load %arg29[%c0_392, %c13_393, %c0_394] : memref<2x48x16xbf16, #tpu.memory_space<vmem>>, vector<2x16x16xbf16>
    %c0_395 = arith.constant 0 : index
    %c0_396 = arith.constant 0 : index
    %c0_397 = arith.constant 0 : index
    %327 = vector.load %arg30[%c0_395, %c0_396, %c0_397] : memref<2x16x128xbf16, #tpu.memory_space<vmem>>, vector<2x16x16xbf16>
    tpu.vector_store %arg30[%c0_395, %c0_396, %c0_397], %326 {strides = array<i32>} : memref<2x16x128xbf16, #tpu.memory_space<vmem>>, vector<2x16x16xbf16>,
    %c0_398 = arith.constant 0 : index
    %c14_399 = arith.constant 14 : index
    %c0_400 = arith.constant 0 : index
    %328 = vector.load %arg29[%c0_398, %c14_399, %c0_400] : memref<2x48x16xbf16, #tpu.memory_space<vmem>>, vector<2x16x16xbf16>
    %c0_401 = arith.constant 0 : index
    %c0_402 = arith.constant 0 : index
    %c16_403 = arith.constant 16 : index
    %329 = vector.load %arg30[%c0_401, %c0_402, %c16_403] : memref<2x16x128xbf16, #tpu.memory_space<vmem>>, vector<2x16x16xbf16>
    tpu.vector_store %arg30[%c0_401, %c0_402, %c16_403], %328 {strides = array<i32>} : memref<2x16x128xbf16, #tpu.memory_space<vmem>>, vector<2x16x16xbf16>,
    %c0_404 = arith.constant 0 : index
    %c15_405 = arith.constant 15 : index
    %c0_406 = arith.constant 0 : index
    %330 = vector.load %arg29[%c0_404, %c15_405, %c0_406] : memref<2x48x16xbf16, #tpu.memory_space<vmem>>, vector<2x16x16xbf16>
    %c0_407 = arith.constant 0 : index
    %c0_408 = arith.constant 0 : index
    %c32_409 = arith.constant 32 : index
    %331 = vector.load %arg30[%c0_407, %c0_408, %c32_409] : memref<2x16x128xbf16, #tpu.memory_space<vmem>>, vector<2x16x16xbf16>
    tpu.vector_store %arg30[%c0_407, %c0_408, %c32_409], %330 {strides = array<i32>} : memref<2x16x128xbf16, #tpu.memory_space<vmem>>, vector<2x16x16xbf16>,
    %c0_410 = arith.constant 0 : index
    %c16_411 = arith.constant 16 : index
    %c0_412 = arith.constant 0 : index
    %332 = vector.load %arg29[%c0_410, %c16_411, %c0_412] : memref<2x48x16xbf16, #tpu.memory_space<vmem>>, vector<2x16x16xbf16>
    %c0_413 = arith.constant 0 : index
    %c0_414 = arith.constant 0 : index
    %c48_415 = arith.constant 48 : index
    %333 = vector.load %arg30[%c0_413, %c0_414, %c48_415] : memref<2x16x128xbf16, #tpu.memory_space<vmem>>, vector<2x16x16xbf16>
    tpu.vector_store %arg30[%c0_413, %c0_414, %c48_415], %332 {strides = array<i32>} : memref<2x16x128xbf16, #tpu.memory_space<vmem>>, vector<2x16x16xbf16>,
    %c0_416 = arith.constant 0 : index
    %c17_417 = arith.constant 17 : index
    %c0_418 = arith.constant 0 : index
    %334 = vector.load %arg29[%c0_416, %c17_417, %c0_418] : memref<2x48x16xbf16, #tpu.memory_space<vmem>>, vector<2x16x16xbf16>
    %c0_419 = arith.constant 0 : index
    %c0_420 = arith.constant 0 : index
    %c64_421 = arith.constant 64 : index
    %335 = vector.load %arg30[%c0_419, %c0_420, %c64_421] : memref<2x16x128xbf16, #tpu.memory_space<vmem>>, vector<2x16x16xbf16>
    tpu.vector_store %arg30[%c0_419, %c0_420, %c64_421], %334 {strides = array<i32>} : memref<2x16x128xbf16, #tpu.memory_space<vmem>>, vector<2x16x16xbf16>,
    %c0_422 = arith.constant 0 : index
    %c18_423 = arith.constant 18 : index
    %c0_424 = arith.constant 0 : index
    %336 = vector.load %arg29[%c0_422, %c18_423, %c0_424] : memref<2x48x16xbf16, #tpu.memory_space<vmem>>, vector<2x16x16xbf16>
    %c0_425 = arith.constant 0 : index
    %c0_426 = arith.constant 0 : index
    %c80_427 = arith.constant 80 : index
    %337 = vector.load %arg30[%c0_425, %c0_426, %c80_427] : memref<2x16x128xbf16, #tpu.memory_space<vmem>>, vector<2x16x16xbf16>
    tpu.vector_store %arg30[%c0_425, %c0_426, %c80_427], %336 {strides = array<i32>} : memref<2x16x128xbf16, #tpu.memory_space<vmem>>, vector<2x16x16xbf16>,
    %c0_428 = arith.constant 0 : index
    %c19_429 = arith.constant 19 : index
    %c0_430 = arith.constant 0 : index
    %338 = vector.load %arg29[%c0_428, %c19_429, %c0_430] : memref<2x48x16xbf16, #tpu.memory_space<vmem>>, vector<2x16x16xbf16>
    %c0_431 = arith.constant 0 : index
    %c0_432 = arith.constant 0 : index
    %c96_433 = arith.constant 96 : index
    %339 = vector.load %arg30[%c0_431, %c0_432, %c96_433] : memref<2x16x128xbf16, #tpu.memory_space<vmem>>, vector<2x16x16xbf16>
    tpu.vector_store %arg30[%c0_431, %c0_432, %c96_433], %338 {strides = array<i32>} : memref<2x16x128xbf16, #tpu.memory_space<vmem>>, vector<2x16x16xbf16>,
    %c0_434 = arith.constant 0 : index
    %c20_435 = arith.constant 20 : index
    %c0_436 = arith.constant 0 : index
    %340 = vector.load %arg29[%c0_434, %c20_435, %c0_436] : memref<2x48x16xbf16, #tpu.memory_space<vmem>>, vector<2x16x16xbf16>
    %c0_437 = arith.constant 0 : index
    %c0_438 = arith.constant 0 : index
    %c112_439 = arith.constant 112 : index
    %341 = vector.load %arg30[%c0_437, %c0_438, %c112_439] : memref<2x16x128xbf16, #tpu.memory_space<vmem>>, vector<2x16x16xbf16>
    tpu.vector_store %arg30[%c0_437, %c0_438, %c112_439], %340 {strides = array<i32>} : memref<2x16x128xbf16, #tpu.memory_space<vmem>>, vector<2x16x16xbf16>,
    %c0_440 = arith.constant 0 : index
    %c0_441 = arith.constant 0 : index
    %c0_442 = arith.constant 0 : index
    %342 = vector.load %arg30[%c0_440, %c0_441, %c0_442] : memref<2x16x128xbf16, #tpu.memory_space<vmem>>, vector<2x16x128xbf16>
    %343 = vector.shape_cast %342 : vector<2x16x128xbf16> to vector<32x128xbf16>
    %cst_443 = arith.constant dense<0.000000e+00> : vector<32x32xf32>
    %344 = tpu.matmul %343, %323, %cst_443 {dimension_numbers = #tpu.dot_dimension_numbers<[1], [0], [0], [1], [0, 0, 1, 1], [], []>} : vector<32x128xbf16>, vector<128x32xbf16>, vector<32x32xf32> -> vector<32x32xf32>
    %345 = vector.shape_cast %344 : vector<32x32xf32> to vector<2x16x32xf32>
    %346 = vector.extract_strided_slice %345 {offsets = [0, 0, 0], sizes = [2, 16, 16], strides = [1, 1, 1]} : vector<2x16x32xf32> to vector<2x16x16xf32>
    %c0_444 = arith.constant 0 : index
    %c0_445 = arith.constant 0 : index
    %c0_446 = arith.constant 0 : index
    %347 = vector.load %arg22[%c0_444, %c0_445, %c0_446] : memref<1x1x16xf32, #tpu.memory_space<vmem>>, vector<1x1x16xf32>
    %c0_447 = arith.constant 0 : index
    %c0_448 = arith.constant 0 : index
    %c0_449 = arith.constant 0 : index
    %348 = vector.load %arg23[%c0_447, %c0_448, %c0_449] : memref<1x1x16xf32, #tpu.memory_space<vmem>>, vector<1x1x16xf32>
    %cst_450 = arith.constant dense<0.000000e+00> : vector<16xf32>
    %349 = vector.multi_reduction <add>, %346, %cst_450 [0, 1] : vector<2x16x16xf32> to vector<16xf32>
    %350 = vector.shape_cast %349 : vector<16xf32> to vector<1x1x16xf32>
    %cst_451 = arith.constant 3.125000e-02 : f32
    %351 = vector.broadcast %cst_451 : f32 to vector<1x1x16xf32>
    %352 = arith.mulf %350, %351 : vector<1x1x16xf32>
    %353 = vector.broadcast %352 : vector<1x1x16xf32> to vector<2x16x16xf32>
    %354 = arith.subf %346, %353 : vector<2x16x16xf32>
    %355 = arith.mulf %354, %354 : vector<2x16x16xf32>
    %cst_452 = arith.constant dense<0.000000e+00> : vector<16xf32>
    %356 = vector.multi_reduction <add>, %355, %cst_452 [0, 1] : vector<2x16x16xf32> to vector<16xf32>
    %357 = vector.shape_cast %356 : vector<16xf32> to vector<1x1x16xf32>
    %cst_453 = arith.constant 3.125000e-02 : f32
    %358 = vector.broadcast %cst_453 : f32 to vector<1x1x16xf32>
    %359 = arith.mulf %357, %358 : vector<1x1x16xf32>
    %cst_454 = arith.constant 9.99999974E-6 : f32
    %360 = vector.broadcast %cst_454 : f32 to vector<1x1x16xf32>
    %361 = arith.addf %359, %360 : vector<1x1x16xf32>
    %362 = math.rsqrt %361 : vector<1x1x16xf32>
    %363 = vector.broadcast %362 : vector<1x1x16xf32> to vector<2x16x16xf32>
    %364 = arith.mulf %354, %363 : vector<2x16x16xf32>
    %365 = vector.broadcast %347 : vector<1x1x16xf32> to vector<2x16x16xf32>
    %366 = arith.mulf %364, %365 : vector<2x16x16xf32>
    %367 = vector.broadcast %348 : vector<1x1x16xf32> to vector<2x16x16xf32>
    %368 = arith.addf %366, %367 : vector<2x16x16xf32>
    %cst_455 = arith.constant 0.000000e+00 : f32
    %369 = vector.broadcast %cst_455 : f32 to vector<2x16x16xf32>
    %370 = arith.maximumf %368, %369 : vector<2x16x16xf32>
    %371 = vector.extract_strided_slice %345 {offsets = [0, 0, 16], sizes = [2, 16, 16], strides = [1, 1, 1]} : vector<2x16x32xf32> to vector<2x16x16xf32>
    %c0_456 = arith.constant 0 : index
    %c0_457 = arith.constant 0 : index
    %c0_458 = arith.constant 0 : index
    %372 = vector.load %arg22[%c0_456, %c0_457, %c0_458] : memref<1x1x16xf32, #tpu.memory_space<vmem>>, vector<1x1x16xf32>
    %c0_459 = arith.constant 0 : index
    %c0_460 = arith.constant 0 : index
    %c0_461 = arith.constant 0 : index
    %373 = vector.load %arg23[%c0_459, %c0_460, %c0_461] : memref<1x1x16xf32, #tpu.memory_space<vmem>>, vector<1x1x16xf32>
    %cst_462 = arith.constant dense<0.000000e+00> : vector<16xf32>
    %374 = vector.multi_reduction <add>, %371, %cst_462 [0, 1] : vector<2x16x16xf32> to vector<16xf32>
    %375 = vector.shape_cast %374 : vector<16xf32> to vector<1x1x16xf32>
    %cst_463 = arith.constant 3.125000e-02 : f32
    %376 = vector.broadcast %cst_463 : f32 to vector<1x1x16xf32>
    %377 = arith.mulf %375, %376 : vector<1x1x16xf32>
    %378 = vector.broadcast %377 : vector<1x1x16xf32> to vector<2x16x16xf32>
    %379 = arith.subf %371, %378 : vector<2x16x16xf32>
    %380 = arith.mulf %379, %379 : vector<2x16x16xf32>
    %cst_464 = arith.constant dense<0.000000e+00> : vector<16xf32>
    %381 = vector.multi_reduction <add>, %380, %cst_464 [0, 1] : vector<2x16x16xf32> to vector<16xf32>
    %382 = vector.shape_cast %381 : vector<16xf32> to vector<1x1x16xf32>
    %cst_465 = arith.constant 3.125000e-02 : f32
    %383 = vector.broadcast %cst_465 : f32 to vector<1x1x16xf32>
    %384 = arith.mulf %382, %383 : vector<1x1x16xf32>
    %cst_466 = arith.constant 9.99999974E-6 : f32
    %385 = vector.broadcast %cst_466 : f32 to vector<1x1x16xf32>
    %386 = arith.addf %384, %385 : vector<1x1x16xf32>
    %387 = math.rsqrt %386 : vector<1x1x16xf32>
    %388 = vector.broadcast %387 : vector<1x1x16xf32> to vector<2x16x16xf32>
    %389 = arith.mulf %379, %388 : vector<2x16x16xf32>
    %390 = vector.broadcast %372 : vector<1x1x16xf32> to vector<2x16x16xf32>
    %391 = arith.mulf %389, %390 : vector<2x16x16xf32>
    %392 = vector.broadcast %373 : vector<1x1x16xf32> to vector<2x16x16xf32>
    %393 = arith.addf %391, %392 : vector<2x16x16xf32>
    %c0_467 = arith.constant 0 : index
    %c0_468 = arith.constant 0 : index
    %394 = vector.load %arg20[%c0_467, %c0_468] : memref<80x16xbf16, #tpu.memory_space<vmem>>, vector<80x16xbf16>
    %395 = arith.truncf %370 : vector<2x16x16xf32> to vector<2x16x16xbf16>
    %c0_469 = arith.constant 0 : index
    %c16_470 = arith.constant 16 : index
    %c0_471 = arith.constant 0 : index
    %396 = vector.load %arg29[%c0_469, %c16_470, %c0_471] : memref<2x48x16xbf16, #tpu.memory_space<vmem>>, vector<2x16x16xbf16>
    tpu.vector_store %arg29[%c0_469, %c16_470, %c0_471], %395 {strides = array<i32>} : memref<2x48x16xbf16, #tpu.memory_space<vmem>>, vector<2x16x16xbf16>,
    %c0_472 = arith.constant 0 : index
    %c14_473 = arith.constant 14 : index
    %c0_474 = arith.constant 0 : index
    %397 = vector.load %arg29[%c0_472, %c14_473, %c0_474] : memref<2x48x16xbf16, #tpu.memory_space<vmem>>, vector<2x16x16xbf16>
    %c0_475 = arith.constant 0 : index
    %c0_476 = arith.constant 0 : index
    %c0_477 = arith.constant 0 : index
    %398 = vector.load %arg30[%c0_475, %c0_476, %c0_477] : memref<2x16x128xbf16, #tpu.memory_space<vmem>>, vector<2x16x16xbf16>
    tpu.vector_store %arg30[%c0_475, %c0_476, %c0_477], %397 {strides = array<i32>} : memref<2x16x128xbf16, #tpu.memory_space<vmem>>, vector<2x16x16xbf16>,
    %c0_478 = arith.constant 0 : index
    %c15_479 = arith.constant 15 : index
    %c0_480 = arith.constant 0 : index
    %399 = vector.load %arg29[%c0_478, %c15_479, %c0_480] : memref<2x48x16xbf16, #tpu.memory_space<vmem>>, vector<2x16x16xbf16>
    %c0_481 = arith.constant 0 : index
    %c0_482 = arith.constant 0 : index
    %c16_483 = arith.constant 16 : index
    %400 = vector.load %arg30[%c0_481, %c0_482, %c16_483] : memref<2x16x128xbf16, #tpu.memory_space<vmem>>, vector<2x16x16xbf16>
    tpu.vector_store %arg30[%c0_481, %c0_482, %c16_483], %399 {strides = array<i32>} : memref<2x16x128xbf16, #tpu.memory_space<vmem>>, vector<2x16x16xbf16>,
    %c0_484 = arith.constant 0 : index
    %c16_485 = arith.constant 16 : index
    %c0_486 = arith.constant 0 : index
    %401 = vector.load %arg29[%c0_484, %c16_485, %c0_486] : memref<2x48x16xbf16, #tpu.memory_space<vmem>>, vector<2x16x16xbf16>
    %c0_487 = arith.constant 0 : index
    %c0_488 = arith.constant 0 : index
    %c32_489 = arith.constant 32 : index
    %402 = vector.load %arg30[%c0_487, %c0_488, %c32_489] : memref<2x16x128xbf16, #tpu.memory_space<vmem>>, vector<2x16x16xbf16>
    tpu.vector_store %arg30[%c0_487, %c0_488, %c32_489], %401 {strides = array<i32>} : memref<2x16x128xbf16, #tpu.memory_space<vmem>>, vector<2x16x16xbf16>,
    %c0_490 = arith.constant 0 : index
    %c17_491 = arith.constant 17 : index
    %c0_492 = arith.constant 0 : index
    %403 = vector.load %arg29[%c0_490, %c17_491, %c0_492] : memref<2x48x16xbf16, #tpu.memory_space<vmem>>, vector<2x16x16xbf16>
    %c0_493 = arith.constant 0 : index
    %c0_494 = arith.constant 0 : index
    %c48_495 = arith.constant 48 : index
    %404 = vector.load %arg30[%c0_493, %c0_494, %c48_495] : memref<2x16x128xbf16, #tpu.memory_space<vmem>>, vector<2x16x16xbf16>
    tpu.vector_store %arg30[%c0_493, %c0_494, %c48_495], %403 {strides = array<i32>} : memref<2x16x128xbf16, #tpu.memory_space<vmem>>, vector<2x16x16xbf16>,
    %c0_496 = arith.constant 0 : index
    %c18_497 = arith.constant 18 : index
    %c0_498 = arith.constant 0 : index
    %405 = vector.load %arg29[%c0_496, %c18_497, %c0_498] : memref<2x48x16xbf16, #tpu.memory_space<vmem>>, vector<2x16x16xbf16>
    %c0_499 = arith.constant 0 : index
    %c0_500 = arith.constant 0 : index
    %c64_501 = arith.constant 64 : index
    %406 = vector.load %arg30[%c0_499, %c0_500, %c64_501] : memref<2x16x128xbf16, #tpu.memory_space<vmem>>, vector<2x16x16xbf16>
    tpu.vector_store %arg30[%c0_499, %c0_500, %c64_501], %405 {strides = array<i32>} : memref<2x16x128xbf16, #tpu.memory_space<vmem>>, vector<2x16x16xbf16>,
    %c0_502 = arith.constant 0 : index
    %c0_503 = arith.constant 0 : index
    %c0_504 = arith.constant 0 : index
    %407 = vector.load %arg30[%c0_502, %c0_503, %c0_504] : memref<2x16x128xbf16, #tpu.memory_space<vmem>>, vector<2x16x80xbf16>
    %408 = vector.shape_cast %407 : vector<2x16x80xbf16> to vector<32x80xbf16>
    %cst_505 = arith.constant dense<0.000000e+00> : vector<32x16xf32>
    %409 = tpu.matmul %408, %394, %cst_505 {dimension_numbers = #tpu.dot_dimension_numbers<[1], [0], [0], [1], [0, 0, 1, 1], [], []>} : vector<32x80xbf16>, vector<80x16xbf16>, vector<32x16xf32> -> vector<32x16xf32>
    %410 = vector.shape_cast %409 : vector<32x16xf32> to vector<2x16x16xf32>
    %c0_506 = arith.constant 0 : index
    %c0_507 = arith.constant 0 : index
    %c0_508 = arith.constant 0 : index
    %411 = vector.load %arg24[%c0_506, %c0_507, %c0_508] : memref<1x1x16xf32, #tpu.memory_space<vmem>>, vector<1x1x16xf32>
    %c0_509 = arith.constant 0 : index
    %c0_510 = arith.constant 0 : index
    %c0_511 = arith.constant 0 : index
    %412 = vector.load %arg25[%c0_509, %c0_510, %c0_511] : memref<1x1x16xf32, #tpu.memory_space<vmem>>, vector<1x1x16xf32>
    %cst_512 = arith.constant dense<0.000000e+00> : vector<16xf32>
    %413 = vector.multi_reduction <add>, %410, %cst_512 [0, 1] : vector<2x16x16xf32> to vector<16xf32>
    %414 = vector.shape_cast %413 : vector<16xf32> to vector<1x1x16xf32>
    %cst_513 = arith.constant 3.125000e-02 : f32
    %415 = vector.broadcast %cst_513 : f32 to vector<1x1x16xf32>
    %416 = arith.mulf %414, %415 : vector<1x1x16xf32>
    %417 = vector.broadcast %416 : vector<1x1x16xf32> to vector<2x16x16xf32>
    %418 = arith.subf %410, %417 : vector<2x16x16xf32>
    %419 = arith.mulf %418, %418 : vector<2x16x16xf32>
    %cst_514 = arith.constant dense<0.000000e+00> : vector<16xf32>
    %420 = vector.multi_reduction <add>, %419, %cst_514 [0, 1] : vector<2x16x16xf32> to vector<16xf32>
    %421 = vector.shape_cast %420 : vector<16xf32> to vector<1x1x16xf32>
    %cst_515 = arith.constant 3.125000e-02 : f32
    %422 = vector.broadcast %cst_515 : f32 to vector<1x1x16xf32>
    %423 = arith.mulf %421, %422 : vector<1x1x16xf32>
    %cst_516 = arith.constant 9.99999974E-6 : f32
    %424 = vector.broadcast %cst_516 : f32 to vector<1x1x16xf32>
    %425 = arith.addf %423, %424 : vector<1x1x16xf32>
    %426 = math.rsqrt %425 : vector<1x1x16xf32>
    %427 = vector.broadcast %426 : vector<1x1x16xf32> to vector<2x16x16xf32>
    %428 = arith.mulf %418, %427 : vector<2x16x16xf32>
    %429 = vector.broadcast %411 : vector<1x1x16xf32> to vector<2x16x16xf32>
    %430 = arith.mulf %428, %429 : vector<2x16x16xf32>
    %431 = vector.broadcast %412 : vector<1x1x16xf32> to vector<2x16x16xf32>
    %432 = arith.addf %430, %431 : vector<2x16x16xf32>
    %cst_517 = arith.constant 0.000000e+00 : f32
    %433 = vector.broadcast %cst_517 : f32 to vector<2x16x16xf32>
    %434 = arith.maximumf %432, %433 : vector<2x16x16xf32>
    %c0_518 = arith.constant 0 : index
    %c0_519 = arith.constant 0 : index
    %435 = vector.load %arg21[%c0_518, %c0_519] : memref<128x16xbf16, #tpu.memory_space<vmem>>, vector<128x16xbf16>
    %436 = arith.truncf %434 : vector<2x16x16xf32> to vector<2x16x16xbf16>
    %c0_520 = arith.constant 0 : index
    %c16_521 = arith.constant 16 : index
    %c0_522 = arith.constant 0 : index
    %437 = vector.load %arg29[%c0_520, %c16_521, %c0_522] : memref<2x48x16xbf16, #tpu.memory_space<vmem>>, vector<2x16x16xbf16>
    tpu.vector_store %arg29[%c0_520, %c16_521, %c0_522], %436 {strides = array<i32>} : memref<2x48x16xbf16, #tpu.memory_space<vmem>>, vector<2x16x16xbf16>,
    %c0_523 = arith.constant 0 : index
    %c13_524 = arith.constant 13 : index
    %c0_525 = arith.constant 0 : index
    %438 = vector.load %arg29[%c0_523, %c13_524, %c0_525] : memref<2x48x16xbf16, #tpu.memory_space<vmem>>, vector<2x16x16xbf16>
    %c0_526 = arith.constant 0 : index
    %c0_527 = arith.constant 0 : index
    %c0_528 = arith.constant 0 : index
    %439 = vector.load %arg30[%c0_526, %c0_527, %c0_528] : memref<2x16x128xbf16, #tpu.memory_space<vmem>>, vector<2x16x16xbf16>
    tpu.vector_store %arg30[%c0_526, %c0_527, %c0_528], %438 {strides = array<i32>} : memref<2x16x128xbf16, #tpu.memory_space<vmem>>, vector<2x16x16xbf16>,
    %c0_529 = arith.constant 0 : index
    %c14_530 = arith.constant 14 : index
    %c0_531 = arith.constant 0 : index
    %440 = vector.load %arg29[%c0_529, %c14_530, %c0_531] : memref<2x48x16xbf16, #tpu.memory_space<vmem>>, vector<2x16x16xbf16>
    %c0_532 = arith.constant 0 : index
    %c0_533 = arith.constant 0 : index
    %c16_534 = arith.constant 16 : index
    %441 = vector.load %arg30[%c0_532, %c0_533, %c16_534] : memref<2x16x128xbf16, #tpu.memory_space<vmem>>, vector<2x16x16xbf16>
    tpu.vector_store %arg30[%c0_532, %c0_533, %c16_534], %440 {strides = array<i32>} : memref<2x16x128xbf16, #tpu.memory_space<vmem>>, vector<2x16x16xbf16>,
    %c0_535 = arith.constant 0 : index
    %c15_536 = arith.constant 15 : index
    %c0_537 = arith.constant 0 : index
    %442 = vector.load %arg29[%c0_535, %c15_536, %c0_537] : memref<2x48x16xbf16, #tpu.memory_space<vmem>>, vector<2x16x16xbf16>
    %c0_538 = arith.constant 0 : index
    %c0_539 = arith.constant 0 : index
    %c32_540 = arith.constant 32 : index
    %443 = vector.load %arg30[%c0_538, %c0_539, %c32_540] : memref<2x16x128xbf16, #tpu.memory_space<vmem>>, vector<2x16x16xbf16>
    tpu.vector_store %arg30[%c0_538, %c0_539, %c32_540], %442 {strides = array<i32>} : memref<2x16x128xbf16, #tpu.memory_space<vmem>>, vector<2x16x16xbf16>,
    %c0_541 = arith.constant 0 : index
    %c16_542 = arith.constant 16 : index
    %c0_543 = arith.constant 0 : index
    %444 = vector.load %arg29[%c0_541, %c16_542, %c0_543] : memref<2x48x16xbf16, #tpu.memory_space<vmem>>, vector<2x16x16xbf16>
    %c0_544 = arith.constant 0 : index
    %c0_545 = arith.constant 0 : index
    %c48_546 = arith.constant 48 : index
    %445 = vector.load %arg30[%c0_544, %c0_545, %c48_546] : memref<2x16x128xbf16, #tpu.memory_space<vmem>>, vector<2x16x16xbf16>
    tpu.vector_store %arg30[%c0_544, %c0_545, %c48_546], %444 {strides = array<i32>} : memref<2x16x128xbf16, #tpu.memory_space<vmem>>, vector<2x16x16xbf16>,
    %c0_547 = arith.constant 0 : index
    %c17_548 = arith.constant 17 : index
    %c0_549 = arith.constant 0 : index
    %446 = vector.load %arg29[%c0_547, %c17_548, %c0_549] : memref<2x48x16xbf16, #tpu.memory_space<vmem>>, vector<2x16x16xbf16>
    %c0_550 = arith.constant 0 : index
    %c0_551 = arith.constant 0 : index
    %c64_552 = arith.constant 64 : index
    %447 = vector.load %arg30[%c0_550, %c0_551, %c64_552] : memref<2x16x128xbf16, #tpu.memory_space<vmem>>, vector<2x16x16xbf16>
    tpu.vector_store %arg30[%c0_550, %c0_551, %c64_552], %446 {strides = array<i32>} : memref<2x16x128xbf16, #tpu.memory_space<vmem>>, vector<2x16x16xbf16>,
    %c0_553 = arith.constant 0 : index
    %c18_554 = arith.constant 18 : index
    %c0_555 = arith.constant 0 : index
    %448 = vector.load %arg29[%c0_553, %c18_554, %c0_555] : memref<2x48x16xbf16, #tpu.memory_space<vmem>>, vector<2x16x16xbf16>
    %c0_556 = arith.constant 0 : index
    %c0_557 = arith.constant 0 : index
    %c80_558 = arith.constant 80 : index
    %449 = vector.load %arg30[%c0_556, %c0_557, %c80_558] : memref<2x16x128xbf16, #tpu.memory_space<vmem>>, vector<2x16x16xbf16>
    tpu.vector_store %arg30[%c0_556, %c0_557, %c80_558], %448 {strides = array<i32>} : memref<2x16x128xbf16, #tpu.memory_space<vmem>>, vector<2x16x16xbf16>,
    %c0_559 = arith.constant 0 : index
    %c19_560 = arith.constant 19 : index
    %c0_561 = arith.constant 0 : index
    %450 = vector.load %arg29[%c0_559, %c19_560, %c0_561] : memref<2x48x16xbf16, #tpu.memory_space<vmem>>, vector<2x16x16xbf16>
    %c0_562 = arith.constant 0 : index
    %c0_563 = arith.constant 0 : index
    %c96_564 = arith.constant 96 : index
    %451 = vector.load %arg30[%c0_562, %c0_563, %c96_564] : memref<2x16x128xbf16, #tpu.memory_space<vmem>>, vector<2x16x16xbf16>
    tpu.vector_store %arg30[%c0_562, %c0_563, %c96_564], %450 {strides = array<i32>} : memref<2x16x128xbf16, #tpu.memory_space<vmem>>, vector<2x16x16xbf16>,
    %c0_565 = arith.constant 0 : index
    %c20_566 = arith.constant 20 : index
    %c0_567 = arith.constant 0 : index
    %452 = vector.load %arg29[%c0_565, %c20_566, %c0_567] : memref<2x48x16xbf16, #tpu.memory_space<vmem>>, vector<2x16x16xbf16>
    %c0_568 = arith.constant 0 : index
    %c0_569 = arith.constant 0 : index
    %c112_570 = arith.constant 112 : index
    %453 = vector.load %arg30[%c0_568, %c0_569, %c112_570] : memref<2x16x128xbf16, #tpu.memory_space<vmem>>, vector<2x16x16xbf16>
    tpu.vector_store %arg30[%c0_568, %c0_569, %c112_570], %452 {strides = array<i32>} : memref<2x16x128xbf16, #tpu.memory_space<vmem>>, vector<2x16x16xbf16>,
    %c0_571 = arith.constant 0 : index
    %c0_572 = arith.constant 0 : index
    %c0_573 = arith.constant 0 : index
    %454 = vector.load %arg30[%c0_571, %c0_572, %c0_573] : memref<2x16x128xbf16, #tpu.memory_space<vmem>>, vector<2x16x128xbf16>
    %455 = vector.shape_cast %454 : vector<2x16x128xbf16> to vector<32x128xbf16>
    %cst_574 = arith.constant dense<0.000000e+00> : vector<32x16xf32>
    %456 = tpu.matmul %455, %435, %cst_574 {dimension_numbers = #tpu.dot_dimension_numbers<[1], [0], [0], [1], [0, 0, 1, 1], [], []>} : vector<32x128xbf16>, vector<128x16xbf16>, vector<32x16xf32> -> vector<32x16xf32>
    %457 = vector.shape_cast %456 : vector<32x16xf32> to vector<2x16x16xf32>
    %c0_575 = arith.constant 0 : index
    %c0_576 = arith.constant 0 : index
    %c0_577 = arith.constant 0 : index
    %458 = vector.load %arg26[%c0_575, %c0_576, %c0_577] : memref<1x1x16xf32, #tpu.memory_space<vmem>>, vector<1x1x16xf32>
    %c0_578 = arith.constant 0 : index
    %c0_579 = arith.constant 0 : index
    %c0_580 = arith.constant 0 : index
    %459 = vector.load %arg27[%c0_578, %c0_579, %c0_580] : memref<1x1x16xf32, #tpu.memory_space<vmem>>, vector<1x1x16xf32>
    %cst_581 = arith.constant dense<0.000000e+00> : vector<16xf32>
    %460 = vector.multi_reduction <add>, %457, %cst_581 [0, 1] : vector<2x16x16xf32> to vector<16xf32>
    %461 = vector.shape_cast %460 : vector<16xf32> to vector<1x1x16xf32>
    %cst_582 = arith.constant 3.125000e-02 : f32
    %462 = vector.broadcast %cst_582 : f32 to vector<1x1x16xf32>
    %463 = arith.mulf %461, %462 : vector<1x1x16xf32>
    %464 = vector.broadcast %463 : vector<1x1x16xf32> to vector<2x16x16xf32>
    %465 = arith.subf %457, %464 : vector<2x16x16xf32>
    %466 = arith.mulf %465, %465 : vector<2x16x16xf32>
    %cst_583 = arith.constant dense<0.000000e+00> : vector<16xf32>
    %467 = vector.multi_reduction <add>, %466, %cst_583 [0, 1] : vector<2x16x16xf32> to vector<16xf32>
    %468 = vector.shape_cast %467 : vector<16xf32> to vector<1x1x16xf32>
    %cst_584 = arith.constant 3.125000e-02 : f32
    %469 = vector.broadcast %cst_584 : f32 to vector<1x1x16xf32>
    %470 = arith.mulf %468, %469 : vector<1x1x16xf32>
    %cst_585 = arith.constant 9.99999974E-6 : f32
    %471 = vector.broadcast %cst_585 : f32 to vector<1x1x16xf32>
    %472 = arith.addf %470, %471 : vector<1x1x16xf32>
    %473 = math.rsqrt %472 : vector<1x1x16xf32>
    %474 = vector.broadcast %473 : vector<1x1x16xf32> to vector<2x16x16xf32>
    %475 = arith.mulf %465, %474 : vector<2x16x16xf32>
    %476 = vector.broadcast %458 : vector<1x1x16xf32> to vector<2x16x16xf32>
    %477 = arith.mulf %475, %476 : vector<2x16x16xf32>
    %478 = vector.broadcast %459 : vector<1x1x16xf32> to vector<2x16x16xf32>
    %479 = arith.addf %477, %478 : vector<2x16x16xf32>
    %480 = arith.addf %393, %479 : vector<2x16x16xf32>
    %cst_586 = arith.constant 0.000000e+00 : f32
    %481 = vector.broadcast %cst_586 : f32 to vector<2x16x16xf32>
    %482 = arith.maximumf %480, %481 : vector<2x16x16xf32>
    %cst_587 = arith.constant dense<0.000000e+00> : vector<2x16xf32>
    %483 = vector.multi_reduction <add>, %482, %cst_587 [1] : vector<2x16x16xf32> to vector<2x16xf32>
    %cst_588 = arith.constant 1.600000e+01 : f32
    %484 = vector.broadcast %cst_588 : f32 to vector<2x16xf32>
    %485 = arith.divf %483, %484 : vector<2x16xf32>
    %c0_589 = arith.constant 0 : index
    %c0_590 = arith.constant 0 : index
    %486 = vector.load %arg28[%c0_589, %c0_590] : memref<2x16xf32, #tpu.memory_space<vmem>>, vector<2x16xf32>
    tpu.vector_store %arg28[%c0_589, %c0_590], %485 {strides = array<i32>} : memref<2x16xf32, #tpu.memory_space<vmem>>, vector<2x16xf32>,
    return
  }
}

</mosaic_0001>

<bundles_post_ra>
// kernel: resnet_forward.1
= control target key start
LH: loop header
LB: loop body
LE: loop exit
PB: predicated region body
PF: predicated region fallthrough
CT: control target
= control target key end

     0   :  { %s8135_s0 = inlined_call_operand.vmem [shape: bf16[2,16,4], index: 0, kind: input, shape index: {}]   ;;  %s8136_s1 = inlined_call_operand.vmem [shape: bf16[32,16], index: 1, kind: input, shape index: {}]   ;;  %s8137_s2 = inlined_call_operand.vmem [shape: bf16[40,8], index: 2, kind: input, shape index: {}]   ;;  %s8138_s3 = inlined_call_operand.vmem [shape: bf16[64,8], index: 3, kind: input, shape index: {}]   ;;  %s8139_s4 = inlined_call_operand.vmem [shape: f32[1,1,8], index: 4, kind: input, shape index: {}]   ;;  %s8140_s5 = inlined_call_operand.vmem [shape: f32[1,1,8], index: 5, kind: input, shape index: {}]   ;;  %s8141_s6 = inlined_call_operand.vmem [shape: f32[1,1,8], index: 6, kind: input, shape index: {}]   ;;  %s8142_s7 = inlined_call_operand.vmem [shape: f32[1,1,8], index: 7, kind: input, shape index: {}]   ;;  %s8143_s8 = inlined_call_operand.vmem [shape: f32[1,1,8], index: 8, kind: input, shape index: {}]   ;;  %s8144_s9 = inlined_call_operand.vmem [shape: f32[1,1,8], index: 9, kind: input, shape index: {}]   ;;  %s8145_s10 = inlined_call_operand.vmem [shape: bf16[64,32], index: 10, kind: input, shape index: {}]   ;;  %s8146_s11 = inlined_call_operand.vmem [shape: bf16[80,16], index: 11, kind: input, shape index: {}]   ;;  %s8147_s12 = inlined_call_operand.vmem [shape: bf16[128,16], index: 12, kind: input, shape index: {}]   ;;  %s8148_s13 = inlined_call_operand.vmem [shape: f32[1,1,16], index: 13, kind: input, shape index: {}]   ;;  %s8149_s14 = inlined_call_operand.vmem [shape: f32[1,1,16], index: 14, kind: input, shape index: {}]   ;;  %s8150_s15 = inlined_call_operand.vmem [shape: f32[1,1,16], index: 15, kind: input, shape index: {}]   ;;  %s8151_s16 = inlined_call_operand.vmem [shape: f32[1,1,16], index: 16, kind: input, shape index: {}]   ;;  %s8152_s17 = inlined_call_operand.vmem [shape: f32[1,1,16], index: 17, kind: input, shape index: {}]   ;;  %s8153_s18 = inlined_call_operand.vmem [shape: f32[1,1,16], index: 18, kind: input, shape index: {}]   ;;  %s8154_s19 = inlined_call_operand.vmem [shape: bf16[128,32], index: 19, kind: input, shape index: {}]   ;;  %s8155_s20 = inlined_call_operand.vmem [shape: bf16[80,16], index: 20, kind: input, shape index: {}]   ;;  %s8156_s21 = inlined_call_operand.vmem [shape: bf16[128,16], index: 21, kind: input, shape index: {}]   ;;  %s8157_s22 = inlined_call_operand.vmem [shape: f32[1,1,16], index: 22, kind: input, shape index: {}]   ;;  %s8158_s23 = inlined_call_operand.vmem [shape: f32[1,1,16], index: 23, kind: input, shape index: {}]   ;;  %s8159_s24 = inlined_call_operand.vmem [shape: f32[1,1,16], index: 24, kind: input, shape index: {}]   ;;  %s8160_s25 = inlined_call_operand.vmem [shape: f32[1,1,16], index: 25, kind: input, shape index: {}]   ;;  %s8161_s26 = inlined_call_operand.vmem [shape: f32[1,1,16], index: 26, kind: input, shape index: {}]   ;;  %s8162_s27 = inlined_call_operand.vmem [shape: f32[1,1,16], index: 27, kind: input, shape index: {}]   ;;  %s8163_s28 = inlined_call_operand.hbm [shape: f32[2,16], index: 28, kind: output, shape index: {}]  }
   0x1   :  { %8184 = sst [smem:[#allocation7_spill]] %s8135_s0 }
   0x2   :  { %8185 = sst [smem:[#allocation8_spill]] %s8136_s1 }
   0x3   :  { %8186 = sst [smem:[#allocation9_spill]] %s8137_s2 }
   0x4   :  { %8187 = sst [smem:[#allocation10_spill]] %s8138_s3 }
   0x5   :  { %8188 = sst [smem:[#allocation11_spill]] %s8139_s4 }
   0x6   :  { %8189 = sst [smem:[#allocation12_spill]] %s8140_s5 }
   0x7   :  { %8190 = sst [smem:[#allocation13_spill]] %s8141_s6 }
   0x8   :  { %8191 = sst [smem:[#allocation14_spill]] %s8142_s7 }
   0x9   :  { %8192 = sst [smem:[#allocation15_spill]] %s8143_s8 }
   0xa   :  { %8193 = sst [smem:[#allocation16_spill]] %s8144_s9 }
   0xb   :  { %8194 = sst [smem:[#allocation17_spill]] %s8145_s10 }
   0xc   :  { %8195 = sst [smem:[#allocation18_spill]] %s8146_s11 }
   0xd   :  { %8196 = sst [smem:[#allocation19_spill]] %s8147_s12 }
   0xe   :  { %s8197_s9 = sld [smem:[#allocation7_spill]]  ;;  %vm108_vm0 = vcmask 27648   ;;  %vm8173_vm1 = vcmask 125952   ;;  %v6060_v3 = vmov 0   ;;  %vm198_vm2 = vcmask 1040384   ;;  %s6061_s29 = smov 12  }
   0xf   :  { %95 = vst.msk [vmem:[#allocation2 + $0x1c] sm:$0xf] %vm8173_vm1, %v6060_v3  ;;  %93 = vst.msk [vmem:[#allocation2 + $0x4] sm:$0xf] %vm8173_vm1, %v6060_v3  ;;  %vm199_vm3 = vcmask 1044484   ;;  %s6062_s2 = smov 4  }
  0x10   :  { %96 = vst.msk [vmem:[#allocation2 + $0x10] sm:$0xf] %vm8173_vm1, %v6060_v3  ;;  %98 = vst.msk [vmem:[#allocation2 + $0x28] sm:$0xf] %vm8173_vm1, %v6060_v3  ;;  %vm238_vm4 = vsmask.f32 256 }
  0x11   :  { %vm6243_vm5 = vmor %vm198_vm2, %vm199_vm3  ;;  %vm239_vm6 = vsmask.f32 4368  ;;  %vm333_vm7 = vsmask.f32 3328  ;;  %vm334_vm8 = vsmask.f32 7440 }
  0x12   :  { %vm413_vm9 = vcmask 1042432   ;;  %vm6259_vm10 = vmor %vm238_vm4, %vm239_vm6  ;;  %vm414_vm11 = vcmask 1046532   ;;  %s6063_s7 = smov 8   ;;  %vm453_vm14 = vsmask.f32 2304  ;;  %s6064_s12 = smov 16  }
  0x13   :  { %vm6282_vm12 = vmor %vm333_vm7, %vm334_vm8  ;;  %vm454_vm15 = vsmask.f32 6416  ;;  %vm119_vm2 = vsmask.f32 1280  ;;  %vm120_vm3 = vsmask.f32 5392 }
  0x14   :  { %v101_v0 = vld [vmem:[%s8197_s9 + $0x4] sm:$0xf]  ;;  %v100_v1 = vld [vmem:[%s8197_s9] sm:$0xf]  ;;  %v102_v2 = vld [vmem:[%s8197_s9 + $0x8] sm:$0xf] }
  0x15   :  { %110 = vst.msk [vmem:[#allocation2 + $0xc] sm:$0xf] %vm108_vm0, %v101_v0  ;;  %109 = vst.msk [vmem:[#allocation2 + $0x8] sm:$0xf] %vm108_vm0, %v100_v1  ;;  %v103_v4 = vld [vmem:[%s8197_s9 + $0xc] sm:$0xf] }
  0x16   :  { %111 = vst.msk [vmem:[#allocation2 + $0x20] sm:$0xf] %vm108_vm0, %v102_v2  ;;  %112 = vst.msk [vmem:[#allocation2 + $0x24] sm:$0xf] %vm108_vm0, %v103_v4  ;;  %v189_v9 = vld [vmem:[#allocation2 + $0x1c] sm:$0x8] }
  0x17   :  { %v186_v11 = vld [vmem:[#allocation2 + $0x4] sm:$0x8]  ;;  %v5518_v12 = vrot.slane %v189_v9, 11  ;;  %v235_v40 = vld [vmem:[#allocation2 + $0x1c] sm:$0x8]  ;;  %vm6291_vm13 = vmor %vm413_vm9, %vm414_vm11  ;;  %vm541_vm6 = vcmask 1041408  }
  0x18   :  { %v5517_v14 = vrot.slane %v186_v11, 11  ;;  %v232_v25 = vld [vmem:[#allocation2 + $0x4] sm:$0x8]  ;;  %v264_v45 = vshrl.u32 %v235_v40, 16  ;;  %v329_v54 = vld [vmem:[#allocation2 + $0x10] sm:$0x1]  ;;  %vm6337_vm4 = vmor %vm453_vm14, %vm454_vm15 }
  0x19   :  { %v242_v32 = vshrl.u32 %v232_v25, 16  ;;  %v332_v1 = vld [vmem:[#allocation2 + $0x28] sm:$0x1]  ;;  %v356_v3 = vshll.u32 %v329_v54, 16  ;;  %vm542_vm7 = vcmask 1045508   ;;  %s6065_s1 = smov 20   ;;  %vm6377_vm8 = vmor %vm119_vm2, %vm120_vm3 }
  0x1a   :  { %v5520_v52 = vrot.slane %v264_v45, 11  ;;  %s8208_s5 = sld [smem:[#allocation8_spill]]  ;;  %s6066_s9 = smov 24   ;;  %vm6383_vm9 = vmor %vm541_vm6, %vm542_vm7 }
  0x1b   :  { %v5519_v42 = vrot.slane %v242_v32, 11  ;;  %s6067_s6 = smov 28  }
  0x1c   :  { %v303_v6 = vld [vmem:[#allocation2 + $0xc] sm:$0xf]  ;;  %v302_v7 = vld [vmem:[#allocation2 + $0x8] sm:$0xf] }
  0x1d   :  { %v187_v8 = vld [vmem:[#allocation2 + $0x8] sm:$0xf]  ;;  %312 = vrot.lane.b32.xlu1 %v303_v6, %s6061_s29  ;;  %310 = vrot.lane.b32.xlu0 %v302_v7, %s6061_s29  ;;  %v190_v10 = vld [vmem:[#allocation2 + $0x20] sm:$0xf]  ;;  %v191_v16 = vld [vmem:[#allocation2 + $0x24] sm:$0x7] }
  0x1e   :  { %v210_v13 = vrot.slane %v190_v10, 7  ;;  %v203_v15 = vrot.slane %v187_v8, 7  ;;  %v213_v17 = vrot.slane %v191_v16, 7  ;;  %v188_v18 = vld [vmem:[#allocation2 + $0xc] sm:$0x7]  ;;  %v380_v16 = vshll.u32 %v332_v1, 16 }
  0x1f   :  { %v233_v19 = vld [vmem:[#allocation2 + $0x8] sm:$0xf]  ;;  %v234_v24 = vld [vmem:[#allocation2 + $0xc] sm:$0xf]  ;;  %v206_v26 = vrot.slane %v188_v18, 7 }
  0x20   :  { %v211_v20 = vsel %vm6243_vm5, %v5518_v12, %v210_v13  ;;  %v204_v21 = vsel %vm6243_vm5, %v5517_v14, %v203_v15  ;;  %v212_v22 = vrot.slane %v210_v13, 4  ;;  %v205_v23 = vrot.slane %v203_v15, 4  ;;  %v236_v30 = vld [vmem:[#allocation2 + $0x20] sm:$0xf]  ;;  %v237_v34 = vld [vmem:[#allocation2 + $0x24] sm:$0xf] }
  0x21   :  { %219 = vrot.lane.b32.xlu1 %v211_v20, %s6062_s2  ;;  %215 = vrot.lane.b32.xlu0 %v204_v21, %s6062_s2  ;;  %v247_v27 = vshrl.u32 %v233_v19, 16  ;;  %v256_v28 = vshrl.u32 %v234_v24, 16  ;;  %v259_v29 = vshll.u32 %v234_v24, 16  ;;  %v250_v33 = vshll.u32 %v233_v19, 16  ;;  %v328_v50 = vld [vmem:[#allocation2 + $0xc] sm:$0xf] }
  0x22   :  { %v214_v31 = vsel %vm6243_vm5, %v212_v22, %v213_v17  ;;  %v269_v35 = vshrl.u32 %v236_v30, 16  ;;  %v207_v36 = vsel %vm6243_vm5, %v205_v23, %v206_v26  ;;  %v278_v39 = vshrl.u32 %v237_v34, 16  ;;  %v327_v60 = vld [vmem:[#allocation2 + $0x8] sm:$0xf]  ;;  %v331_v61 = vld [vmem:[#allocation2 + $0x24] sm:$0xf] }
  0x23   :  { %v249_v37 = vrot.slane %v247_v27, 7  ;;  %v258_v38 = vrot.slane %v256_v28, 7  ;;  %v281_v44 = vshll.u32 %v237_v34, 16  ;;  %v272_v53 = vshll.u32 %v236_v30, 16  ;;  %v330_v7 = vld [vmem:[#allocation2 + $0x20] sm:$0xf] }
  0x24   :  { %v271_v43 = vrot.slane %v269_v35, 7  ;;  %v280_v49 = vrot.slane %v278_v39, 7  ;;  %v346_v55 = vshll.u32 %v328_v50, 16  ;;  %v350_v59 = vshrl.u32 %v328_v50, 16  ;;  %v402_v12 = vld [vmem:[#allocation2 + $0xc] sm:$0xf] }
  0x25   :  { %221 = vrot.lane.b32.xlu1 %v214_v31, %s6062_s2  ;;  %217 = vrot.lane.b32.xlu0 %v207_v36, %s6062_s2  ;;  %v254_v46 = vrot.slane %v249_v37, 4  ;;  %v261_v47 = vor.u32 %v259_v29, %v258_v38  ;;  %v252_v48 = vor.u32 %v250_v33, %v249_v37  ;;  %v337_v0 = vshrl.u32 %v327_v60, 16  ;;  %v403_v17 = vld [vmem:[#allocation2 + $0x10] sm:$0x1]  ;;  %v305_v18 = vld [vmem:[#allocation2 + $0x24] sm:$0xf] }
  0x26   :  { %v276_v51 = vrot.slane %v271_v43, 4  ;;  %v283_v58 = vor.u32 %v281_v44, %v280_v49  ;;  %v274_v62 = vor.u32 %v272_v53, %v271_v43  ;;  %v6267_v63 = vrot.slane %v346_v55, 5  ;;  %v304_v19 = vld [vmem:[#allocation2 + $0x20] sm:$0xf]  ;;  %v401_v24 = vld [vmem:[#allocation2 + $0x8] sm:$0xe] }
  0x27   :  { %v262_v56 = vsel %vm6259_vm10, %v254_v46, %v261_v47  ;;  %v253_v57 = vsel %vm6259_vm10, %v5519_v42, %v252_v48  ;;  %v352_v2 = vrot.slane %v350_v59, 4  ;;  %v340_v4 = vshll.u32 %v327_v60, 16  ;;  %v6286_v30 = vld [vmem:[#allocation2 + $0x24] sm:$0xf]  ;;  %v6295_v36 = vld [vmem:[#allocation2 + $0x28] sm:$0x1] }
  0x28   :  { %v370_v6 = vshll.u32 %v331_v61, 16  ;;  %v284_v8 = vsel %vm6259_vm10, %v276_v51, %v283_v58  ;;  %v275_v9 = vsel %vm6259_vm10, %v5520_v52, %v274_v62  ;;  %v339_v10 = vrot.slane %v337_v0, 4  ;;  %v448_v43 = vld [vmem:[#allocation2 + $0xc] sm:$0xf]  ;;  %v449_v44 = vld [vmem:[#allocation2 + $0x10] sm:$0x3] }
  0x29   :  { %287 = vrot.lane.b32.xlu1 %v262_v56, %s6063_s7  ;;  %285 = vrot.lane.b32.xlu0 %v253_v57, %s6063_s7  ;;  %v374_v11 = vshrl.u32 %v331_v61, 16  ;;  %v353_v13 = vor.u32 %v352_v2, %v6267_v63  ;;  %v342_v14 = vrot.slane %v340_v4, 5  ;;  %v361_v21 = vshrl.u32 %v330_v7, 16  ;;  %v447_v49 = vld [vmem:[#allocation2 + $0x8] sm:$0xe] }
  0x2a   :  { %v6276_v15 = vrot.slane %v370_v6, 5  ;;  %v364_v22 = vshll.u32 %v330_v7, 16  ;;  %v418_v23 = vrot.slane %v402_v12, 5  ;;  %v358_v27 = vrot.slane %v356_v3, 5  ;;  %v451_v54 = vld [vmem:[#allocation2 + $0x24] sm:$0xf] }
  0x2b   :  { %v376_v20 = vrot.slane %v374_v11, 4  ;;  %v354_v26 = vrot.slane %v353_v13, 4  ;;  %v343_v28 = vor.u32 %v342_v14, %v339_v10  ;;  %v421_v29 = vrot.slane %v403_v17, 5  ;;  %v452_v59 = vld [vmem:[#allocation2 + $0x28] sm:$0x3] }
  0x2c   :  { %v363_v32 = vrot.slane %v361_v21, 4  ;;  %v366_v33 = vrot.slane %v364_v22, 5  ;;  %v420_v35 = vrot.slane %v418_v23, 4  ;;  %v382_v38 = vrot.slane %v380_v16, 5  ;;  %v404_v61 = vld [vmem:[#allocation2 + $0x20] sm:$0xe] }
  0x2d   :  { %291 = vrot.lane.b32.xlu1 %v284_v8, %s6063_s7  ;;  %289 = vrot.lane.b32.xlu0 %v275_v9, %s6063_s7  ;;  %v377_v31 = vor.u32 %v376_v20, %v6276_v15  ;;  %v344_v37 = vrot.slane %v343_v28, 4  ;;  %v5521_v39 = vrot.slane %v401_v24, 9  ;;  %v359_v45 = vsel %vm6282_vm12, %v354_v26, %v358_v27  ;;  %v450_v6 = vld [vmem:[#allocation2 + $0x20] sm:$0xe]  ;;  %v6321_v11 = vld [vmem:[#allocation2 + $0xc] sm:$0xf] }
  0x2e   :  { %v367_v42 = vor.u32 %v366_v33, %v363_v32  ;;  %v6303_v46 = vsel %vm6291_vm13, %v420_v35, %v421_v29  ;;  %v425_v47 = vrot.slane %v6286_v30, 5  ;;  %v428_v48 = vrot.slane %v6295_v36, 5 }
  0x2f   :  { %v378_v40 = vrot.slane %v377_v31, 4  ;;  %v349_v50 = vsel %vm6282_vm12, %v344_v37, %v6267_v63  ;;  %v466_v52 = vshrl.u32 %v448_v43, 16  ;;  %v469_v53 = vshll.u32 %v448_v43, 16  ;;  %v6333_v31 = vld [vmem:[#allocation2 + $0x8] sm:$0xc] }
  0x30   :  { %v368_v51 = vrot.slane %v367_v42, 4  ;;  %v419_v56 = vsel %vm6291_vm13, %v5521_v39, %v418_v23  ;;  %v476_v57 = vshrl.u32 %v449_v44, 16  ;;  %v479_v58 = vshll.u32 %v449_v44, 16  ;;  %v6327_v23 = vld [vmem:[#allocation2 + $0x10] sm:$0x3] }
  0x31   :  { %316 = vrot.lane.b32.xlu1 %v305_v18, %s6061_s29  ;;  %314 = vrot.lane.b32.xlu0 %v304_v19, %s6061_s29  ;;  %v383_v55 = vsel %vm6282_vm12, %v378_v40, %v382_v38  ;;  %v468_v62 = vrot.slane %v466_v52, 5  ;;  %v471_v63 = vrot.slane %v469_v53, 6  ;;  %v457_v0 = vshrl.u32 %v447_v49, 16  ;;  %v6341_v37 = vld [vmem:[#allocation2 + $0x24] sm:$0xf] }
  0x32   :  { %v373_v60 = vsel %vm6282_vm12, %v368_v51, %v6276_v15  ;;  %v478_v1 = vrot.slane %v476_v57, 5  ;;  %v481_v2 = vrot.slane %v479_v58, 6  ;;  %v460_v3 = vshll.u32 %v447_v49, 16  ;;  %v117_v38 = vld [vmem:[#allocation2 + $0x20] sm:$0xf] }
  0x33   :  { %v494_v4 = vshrl.u32 %v451_v54, 16  ;;  %v6319_v7 = vor.u32 %v471_v63, %v468_v62  ;;  %v459_v8 = vrot.slane %v457_v0, 5  ;;  %v497_v9 = vshll.u32 %v451_v54, 16  ;;  %v116_v43 = vld [vmem:[#allocation2 + $0x1c] sm:$0xc] }
  0x34   :  { %v504_v10 = vshrl.u32 %v452_v59, 16  ;;  %v427_v12 = vrot.slane %v425_v47, 4  ;;  %v462_v13 = vrot.slane %v460_v3, 6  ;;  %v507_v15 = vshll.u32 %v452_v59, 16  ;;  %v114_v44 = vld [vmem:[#allocation2 + $0x8] sm:$0xf] }
  0x35   :  { %386 = vrot.lane.b32.xlu1 %v359_v45, %s6064_s12  ;;  %384 = vrot.lane.b32.xlu0 %v349_v50, %s6064_s12  ;;  %v496_v14 = vrot.slane %v494_v4, 5  ;;  %v5522_v16 = vrot.slane %v404_v61, 9  ;;  %v499_v17 = vrot.slane %v497_v9, 6  ;;  %v485_v19 = vshrl.u32 %v450_v6, 16  ;;  %v113_v52 = vld [vmem:[#allocation2 + $0x4] sm:$0xc] }
  0x36   :  { %v506_v18 = vrot.slane %v504_v10, 5  ;;  %v463_v20 = vor.u32 %v462_v13, %v459_v8  ;;  %v509_v21 = vrot.slane %v507_v15, 6  ;;  %v488_v22 = vshll.u32 %v450_v6, 16  ;;  %v115_v59 = vld [vmem:[#allocation2 + $0xc] sm:$0x7] }
  0x37   :  { %v546_v24 = vrot.slane %v6321_v11, 6  ;;  %v474_v26 = vrot.slane %v6319_v7, 4  ;;  %v482_v27 = vor.u32 %v481_v2, %v478_v1  ;;  %v6331_v28 = vor.u32 %v499_v17, %v496_v14  ;;  %v534_v2 = vld [vmem:[#allocation2 + $0x28] sm:$0x3]  ;;  %v532_v13 = vld [vmem:[#allocation2 + $0x20] sm:$0xc] }
  0x38   :  { %v487_v29 = vrot.slane %v485_v19, 5  ;;  %v464_v33 = vrot.slane %v463_v20, 4  ;;  %v490_v35 = vrot.slane %v488_v22, 6  ;;  %v510_v40 = vor.u32 %v509_v21, %v506_v18  ;;  %v5956_v18 = vld [vmem:[%s8208_s5 + $0x8] sm:$0xff]  }
  0x39   :  { %390 = vrot.lane.b32.xlu1 %v383_v55, %s6064_s12  ;;  %388 = vrot.lane.b32.xlu0 %v373_v60, %s6064_s12  ;;  %v502_v39 = vrot.slane %v6331_v28, 4  ;;  %v549_v42 = vrot.slane %v6327_v23, 6  ;;  %v429_v45 = vsel %vm6291_vm13, %v427_v12, %v428_v48  ;;  %v6352_v50 = vrot.slane %v546_v24, 4  ;;  %v118_v48 = vld [vmem:[#allocation2 + $0x24] sm:$0x7] }
  0x3a   :  { %v491_v49 = vor.u32 %v490_v35, %v487_v29  ;;  %v5523_v51 = vrot.slane %v6333_v31, 10  ;;  %v426_v53 = vsel %vm6291_vm13, %v5522_v16, %v425_v47  ;;  %v553_v36 = vrot.slane %v6341_v37, 6  ;;  %5807 = vmatprep.subr.bf16.mxu0 %v5956_v18 }
  0x3b   :  { %v160_v54 = vshrl.u32 %v117_v38, 16  ;;  %v473_v55 = vsel %vm6337_vm4, %v464_v33, %v6319_v7  ;;  %v163_v57 = vshll.u32 %v117_v38, 16  ;;  %v151_v58 = vshrl.u32 %v116_v43, 16  ;;  %5808 = vmatpush3.bf16.msra.mxu0 %v5956_v18 }
  0x3c   :  { %v511_v30 = vsel %vm6337_vm4, %v502_v39, %v510_v40  ;;  %v154_v47 = vshll.u32 %v116_v43, 16  ;;  %v132_v61 = vshrl.u32 %v114_v44, 16  ;;  %v135_v1 = vshll.u32 %v114_v44, 16 }
  0x3d   :  { %432 = vrot.lane.b32.xlu1 %v6303_v46, %s6065_s1  ;;  %430 = vrot.lane.b32.xlu0 %v419_v56, %s6065_s1  ;;  %v483_v46 = vsel %vm6337_vm4, %v474_v26, %v482_v27  ;;  %v492_v56 = vrot.slane %v491_v49, 4  ;;  %v162_v60 = vrot.slane %v160_v54, 6  ;;  %v165_v63 = vrot.slane %v163_v57, 7  ;;  %v5957_v49 = vld [vmem:[%s8208_s5] sm:$0xff]  }
  0x3e   :  { %v153_v0 = vrot.slane %v151_v58, 6  ;;  %v156_v3 = vrot.slane %v154_v47, 7  ;;  %v134_v4 = vrot.slane %v132_v61, 6  ;;  %v123_v6 = vshrl.u32 %v113_v52, 16  ;;  %5809 = vmatprep.subr.bf16.mxu0 %v5957_v49 }
  0x3f   :  { %v501_v62 = vsel %vm6337_vm4, %v492_v56, %v6331_v28  ;;  %v126_v7 = vshll.u32 %v113_v52, 16  ;;  %v166_v8 = vor.u32 %v165_v63, %v162_v60  ;;  %v137_v9 = vrot.slane %v135_v1, 7  ;;  %5810 = vmatpush3.bf16.msra.mxu0 %v5957_v49 }
  0x40   :  { %v170_v10 = vshrl.u32 %v118_v48, 16  ;;  %v173_v12 = vshll.u32 %v118_v48, 16  ;;  %v157_v14 = vor.u32 %v156_v3, %v153_v0  ;;  %v125_v15 = vrot.slane %v123_v6, 6 }
  0x41   :  { %436 = vrot.lane.b32.xlu1 %v429_v45, %s6065_s1  ;;  %434 = vrot.lane.b32.xlu0 %v426_v53, %s6065_s1  ;;  %v128_v16 = vrot.slane %v126_v7, 7  ;;  %v142_v17 = vshrl.u32 %v115_v59, 16  ;;  %v138_v20 = vor.u32 %v137_v9, %v134_v4  ;;  %v168_v21 = vrot.slane %v166_v8, 4 }
  0x42   :  { %v172_v22 = vrot.slane %v170_v10, 6  ;;  %v175_v26 = vrot.slane %v173_v12, 7  ;;  %v158_v27 = vrot.slane %v157_v14, 4  ;;  %v145_v33 = vshll.u32 %v115_v59, 16 }
  0x43   :  { %v129_v28 = vor.u32 %v128_v16, %v125_v15  ;;  %v144_v29 = vrot.slane %v142_v17, 6  ;;  %v556_v38 = vrot.slane %v534_v2, 6  ;;  %v140_v44 = vrot.slane %v138_v20, 4 }
  0x44   :  { %v176_v39 = vor.u32 %v175_v26, %v172_v22  ;;  %v167_v40 = vsel %vm6377_vm8, %v158_v27, %v166_v8  ;;  %v147_v45 = vrot.slane %v145_v33, 7  ;;  %v555_v52 = vrot.slane %v553_v36, 4 }
  0x45   :  { %514 = vrot.lane.b32.xlu1 %v483_v46, %s6066_s9  ;;  %512 = vrot.lane.b32.xlu0 %v473_v55, %s6066_s9  ;;  %v130_v43 = vrot.slane %v129_v28, 4  ;;  %v5524_v53 = vrot.slane %v532_v13, 10  ;;  %184 = vst.msk [vmem:[#allocation3 + $0x8] sm:$0xf] %vm108_vm0, %v167_v40  ;;  %v550_v54 = vsel %vm6383_vm9, %v6352_v50, %v549_v42  ;;  %v547_v48 = vsel %vm6383_vm9, %v5523_v51, %v546_v24 }
  0x46   :  { %v177_v46 = vsel %vm6377_vm8, %v168_v21, %v176_v39  ;;  %v148_v56 = vor.u32 %v147_v45, %v144_v29  ;;  %v557_v11 = vsel %vm6383_vm9, %v555_v52, %v556_v38 }
  0x47   :  { %v139_v55 = vsel %vm6377_vm8, %v130_v43, %v138_v20  ;;  %185 = vst.msk [vmem:[#allocation3 + $0xc] sm:$0xf] %vm108_vm0, %v177_v46  ;;  %v554_v24 = vsel %vm6383_vm9, %v5524_v53, %v553_v36 }
  0x48   :  { %182 = vst.msk [vmem:[#allocation3] sm:$0xf] %vm108_vm0, %v139_v55  ;;  %v149_v23 = vsel %vm6377_vm8, %v140_v44, %v148_v56 }
  0x49   :  { %518 = vrot.lane.b32.xlu1 %v511_v30, %s6066_s9  ;;  %516 = vrot.lane.b32.xlu0 %v501_v62, %s6066_s9  ;;  %183 = vst.msk [vmem:[#allocation3 + $0x4] sm:$0xf] %vm108_vm0, %v149_v23 }
  0x4d   :  { %560 = vrot.lane.b32.xlu1 %v550_v54, %s6067_s6  ;;  %558 = vrot.lane.b32.xlu0 %v547_v48, %s6067_s6 }
  0x51   :  { %564 = vrot.lane.b32.xlu1 %v557_v11, %s6067_s6  ;;  %562 = vrot.lane.b32.xlu0 %v554_v24, %s6067_s6 }
  0x52   :  { %33 = vsyncpa [#allocation5], 0  ;;  %vm227_vm11 = vcmask 60448   ;;  %vm297_vm0 = vcmask 93248   ;;  %vm322_vm14 = vcmask 126048   ;;  %vm396_vm15 = vcmask 158848  }
  0x53   :  { %vm442_vm2 = vcmask 191648   ;;  %vm524_vm3 = vcmask 224448   ;;  %vm570_vm6 = vcmask 257248   ;;  %vm601_vm7 = vcmask 261120   ;;  %s8213_s11 = sld [smem:[#allocation11_spill]]  ;;  %s6068_s4 = smov 32  }
  0x54   :  { %s8214_s1 = sld [smem:[#allocation12_spill]]  ;;  %s6069_s6 = smov 40   ;;  %vm1666_vm1 = vcmask 519616   ;;  %v6004_v25 = vld [vmem:[%s8156_s21 + $0x8] sm:$0xff]   ;;  %v6036_v32 = vld [vmem:[%s8157_s22] ss:$0 sm:$0xff] }
  0x55   :  { %s8215_s30 = sld [smem:[#allocation9_spill]]  ;;  %s6070_s10 = smov 56  }
  0x56   :  { %s8216_s8 = sld [smem:[#allocation13_spill]]  ;;  %s6076_s5 = smov 96  }
  0x57   :  { %s8217_s3 = sld [smem:[#allocation14_spill]] }
  0x58   :  { %s8219_s2 = sld [smem:[#allocation10_spill]] }
  0x59   :  { %s8220_s29 = sld [smem:[#allocation15_spill]] }
  0x5a   :  { %s8231_s0 = sld [smem:[#allocation18_spill]] }
  0x8f   :  { %v313_v31 = vpop.permute.xlu1 %312  ;;  %v311_v42 = vpop.permute.xlu0 %310 }
  0x93   :  { %v220_v50 = vpop.permute.xlu1 %219  ;;  %v216_v51 = vpop.permute.xlu0 %215 }
  0x94   :  { %230 = vst.msk [vmem:[#allocation3 + $0x8] sm:$0xf] %vm227_vm11, %v220_v50  ;;  %228 = vst.msk [vmem:[#allocation3] sm:$0xf] %vm227_vm11, %v216_v51 }
  0x97   :  { %v222_v57 = vpop.permute.xlu1 %221  ;;  %v218_v58 = vpop.permute.xlu0 %217 }
  0x98   :  { %231 = vst.msk [vmem:[#allocation3 + $0xc] sm:$0xf] %vm227_vm11, %v222_v57  ;;  %229 = vst.msk [vmem:[#allocation3 + $0x4] sm:$0xf] %vm227_vm11, %v218_v58  ;;  %vm659_vm11 = vcmask 64512  }
  0x9b   :  { %v288_v37 = vpop.permute.xlu1 %287  ;;  %v286_v59 = vpop.permute.xlu0 %285 }
  0x9c   :  { %299 = vst.msk [vmem:[#allocation3 + $0x4] sm:$0xf] %vm297_vm0, %v288_v37  ;;  %298 = vst.msk [vmem:[#allocation3] sm:$0xf] %vm297_vm0, %v286_v59 }
  0x9d   :  { %323 = vst.msk [vmem:[#allocation3] sm:$0xf] %vm322_vm14, %v311_v42  ;;  %324 = vst.msk [vmem:[#allocation3 + $0x4] sm:$0xf] %vm322_vm14, %v313_v31 }
  0x9f   :  { %v292_v36 = vpop.permute.xlu1 %291  ;;  %v290_v30 = vpop.permute.xlu0 %289 }
  0xa0   :  { %301 = vst.msk [vmem:[#allocation3 + $0xc] sm:$0xf] %vm297_vm0, %v292_v36  ;;  %300 = vst.msk [vmem:[#allocation3 + $0x8] sm:$0xf] %vm297_vm0, %v290_v30  ;;  %vm726_vm0 = vcmask 130112  }
  0xa3   :  { %v317_v60 = vpop.permute.xlu1 %316  ;;  %v315_v47 = vpop.permute.xlu0 %314 }
  0xa4   :  { %326 = vst.msk [vmem:[#allocation3 + $0xc] sm:$0xf] %vm322_vm14, %v317_v60  ;;  %325 = vst.msk [vmem:[#allocation3 + $0x8] sm:$0xf] %vm322_vm14, %v315_v47  ;;  %vm804_vm14 = vcmask 60416  }
  0xa7   :  { %v387_v61 = vpop.permute.xlu1 %386  ;;  %v385_v62 = vpop.permute.xlu0 %384 }
  0xa8   :  { %398 = vst.msk [vmem:[#allocation3 + $0x4] sm:$0xf] %vm396_vm15, %v387_v61  ;;  %397 = vst.msk [vmem:[#allocation3] sm:$0xf] %vm396_vm15, %v385_v62 }
  0xab   :  { %v391_v63 = vpop.permute.xlu1 %390  ;;  %v389_v0 = vpop.permute.xlu0 %388 }
  0xac   :  { %400 = vst.msk [vmem:[#allocation3 + $0xc] sm:$0xf] %vm396_vm15, %v391_v63  ;;  %399 = vst.msk [vmem:[#allocation3 + $0x8] sm:$0xf] %vm396_vm15, %v389_v0  ;;  %vm1085_vm15 = vcmask 1043456  }
  0xaf   :  { %v433_v1 = vpop.permute.xlu1 %432  ;;  %v431_v2 = vpop.permute.xlu0 %430 }
  0xb0   :  { %444 = vst.msk [vmem:[#allocation3 + $0x4] sm:$0xf] %vm442_vm2, %v433_v1  ;;  %443 = vst.msk [vmem:[#allocation3] sm:$0xf] %vm442_vm2, %v431_v2 }
  0xb3   :  { %v437_v3 = vpop.permute.xlu1 %436  ;;  %v435_v4 = vpop.permute.xlu0 %434 }
  0xb4   :  { %446 = vst.msk [vmem:[#allocation3 + $0xc] sm:$0xf] %vm442_vm2, %v437_v3  ;;  %445 = vst.msk [vmem:[#allocation3 + $0x8] sm:$0xf] %vm442_vm2, %v435_v4  ;;  %vm905_vm2 = vcmask 126016  }
  0xb7   :  { %v515_v6 = vpop.permute.xlu1 %514  ;;  %v513_v7 = vpop.permute.xlu0 %512 }
  0xb8   :  { %526 = vst.msk [vmem:[#allocation3 + $0x4] sm:$0xf] %vm524_vm3, %v515_v6  ;;  %525 = vst.msk [vmem:[#allocation3] sm:$0xf] %vm524_vm3, %v513_v7 }
  0xbb   :  { %v519_v8 = vpop.permute.xlu1 %518  ;;  %v517_v9 = vpop.permute.xlu0 %516 }
  0xbc   :  { %528 = vst.msk [vmem:[#allocation3 + $0xc] sm:$0xf] %vm524_vm3, %v519_v8  ;;  %527 = vst.msk [vmem:[#allocation3 + $0x8] sm:$0xf] %vm524_vm3, %v517_v9  ;;  %vm930_vm3 = vcmask 191616  }
  0xbf   :  { %v561_v10 = vpop.permute.xlu1 %560  ;;  %v559_v12 = vpop.permute.xlu0 %558 }
  0xc0   :  { %572 = vst.msk [vmem:[#allocation3 + $0x4] sm:$0xf] %vm570_vm6, %v561_v10  ;;  %571 = vst.msk [vmem:[#allocation3] sm:$0xf] %vm570_vm6, %v559_v12 }
  0xc3   :  { %v565_v13 = vpop.permute.xlu1 %564  ;;  %v563_v14 = vpop.permute.xlu0 %562 }
  0xc4   :  { %574 = vst.msk [vmem:[#allocation3 + $0xc] sm:$0xf] %vm570_vm6, %v565_v13  ;;  %573 = vst.msk [vmem:[#allocation3 + $0x8] sm:$0xf] %vm570_vm6, %v563_v14  ;;  %vm1001_vm6 = vcmask 257216  }
  0xc7   :  { %v576_v15 = vld [vmem:[#allocation3 + $0x4] sm:$0xf]  ;;  %v575_v16 = vld [vmem:[#allocation3] sm:$0xf] }
  0xc8   :  { %v5525_v17 = vcombine.low %v575_v16, %v576_v15 }
  0xca   :  { %5811 = vmatprep.mubr.msk.bf16.mxu0 %vm601_vm7, %v5525_v17 }
  0xcb   :  { %v578_v18 = vld [vmem:[#allocation3 + $0xc] sm:$0xf]  ;;  %v577_v20 = vld [vmem:[#allocation3 + $0x8] sm:$0xf] }
  0xcc   :  { %v5526_v21 = vcombine.low %v577_v20, %v578_v18 }
  0xce   :  { %5812 = vmatmul.mubr.msk.bf16.vlgmr.msra.gmra.mxu0 %vm601_vm7, %v5526_v21  ;;  %vm1044_vm7 = vcmask 322816  }
 0x18e   :  { %v5813_v22 = vpop.f32.mrf.mxu0 }
 0x18f   :  { %v663_v44 = vsel %vm659_vm11, %v5813_v22, 0.0  ;;  %v730_v45 = vsel %vm726_vm0, %v5813_v22, 0.0 }
 0x190   :  { %v642_v26 = vpop.f32.mrf.mxu0 }
 0x191   :  { %v660_v29 = vsel %vm659_vm11, %v642_v26, 0.0  ;;  %v727_v33 = vsel %vm726_vm0, %v642_v26, 0.0 }
 0x192   :  { %v5814_v27 = vpop.f32.mrf.mxu0 }
 0x193   :  { %v665_v53 = vsel %vm659_vm11, %v5814_v27, 0.0  ;;  %v732_v46 = vsel %vm726_vm0, %v5814_v27, 0.0 }
 0x194   :  { %v645_v28 = vpop.f32.mrf.mxu0 }
 0x195   :  { %v661_v38 = vsel %vm659_vm11, %v645_v28, 0.0  ;;  %v728_v39 = vsel %vm726_vm0, %v645_v28, 0.0 }
 0x196   :  { %v662_v40 = vadd.f32 %v661_v38, %v660_v29  ;;  %v729_v43 = vadd.f32 %v728_v39, %v727_v33 }
 0x198   :  { %v664_v49 = vadd.f32 %v663_v44, %v662_v40  ;;  %v731_v52 = vadd.f32 %v730_v45, %v729_v43 }
 0x19a   :  { %v666_v54 = vadd.f32 %v665_v53, %v664_v49  ;;  %v733_v48 = vadd.f32 %v732_v46, %v731_v52 }
 0x19c   :  { %v667_v55 = vrot.slane %v666_v54, 4  ;;  %v734_v56 = vrot.slane %v733_v48, 4 }
 0x19e   :  { %v668_v23 = vadd.f32 %v667_v55, %v666_v54  ;;  %v735_v11 = vadd.f32 %v734_v56, %v733_v48 }
 0x1a0   :  { %v669_v24 = vrot.slane %v668_v23, 2  ;;  %v736_v31 = vrot.slane %v735_v11, 2 }
 0x1a2   :  { %v670_v42 = vadd.f32 %v669_v24, %v668_v23  ;;  %v737_v50 = vadd.f32 %v736_v31, %v735_v11  ;;  %v5531_v24 = vld [vmem:[%s8213_s11] ss:$0 sm:$0xff] }
 0x1a4   :  { %v671_v51 = vrot.slane %v670_v42, 1  ;;  %v738_v57 = vrot.slane %v737_v50, 1 }
 0x1a6   :  { %v672_v58 = vadd.f32 %v671_v51, %v670_v42  ;;  %v739_v37 = vadd.f32 %v738_v57, %v737_v50 }
 0x1a8   :  { %v673_v59 = vmul.f32 0.03125, %v672_v58  ;;  %v740_v36 = vmul.f32 0.03125, %v739_v37  ;;  %v5532_v58 = vld [vmem:[%s8214_s1] ss:$0 sm:$0xff] }
 0x1aa   :  { %v674_v30 = vsub.f32 %v642_v26, %v673_v59  ;;  %v675_v60 = vsub.f32 %v645_v28, %v673_v59  ;;  %v676_v47 = vsub.f32 %v5813_v22, %v673_v59  ;;  %v677_v61 = vsub.f32 %v5814_v27, %v673_v59 }
 0x1ab   :  { %v741_v62 = vsub.f32 %v642_v26, %v740_v36  ;;  %v742_v63 = vsub.f32 %v645_v28, %v740_v36  ;;  %v743_v0 = vsub.f32 %v5813_v22, %v740_v36  ;;  %v744_v1 = vsub.f32 %v5814_v27, %v740_v36 }
 0x1ac   :  { %v678_v2 = vmul.f32 %v674_v30, %v674_v30  ;;  %v679_v3 = vmul.f32 %v675_v60, %v675_v60  ;;  %v680_v4 = vmul.f32 %v676_v47, %v676_v47  ;;  %v681_v9 = vmul.f32 %v677_v61, %v677_v61 }
 0x1ad   :  { %v745_v6 = vmul.f32 %v741_v62, %v741_v62  ;;  %v746_v7 = vmul.f32 %v742_v63, %v742_v63  ;;  %v747_v8 = vmul.f32 %v743_v0, %v743_v0  ;;  %v748_v14 = vmul.f32 %v744_v1, %v744_v1 }
 0x1ae   :  { %v682_v10 = vsel %vm659_vm11, %v678_v2, 0.0  ;;  %v683_v12 = vsel %vm659_vm11, %v679_v3, 0.0  ;;  %v685_v17 = vsel %vm659_vm11, %v680_v4, 0.0  ;;  %v687_v22 = vsel %vm659_vm11, %v681_v9, 0.0 }
 0x1af   :  { %v684_v13 = vadd.f32 %v683_v12, %v682_v10  ;;  %v749_v15 = vsel %vm726_vm0, %v745_v6, 0.0  ;;  %v750_v16 = vsel %vm726_vm0, %v746_v7, 0.0  ;;  %v752_v21 = vsel %vm726_vm0, %v747_v8, 0.0 }
 0x1b0   :  { %v751_v18 = vadd.f32 %v750_v16, %v749_v15  ;;  %v754_v28 = vsel %vm726_vm0, %v748_v14, 0.0  ;;  %v846_v14 = vld [vmem:[#allocation2 + $0x1c] sm:$0x8]  ;;  %v1008_v15 = vld [vmem:[#allocation2 + $0x10] sm:$0x1]  ;;  %vm1078_vm0 = vcmask 326656  }
 0x1b1   :  { %v686_v20 = vadd.f32 %v685_v17, %v684_v13  ;;  %v872_v17 = vshrl.u32 %v846_v14, 16  ;;  %v940_v14 = vld [vmem:[#allocation2 + $0x28] sm:$0x1] }
 0x1b2   :  { %v753_v26 = vadd.f32 %v752_v21, %v751_v18  ;;  %v1023_v18 = vrot.slane %v1008_v15, 5 }
 0x1b3   :  { %v688_v27 = vadd.f32 %v687_v22, %v686_v20 }
 0x1b4   :  { %v755_v29 = vadd.f32 %v754_v28, %v753_v26  ;;  %v6459_v26 = vrot.slane %v872_v17, 11 }
 0x1b5   :  { %v689_v33 = vrot.slane %v688_v27, 4 }
 0x1b6   :  { %v756_v38 = vrot.slane %v755_v29, 4 }
 0x1b7   :  { %v690_v39 = vadd.f32 %v689_v33, %v688_v27 }
 0x1b8   :  { %v757_v40 = vadd.f32 %v756_v38, %v755_v29  ;;  %v937_v29 = vld [vmem:[#allocation2 + $0x10] sm:$0x1] }
 0x1b9   :  { %v691_v43 = vrot.slane %v690_v39, 2 }
 0x1ba   :  { %v758_v44 = vrot.slane %v757_v40, 2 }
 0x1bb   :  { %v692_v45 = vadd.f32 %v691_v43, %v690_v39 }
 0x1bc   :  { %v759_v49 = vadd.f32 %v758_v44, %v757_v40 }
 0x1bd   :  { %v693_v52 = vrot.slane %v692_v45, 1 }
 0x1be   :  { %v760_v53 = vrot.slane %v759_v49, 1 }
 0x1bf   :  { %v694_v46 = vadd.f32 %v693_v52, %v692_v45 }
 0x1c0   :  { %v761_v54 = vadd.f32 %v760_v53, %v759_v49 }
 0x1c1   :  { %v695_v48 = vmul.f32 0.03125, %v694_v46 }
 0x1c2   :  { %v762_v55 = vmul.f32 0.03125, %v761_v54 }
 0x1c3   :  { %v696_v56 = vadd.f32 1e-05, %v695_v48 }
 0x1c4   :  { %v763_v23 = vadd.f32 1e-05, %v762_v55  ;;  %v961_v55 = vshll.u32 %v937_v29, 16 }
 0x1c5   :  { %6008 = vrsqrt.f32 %v696_v56 }
 0x1c6   :  { %6010 = vrsqrt.f32 %v763_v23 }
 0x1d2   :  { %v6009_v11 = vpop.eup %6008 }
 0x1d3   :  { %v6011_v31 = vpop.eup %6010  ;;  %v698_v42 = vmul.f32 %v6009_v11, %v674_v30  ;;  %v699_v50 = vmul.f32 %v6009_v11, %v675_v60  ;;  %v700_v51 = vmul.f32 %v6009_v11, %v676_v47  ;;  %v701_v57 = vmul.f32 %v6009_v11, %v677_v61 }
 0x1d4   :  { %v6445_v37 = vmul.f32 %v6011_v31, %v742_v63  ;;  %v6447_v59 = vmul.f32 %v6011_v31, %v741_v62  ;;  %v6449_v36 = vmul.f32 %v6011_v31, %v744_v1  ;;  %v6451_v2 = vmul.f32 %v6011_v31, %v743_v0  ;;  %v843_v0 = vld [vmem:[#allocation2 + $0x4] sm:$0x8] }
 0x1d5   :  { %v708_v3 = vmul.f32 %v5531_v24, %v698_v42  ;;  %v709_v4 = vmul.f32 %v5531_v24, %v699_v50  ;;  %v710_v6 = vmul.f32 %v5531_v24, %v700_v51  ;;  %v711_v7 = vmul.f32 %v5531_v24, %v701_v57 }
 0x1d6   :  { %v850_v16 = vshrl.u32 %v843_v0, 16 }
 0x1d7   :  { %v718_v30 = vadd.f32 %v5532_v58, %v708_v3  ;;  %v719_v60 = vadd.f32 %v5532_v58, %v709_v4  ;;  %v720_v47 = vadd.f32 %v5532_v58, %v710_v6  ;;  %v721_v61 = vadd.f32 %v5532_v58, %v711_v7 }
 0x1d8   :  { %v6457_v22 = vrot.slane %v850_v16, 11  ;;  %v809_v16 = vld [vmem:[#allocation2 + $0x4] sm:$0x8] }
 0x1d9   :  { %v722_v8 = vmax.f32 %v718_v30, 0.0  ;;  %v723_v9 = vmax.f32 %v719_v60, 0.0  ;;  %v724_v10 = vmax.f32 %v720_v47, 0.0  ;;  %v725_v12 = vmax.f32 %v721_v61, 0.0 }
 0x1db   :  { %v5710_v63 = vpack.c.bf16 %v722_v8, %v722_v8  ;;  %v5711_v62 = vpack.c.bf16 %v723_v9, %v723_v9  ;;  %v5712_v13 = vpack.c.bf16 %v724_v10, %v724_v10  ;;  %v5713_v1 = vpack.c.bf16 %v725_v12, %v725_v12 }
 0x1dd   :  { %806 = vst.msk [vmem:[#allocation2 + $0xc] sm:$0xf] %vm804_vm14, %v5711_v62  ;;  %805 = vst.msk [vmem:[#allocation2 + $0x8] sm:$0xf] %vm804_vm14, %v5710_v63 }
 0x1de   :  { %807 = vst.msk [vmem:[#allocation2 + $0x20] sm:$0xf] %vm804_vm14, %v5712_v13  ;;  %808 = vst.msk [vmem:[#allocation2 + $0x24] sm:$0xf] %vm804_vm14, %v5713_v1 }
 0x1e4   :  { %v911_v20 = vld [vmem:[#allocation2 + $0xc] sm:$0xf]  ;;  %v910_v21 = vld [vmem:[#allocation2 + $0x8] sm:$0xf] }
 0x1e5   :  { %920 = vrot.lane.b32.xlu1 %v911_v20, %s6064_s12  ;;  %918 = vrot.lane.b32.xlu0 %v910_v21, %s6064_s12  ;;  %v1007_v27 = vld [vmem:[#allocation2 + $0xc] sm:$0xf]  ;;  %v1006_v28 = vld [vmem:[#allocation2 + $0x8] sm:$0xe]  ;;  %v913_v33 = vld [vmem:[#allocation2 + $0x24] sm:$0xf] }
 0x1e6   :  { %v1020_v38 = vrot.slane %v1007_v27, 5  ;;  %v5541_v39 = vrot.slane %v1006_v28, 9  ;;  %v844_v40 = vld [vmem:[#allocation2 + $0x8] sm:$0xf]  ;;  %v845_v43 = vld [vmem:[#allocation2 + $0xc] sm:$0xf] }
 0x1e7   :  { %v912_v44 = vld [vmem:[#allocation2 + $0x20] sm:$0xf]  ;;  %v855_v45 = vshrl.u32 %v844_v40, 16  ;;  %v864_v49 = vshrl.u32 %v845_v43, 16  ;;  %v867_v46 = vshll.u32 %v845_v43, 16  ;;  %v858_v11 = vshll.u32 %v844_v40, 16 }
 0x1e8   :  { %v847_v52 = vld [vmem:[#allocation2 + $0x20] sm:$0xf]  ;;  %v1022_v53 = vrot.slane %v1020_v38, 4  ;;  %v848_v54 = vld [vmem:[#allocation2 + $0x24] sm:$0xf]  ;;  %v1021_v42 = vsel %vm6291_vm13, %v5541_v39, %v1020_v38 }
 0x1e9   :  { %v877_v48 = vshrl.u32 %v847_v52, 16  ;;  %924 = vrot.lane.b32.xlu1 %v913_v33, %s6064_s12  ;;  %922 = vrot.lane.b32.xlu0 %v912_v44, %s6064_s12  ;;  %v857_v56 = vrot.slane %v855_v45, 7  ;;  %v866_v23 = vrot.slane %v864_v49, 7  ;;  %v886_v24 = vshrl.u32 %v848_v54, 16  ;;  %v936_v31 = vld [vmem:[#allocation2 + $0xc] sm:$0xf] }
 0x1ea   :  { %v951_v51 = vshll.u32 %v936_v31, 16  ;;  %v955_v57 = vshrl.u32 %v936_v31, 16  ;;  %v935_v58 = vld [vmem:[#allocation2 + $0x8] sm:$0xf]  ;;  %v880_v7 = vshll.u32 %v847_v52, 16  ;;  %v1024_v60 = vsel %vm6291_vm13, %v1022_v53, %v1023_v18 }
 0x1eb   :  { %v879_v50 = vrot.slane %v877_v48, 7  ;;  %v862_v3 = vrot.slane %v857_v56, 4  ;;  %v869_v4 = vor.u32 %v867_v46, %v866_v23  ;;  %v860_v6 = vor.u32 %v858_v11, %v857_v56  ;;  %v939_v30 = vld [vmem:[#allocation2 + $0x24] sm:$0xf]  ;;  %v938_v9 = vld [vmem:[#allocation2 + $0x20] sm:$0xf] }
 0x1ec   :  { %v888_v47 = vrot.slane %v886_v24, 7  ;;  %v6469_v61 = vrot.slane %v951_v51, 5  ;;  %v957_v8 = vrot.slane %v955_v57, 4  ;;  %v889_v12 = vshll.u32 %v848_v54, 16  ;;  %v812_v27 = vld [vmem:[#allocation2 + $0x1c] sm:$0x8] }
 0x1ed   :  { %1034 = vrot.lane.b32.xlu1 %v1024_v60, %s6068_s4  ;;  %1032 = vrot.lane.b32.xlu0 %v1021_v42, %s6068_s4  ;;  %v884_v10 = vrot.slane %v879_v50, 4  ;;  %v882_v63 = vor.u32 %v880_v7, %v879_v50  ;;  %v942_v62 = vshrl.u32 %v935_v58, 16  ;;  %v870_v13 = vsel %vm6259_vm10, %v862_v3, %v869_v4  ;;  %v810_v39 = vld [vmem:[#allocation2 + $0x8] sm:$0xf]  ;;  %v813_v45 = vld [vmem:[#allocation2 + $0x20] sm:$0xf] }
 0x1ee   :  { %v861_v1 = vsel %vm6259_vm10, %v6457_v22, %v860_v6  ;;  %v945_v0 = vshll.u32 %v935_v58, 16  ;;  %v975_v15 = vshll.u32 %v939_v30, 16  ;;  %v958_v17 = vor.u32 %v957_v8, %v6469_v61  ;;  %v811_v46 = vld [vmem:[#allocation2 + $0xc] sm:$0x7]  ;;  %v814_v24 = vld [vmem:[#allocation2 + $0x24] sm:$0x7] }
 0x1ef   :  { %v944_v18 = vrot.slane %v942_v62, 4  ;;  %v979_v20 = vshrl.u32 %v939_v30, 16  ;;  %v966_v21 = vshrl.u32 %v938_v9, 16  ;;  %v891_v28 = vor.u32 %v889_v12, %v888_v47  ;;  %v1010_v50 = vld [vmem:[#allocation2 + $0x24] sm:$0xf] }
 0x1f0   :  { %v947_v29 = vrot.slane %v945_v0, 5  ;;  %v977_v33 = vrot.slane %v975_v15, 5  ;;  %v969_v38 = vshll.u32 %v938_v9, 16  ;;  %v963_v22 = vrot.slane %v961_v55, 5  ;;  %v5958_v3 = vld [vmem:[%s8215_s30 + $0x10] ss:$0 sps:$4 sm:$0xff]  }
 0x1f1   :  { %895 = vrot.lane.b32.xlu1 %v870_v13, %s6063_s7  ;;  %893 = vrot.lane.b32.xlu0 %v861_v1, %s6063_s7  ;;  %v981_v40 = vrot.slane %v979_v20, 4  ;;  %v968_v43 = vrot.slane %v966_v21, 4  ;;  %v5537_v44 = vrot.slane %v809_v16, 11  ;;  %v985_v52 = vshll.u32 %v940_v14, 16  ;;  %v1009_v13 = vld [vmem:[#allocation2 + $0x20] sm:$0xe] }
 0x1f2   :  { %v948_v49 = vor.u32 %v947_v29, %v944_v18  ;;  %v971_v53 = vrot.slane %v969_v38, 5  ;;  %v5538_v54 = vrot.slane %v812_v27, 11  ;;  %v883_v48 = vsel %vm6259_vm10, %v6459_v26, %v882_v63  ;;  %v1011_v63 = vld [vmem:[#allocation2 + $0x28] sm:$0x1]  ;;  %5937 = vmatprep.subr.msk.bf16.mxu1 %vm1085_vm15, %v5958_v3  ;;  %v5960_v18 = vld [vmem:[%s8215_s30] sm:$0xff]  }
 0x1f3   :  { %v959_v56 = vrot.slane %v958_v17, 4  ;;  %v982_v23 = vor.u32 %v981_v40, %v977_v33  ;;  %v823_v11 = vrot.slane %v810_v39, 7  ;;  %v892_v55 = vsel %vm6259_vm10, %v884_v10, %v891_v28 }
 0x1f4   :  { %v949_v31 = vrot.slane %v948_v49, 4  ;;  %v972_v42 = vor.u32 %v971_v53, %v968_v43  ;;  %v830_v51 = vrot.slane %v813_v45, 7  ;;  %v826_v57 = vrot.slane %v811_v46, 7 }
 0x1f5   :  { %899 = vrot.lane.b32.xlu1 %v892_v55, %s6063_s7  ;;  %897 = vrot.lane.b32.xlu0 %v883_v48, %s6063_s7  ;;  %v825_v58 = vrot.slane %v823_v11, 4  ;;  %v824_v26 = vsel %vm6243_vm5, %v5537_v44, %v823_v11  ;;  %v987_v4 = vrot.slane %v985_v52, 5  ;;  %v833_v7 = vrot.slane %v814_v24, 7 }
 0x1f6   :  { %839 = vst.msk [vmem:[#allocation3] sm:$0xf] %vm804_vm14, %v824_v26  ;;  %v832_v6 = vrot.slane %v830_v51, 4  ;;  %v831_v30 = vsel %vm6243_vm5, %v5538_v54, %v830_v51  ;;  %v964_v60 = vsel %vm6282_vm12, %v959_v56, %v963_v22  ;;  %v983_v47 = vrot.slane %v982_v23, 4 }
 0x1f7   :  { %v1027_v8 = vrot.slane %v1010_v50, 5  ;;  %v827_v9 = vsel %vm6243_vm5, %v825_v58, %v826_v57  ;;  %841 = vst.msk [vmem:[#allocation3 + $0x8] sm:$0xf] %vm804_vm14, %v831_v30  ;;  %v954_v10 = vsel %vm6282_vm12, %v949_v31, %v6469_v61  ;;  %v973_v12 = vrot.slane %v972_v42, 4  ;;  %v5959_v61 = vld [vmem:[%s8215_s30 + $0x8] sm:$0xff]   ;;  %s6071_s30 = smov 48  }
 0x1f8   :  { %840 = vst.msk [vmem:[#allocation3 + $0x4] sm:$0xf] %vm804_vm14, %v827_v9  ;;  %v834_v62 = vsel %vm6243_vm5, %v832_v6, %v833_v7  ;;  %v1087_v1 = vsel %vm1085_vm15, %v5958_v3, 0  ;;  %v1030_v0 = vrot.slane %v1011_v63, 5  ;;  %v988_v14 = vsel %vm6282_vm12, %v983_v47, %v987_v4 }
 0x1f9   :  { %991 = vrot.lane.b32.xlu1 %v964_v60, %s6066_s9  ;;  %989 = vrot.lane.b32.xlu0 %v954_v10, %s6066_s9  ;;  %842 = vst.msk [vmem:[#allocation3 + $0xc] sm:$0xf] %vm804_vm14, %v834_v62  ;;  %v978_v15 = vsel %vm6282_vm12, %v973_v12, %v977_v33  ;;  %v1029_v16 = vrot.slane %v1027_v8, 4  ;;  %v5542_v17 = vrot.slane %v1009_v13, 9  ;;  %vm8174_vm15 = vcmask 388416  }
 0x1fa   :  { %5816 = vmatpush3.bf16.msra.mxu1 %v1087_v1 }
 0x1fb   :  { %5817 = vmatprep.subr.bf16.mxu1 %v5959_v61  ;;  %v1031_v20 = vsel %vm6291_vm13, %v1029_v16, %v1030_v0  ;;  %v1028_v21 = vsel %vm6291_vm13, %v5542_v17, %v1027_v8 }
 0x1fd   :  { %995 = vrot.lane.b32.xlu1 %v988_v14, %s6066_s9  ;;  %993 = vrot.lane.b32.xlu0 %v978_v15, %s6066_s9 }
 0x1fe   :  { %5818 = vmatpush3.bf16.msra.mxu1 %v5959_v61 }
 0x1ff   :  { %5819 = vmatprep.subr.bf16.mxu1 %v5960_v18 }
 0x201   :  { %1038 = vrot.lane.b32.xlu1 %v1031_v20, %s6068_s4  ;;  %1036 = vrot.lane.b32.xlu0 %v1028_v21, %s6068_s4 }
 0x202   :  { %5820 = vmatpush3.bf16.msra.mxu1 %v5960_v18 }
 0x257   :  { %v921_v27 = vpop.permute.xlu1 %920  ;;  %v919_v28 = vpop.permute.xlu0 %918 }
 0x25b   :  { %v925_v29 = vpop.permute.xlu1 %924  ;;  %v923_v33 = vpop.permute.xlu0 %922 }
 0x25f   :  { %v1035_v38 = vpop.permute.xlu1 %1034  ;;  %v1033_v39 = vpop.permute.xlu0 %1032 }
 0x263   :  { %v896_v22 = vpop.permute.xlu1 %895  ;;  %v894_v40 = vpop.permute.xlu0 %893 }
 0x264   :  { %907 = vst.msk [vmem:[#allocation3 + $0x4] sm:$0xf] %vm905_vm2, %v896_v22  ;;  %906 = vst.msk [vmem:[#allocation3] sm:$0xf] %vm905_vm2, %v894_v40 }
 0x265   :  { %932 = vst.msk [vmem:[#allocation3 + $0x4] sm:$0xf] %vm930_vm3, %v921_v27  ;;  %931 = vst.msk [vmem:[#allocation3] sm:$0xf] %vm930_vm3, %v919_v28 }
 0x267   :  { %v900_v43 = vpop.permute.xlu1 %899  ;;  %v898_v44 = vpop.permute.xlu0 %897 }
 0x268   :  { %909 = vst.msk [vmem:[#allocation3 + $0xc] sm:$0xf] %vm905_vm2, %v900_v43  ;;  %908 = vst.msk [vmem:[#allocation3 + $0x8] sm:$0xf] %vm905_vm2, %v898_v44 }
 0x269   :  { %933 = vst.msk [vmem:[#allocation3 + $0x8] sm:$0xf] %vm930_vm3, %v923_v33  ;;  %934 = vst.msk [vmem:[#allocation3 + $0xc] sm:$0xf] %vm930_vm3, %v925_v29 }
 0x26b   :  { %v992_v45 = vpop.permute.xlu1 %991  ;;  %v990_v49 = vpop.permute.xlu0 %989 }
 0x26c   :  { %1003 = vst.msk [vmem:[#allocation3 + $0x4] sm:$0xf] %vm1001_vm6, %v992_v45  ;;  %1002 = vst.msk [vmem:[#allocation3] sm:$0xf] %vm1001_vm6, %v990_v49  ;;  %v5550_v49 = vld [vmem:[%s8216_s8] ss:$0 sm:$0xff] }
 0x26d   :  { %1046 = vst.msk [vmem:[#allocation3 + $0x4] sm:$0xf] %vm1044_vm7, %v1035_v38  ;;  %1045 = vst.msk [vmem:[#allocation3] sm:$0xf] %vm1044_vm7, %v1033_v39  ;;  %s8239_s8 = sld [smem:[#allocation19_spill]] }
 0x26f   :  { %v996_v52 = vpop.permute.xlu1 %995  ;;  %v994_v53 = vpop.permute.xlu0 %993 }
 0x270   :  { %1005 = vst.msk [vmem:[#allocation3 + $0xc] sm:$0xf] %vm1001_vm6, %v996_v52  ;;  %1004 = vst.msk [vmem:[#allocation3 + $0x8] sm:$0xf] %vm1001_vm6, %v994_v53 }
 0x273   :  { %v1039_v46 = vpop.permute.xlu1 %1038  ;;  %v1037_v54 = vpop.permute.xlu0 %1036 }
 0x274   :  { %v1050_v48 = vld [vmem:[#allocation3 + $0x4] sm:$0xf]  ;;  %v1049_v56 = vld [vmem:[#allocation3] sm:$0xf]  ;;  %1048 = vst.msk [vmem:[#allocation3 + $0xc] sm:$0xf] %vm1044_vm7, %v1039_v46 }
 0x275   :  { %1047 = vst.msk [vmem:[#allocation3 + $0x8] sm:$0xf] %vm1044_vm7, %v1037_v54  ;;  %v5543_v23 = vcombine.low %v1049_v56, %v1050_v48  ;;  %v5551_v48 = vld [vmem:[%s8217_s3] ss:$0 sm:$0xff]  ;;  %s6072_s3 = smov 120  }
 0x277   :  { %5821 = vmatprep.mubr.msk.bf16.mxu1 %vm1078_vm0, %v5543_v23 }
 0x27b   :  { %v1052_v11 = vld [vmem:[#allocation3 + $0xc] sm:$0xf] }
 0x27c   :  { %v1051_v24 = vld [vmem:[#allocation3 + $0x8] sm:$0xf] }
 0x27d   :  { %v5544_v55 = vcombine.low %v1051_v24, %v1052_v11 }
 0x27f   :  { %5822 = vmatmul.mubr.msk.bf16.vlgmr.msra.gmra.mxu1 %vm1078_vm0, %v5544_v55  ;;  %vm1623_vm0 = vcmask 454016  }
 0x33f   :  { %v5823_v31 = vpop.f32.mrf.mxu1 }
 0x340   :  { %v1143_v3 = vsel %vm659_vm11, %v5823_v31, 0.0 }
 0x341   :  { %v1123_v42 = vpop.f32.mrf.mxu1 }
 0x342   :  { %v1140_v57 = vsel %vm659_vm11, %v1123_v42, 0.0 }
 0x343   :  { %v5824_v50 = vpop.f32.mrf.mxu1 }
 0x344   :  { %v1145_v6 = vsel %vm659_vm11, %v5824_v50, 0.0 }
 0x345   :  { %v1126_v51 = vpop.f32.mrf.mxu1 }
 0x346   :  { %v1141_v58 = vsel %vm659_vm11, %v1126_v51, 0.0 }
 0x347   :  { %v1142_v26 = vadd.f32 %v1141_v58, %v1140_v57 }
 0x349   :  { %v1144_v4 = vadd.f32 %v1143_v3, %v1142_v26 }
 0x34b   :  { %v1146_v7 = vadd.f32 %v1145_v6, %v1144_v4 }
 0x34d   :  { %v1147_v30 = vrot.slane %v1146_v7, 4 }
 0x34f   :  { %v1148_v60 = vadd.f32 %v1147_v30, %v1146_v7  ;;  %v1346_v30 = vld [vmem:[#allocation2 + $0x4] sm:$0x8] }
 0x351   :  { %v1149_v47 = vrot.slane %v1148_v60, 2 }
 0x353   :  { %v1150_v8 = vadd.f32 %v1149_v47, %v1148_v60  ;;  %v1304_v60 = vld [vmem:[#allocation2 + $0x4] sm:$0x8]  ;;  %v1349_v47 = vld [vmem:[#allocation2 + $0x1c] sm:$0x8] }
 0x355   :  { %v1151_v9 = vrot.slane %v1150_v8, 1 }
 0x357   :  { %v1152_v10 = vadd.f32 %v1151_v9, %v1150_v8  ;;  %v6562_v8 = vld [vmem:[#allocation2 + $0x1c] sm:$0x8]  ;;  %v1353_v9 = vshrl.u32 %v1346_v30, 16 }
 0x359   :  { %v1153_v12 = vmul.f32 0.03125, %v1152_v10  ;;  %v1438_v10 = vld [vmem:[#allocation2 + $0x10] sm:$0x1] }
 0x35b   :  { %v1154_v63 = vsub.f32 %v1123_v42, %v1153_v12  ;;  %v1155_v62 = vsub.f32 %v1126_v51, %v1153_v12  ;;  %v1156_v13 = vsub.f32 %v5823_v31, %v1153_v12  ;;  %v1157_v1 = vsub.f32 %v5824_v50, %v1153_v12  ;;  %v6564_v12 = vld [vmem:[#allocation2 + $0x10] sm:$0x1] }
 0x35d   :  { %v1158_v0 = vmul.f32 %v1154_v63, %v1154_v63  ;;  %v1159_v61 = vmul.f32 %v1155_v62, %v1155_v62  ;;  %v1160_v14 = vmul.f32 %v1156_v13, %v1156_v13  ;;  %v1161_v15 = vmul.f32 %v1157_v1, %v1157_v1 }
 0x35f   :  { %v1162_v16 = vsel %vm659_vm11, %v1158_v0, 0.0  ;;  %v1163_v17 = vsel %vm659_vm11, %v1159_v61, 0.0  ;;  %v1165_v20 = vsel %vm659_vm11, %v1160_v14, 0.0  ;;  %v1167_v27 = vsel %vm659_vm11, %v1161_v15, 0.0  ;;  %v1441_v14 = vld [vmem:[#allocation2 + $0x28] sm:$0x1] }
 0x360   :  { %v1164_v18 = vadd.f32 %v1163_v17, %v1162_v16  ;;  %v5557_v0 = vrot.slane %v6562_v8, 11  ;;  %v1462_v61 = vshll.u32 %v1438_v10, 16  ;;  %v1551_v15 = vld [vmem:[#allocation2 + $0x10] sm:$0x3]  ;;  %v1523_v16 = vrot.slane %v6564_v12, 5 }
 0x362   :  { %v1166_v21 = vadd.f32 %v1165_v20, %v1164_v18  ;;  %v6574_v20 = vrot.slane %v1353_v9, 11 }
 0x364   :  { %v1168_v28 = vadd.f32 %v1167_v27, %v1166_v21  ;;  %v1234_v21 = vld [vmem:[#allocation2 + $0x4] sm:$0xc] }
 0x366   :  { %v1169_v29 = vrot.slane %v1168_v28, 4 }
 0x368   :  { %v1170_v33 = vadd.f32 %v1169_v29, %v1168_v28  ;;  %v1237_v29 = vld [vmem:[#allocation2 + $0x1c] sm:$0xc] }
 0x36a   :  { %v1171_v38 = vrot.slane %v1170_v33, 2 }
 0x36c   :  { %v1172_v39 = vadd.f32 %v1171_v38, %v1170_v33 }
 0x36e   :  { %v1173_v22 = vrot.slane %v1172_v39, 1 }
 0x370   :  { %v1174_v40 = vadd.f32 %v1173_v22, %v1172_v39  ;;  %v1486_v39 = vshll.u32 %v1441_v14, 16  ;;  %v1575_v22 = vshrl.u32 %v1551_v15, 16 }
 0x372   :  { %v1175_v43 = vmul.f32 0.03125, %v1174_v40  ;;  %v1578_v40 = vshll.u32 %v1551_v15, 16 }
 0x374   :  { %v1176_v44 = vadd.f32 1e-05, %v1175_v43 }
 0x376   :  { %6012 = vrsqrt.f32 %v1176_v44 }
 0x383   :  { %v6013_v45 = vpop.eup %6012 }
 0x384   :  { %v1178_v52 = vmul.f32 %v6013_v45, %v1154_v63  ;;  %v1179_v53 = vmul.f32 %v6013_v45, %v1155_v62  ;;  %v1180_v46 = vmul.f32 %v6013_v45, %v1156_v13  ;;  %v1181_v54 = vmul.f32 %v6013_v45, %v1157_v1  ;;  %v6566_v63 = vld [vmem:[#allocation2 + $0x28] sm:$0x1]  ;;  %v6568_v62 = vld [vmem:[#allocation2 + $0x10] sm:$0x3] }
 0x385   :  { %v5556_v13 = vrot.slane %v1304_v60, 11  ;;  %v1375_v1 = vshrl.u32 %v1349_v47, 16  ;;  %v1530_v17 = vrot.slane %v6566_v63, 5  ;;  %v1645_v18 = vrot.slane %v6568_v62, 6 }
 0x386   :  { %v1188_v56 = vmul.f32 %v5550_v49, %v1178_v52  ;;  %v1189_v23 = vmul.f32 %v5550_v49, %v1179_v53  ;;  %v1190_v11 = vmul.f32 %v5550_v49, %v1180_v46  ;;  %v1191_v24 = vmul.f32 %v5550_v49, %v1181_v54 }
 0x387   :  { %v6578_v38 = vrot.slane %v1375_v1, 11  ;;  %v6580_v45 = vrot.slane %v1462_v61, 5  ;;  %v1241_v49 = vshrl.u32 %v1234_v21, 16  ;;  %v1244_v52 = vshll.u32 %v1234_v21, 16 }
 0x388   :  { %v1198_v55 = vadd.f32 %v5551_v48, %v1188_v56  ;;  %v1199_v31 = vadd.f32 %v5551_v48, %v1189_v23  ;;  %v1200_v42 = vadd.f32 %v5551_v48, %v1190_v11  ;;  %v1201_v50 = vadd.f32 %v5551_v48, %v1191_v24 }
 0x389   :  { %v1269_v54 = vshrl.u32 %v1237_v29, 16  ;;  %v1272_v48 = vshll.u32 %v1237_v29, 16 }
 0x38a   :  { %v1202_v51 = vmax.f32 %v1198_v55, 0.0  ;;  %v1203_v57 = vmax.f32 %v1199_v31, 0.0  ;;  %v1204_v58 = vmax.f32 %v1200_v42, 0.0  ;;  %v1205_v26 = vmax.f32 %v1201_v50, 0.0 }
 0x38b   :  { %v6584_v50 = vrot.slane %v1486_v39, 5  ;;  %v6596_v30 = vrot.slane %v1269_v54, 6  ;;  %v6598_v60 = vrot.slane %v1272_v48, 7 }
 0x38c   :  { %v5714_v3 = vpack.c.bf16 %v1202_v51, %v1202_v51  ;;  %v5715_v4 = vpack.c.bf16 %v1203_v57, %v1203_v57  ;;  %v5716_v6 = vpack.c.bf16 %v1204_v58, %v1204_v58  ;;  %v5717_v7 = vpack.c.bf16 %v1205_v26, %v1205_v26  ;;  %v6588_v58 = vld [vmem:[#allocation2 + $0x28] sm:$0x3] }
 0x38d   :  { %v6586_v57 = vrot.slane %v1575_v22, 5  ;;  %v6590_v26 = vrot.slane %v1241_v49, 6  ;;  %v1603_v15 = vshrl.u32 %v6588_v58, 16  ;;  %v1275_v49 = vor.u32 %v6598_v60, %v6596_v30 }
 0x38e   :  { %1230 = vst.msk [vmem:[#allocation2 + $0x8] sm:$0xf] %vm804_vm14, %v5714_v3  ;;  %1231 = vst.msk [vmem:[#allocation2 + $0xc] sm:$0xf] %vm804_vm14, %v5715_v4  ;;  %v6592_v3 = vrot.slane %v1244_v52, 7 }
 0x38f   :  { %1232 = vst.msk [vmem:[#allocation2 + $0x20] sm:$0xf] %vm804_vm14, %v5716_v6  ;;  %1233 = vst.msk [vmem:[#allocation2 + $0x24] sm:$0xf] %vm804_vm14, %v5717_v7 }
 0x395   :  { %v1413_v27 = vld [vmem:[#allocation2 + $0xc] sm:$0xf]  ;;  %v1412_v28 = vld [vmem:[#allocation2 + $0x8] sm:$0xf] }
 0x396   :  { %1422 = vrot.lane.b32.xlu1 %v1413_v27, %s6066_s9  ;;  %1420 = vrot.lane.b32.xlu0 %v1412_v28, %s6066_s9  ;;  %v1305_v33 = vld [vmem:[#allocation2 + $0x8] sm:$0xf]  ;;  %v1308_v44 = vld [vmem:[#allocation2 + $0x20] sm:$0xf]  ;;  %v1306_v53 = vld [vmem:[#allocation2 + $0xc] sm:$0x7] }
 0x397   :  { %v1318_v43 = vrot.slane %v1305_v33, 7  ;;  %v1507_v46 = vld [vmem:[#allocation2 + $0xc] sm:$0xf]  ;;  %v1415_v56 = vld [vmem:[#allocation2 + $0x24] sm:$0xf]  ;;  %v1325_v24 = vrot.slane %v1308_v44, 7 }
 0x398   :  { %v1414_v23 = vld [vmem:[#allocation2 + $0x20] sm:$0xf]  ;;  %v1520_v55 = vrot.slane %v1507_v46, 5  ;;  %v1506_v31 = vld [vmem:[#allocation2 + $0x8] sm:$0xe]  ;;  %v1321_v51 = vrot.slane %v1306_v53, 7 }
 0x399   :  { %v1320_v11 = vrot.slane %v1318_v43, 4  ;;  %v1510_v42 = vld [vmem:[#allocation2 + $0x24] sm:$0xf]  ;;  %v1319_v4 = vsel %vm6243_vm5, %v5556_v13, %v1318_v43  ;;  %v1509_v7 = vld [vmem:[#allocation2 + $0x20] sm:$0xe]  ;;  %v1327_v9 = vrot.slane %v1325_v24, 4  ;;  %v1326_v39 = vsel %vm6243_vm5, %v5557_v0, %v1325_v24 }
 0x39a   :  { %1426 = vrot.lane.b32.xlu1 %v1415_v56, %s6066_s9  ;;  %1424 = vrot.lane.b32.xlu0 %v1414_v23, %s6066_s9  ;;  %v1309_v6 = vld [vmem:[#allocation2 + $0x24] sm:$0x7]  ;;  %v5560_v10 = vrot.slane %v1506_v31, 9  ;;  %v1527_v1 = vrot.slane %v1510_v42, 5  ;;  %v1522_v61 = vrot.slane %v1520_v55, 4  ;;  %v6606_v13 = vrot.slane %v1578_v40, 6 }
 0x39b   :  { %v1322_v47 = vsel %vm6243_vm5, %v1320_v11, %v1321_v51  ;;  %v6604_v14 = vld [vmem:[#allocation2 + $0xc] sm:$0xf]  ;;  %v1328_v27 = vrot.slane %v1309_v6, 7  ;;  %v5561_v28 = vrot.slane %v1509_v7, 9  ;;  %v6610_v29 = vld [vmem:[#allocation2 + $0x8] sm:$0xc]  ;;  %v1247_v40 = vor.u32 %v6592_v3, %v6590_v26 }
 0x39c   :  { %v1437_v33 = vld [vmem:[#allocation2 + $0xc] sm:$0xf]  ;;  %v1347_v22 = vld [vmem:[#allocation2 + $0x8] sm:$0xf]  ;;  %v1350_v44 = vld [vmem:[#allocation2 + $0x20] sm:$0xf]  ;;  %v1521_v53 = vsel %vm6291_vm13, %v5560_v10, %v1520_v55  ;;  %v1524_v48 = vsel %vm6291_vm13, %v1522_v61, %v1523_v16 }
 0x39d   :  { %v1348_v43 = vld [vmem:[#allocation2 + $0xc] sm:$0xf]  ;;  %v1329_v52 = vsel %vm6243_vm5, %v1327_v9, %v1328_v27  ;;  %v1529_v46 = vrot.slane %v1527_v1, 4  ;;  %v1642_v8 = vrot.slane %v6604_v14, 6  ;;  %v1351_v54 = vld [vmem:[#allocation2 + $0x24] sm:$0xf]  ;;  %v1528_v55 = vsel %vm6291_vm13, %v5561_v28, %v1527_v1 }
 0x39e   :  { %1332 = vrot.lane.b32.xlu1 %v1322_v47, %s6063_s7  ;;  %1330 = vrot.lane.b32.xlu0 %v1319_v4, %s6063_s7  ;;  %v1436_v0 = vld [vmem:[#allocation2 + $0x8] sm:$0xf]  ;;  %v5562_v56 = vrot.slane %v6610_v29, 10  ;;  %v1452_v23 = vshll.u32 %v1437_v33, 16  ;;  %v1456_v11 = vshrl.u32 %v1437_v33, 16  ;;  %v1358_v31 = vshrl.u32 %v1347_v22, 16 }
 0x39f   :  { %v1440_v24 = vld [vmem:[#allocation2 + $0x24] sm:$0xf]  ;;  %v1367_v42 = vshrl.u32 %v1348_v43, 16  ;;  %v1380_v51 = vshrl.u32 %v1350_v44, 16  ;;  %v1439_v4 = vld [vmem:[#allocation2 + $0x20] sm:$0xf]  ;;  %v1531_v16 = vsel %vm6291_vm13, %v1529_v46, %v1530_v17 }
 0x3a0   :  { %v1389_v6 = vshrl.u32 %v1351_v54, 16  ;;  %v6634_v7 = vrot.slane %v1452_v23, 5  ;;  %v1458_v47 = vrot.slane %v1456_v11, 4  ;;  %v1443_v12 = vshrl.u32 %v1436_v0, 16  ;;  %v1550_v63 = vld [vmem:[#allocation2 + $0xc] sm:$0xf] }
 0x3a1   :  { %v1446_v9 = vshll.u32 %v1436_v0, 16  ;;  %v1476_v10 = vshll.u32 %v1440_v24, 16  ;;  %v1480_v61 = vshrl.u32 %v1440_v24, 16  ;;  %v1644_v1 = vrot.slane %v1642_v8, 4  ;;  %v1238_v60 = vld [vmem:[#allocation2 + $0x20] sm:$0xf] }
 0x3a2   :  { %1336 = vrot.lane.b32.xlu1 %v1329_v52, %s6063_s7  ;;  %1334 = vrot.lane.b32.xlu0 %v1326_v39, %s6063_s7  ;;  %v1370_v14 = vshll.u32 %v1348_v43, 16  ;;  %v1467_v27 = vshrl.u32 %v1439_v4, 16  ;;  %v1470_v28 = vshll.u32 %v1439_v4, 16  ;;  %v1360_v29 = vrot.slane %v1358_v31, 7 }
 0x3a3   :  { %v1369_v33 = vrot.slane %v1367_v42, 7  ;;  %v1361_v39 = vshll.u32 %v1347_v22, 16  ;;  %v1382_v52 = vrot.slane %v1380_v51, 7  ;;  %v1391_v23 = vrot.slane %v1389_v6, 7  ;;  %v1549_v42 = vld [vmem:[#allocation2 + $0x8] sm:$0xe] }
 0x3a4   :  { %v1459_v17 = vor.u32 %v1458_v47, %v6634_v7  ;;  %v1445_v46 = vrot.slane %v1443_v12, 4  ;;  %v1448_v0 = vrot.slane %v1446_v9, 5  ;;  %v1392_v11 = vshll.u32 %v1351_v54, 16 }
 0x3a5   :  { %v1383_v24 = vshll.u32 %v1350_v44, 16  ;;  %v6643_v21 = vrot.slane %v1476_v10, 5  ;;  %v1469_v43 = vrot.slane %v1467_v27, 4  ;;  %v1565_v31 = vshrl.u32 %v1550_v63, 16 }
 0x3a6   :  { %1534 = vrot.lane.b32.xlu1 %v1524_v48, %s6069_s6  ;;  %1532 = vrot.lane.b32.xlu0 %v1521_v53, %s6069_s6  ;;  %v1482_v48 = vrot.slane %v1480_v61, 4  ;;  %v1472_v53 = vrot.slane %v1470_v28, 5  ;;  %v1568_v22 = vshll.u32 %v1550_v63, 16  ;;  %v1365_v51 = vrot.slane %v1360_v29, 4 }
 0x3a7   :  { %v1372_v4 = vor.u32 %v1370_v14, %v1369_v33  ;;  %v1363_v6 = vor.u32 %v1361_v39, %v1360_v29  ;;  %v1387_v47 = vrot.slane %v1382_v52, 4  ;;  %v1394_v12 = vor.u32 %v1392_v11, %v1391_v23  ;;  %v1236_v29 = vld [vmem:[#allocation2 + $0xc] sm:$0x7]  ;;  %v1235_v33 = vld [vmem:[#allocation2 + $0x8] sm:$0xf] }
 0x3a8   :  { %v1385_v9 = vor.u32 %v1383_v24, %v1382_v52  ;;  %v6647_v54 = vrot.slane %v1459_v17, 4  ;;  %v1449_v44 = vor.u32 %v1448_v0, %v1445_v46  ;;  %v1483_v10 = vor.u32 %v1482_v48, %v6643_v21  ;;  %v1239_v11 = vld [vmem:[#allocation2 + $0x24] sm:$0x7] }
 0x3a9   :  { %v1556_v61 = vshrl.u32 %v1549_v42, 16  ;;  %v1473_v14 = vor.u32 %v1472_v53, %v1469_v43  ;;  %v1567_v27 = vrot.slane %v1565_v31, 5  ;;  %v1570_v28 = vrot.slane %v1568_v22, 6 }
 0x3aa   :  { %1538 = vrot.lane.b32.xlu1 %v1531_v16, %s6069_s6  ;;  %1536 = vrot.lane.b32.xlu0 %v1528_v55, %s6069_s6  ;;  %v1646_v16 = vsel %vm6383_vm9, %v1644_v1, %v1645_v18  ;;  %v1643_v55 = vsel %vm6383_vm9, %v5562_v56, %v1642_v8  ;;  %v1248_v62 = vrot.slane %v1247_v40, 4  ;;  %v1373_v18 = vsel %vm6259_vm10, %v1365_v51, %v1372_v4  ;;  %v1553_v1 = vld [vmem:[#allocation2 + $0x24] sm:$0xf]  ;;  %v1552_v40 = vld [vmem:[#allocation2 + $0x20] sm:$0xe] }
 0x3ab   :  { %v1364_v8 = vsel %vm6259_vm10, %v6574_v20, %v1363_v6  ;;  %v1559_v56 = vshll.u32 %v1549_v42, 16  ;;  %v1276_v39 = vrot.slane %v1275_v49, 4  ;;  %v1395_v52 = vsel %vm6259_vm10, %v1387_v47, %v1394_v12 }
 0x3ac   :  { %v1386_v26 = vsel %vm6259_vm10, %v6578_v38, %v1385_v9  ;;  %v1465_v3 = vsel %vm6282_vm12, %v6647_v54, %v6580_v45  ;;  %v1450_v20 = vrot.slane %v1449_v44, 4  ;;  %v6678_v63 = vrot.slane %v1483_v10, 4 }
 0x3ad   :  { %v1558_v23 = vrot.slane %v1556_v61, 5  ;;  %v1260_v17 = vshrl.u32 %v1236_v29, 16  ;;  %v1263_v30 = vshll.u32 %v1236_v29, 16  ;;  %v1474_v49 = vrot.slane %v1473_v14, 4 }
 0x3ae   :  { %1656 = vrot.lane.b32.xlu1 %v1646_v16, %s6070_s10  ;;  %1654 = vrot.lane.b32.xlu0 %v1643_v55, %s6070_s10  ;;  %v6682_v46 = vor.u32 %v1570_v28, %v1567_v27  ;;  %v1593_v38 = vshrl.u32 %v1553_v1, 16  ;;  %v1250_v0 = vshrl.u32 %v1235_v33, 16  ;;  %v1561_v24 = vrot.slane %v1559_v56, 6 }
 0x3af   :  { %v1596_v45 = vshll.u32 %v1553_v1, 16  ;;  %v1584_v48 = vshrl.u32 %v1552_v40, 16  ;;  %v1253_v43 = vshll.u32 %v1235_v33, 16  ;;  %v1587_v53 = vshll.u32 %v1552_v40, 16 }
 0x3b0   :  { %v1252_v31 = vrot.slane %v1250_v0, 6  ;;  %v1278_v22 = vshrl.u32 %v1238_v60, 16  ;;  %v1281_v42 = vshll.u32 %v1238_v60, 16  ;;  %v1262_v51 = vrot.slane %v1260_v17, 6  ;;  %v1632_v60 = vld [vmem:[#allocation2 + $0x24] sm:$0xf] }
 0x3b1   :  { %v1265_v4 = vrot.slane %v1263_v30, 7  ;;  %v1255_v6 = vrot.slane %v1253_v43, 7  ;;  %v1288_v47 = vshrl.u32 %v1239_v11, 16  ;;  %v1455_v12 = vsel %vm6282_vm12, %v1450_v20, %v6634_v7  ;;  %v5963_v43 = vld [vmem:[%s8219_s2 + $0x8] sm:$0xff]  }
 0x3b2   :  { %1398 = vrot.lane.b32.xlu1 %v1373_v18, %s6064_s12  ;;  %1396 = vrot.lane.b32.xlu0 %v1364_v8, %s6064_s12  ;;  %v1280_v9 = vrot.slane %v1278_v22, 6  ;;  %v1283_v54 = vrot.slane %v1281_v42, 7  ;;  %v1291_v44 = vshll.u32 %v1239_v11, 16  ;;  %v1562_v16 = vor.u32 %v1561_v24, %v1558_v23  ;;  %v1633_v24 = vld [vmem:[#allocation2 + $0x28] sm:$0x3]  ;;  %v5964_v42 = vld [vmem:[%s8219_s2] sm:$0xff]  }
 0x3b3   :  { %v1595_v55 = vrot.slane %v1593_v38, 5  ;;  %v1256_v10 = vor.u32 %v1255_v6, %v1252_v31  ;;  %v1290_v61 = vrot.slane %v1288_v47, 6  ;;  %v1598_v14 = vrot.slane %v1596_v45, 6  ;;  %v1631_v45 = vld [vmem:[#allocation2 + $0x20] sm:$0xc] }
 0x3b4   :  { %v1586_v27 = vrot.slane %v1584_v48, 5  ;;  %v1284_v28 = vor.u32 %v1283_v54, %v1280_v9  ;;  %v1293_v29 = vrot.slane %v1291_v44, 7  ;;  %v1589_v18 = vrot.slane %v1587_v53, 6  ;;  %v6032_v6 = vld [vmem:[%s8213_s11] ss:$0 sm:$0xff]  ;;  %s6073_s11 = smov 64  }
 0x3b5   :  { %v1266_v8 = vor.u32 %v1265_v4, %v1262_v51  ;;  %v1258_v56 = vrot.slane %v1256_v10, 4  ;;  %v1257_v1 = vsel %vm6377_vm8, %v1248_v62, %v1256_v10  ;;  %v1605_v20 = vrot.slane %v1603_v15, 5  ;;  %v6033_v47 = vld [vmem:[%s8214_s1] ss:$0 sm:$0xff] }
 0x3b6   :  { %1402 = vrot.lane.b32.xlu1 %v1395_v52, %s6064_s12  ;;  %1400 = vrot.lane.b32.xlu0 %v1386_v26, %s6064_s12  ;;  %1300 = vst.msk [vmem:[#allocation3] sm:$0xf] %vm804_vm14, %v1257_v1  ;;  %v1286_v7 = vrot.slane %v1284_v28, 4  ;;  %v1294_v33 = vor.u32 %v1293_v29, %v1290_v61  ;;  %v1285_v52 = vsel %vm6377_vm8, %v1276_v39, %v1284_v28  ;;  %v8218_v40 = vshll.u32 %v6588_v58, 16  ;;  %v5962_v58 = vld [vmem:[%s8219_s2 + $0x10] sm:$0xff]  }
 0x3b7   :  { %v1581_v26 = vor.u32 %v6606_v13, %v6586_v57  ;;  %v1267_v62 = vsel %vm6377_vm8, %v1258_v56, %v1266_v8  ;;  %1302 = vst.msk [vmem:[#allocation3 + $0x8] sm:$0xf] %vm804_vm14, %v1285_v52  ;;  %v1479_v39 = vsel %vm6282_vm12, %v1474_v49, %v6643_v21  ;;  %v1573_v15 = vrot.slane %v6682_v46, 4 }
 0x3b8   :  { %v1608_v57 = vrot.slane %v8218_v40, 6  ;;  %1301 = vst.msk [vmem:[#allocation3 + $0x4] sm:$0xf] %vm804_vm14, %v1267_v62  ;;  %v1295_v13 = vsel %vm6377_vm8, %v1286_v7, %v1294_v33  ;;  %v1563_v23 = vrot.slane %v1562_v16, 4  ;;  %v1599_v17 = vor.u32 %v1598_v14, %v1595_v55 }
 0x3b9   :  { %v1590_v30 = vor.u32 %v1589_v18, %v1586_v27  ;;  %1303 = vst.msk [vmem:[#allocation3 + $0xc] sm:$0xf] %vm804_vm14, %v1295_v13  ;;  %v1582_v49 = vsel %vm6337_vm4, %v1573_v15, %v1581_v26  ;;  %v1652_v48 = vrot.slane %v1633_v24, 6  ;;  %v5563_v22 = vrot.slane %v1631_v45, 10 }
 0x3ba   :  { %1492 = vrot.lane.b32.xlu1 %v1465_v3, %s6068_s4  ;;  %1490 = vrot.lane.b32.xlu0 %v1455_v12, %s6068_s4  ;;  %v1489_v3 = vsel %vm6282_vm12, %v6678_v63, %v6584_v50  ;;  %v5961_v50 = vld [vmem:[%s8219_s2 + $0x18] sm:$0xff]   ;;  %v1609_v21 = vor.u32 %v1608_v57, %v1605_v20  ;;  %v1649_v63 = vrot.slane %v1632_v60, 6  ;;  %v1572_v38 = vsel %vm6337_vm4, %v1563_v23, %v6682_v46  ;;  %s8221_s2 = sld [smem:[#allocation16_spill]] }
 0x3bb   :  { %5825 = vmatprep.subr.bf16.mxu1 %v5961_v50  ;;  %v1601_v0 = vrot.slane %v1599_v17, 4  ;;  %v1591_v11 = vrot.slane %v1590_v30, 4 }
 0x3bc   :  { %5826 = vmatpush3.bf16.msra.mxu1 %v5961_v50  ;;  %v1651_v31 = vrot.slane %v1649_v63, 4  ;;  %v1650_v4 = vsel %vm6383_vm9, %v5563_v22, %v1649_v63 }
 0x3bd   :  { %5827 = vmatprep.subr.bf16.mxu1 %v5962_v58  ;;  %v1610_v53 = vsel %vm6337_vm4, %v1601_v0, %v1609_v21  ;;  %v1600_v46 = vsel %vm6337_vm4, %v1591_v11, %v1599_v17 }
 0x3be   :  { %1496 = vrot.lane.b32.xlu1 %v1489_v3, %s6068_s4  ;;  %1494 = vrot.lane.b32.xlu0 %v1479_v39, %s6068_s4  ;;  %v1653_v51 = vsel %vm6383_vm9, %v1651_v31, %v1652_v48 }
 0x3c0   :  { %5828 = vmatpush3.bf16.msra.mxu1 %v5962_v58 }
 0x3c1   :  { %5829 = vmatprep.subr.bf16.mxu1 %v5963_v43 }
 0x3c2   :  { %1613 = vrot.lane.b32.xlu1 %v1582_v49, %s6071_s30  ;;  %1611 = vrot.lane.b32.xlu0 %v1572_v38, %s6071_s30 }
 0x3c4   :  { %5830 = vmatpush3.bf16.msra.mxu1 %v5963_v43 }
 0x3c5   :  { %5831 = vmatprep.subr.bf16.mxu1 %v5964_v42 }
 0x3c6   :  { %1617 = vrot.lane.b32.xlu1 %v1610_v53, %s6071_s30  ;;  %1615 = vrot.lane.b32.xlu0 %v1600_v46, %s6071_s30 }
 0x3c8   :  { %5832 = vmatpush3.bf16.msra.mxu1 %v5964_v42 }
 0x3ca   :  { %1660 = vrot.lane.b32.xlu1 %v1653_v51, %s6070_s10  ;;  %1658 = vrot.lane.b32.xlu0 %v1650_v4, %s6070_s10 }
 0x3ce   :  { %769 = vrot.lane.b32.xlu0 %v6032_v6, %s6063_s7  ;;  %776 = vrot.lane.b32.xlu1 %v6033_v47, %s6063_s7 }
 0x408   :  { %v1423_v12 = vpop.permute.xlu1 %1422  ;;  %v1421_v9 = vpop.permute.xlu0 %1420 }
 0x40c   :  { %v1427_v54 = vpop.permute.xlu1 %1426  ;;  %v1425_v44 = vpop.permute.xlu0 %1424 }
 0x410   :  { %v1333_v16 = vpop.permute.xlu1 %1332  ;;  %v1331_v55 = vpop.permute.xlu0 %1330 }
 0x411   :  { %1343 = vst.msk [vmem:[#allocation3 + $0x4] sm:$0xf] %vm905_vm2, %v1333_v16  ;;  %1342 = vst.msk [vmem:[#allocation3] sm:$0xf] %vm905_vm2, %v1331_v55 }
 0x414   :  { %v1337_v10 = vpop.permute.xlu1 %1336  ;;  %v1335_v61 = vpop.permute.xlu0 %1334 }
 0x415   :  { %1345 = vst.msk [vmem:[#allocation3 + $0xc] sm:$0xf] %vm905_vm2, %v1337_v10  ;;  %1344 = vst.msk [vmem:[#allocation3 + $0x8] sm:$0xf] %vm905_vm2, %v1335_v61 }
 0x418   :  { %v1535_v14 = vpop.permute.xlu1 %1534  ;;  %v1533_v27 = vpop.permute.xlu0 %1532 }
 0x41c   :  { %v1539_v28 = vpop.permute.xlu1 %1538  ;;  %v1537_v29 = vpop.permute.xlu0 %1536 }
 0x420   :  { %v1657_v18 = vpop.permute.xlu1 %1656  ;;  %v1655_v8 = vpop.permute.xlu0 %1654 }
 0x424   :  { %v1399_v56 = vpop.permute.xlu1 %1398  ;;  %v1397_v1 = vpop.permute.xlu0 %1396 }
 0x425   :  { %1409 = vst.msk [vmem:[#allocation3 + $0x4] sm:$0xf] %vm930_vm3, %v1399_v56  ;;  %1408 = vst.msk [vmem:[#allocation3] sm:$0xf] %vm930_vm3, %v1397_v1 }
 0x426   :  { %1433 = vst.msk [vmem:[#allocation3 + $0x4] sm:$0xf] %vm1001_vm6, %v1423_v12  ;;  %1432 = vst.msk [vmem:[#allocation3] sm:$0xf] %vm1001_vm6, %v1421_v9 }
 0x428   :  { %v1403_v7 = vpop.permute.xlu1 %1402  ;;  %v1401_v33 = vpop.permute.xlu0 %1400 }
 0x429   :  { %1411 = vst.msk [vmem:[#allocation3 + $0xc] sm:$0xf] %vm930_vm3, %v1403_v7  ;;  %1410 = vst.msk [vmem:[#allocation3 + $0x8] sm:$0xf] %vm930_vm3, %v1401_v33 }
 0x42a   :  { %1435 = vst.msk [vmem:[#allocation3 + $0xc] sm:$0xf] %vm1001_vm6, %v1427_v54  ;;  %1434 = vst.msk [vmem:[#allocation3 + $0x8] sm:$0xf] %vm1001_vm6, %v1425_v44 }
 0x42c   :  { %v1493_v52 = vpop.permute.xlu1 %1492  ;;  %v1491_v26 = vpop.permute.xlu0 %1490 }
 0x42d   :  { %1503 = vst.msk [vmem:[#allocation3 + $0x4] sm:$0xf] %vm1044_vm7, %v1493_v52  ;;  %1502 = vst.msk [vmem:[#allocation3] sm:$0xf] %vm1044_vm7, %v1491_v26 }
 0x42e   :  { %1546 = vst.msk [vmem:[#allocation3 + $0x4] sm:$0xf] %vm8174_vm15, %v1535_v14  ;;  %1545 = vst.msk [vmem:[#allocation3] sm:$0xf] %vm8174_vm15, %v1533_v27 }
 0x430   :  { %v1497_v20 = vpop.permute.xlu1 %1496  ;;  %v1495_v62 = vpop.permute.xlu0 %1494 }
 0x431   :  { %1505 = vst.msk [vmem:[#allocation3 + $0xc] sm:$0xf] %vm1044_vm7, %v1497_v20  ;;  %1504 = vst.msk [vmem:[#allocation3 + $0x8] sm:$0xf] %vm1044_vm7, %v1495_v62 }
 0x432   :  { %1547 = vst.msk [vmem:[#allocation3 + $0x8] sm:$0xf] %vm8174_vm15, %v1537_v29  ;;  %1548 = vst.msk [vmem:[#allocation3 + $0xc] sm:$0xf] %vm8174_vm15, %v1539_v28  ;;  %vm1709_vm15 = vcmask 523264  }
 0x434   :  { %v1614_v3 = vpop.permute.xlu1 %1613  ;;  %v1612_v39 = vpop.permute.xlu0 %1611 }
 0x435   :  { %1625 = vst.msk [vmem:[#allocation3 + $0x4] sm:$0xf] %vm1623_vm0, %v1614_v3  ;;  %1624 = vst.msk [vmem:[#allocation3] sm:$0xf] %vm1623_vm0, %v1612_v39  ;;  %v5572_v39 = vld [vmem:[%s8220_s29] ss:$0 sm:$0xff] }
 0x436   :  { %1668 = vst.msk [vmem:[#allocation3 + $0x4] sm:$0xf] %vm1666_vm1, %v1657_v18  ;;  %1667 = vst.msk [vmem:[#allocation3] sm:$0xf] %vm1666_vm1, %v1655_v8 }
 0x438   :  { %v1618_v40 = vpop.permute.xlu1 %1617  ;;  %v1616_v57 = vpop.permute.xlu0 %1615 }
 0x439   :  { %1627 = vst.msk [vmem:[#allocation3 + $0xc] sm:$0xf] %vm1623_vm0, %v1618_v40  ;;  %1626 = vst.msk [vmem:[#allocation3 + $0x8] sm:$0xf] %vm1623_vm0, %v1616_v57 }
 0x43c   :  { %v1661_v13 = vpop.permute.xlu1 %1660  ;;  %v1659_v15 = vpop.permute.xlu0 %1658 }
 0x43d   :  { %v1672_v23 = vld [vmem:[#allocation3 + $0x4] sm:$0xf]  ;;  %v1671_v17 = vld [vmem:[#allocation3] sm:$0xf]  ;;  %1670 = vst.msk [vmem:[#allocation3 + $0xc] sm:$0xf] %vm1666_vm1, %v1661_v13 }
 0x43e   :  { %1669 = vst.msk [vmem:[#allocation3 + $0x8] sm:$0xf] %vm1666_vm1, %v1659_v15  ;;  %v5564_v30 = vcombine.low %v1671_v17, %v1672_v23  ;;  %v5573_v23 = vld [vmem:[%s8221_s2] ss:$0 sm:$0xff] }
 0x440   :  { %5833 = vmatprep.mubr.msk.bf16.mxu1 %vm1709_vm15, %v5564_v30 }
 0x444   :  { %v1674_v60 = vld [vmem:[#allocation3 + $0xc] sm:$0xf] }
 0x445   :  { %v1673_v50 = vld [vmem:[#allocation3 + $0x8] sm:$0xf] }
 0x446   :  { %v5565_v58 = vcombine.low %v1673_v50, %v1674_v60 }
 0x448   :  { %5834 = vmatmul.mubr.msk.bf16.vlgmr.msra.gmra.mxu1 %vm1709_vm15, %v5565_v58 }
 0x508   :  { %v5835_v21 = vpop.f32.mrf.mxu1 }
 0x509   :  { %v1770_v45 = vsel %vm659_vm11, %v5835_v21, 0.0 }
 0x50a   :  { %v1750_v63 = vpop.f32.mrf.mxu1 }
 0x50b   :  { %v1767_v0 = vsel %vm659_vm11, %v1750_v63, 0.0 }
 0x50c   :  { %v5836_v49 = vpop.f32.mrf.mxu1 }
 0x50d   :  { %v1772_v43 = vsel %vm659_vm11, %v5836_v49, 0.0 }
 0x50e   :  { %v1753_v38 = vpop.f32.mrf.mxu1 }
 0x50f   :  { %v1768_v11 = vsel %vm659_vm11, %v1753_v38, 0.0 }
 0x510   :  { %v1769_v24 = vadd.f32 %v1768_v11, %v1767_v0 }
 0x512   :  { %v1771_v48 = vadd.f32 %v1770_v45, %v1769_v24  ;;  %v777_v24 = vpop.permute.xlu1 %776 }
 0x514   :  { %v1773_v53 = vadd.f32 %v1772_v43, %v1771_v48 }
 0x516   :  { %v1774_v46 = vrot.slane %v1773_v53, 4 }
 0x518   :  { %v1775_v31 = vadd.f32 %v1774_v46, %v1773_v53 }
 0x51a   :  { %v1776_v22 = vrot.slane %v1775_v31, 2 }
 0x51c   :  { %v1777_v42 = vadd.f32 %v1776_v22, %v1775_v31 }
 0x51e   :  { %v1778_v51 = vrot.slane %v1777_v42, 1 }
 0x520   :  { %v1779_v4 = vadd.f32 %v1778_v51, %v1777_v42 }
 0x522   :  { %v1780_v6 = vmul.f32 0.03125, %v1779_v4 }
 0x524   :  { %v1781_v47 = vsub.f32 %v1750_v63, %v1780_v6  ;;  %v1782_v12 = vsub.f32 %v1753_v38, %v1780_v6  ;;  %v1783_v9 = vsub.f32 %v5835_v21, %v1780_v6  ;;  %v1784_v54 = vsub.f32 %v5836_v49, %v1780_v6  ;;  %v770_v38 = vpop.permute.xlu0 %769 }
 0x525   :  { %v773_v0 = vmul.f32 %v770_v38, %v6445_v37  ;;  %v772_v11 = vmul.f32 %v770_v38, %v6447_v59  ;;  %v775_v43 = vmul.f32 %v770_v38, %v6449_v36  ;;  %v774_v53 = vmul.f32 %v770_v38, %v6451_v2 }
 0x526   :  { %v1785_v44 = vmul.f32 %v1781_v47, %v1781_v47  ;;  %v1786_v16 = vmul.f32 %v1782_v12, %v1782_v12  ;;  %v1787_v55 = vmul.f32 %v1783_v9, %v1783_v9  ;;  %v1788_v10 = vmul.f32 %v1784_v54, %v1784_v54 }
 0x527   :  { %v780_v45 = vadd.f32 %v777_v24, %v773_v0  ;;  %v779_v48 = vadd.f32 %v777_v24, %v772_v11  ;;  %v782_v6 = vadd.f32 %v777_v24, %v775_v43 }
 0x528   :  { %v1789_v61 = vsel %vm659_vm11, %v1785_v44, 0.0  ;;  %v1790_v14 = vsel %vm659_vm11, %v1786_v16, 0.0  ;;  %v1792_v28 = vsel %vm659_vm11, %v1787_v55, 0.0  ;;  %v1794_v18 = vsel %vm659_vm11, %v1788_v10, 0.0  ;;  %v1889_v10 = vld [vmem:[#allocation2 + $0x4] sm:$0xc] }
 0x529   :  { %v1791_v27 = vadd.f32 %v1790_v14, %v1789_v61  ;;  %vm8223_vm11 = vcmask 388416  }
 0x52b   :  { %v1793_v29 = vadd.f32 %v1792_v28, %v1791_v27  ;;  %v2001_v27 = vld [vmem:[#allocation2 + $0x4] sm:$0x8]  ;;  %v1896_v28 = vshrl.u32 %v1889_v10, 16 }
 0x52d   :  { %v1795_v8 = vadd.f32 %v1794_v18, %v1793_v29  ;;  %v1899_v29 = vshll.u32 %v1889_v10, 16  ;;  %v6812_v18 = vld [vmem:[#allocation2 + $0x4] sm:$0x8] }
 0x52f   :  { %v1796_v56 = vrot.slane %v1795_v8, 4 }
 0x531   :  { %v1797_v1 = vadd.f32 %v1796_v56, %v1795_v8  ;;  %v6814_v8 = vld [vmem:[#allocation2 + $0x1c] sm:$0x8]  ;;  %v6816_v56 = vld [vmem:[#allocation2 + $0x10] sm:$0x1] }
 0x533   :  { %v1798_v7 = vrot.slane %v1797_v1, 2 }
 0x535   :  { %v1799_v33 = vadd.f32 %v1798_v7, %v1797_v1  ;;  %v6818_v1 = vld [vmem:[#allocation2 + $0x28] sm:$0x1]  ;;  %v2008_v7 = vshrl.u32 %v2001_v27, 16 }
 0x537   :  { %v1800_v52 = vrot.slane %v1799_v33, 1 }
 0x539   :  { %v1801_v26 = vadd.f32 %v1800_v52, %v1799_v33  ;;  %v2004_v33 = vld [vmem:[#allocation2 + $0x1c] sm:$0x8] }
 0x53b   :  { %v1802_v20 = vmul.f32 0.03125, %v1801_v26 }
 0x53d   :  { %v1803_v62 = vadd.f32 1e-05, %v1802_v20  ;;  %v6820_v20 = vld [vmem:[#allocation2 + $0x10] sm:$0x3] }
 0x53f   :  { %6014 = vrsqrt.f32 %v1803_v62  ;;  %v2093_v62 = vld [vmem:[#allocation2 + $0x10] sm:$0x1] }
 0x54c   :  { %v6015_v3 = vpop.eup %6014 }
 0x54d   :  { %v1806_v40 = vmul.f32 %v6015_v3, %v1782_v12  ;;  %v1805_v57 = vmul.f32 %v6015_v3, %v1781_v47  ;;  %v1808_v13 = vmul.f32 %v6015_v3, %v1784_v54  ;;  %v1807_v15 = vmul.f32 %v6015_v3, %v1783_v9  ;;  %v2205_v3 = vld [vmem:[#allocation2 + $0x10] sm:$0x3] }
 0x54e   :  { %v781_v47 = vadd.f32 %v777_v24, %v774_v53  ;;  %v2232_v11 = vshll.u32 %v2205_v3, 16  ;;  %v6835_v53 = vld [vmem:[#allocation2 + $0x28] sm:$0x1] }
 0x54f   :  { %v1816_v17 = vmul.f32 %v5572_v39, %v1806_v40  ;;  %v1815_v30 = vmul.f32 %v5572_v39, %v1805_v57  ;;  %v1818_v58 = vmul.f32 %v5572_v39, %v1808_v13  ;;  %v1817_v21 = vmul.f32 %v5572_v39, %v1807_v15 }
 0x550   :  { %v5578_v39 = vrot.slane %v6812_v18, 11  ;;  %v1898_v40 = vrot.slane %v1896_v28, 6  ;;  %v1901_v57 = vrot.slane %v1899_v29, 7  ;;  %v5579_v13 = vrot.slane %v6814_v8, 11 }
 0x551   :  { %v1826_v60 = vadd.f32 %v5573_v23, %v1816_v17  ;;  %v1825_v50 = vadd.f32 %v5573_v23, %v1815_v30  ;;  %v1828_v63 = vadd.f32 %v5573_v23, %v1818_v58  ;;  %v1827_v49 = vadd.f32 %v5573_v23, %v1817_v21  ;;  %v1892_v30 = vld [vmem:[#allocation2 + $0x1c] sm:$0xc] }
 0x552   :  { %v2178_v15 = vrot.slane %v6816_v56, 5  ;;  %v2185_v23 = vrot.slane %v6818_v1, 5  ;;  %v2030_v17 = vshrl.u32 %v2004_v33, 16  ;;  %v2117_v58 = vshll.u32 %v2093_v62, 16 }
 0x553   :  { %1835 = vrot.lane.b32.xlu1 %v1826_v60, %s6063_s7  ;;  %1833 = vrot.lane.b32.xlu0 %v1825_v50, %s6063_s7  ;;  %v2298_v60 = vrot.slane %v6820_v20, 6  ;;  %v6829_v50 = vrot.slane %v2008_v7, 11  ;;  %v2229_v21 = vshrl.u32 %v2205_v3, 16  ;;  %v1902_v24 = vor.u32 %v1901_v57, %v1898_v40 }
 0x554   :  { %v6833_v43 = vrot.slane %v2030_v17, 11 }
 0x557   :  { %1839 = vrot.lane.b32.xlu1 %v1828_v63, %s6063_s7  ;;  %1837 = vrot.lane.b32.xlu0 %v1827_v49, %s6063_s7 }
 0x5c5   :  { %v1836_v46 = vpop.permute.xlu1 %1835  ;;  %v1834_v31 = vpop.permute.xlu0 %1833 }
 0x5c6   :  { %v1846_v22 = vadd.f32 %v1836_v46, %v780_v45  ;;  %v1845_v42 = vadd.f32 %v1834_v31, %v779_v48  ;;  %v1924_v45 = vshrl.u32 %v1892_v30, 16  ;;  %v1927_v46 = vshll.u32 %v1892_v30, 16 }
 0x5c8   :  { %v1850_v51 = vmax.f32 %v1846_v22, 0.0  ;;  %v1849_v4 = vmax.f32 %v1845_v42, 0.0 }
 0x5c9   :  { %v1840_v12 = vpop.permute.xlu1 %1839  ;;  %v1838_v9 = vpop.permute.xlu0 %1837 }
 0x5ca   :  { %v5719_v37 = vpack.c.bf16 %v1850_v51, %v1850_v51  ;;  %v5718_v54 = vpack.c.bf16 %v1849_v4, %v1849_v4  ;;  %v1848_v59 = vadd.f32 %v1840_v12, %v782_v6  ;;  %v1847_v44 = vadd.f32 %v1838_v9, %v781_v47 }
 0x5cb   :  { %v6839_v51 = vrot.slane %v2117_v58, 5  ;;  %v6843_v9 = vrot.slane %v2229_v21, 5 }
 0x5cc   :  { %v1852_v16 = vmax.f32 %v1848_v59, 0.0  ;;  %v1851_v55 = vmax.f32 %v1847_v44, 0.0  ;;  %1875 = vrot.lane.b32.xlu1 %v5719_v37, %s6072_s3  ;;  %1873 = vrot.lane.b32.xlu0 %v5718_v54, %s6072_s3  ;;  %v6845_v37 = vrot.slane %v2232_v11, 6  ;;  %v6847_v54 = vld [vmem:[#allocation2 + $0x28] sm:$0x3]  ;;  %v6849_v59 = vrot.slane %v1902_v24, 4 }
 0x5cd   :  { %v2257_v7 = vshrl.u32 %v6847_v54, 16  ;;  %v2260_v62 = vshll.u32 %v6847_v54, 16 }
 0x5ce   :  { %v5721_v36 = vpack.c.bf16 %v1852_v16, %v1852_v16  ;;  %v5720_v2 = vpack.c.bf16 %v1851_v55, %v1851_v55  ;;  %v2141_v55 = vshll.u32 %v6835_v53, 16 }
 0x5d0   :  { %1879 = vrot.lane.b32.xlu1 %v5721_v36, %s6072_s3  ;;  %1877 = vrot.lane.b32.xlu0 %v5720_v2, %s6072_s3  ;;  %v6852_v36 = vrot.slane %v1924_v45, 6  ;;  %v6854_v2 = vrot.slane %v1927_v46, 7 }
 0x5d2   :  { %v1930_v8 = vor.u32 %v6854_v2, %v6852_v36 }
 0x63e   :  { %v1876_v61 = vpop.permute.xlu1 %1875  ;;  %v1874_v14 = vpop.permute.xlu0 %1873 }
 0x63f   :  { %1886 = vst.msk [vmem:[#allocation2 + $0xc] sm:$0xf] %vm804_vm14, %v1876_v61  ;;  %1885 = vst.msk [vmem:[#allocation2 + $0x8] sm:$0xf] %vm804_vm14, %v1874_v14 }
 0x642   :  { %v1880_v52 = vpop.permute.xlu1 %1879  ;;  %v1878_v26 = vpop.permute.xlu0 %1877 }
 0x643   :  { %1888 = vst.msk [vmem:[#allocation2 + $0x24] sm:$0xf] %vm804_vm14, %v1880_v52  ;;  %1887 = vst.msk [vmem:[#allocation2 + $0x20] sm:$0xf] %vm804_vm14, %v1878_v26 }
 0x646   :  { %v2068_v63 = vld [vmem:[#allocation2 + $0xc] sm:$0xf]  ;;  %v2067_v49 = vld [vmem:[#allocation2 + $0x8] sm:$0xf] }
 0x647   :  { %v1960_v38 = vld [vmem:[#allocation2 + $0x8] sm:$0xf]  ;;  %2077 = vrot.lane.b32.xlu1 %v2068_v63, %s6066_s9  ;;  %2075 = vrot.lane.b32.xlu0 %v2067_v49, %s6066_s9  ;;  %v1961_v48 = vld [vmem:[#allocation2 + $0xc] sm:$0x7] }
 0x648   :  { %v1973_v0 = vrot.slane %v1960_v38, 7  ;;  %v2162_v22 = vld [vmem:[#allocation2 + $0xc] sm:$0xf]  ;;  %v1976_v44 = vrot.slane %v1961_v48, 7  ;;  %v2161_v16 = vld [vmem:[#allocation2 + $0x8] sm:$0xe] }
 0x649   :  { %v6837_v42 = vld [vmem:[#allocation2 + $0xc] sm:$0xf]  ;;  %v2175_v61 = vrot.slane %v2162_v22, 5  ;;  %v5582_v33 = vrot.slane %v2161_v16, 9  ;;  %v6865_v57 = vld [vmem:[#allocation2 + $0x8] sm:$0xc] }
 0x64a   :  { %v1975_v31 = vrot.slane %v1973_v0, 4  ;;  %v2070_v4 = vld [vmem:[#allocation2 + $0x24] sm:$0xf]  ;;  %v2069_v6 = vld [vmem:[#allocation2 + $0x20] sm:$0xf]  ;;  %v2295_v27 = vrot.slane %v6837_v42, 6  ;;  %v1974_v29 = vsel %vm6243_vm5, %v5578_v39, %v1973_v0 }
 0x64b   :  { %v1963_v47 = vld [vmem:[#allocation2 + $0x20] sm:$0xf]  ;;  %2081 = vrot.lane.b32.xlu1 %v2070_v4, %s6066_s9  ;;  %2079 = vrot.lane.b32.xlu0 %v2069_v6, %s6066_s9  ;;  %v1964_v10 = vld [vmem:[#allocation2 + $0x24] sm:$0x7]  ;;  %v2092_v26 = vld [vmem:[#allocation2 + $0xc] sm:$0xf]  ;;  %v2176_v24 = vsel %vm6291_vm13, %v5582_v33, %v2175_v61 }
 0x64c   :  { %v1980_v12 = vrot.slane %v1963_v47, 7  ;;  %v2165_v14 = vld [vmem:[#allocation2 + $0x24] sm:$0xf]  ;;  %v1977_v28 = vsel %vm6243_vm5, %v1975_v31, %v1976_v44  ;;  %v2164_v52 = vld [vmem:[#allocation2 + $0x20] sm:$0xe]  ;;  %v1983_v3 = vrot.slane %v1964_v10, 7 }
 0x64d   :  { %v2182_v40 = vrot.slane %v2165_v14, 5  ;;  %v2002_v17 = vld [vmem:[#allocation2 + $0x8] sm:$0xf]  ;;  %v2177_v30 = vrot.slane %v2175_v61, 4  ;;  %v6869_v39 = vrot.slane %v2295_v27, 4  ;;  %v5583_v38 = vrot.slane %v2164_v52, 9 }
 0x64e   :  { %v1982_v18 = vrot.slane %v1980_v12, 4  ;;  %v2003_v58 = vld [vmem:[#allocation2 + $0xc] sm:$0xf]  ;;  %v2005_v21 = vld [vmem:[#allocation2 + $0x20] sm:$0xf]  ;;  %v1981_v49 = vsel %vm6243_vm5, %v5579_v13, %v1980_v12  ;;  %v2107_v11 = vshll.u32 %v2092_v26, 16 }
 0x64f   :  { %1987 = vrot.lane.b32.xlu1 %v1977_v28, %s6063_s7  ;;  %1985 = vrot.lane.b32.xlu0 %v1974_v29, %s6063_s7  ;;  %v2006_v0 = vld [vmem:[#allocation2 + $0x24] sm:$0xf]  ;;  %v2013_v45 = vshrl.u32 %v2002_v17, 16  ;;  %v2111_v48 = vshrl.u32 %v2092_v26, 16  ;;  %v2091_v46 = vld [vmem:[#allocation2 + $0x8] sm:$0xf]  ;;  %v2179_v12 = vsel %vm6291_vm13, %v2177_v30, %v2178_v15  ;;  %v2183_v36 = vsel %vm6291_vm13, %v5583_v38, %v2182_v40 }
 0x650   :  { %v1984_v63 = vsel %vm6243_vm5, %v1982_v18, %v1983_v3  ;;  %v2095_v31 = vld [vmem:[#allocation2 + $0x24] sm:$0xf]  ;;  %v2184_v22 = vrot.slane %v2182_v40, 4  ;;  %v5584_v13 = vrot.slane %v6865_v57, 10  ;;  %v2022_v4 = vshrl.u32 %v2003_v58, 16 }
 0x651   :  { %v2035_v6 = vshrl.u32 %v2005_v21, 16  ;;  %v2094_v47 = vld [vmem:[#allocation2 + $0x20] sm:$0xf]  ;;  %v2044_v44 = vshrl.u32 %v2006_v0, 16  ;;  %v6888_v16 = vrot.slane %v2107_v11, 5  ;;  %v2113_v10 = vrot.slane %v2111_v48, 4 }
 0x652   :  { %v2098_v61 = vshrl.u32 %v2091_v46, 16  ;;  %v2101_v14 = vshll.u32 %v2091_v46, 16  ;;  %v2131_v28 = vshll.u32 %v2095_v31, 16  ;;  %v2135_v29 = vshrl.u32 %v2095_v31, 16  ;;  %v2204_v38 = vld [vmem:[#allocation2 + $0xc] sm:$0xf] }
 0x653   :  { %1991 = vrot.lane.b32.xlu1 %v1984_v63, %s6063_s7  ;;  %1989 = vrot.lane.b32.xlu0 %v1981_v49, %s6063_s7  ;;  %v2015_v2 = vrot.slane %v2013_v45, 7  ;;  %v2122_v56 = vshrl.u32 %v2094_v47, 16  ;;  %v2125_v18 = vshll.u32 %v2094_v47, 16  ;;  %v2186_v15 = vsel %vm6291_vm13, %v2184_v22, %v2185_v23  ;;  %v2203_v31 = vld [vmem:[#allocation2 + $0x8] sm:$0xe]  ;;  %s6075_s7 = smov 112  }
 0x654   :  { %v2024_v33 = vrot.slane %v2022_v4, 7  ;;  %v2025_v52 = vshll.u32 %v2003_v58, 16  ;;  %v2037_v26 = vrot.slane %v2035_v6, 7  ;;  %v2016_v3 = vshll.u32 %v2002_v17, 16  ;;  %v2207_v53 = vld [vmem:[#allocation2 + $0x24] sm:$0xf] }
 0x655   :  { %v2046_v57 = vrot.slane %v2044_v44, 7  ;;  %v2038_v30 = vshll.u32 %v2005_v21, 16  ;;  %v2114_v63 = vor.u32 %v2113_v10, %v6888_v16  ;;  %v2100_v49 = vrot.slane %v2098_v61, 4 }
 0x656   :  { %v2103_v11 = vrot.slane %v2101_v14, 5  ;;  %v2137_v40 = vrot.slane %v2135_v29, 4  ;;  %v2020_v1 = vrot.slane %v2015_v2, 4  ;;  %v2047_v23 = vshll.u32 %v2006_v0, 16 }
 0x657   :  { %2189 = vrot.lane.b32.xlu1 %v2179_v12, %s6069_s6  ;;  %2187 = vrot.lane.b32.xlu0 %v2176_v24, %s6069_s6  ;;  %v6899_v24 = vrot.slane %v2131_v28, 5  ;;  %v2124_v45 = vrot.slane %v2122_v56, 4  ;;  %v2127_v58 = vrot.slane %v2125_v18, 5  ;;  %v2027_v48 = vor.u32 %v2025_v52, %v2024_v33  ;;  %v1891_v28 = vld [vmem:[#allocation2 + $0xc] sm:$0x7] }
 0x658   :  { %v2018_v17 = vor.u32 %v2016_v3, %v2015_v2  ;;  %v2042_v46 = vrot.slane %v2037_v26, 4  ;;  %v2040_v21 = vor.u32 %v2038_v30, %v2037_v26  ;;  %v2049_v22 = vor.u32 %v2047_v23, %v2046_v57  ;;  %v2206_v56 = vld [vmem:[#allocation2 + $0x20] sm:$0xe] }
 0x659   :  { %v6903_v4 = vrot.slane %v2114_v63, 4  ;;  %v2219_v6 = vshrl.u32 %v2204_v38, 16  ;;  %v2222_v47 = vshll.u32 %v2204_v38, 16  ;;  %v2299_v12 = vsel %vm6383_vm9, %v6869_v39, %v2298_v60  ;;  %v1893_v30 = vld [vmem:[#allocation2 + $0x20] sm:$0xf] }
 0x65a   :  { %v2296_v0 = vsel %vm6383_vm9, %v5584_v13, %v2295_v27  ;;  %v2104_v44 = vor.u32 %v2103_v11, %v2100_v49  ;;  %v2138_v10 = vor.u32 %v2137_v40, %v6899_v24  ;;  %v6919_v61 = vrot.slane %v2141_v55, 5  ;;  %v1890_v55 = vld [vmem:[#allocation2 + $0x8] sm:$0xf] }
 0x65b   :  { %2193 = vrot.lane.b32.xlu1 %v2186_v15, %s6069_s6  ;;  %2191 = vrot.lane.b32.xlu0 %v2183_v36, %s6069_s6  ;;  %v2128_v20 = vor.u32 %v2127_v58, %v2124_v45  ;;  %v2210_v14 = vshrl.u32 %v2203_v31, 16  ;;  %v6921_v60 = vrot.slane %v1930_v8, 4  ;;  %v2028_v42 = vsel %vm6259_vm10, %v2020_v1, %v2027_v48  ;;  %s8222_s6 = sld [smem:[#allocation17_spill]] }
 0x65c   :  { %v2019_v27 = vsel %vm6259_vm10, %v6829_v50, %v2018_v17  ;;  %v2041_v39 = vsel %vm6259_vm10, %v6833_v43, %v2040_v21  ;;  %v2213_v13 = vshll.u32 %v2203_v31, 16  ;;  %v2050_v29 = vsel %vm6259_vm10, %v2042_v46, %v2049_v22  ;;  %v1894_v43 = vld [vmem:[#allocation2 + $0x24] sm:$0x7] }
 0x65d   :  { %v2120_v8 = vsel %vm6282_vm12, %v6903_v4, %v6839_v51  ;;  %v2221_v36 = vrot.slane %v2219_v6, 5  ;;  %v2224_v2 = vrot.slane %v2222_v47, 6  ;;  %v2105_v18 = vrot.slane %v2104_v44, 4 }
 0x65e   :  { %v6937_v50 = vrot.slane %v2138_v10, 4  ;;  %v1915_v15 = vshrl.u32 %v1891_v28, 16  ;;  %v1918_v33 = vshll.u32 %v1891_v28, 16  ;;  %v2129_v52 = vrot.slane %v2128_v20, 4 }
 0x65f   :  { %2309 = vrot.lane.b32.xlu1 %v2299_v12, %s6070_s10  ;;  %2307 = vrot.lane.b32.xlu0 %v2296_v0, %s6070_s10  ;;  %v2212_v26 = vrot.slane %v2210_v14, 5  ;;  %v2247_v3 = vshrl.u32 %v2207_v53, 16  ;;  %v1905_v57 = vshrl.u32 %v1890_v55, 16  ;;  %v2215_v63 = vrot.slane %v2213_v13, 6 }
 0x660   :  { %v2250_v51 = vshll.u32 %v2207_v53, 16  ;;  %v2238_v49 = vshrl.u32 %v2206_v56, 16  ;;  %v1908_v11 = vshll.u32 %v1890_v55, 16  ;;  %v2241_v40 = vshll.u32 %v2206_v56, 16 }
 0x661   :  { %v1907_v38 = vrot.slane %v1905_v57, 6  ;;  %v1943_v1 = vshrl.u32 %v1894_v43, 16  ;;  %v1946_v23 = vshll.u32 %v1894_v43, 16  ;;  %v1917_v45 = vrot.slane %v1915_v15, 6  ;;  %v5967_v57 = vld [vmem:[%s8222_s6 + $0x8] sm:$0xff]  }
 0x662   :  { %v1920_v58 = vrot.slane %v1918_v33, 7  ;;  %v1910_v48 = vrot.slane %v1908_v11, 7  ;;  %v1933_v17 = vshrl.u32 %v1893_v30, 16  ;;  %v2110_v46 = vsel %vm6282_vm12, %v2105_v18, %v6888_v16  ;;  %v5968_v11 = vld [vmem:[%s8222_s6] sm:$0xff]  }
 0x663   :  { %2053 = vrot.lane.b32.xlu1 %v2028_v42, %s6064_s12  ;;  %2051 = vrot.lane.b32.xlu0 %v2019_v27, %s6064_s12  ;;  %v2225_v21 = vor.u32 %v2224_v2, %v2221_v36  ;;  %v2249_v31 = vrot.slane %v2247_v3, 5  ;;  %v1936_v22 = vshll.u32 %v1893_v30, 16  ;;  %v2216_v4 = vor.u32 %v2215_v63, %v2212_v26  ;;  %v5965_v2 = vld [vmem:[%s8222_s6 + $0x18] sm:$0xff]   ;;  %v2284_v26 = vld [vmem:[#allocation2 + $0x20] sm:$0xc] }
 0x664   :  { %v2252_v6 = vrot.slane %v2250_v51, 6  ;;  %v1911_v47 = vor.u32 %v1910_v48, %v1907_v38  ;;  %v1935_v12 = vrot.slane %v1933_v17, 6  ;;  %v2240_v0 = vrot.slane %v2238_v49, 5  ;;  %5837 = vmatprep.subr.bf16.mxu1 %v5965_v2 }
 0x665   :  { %v1945_v44 = vrot.slane %v1943_v1, 6  ;;  %v1948_v10 = vrot.slane %v1946_v23, 7  ;;  %v1938_v20 = vrot.slane %v1936_v22, 7  ;;  %v2243_v14 = vrot.slane %v2241_v40, 6  ;;  %5838 = vmatpush3.bf16.msra.mxu1 %v5965_v2 }
 0x666   :  { %v1921_v28 = vor.u32 %v1920_v58, %v1917_v45  ;;  %v1913_v42 = vrot.slane %v1911_v47, 4  ;;  %v1912_v27 = vsel %vm6377_vm8, %v6849_v59, %v1911_v47  ;;  %v2235_v16 = vor.u32 %v6845_v37, %v6843_v9 }
 0x667   :  { %2057 = vrot.lane.b32.xlu1 %v2050_v29, %s6064_s12  ;;  %2055 = vrot.lane.b32.xlu0 %v2041_v39, %s6064_s12  ;;  %1955 = vst.msk [vmem:[#allocation3] sm:$0xf] %vm804_vm14, %v1912_v27  ;;  %v1939_v39 = vor.u32 %v1938_v20, %v1935_v12  ;;  %v2144_v13 = vsel %vm6282_vm12, %v6937_v50, %v6919_v61  ;;  %v2259_v53 = vrot.slane %v2257_v7, 5  ;;  %v2262_v59 = vrot.slane %v2260_v62, 6  ;;  %v2285_v62 = vld [vmem:[#allocation2 + $0x24] sm:$0xf] }
 0x668   :  { %v1922_v55 = vsel %vm6377_vm8, %v1913_v42, %v1921_v28  ;;  %v2134_v9 = vsel %vm6282_vm12, %v2129_v52, %v6899_v24  ;;  %v1949_v37 = vor.u32 %v1948_v10, %v1945_v44  ;;  %v2217_v7 = vrot.slane %v2216_v4, 4  ;;  %v5966_v24 = vld [vmem:[%s8222_s6 + $0x10] sm:$0xff]   ;;  %v2286_v52 = vld [vmem:[#allocation2 + $0x28] sm:$0x3] }
 0x669   :  { %1956 = vst.msk [vmem:[#allocation3 + $0x4] sm:$0xf] %vm804_vm14, %v1922_v55  ;;  %v1941_v29 = vrot.slane %v1939_v39, 4  ;;  %v1940_v61 = vsel %vm6377_vm8, %v6921_v60, %v1939_v39  ;;  %v2253_v36 = vor.u32 %v2252_v6, %v2249_v31  ;;  %v2244_v54 = vor.u32 %v2243_v14, %v2240_v0  ;;  %5839 = vmatprep.subr.bf16.mxu1 %v5966_v24 }
 0x66a   :  { %1957 = vst.msk [vmem:[#allocation3 + $0x8] sm:$0xf] %vm804_vm14, %v1940_v61  ;;  %v2263_v56 = vor.u32 %v2262_v59, %v2259_v53  ;;  %v2302_v18 = vrot.slane %v2285_v62, 6  ;;  %v2226_v15 = vsel %vm6337_vm4, %v2217_v7, %v2225_v21  ;;  %v2305_v3 = vrot.slane %v2286_v52, 6  ;;  %5840 = vmatpush3.bf16.msra.mxu1 %v5966_v24 }
 0x66b   :  { %2147 = vrot.lane.b32.xlu1 %v2120_v8, %s6068_s4  ;;  %2145 = vrot.lane.b32.xlu0 %v2110_v46, %s6068_s4  ;;  %v2227_v8 = vrot.slane %v2225_v21, 4  ;;  %v1950_v60 = vsel %vm6377_vm8, %v1941_v29, %v1949_v37  ;;  %v2255_v33 = vrot.slane %v2253_v36, 4  ;;  %v2245_v43 = vrot.slane %v2244_v54, 4 }
 0x66c   :  { %1958 = vst.msk [vmem:[#allocation3 + $0xc] sm:$0xf] %vm804_vm14, %v1950_v60  ;;  %v2304_v51 = vrot.slane %v2302_v18, 4  ;;  %v5585_v49 = vrot.slane %v2284_v26, 10  ;;  %5841 = vmatprep.subr.bf16.mxu1 %v5967_v57  ;;  %vm8224_vm14 = vmmov %vm8223_vm11 }
 0x66d   :  { %v2236_v50 = vsel %vm6337_vm4, %v2227_v8, %v2235_v16  ;;  %v2264_v30 = vsel %vm6337_vm4, %v2255_v33, %v2263_v56  ;;  %v2254_v63 = vsel %vm6337_vm4, %v2245_v43, %v2253_v36 }
 0x66e   :  { %5842 = vmatpush3.bf16.msra.mxu1 %v5967_v57  ;;  %v2306_v40 = vsel %vm6383_vm9, %v2304_v51, %v2305_v3  ;;  %v2303_v38 = vsel %vm6383_vm9, %v5585_v49, %v2302_v18 }
 0x66f   :  { %2151 = vrot.lane.b32.xlu1 %v2144_v13, %s6068_s4  ;;  %2149 = vrot.lane.b32.xlu0 %v2134_v9, %s6068_s4 }
 0x670   :  { %5843 = vmatprep.subr.bf16.mxu1 %v5968_v11 }
 0x672   :  { %5844 = vmatpush3.bf16.msra.mxu1 %v5968_v11 }
 0x673   :  { %2267 = vrot.lane.b32.xlu1 %v2236_v50, %s6071_s30  ;;  %2265 = vrot.lane.b32.xlu0 %v2226_v15, %s6071_s30 }
 0x677   :  { %2271 = vrot.lane.b32.xlu1 %v2264_v30, %s6071_s30  ;;  %2269 = vrot.lane.b32.xlu0 %v2254_v63, %s6071_s30 }
 0x67b   :  { %2313 = vrot.lane.b32.xlu1 %v2306_v40, %s6070_s10  ;;  %2311 = vrot.lane.b32.xlu0 %v2303_v38, %s6070_s10 }
 0x6b9   :  { %v2078_v1 = vpop.permute.xlu1 %2077  ;;  %v2076_v23 = vpop.permute.xlu0 %2075 }
 0x6bd   :  { %v2082_v45 = vpop.permute.xlu1 %2081  ;;  %v2080_v58 = vpop.permute.xlu0 %2079 }
 0x6c1   :  { %v1988_v48 = vpop.permute.xlu1 %1987  ;;  %v1986_v17 = vpop.permute.xlu0 %1985 }
 0x6c2   :  { %1998 = vst.msk [vmem:[#allocation3 + $0x4] sm:$0xf] %vm905_vm2, %v1988_v48  ;;  %1997 = vst.msk [vmem:[#allocation3] sm:$0xf] %vm905_vm2, %v1986_v17 }
 0x6c5   :  { %v1992_v46 = vpop.permute.xlu1 %1991  ;;  %v1990_v21 = vpop.permute.xlu0 %1989 }
 0x6c6   :  { %2000 = vst.msk [vmem:[#allocation3 + $0xc] sm:$0xf] %vm905_vm2, %v1992_v46  ;;  %1999 = vst.msk [vmem:[#allocation3 + $0x8] sm:$0xf] %vm905_vm2, %v1990_v21 }
 0x6c7   :  { %vm8225_vm2 = vmmov %vm8223_vm11 }
 0x6c9   :  { %v2190_v31 = vpop.permute.xlu1 %2189  ;;  %v2188_v22 = vpop.permute.xlu0 %2187 }
 0x6cd   :  { %v2194_v4 = vpop.permute.xlu1 %2193  ;;  %v2192_v6 = vpop.permute.xlu0 %2191 }
 0x6d1   :  { %v2310_v47 = vpop.permute.xlu1 %2309  ;;  %v2308_v12 = vpop.permute.xlu0 %2307 }
 0x6d5   :  { %v2054_v0 = vpop.permute.xlu1 %2053  ;;  %v2052_v44 = vpop.permute.xlu0 %2051 }
 0x6d6   :  { %2064 = vst.msk [vmem:[#allocation3 + $0x4] sm:$0xf] %vm930_vm3, %v2054_v0  ;;  %2063 = vst.msk [vmem:[#allocation3] sm:$0xf] %vm930_vm3, %v2052_v44 }
 0x6d7   :  { %2088 = vst.msk [vmem:[#allocation3 + $0x4] sm:$0xf] %vm1001_vm6, %v2078_v1  ;;  %2087 = vst.msk [vmem:[#allocation3] sm:$0xf] %vm1001_vm6, %v2076_v23 }
 0x6d9   :  { %v2058_v10 = vpop.permute.xlu1 %2057  ;;  %v2056_v20 = vpop.permute.xlu0 %2055 }
 0x6da   :  { %2066 = vst.msk [vmem:[#allocation3 + $0xc] sm:$0xf] %vm930_vm3, %v2058_v10  ;;  %2065 = vst.msk [vmem:[#allocation3 + $0x8] sm:$0xf] %vm930_vm3, %v2056_v20 }
 0x6db   :  { %2090 = vst.msk [vmem:[#allocation3 + $0xc] sm:$0xf] %vm1001_vm6, %v2082_v45  ;;  %2089 = vst.msk [vmem:[#allocation3 + $0x8] sm:$0xf] %vm1001_vm6, %v2080_v58  ;;  %vm8177_vm6 = vcmask 130048  }
 0x6dc   :  { %vm8226_vm3 = vmmov %vm8225_vm2 }
 0x6dd   :  { %v2148_v14 = vpop.permute.xlu1 %2147  ;;  %v2146_v28 = vpop.permute.xlu0 %2145 }
 0x6de   :  { %2158 = vst.msk [vmem:[#allocation3 + $0x4] sm:$0xf] %vm1044_vm7, %v2148_v14  ;;  %2157 = vst.msk [vmem:[#allocation3] sm:$0xf] %vm1044_vm7, %v2146_v28 }
 0x6df   :  { %2200 = vst.msk [vmem:[#allocation3 + $0x4] sm:$0xf] %vm8223_vm11, %v2190_v31 }
 0x6e0   :  { %2199 = vst.msk [vmem:[#allocation3] sm:$0xf] %vm8224_vm14, %v2188_v22 }
 0x6e1   :  { %v2152_v42 = vpop.permute.xlu1 %2151  ;;  %v2150_v27 = vpop.permute.xlu0 %2149 }
 0x6e2   :  { %2160 = vst.msk [vmem:[#allocation3 + $0xc] sm:$0xf] %vm1044_vm7, %v2152_v42  ;;  %2159 = vst.msk [vmem:[#allocation3 + $0x8] sm:$0xf] %vm1044_vm7, %v2150_v27  ;;  %vm8176_vm7 = vcmask 261248  }
 0x6e3   :  { %2202 = vst.msk [vmem:[#allocation3 + $0xc] sm:$0xf] %vm8225_vm2, %v2194_v4 }
 0x6e4   :  { %2201 = vst.msk [vmem:[#allocation3 + $0x8] sm:$0xf] %vm8226_vm3, %v2192_v6 }
 0x6e5   :  { %v2268_v16 = vpop.permute.xlu1 %2267  ;;  %v2266_v39 = vpop.permute.xlu0 %2265 }
 0x6e6   :  { %2278 = vst.msk [vmem:[#allocation3 + $0x4] sm:$0xf] %vm1623_vm0, %v2268_v16  ;;  %2277 = vst.msk [vmem:[#allocation3] sm:$0xf] %vm1623_vm0, %v2266_v39 }
 0x6e7   :  { %2320 = vst.msk [vmem:[#allocation3 + $0x4] sm:$0xf] %vm1666_vm1, %v2310_v47  ;;  %2319 = vst.msk [vmem:[#allocation3] sm:$0xf] %vm1666_vm1, %v2308_v12 }
 0x6e9   :  { %v2272_v13 = vpop.permute.xlu1 %2271  ;;  %v2270_v53 = vpop.permute.xlu0 %2269 }
 0x6ea   :  { %2280 = vst.msk [vmem:[#allocation3 + $0xc] sm:$0xf] %vm1623_vm0, %v2272_v13  ;;  %2279 = vst.msk [vmem:[#allocation3 + $0x8] sm:$0xf] %vm1623_vm0, %v2270_v53 }
 0x6ed   :  { %v2314_v59 = vpop.permute.xlu1 %2313  ;;  %v2312_v55 = vpop.permute.xlu0 %2311 }
 0x6ee   :  { %v2324_v9 = vld [vmem:[#allocation3 + $0x4] sm:$0xf]  ;;  %v2323_v37 = vld [vmem:[#allocation3] sm:$0xf]  ;;  %2322 = vst.msk [vmem:[#allocation3 + $0xc] sm:$0xf] %vm1666_vm1, %v2314_v59 }
 0x6ef   :  { %2321 = vst.msk [vmem:[#allocation3 + $0x8] sm:$0xf] %vm1666_vm1, %v2312_v55  ;;  %v5586_v29 = vcombine.low %v2323_v37, %v2324_v9  ;;  %vm8227_vm1 = vcmask 125952  }
 0x6f0   :  { %vm8229_vm0 = vmmov %vm8227_vm1 }
 0x6f1   :  { %5845 = vmatprep.mubr.msk.bf16.mxu1 %vm1709_vm15, %v5586_v29  ;;  %vm8230_vm11 = vmmov %vm8229_vm0 }
 0x6f2   :  { %vm8232_vm14 = vmmov %vm8229_vm0 }
 0x6f3   :  { %vm8233_vm2 = vmmov %vm8229_vm0 }
 0x6f4   :  { %vm8234_vm3 = vmmov %vm8229_vm0 }
 0x6f5   :  { %v2326_v61 = vld [vmem:[#allocation3 + $0xc] sm:$0xf] }
 0x6f6   :  { %v2325_v8 = vld [vmem:[#allocation3 + $0x8] sm:$0xf] }
 0x6f7   :  { %v5587_v7 = vcombine.low %v2325_v8, %v2326_v61 }
 0x6f9   :  { %5846 = vmatmul.mubr.msk.bf16.vlgmr.msra.gmra.mxu1 %vm1709_vm15, %v5587_v7  ;;  %vm8228_vm15 = vmmov %vm8227_vm1 }
 0x7b9   :  { %v5847_v36 = vpop.f32.mrf.mxu1 }
 0x7ba   :  { %v2422_v33 = vsel %vm8177_vm6, %v5847_v36, 0.0  ;;  %v2489_v43 = vsel %vm8176_vm7, %v5847_v36, 0.0 }
 0x7bb   :  { %v2401_v54 = vpop.f32.mrf.mxu1 }
 0x7bc   :  { %v2419_v24 = vsel %vm8177_vm6, %v2401_v54, 0.0  ;;  %v2486_v60 = vsel %vm8176_vm7, %v2401_v54, 0.0 }
 0x7bd   :  { %v5848_v62 = vpop.f32.mrf.mxu1 }
 0x7be   :  { %v2424_v3 = vsel %vm8177_vm6, %v5848_v62, 0.0  ;;  %v2491_v57 = vsel %vm8176_vm7, %v5848_v62, 0.0 }
 0x7bf   :  { %v2404_v2 = vpop.f32.mrf.mxu1 }
 0x7c0   :  { %v2420_v56 = vsel %vm8177_vm6, %v2404_v2, 0.0  ;;  %v2487_v18 = vsel %vm8176_vm7, %v2404_v2, 0.0 }
 0x7c1   :  { %v2421_v50 = vadd.f32 %v2420_v56, %v2419_v24  ;;  %v2488_v15 = vadd.f32 %v2487_v18, %v2486_v60 }
 0x7c3   :  { %v2423_v52 = vadd.f32 %v2422_v33, %v2421_v50  ;;  %v2490_v26 = vadd.f32 %v2489_v43, %v2488_v15 }
 0x7c5   :  { %v2425_v30 = vadd.f32 %v2424_v3, %v2423_v52  ;;  %v2492_v63 = vadd.f32 %v2491_v57, %v2490_v26 }
 0x7c7   :  { %v2426_v51 = vrot.slane %v2425_v30, 4  ;;  %v2493_v49 = vrot.slane %v2492_v63, 4 }
 0x7c9   :  { %v2427_v11 = vadd.f32 %v2426_v51, %v2425_v30  ;;  %v2494_v40 = vadd.f32 %v2493_v49, %v2492_v63 }
 0x7cb   :  { %v2428_v38 = vrot.slane %v2427_v11, 2  ;;  %v2495_v1 = vrot.slane %v2494_v40, 2 }
 0x7cd   :  { %v2429_v23 = vadd.f32 %v2428_v38, %v2427_v11  ;;  %v2496_v45 = vadd.f32 %v2495_v1, %v2494_v40  ;;  %v5594_v38 = vld [vmem:[%s8148_s13] ss:$0 sm:$0xff] }
 0x7cf   :  { %v2430_v58 = vrot.slane %v2429_v23, 1  ;;  %v2497_v48 = vrot.slane %v2496_v45, 1 }
 0x7d1   :  { %v2431_v17 = vadd.f32 %v2430_v58, %v2429_v23  ;;  %v2498_v46 = vadd.f32 %v2497_v48, %v2496_v45 }
 0x7d3   :  { %v2432_v21 = vmul.f32 0.03125, %v2431_v17  ;;  %v2499_v31 = vmul.f32 0.03125, %v2498_v46  ;;  %v5595_v17 = vld [vmem:[%s8149_s14] ss:$0 sm:$0xff] }
 0x7d5   :  { %v2433_v22 = vsub.f32 %v2401_v54, %v2432_v21  ;;  %v2434_v4 = vsub.f32 %v2404_v2, %v2432_v21  ;;  %v2435_v6 = vsub.f32 %v5847_v36, %v2432_v21  ;;  %v2436_v47 = vsub.f32 %v5848_v62, %v2432_v21 }
 0x7d6   :  { %v2500_v12 = vsub.f32 %v2401_v54, %v2499_v31  ;;  %v2501_v0 = vsub.f32 %v2404_v2, %v2499_v31  ;;  %v2502_v44 = vsub.f32 %v5847_v36, %v2499_v31  ;;  %v2503_v10 = vsub.f32 %v5848_v62, %v2499_v31 }
 0x7d7   :  { %v2437_v20 = vmul.f32 %v2433_v22, %v2433_v22  ;;  %v2438_v14 = vmul.f32 %v2434_v4, %v2434_v4  ;;  %v2439_v28 = vmul.f32 %v2435_v6, %v2435_v6  ;;  %v2440_v39 = vmul.f32 %v2436_v47, %v2436_v47 }
 0x7d8   :  { %v2504_v42 = vmul.f32 %v2500_v12, %v2500_v12  ;;  %v2505_v27 = vmul.f32 %v2501_v0, %v2501_v0  ;;  %v2506_v16 = vmul.f32 %v2502_v44, %v2502_v44  ;;  %v2507_v55 = vmul.f32 %v2503_v10, %v2503_v10 }
 0x7d9   :  { %v2441_v13 = vsel %vm8177_vm6, %v2437_v20, 0.0  ;;  %v2442_v53 = vsel %vm8177_vm6, %v2438_v14, 0.0  ;;  %v2444_v29 = vsel %vm8177_vm6, %v2439_v28, 0.0  ;;  %v2446_v36 = vsel %vm8177_vm6, %v2440_v39, 0.0 }
 0x7da   :  { %v2443_v59 = vadd.f32 %v2442_v53, %v2441_v13  ;;  %v2508_v9 = vsel %vm8176_vm7, %v2504_v42, 0.0  ;;  %v2509_v37 = vsel %vm8176_vm7, %v2505_v27, 0.0  ;;  %v2511_v7 = vsel %vm8176_vm7, %v2506_v16, 0.0 }
 0x7db   :  { %v2510_v61 = vadd.f32 %v2509_v37, %v2508_v9  ;;  %v2513_v2 = vsel %vm8176_vm7, %v2507_v55, 0.0  ;;  %v2609_v37 = vld [vmem:[#allocation2 + $0x1c] sm:$0x8] }
 0x7dc   :  { %v2445_v8 = vadd.f32 %v2444_v29, %v2443_v59 }
 0x7dd   :  { %v2512_v54 = vadd.f32 %v2511_v7, %v2510_v61  ;;  %v7071_v7 = vld [vmem:[#allocation2 + $0x10] sm:$0x1] }
 0x7de   :  { %v2447_v62 = vadd.f32 %v2446_v36, %v2445_v8 }
 0x7df   :  { %v2514_v24 = vadd.f32 %v2513_v2, %v2512_v54  ;;  %v2635_v2 = vshrl.u32 %v2609_v37, 16 }
 0x7e0   :  { %v2448_v60 = vrot.slane %v2447_v62, 4 }
 0x7e1   :  { %v2515_v56 = vrot.slane %v2514_v24, 4 }
 0x7e2   :  { %v2449_v18 = vadd.f32 %v2448_v60, %v2447_v62 }
 0x7e3   :  { %v2516_v50 = vadd.f32 %v2515_v56, %v2514_v24 }
 0x7e4   :  { %v2450_v15 = vrot.slane %v2449_v18, 2 }
 0x7e5   :  { %v2517_v33 = vrot.slane %v2516_v50, 2 }
 0x7e6   :  { %v2451_v43 = vadd.f32 %v2450_v15, %v2449_v18 }
 0x7e7   :  { %v2518_v52 = vadd.f32 %v2517_v33, %v2516_v50 }
 0x7e8   :  { %v2452_v26 = vrot.slane %v2451_v43, 1 }
 0x7e9   :  { %v2519_v3 = vrot.slane %v2518_v52, 1 }
 0x7ea   :  { %v2453_v57 = vadd.f32 %v2452_v26, %v2451_v43 }
 0x7eb   :  { %v2520_v30 = vadd.f32 %v2519_v3, %v2518_v52  ;;  %v2724_v3 = vshll.u32 %v7071_v7, 16 }
 0x7ec   :  { %v2454_v63 = vmul.f32 0.03125, %v2453_v57 }
 0x7ed   :  { %v2521_v51 = vmul.f32 0.03125, %v2520_v30 }
 0x7ee   :  { %v2455_v49 = vadd.f32 1e-05, %v2454_v63 }
 0x7ef   :  { %v2522_v11 = vadd.f32 1e-05, %v2521_v51 }
 0x7f0   :  { %6016 = vrsqrt.f32 %v2455_v49  ;;  %v5969_v49 = vld [vmem:[%s8231_s0 + $0x20] sm:$0xff]  }
 0x7f1   :  { %6018 = vrsqrt.f32 %v2522_v11  ;;  %5849 = vmatprep.subr.bf16.mxu0 %v5969_v49 }
 0x7f2   :  { %5850 = vmatpush3.bf16.msra.mxu0 %v5969_v49 }
 0x7fd   :  { %v6017_v40 = vpop.eup %6016 }
 0x7fe   :  { %v6019_v1 = vpop.eup %6018  ;;  %v2457_v23 = vmul.f32 %v6017_v40, %v2433_v22  ;;  %v2458_v45 = vmul.f32 %v6017_v40, %v2434_v4  ;;  %v2459_v58 = vmul.f32 %v6017_v40, %v2435_v6  ;;  %v2460_v48 = vmul.f32 %v6017_v40, %v2436_v47 }
 0x7ff   :  { %v7059_v46 = vmul.f32 %v6019_v1, %v2501_v0  ;;  %v7061_v21 = vmul.f32 %v6019_v1, %v2500_v12  ;;  %v7063_v31 = vmul.f32 %v6019_v1, %v2503_v10  ;;  %v7065_v20 = vmul.f32 %v6019_v1, %v2502_v44  ;;  %v2606_v44 = vld [vmem:[#allocation2 + $0x4] sm:$0x8]  ;;  %v2771_v10 = vld [vmem:[#allocation2 + $0x10] sm:$0x1] }
 0x800   :  { %v2467_v14 = vmul.f32 %v5594_v38, %v2457_v23  ;;  %v2468_v28 = vmul.f32 %v5594_v38, %v2458_v45  ;;  %v2469_v42 = vmul.f32 %v5594_v38, %v2459_v58  ;;  %v2470_v27 = vmul.f32 %v5594_v38, %v2460_v48 }
 0x801   :  { %v2613_v9 = vshrl.u32 %v2606_v44, 16  ;;  %v2786_v29 = vrot.slane %v2771_v10, 5 }
 0x802   :  { %v2477_v22 = vadd.f32 %v5595_v17, %v2467_v14  ;;  %v2478_v4 = vadd.f32 %v5595_v17, %v2468_v28  ;;  %v2479_v6 = vadd.f32 %v5595_v17, %v2469_v42  ;;  %v2480_v47 = vadd.f32 %v5595_v17, %v2470_v27 }
 0x803   :  { %v7075_v62 = vrot.slane %v2613_v9, 11  ;;  %v2703_v9 = vld [vmem:[#allocation2 + $0x28] sm:$0x1] }
 0x804   :  { %v2481_v16 = vmax.f32 %v2477_v22, 0.0  ;;  %v2482_v39 = vmax.f32 %v2478_v4, 0.0  ;;  %v2483_v13 = vmax.f32 %v2479_v6, 0.0  ;;  %v2484_v53 = vmax.f32 %v2480_v47, 0.0 }
 0x806   :  { %v5722_v0 = vpack.c.bf16 %v2481_v16, %v2481_v16  ;;  %v5723_v59 = vpack.c.bf16 %v2482_v39, %v2482_v39  ;;  %v5724_v12 = vpack.c.bf16 %v2483_v13, %v2483_v13  ;;  %v5725_v55 = vpack.c.bf16 %v2484_v53, %v2484_v53 }
 0x808   :  { %2568 = vst.msk [vmem:[#allocation2 + $0x8] sm:$0xf] %vm8227_vm1, %v5722_v0  ;;  %v5603_v0 = vrot.slane %v2635_v2, 11  ;;  %vm8235_vm1 = vmmov %vm8229_vm0 }
 0x809   :  { %2569 = vst.msk [vmem:[#allocation2 + $0xc] sm:$0xf] %vm8228_vm15, %v5723_v59  ;;  %vm2668_vm15 = vcmask 257152   ;;  %vm8238_vm7 = vmmov %vm8235_vm1 }
 0x80a   :  { %2570 = vst.msk [vmem:[#allocation2 + $0x20] sm:$0xf] %vm8229_vm0, %v5724_v12  ;;  %vm8183_vm0 = vcmask 388352  }
 0x80b   :  { %2571 = vst.msk [vmem:[#allocation2 + $0x24] sm:$0xf] %vm8230_vm11, %v5725_v55  ;;  %vm8182_vm11 = vcmask 519552  }
 0x80f   :  { %v2673_v8 = vld [vmem:[#allocation2 + $0x8] sm:$0xf] }
 0x810   :  { %v2674_v61 = vld [vmem:[#allocation2 + $0xc] sm:$0xf]  ;;  %2681 = vrot.lane.b32.xlu0 %v2673_v8, %s6068_s4  ;;  %v2769_v54 = vld [vmem:[#allocation2 + $0x8] sm:$0xe] }
 0x811   :  { %2683 = vrot.lane.b32.xlu1 %v2674_v61, %s6068_s4  ;;  %v2770_v36 = vld [vmem:[#allocation2 + $0xc] sm:$0xf]  ;;  %v2675_v60 = vld [vmem:[#allocation2 + $0x20] sm:$0xf]  ;;  %v5604_v18 = vrot.slane %v2769_v54, 9 }
 0x812   :  { %v2676_v24 = vld [vmem:[#allocation2 + $0x24] sm:$0xf]  ;;  %v2783_v56 = vrot.slane %v2770_v36, 5  ;;  %v2607_v50 = vld [vmem:[#allocation2 + $0x8] sm:$0xf] }
 0x813   :  { %v2608_v15 = vld [vmem:[#allocation2 + $0xc] sm:$0xf]  ;;  %v2618_v33 = vshrl.u32 %v2607_v50, 16  ;;  %v2610_v26 = vld [vmem:[#allocation2 + $0x20] sm:$0xf]  ;;  %v2621_v30 = vshll.u32 %v2607_v50, 16 }
 0x814   :  { %v2627_v43 = vshrl.u32 %v2608_v15, 16  ;;  %v2630_v52 = vshll.u32 %v2608_v15, 16  ;;  %v2785_v57 = vrot.slane %v2783_v56, 4  ;;  %v2611_v63 = vld [vmem:[#allocation2 + $0x24] sm:$0xf]  ;;  %v2640_v51 = vshrl.u32 %v2610_v26, 16  ;;  %2685 = vrot.lane.b32.xlu0 %v2675_v60, %s6068_s4 }
 0x815   :  { %2687 = vrot.lane.b32.xlu1 %v2676_v24, %s6068_s4  ;;  %v2784_v11 = vsel %vm6291_vm13, %v5604_v18, %v2783_v56  ;;  %v2620_v40 = vrot.slane %v2618_v33, 7  ;;  %v2649_v1 = vshrl.u32 %v2611_v63, 16  ;;  %v2699_v23 = vld [vmem:[#allocation2 + $0xc] sm:$0xf]  ;;  %v2643_v58 = vshll.u32 %v2610_v26, 16 }
 0x816   :  { %v2629_v38 = vrot.slane %v2627_v43, 7  ;;  %v2642_v45 = vrot.slane %v2640_v51, 7  ;;  %v2714_v48 = vshll.u32 %v2699_v23, 16  ;;  %v2718_v17 = vshrl.u32 %v2699_v23, 16  ;;  %v2698_v14 = vld [vmem:[#allocation2 + $0x8] sm:$0xf] }
 0x817   :  { %v2625_v28 = vrot.slane %v2620_v40, 4  ;;  %v2651_v27 = vrot.slane %v2649_v1, 7  ;;  %v2652_v22 = vshll.u32 %v2611_v63, 16  ;;  %v2702_v4 = vld [vmem:[#allocation2 + $0x24] sm:$0xf]  ;;  %v2787_v6 = vsel %vm6291_vm13, %v2785_v57, %v2786_v29 }
 0x818   :  { %v2632_v42 = vor.u32 %v2630_v52, %v2629_v38  ;;  %v2623_v47 = vor.u32 %v2621_v30, %v2620_v40  ;;  %v7087_v16 = vrot.slane %v2714_v48, 5  ;;  %v2720_v39 = vrot.slane %v2718_v17, 4  ;;  %v2701_v13 = vld [vmem:[#allocation2 + $0x20] sm:$0xf]  ;;  %2795 = vrot.lane.b32.xlu0 %v2784_v11, %s6073_s11  ;;  %v2572_v29 = vld [vmem:[#allocation2 + $0x4] sm:$0x8] }
 0x819   :  { %2797 = vrot.lane.b32.xlu1 %v2787_v6, %s6073_s11  ;;  %v2647_v53 = vrot.slane %v2642_v45, 4  ;;  %v2645_v59 = vor.u32 %v2643_v58, %v2642_v45  ;;  %v2705_v12 = vshrl.u32 %v2698_v14, 16  ;;  %v2654_v44 = vor.u32 %v2652_v22, %v2651_v27  ;;  %v2575_v54 = vld [vmem:[#allocation2 + $0x1c] sm:$0x8]  ;;  %v2573_v18 = vld [vmem:[#allocation2 + $0x8] sm:$0xf] }
 0x81a   :  { %v2633_v55 = vsel %vm6259_vm10, %v2625_v28, %v2632_v42  ;;  %v2708_v10 = vshll.u32 %v2698_v14, 16  ;;  %v2738_v37 = vshll.u32 %v2702_v4, 16  ;;  %v2721_v61 = vor.u32 %v2720_v39, %v7087_v16  ;;  %v2576_v52 = vld [vmem:[#allocation2 + $0x20] sm:$0xf]  ;;  %v2574_v63 = vld [vmem:[#allocation2 + $0xc] sm:$0x7] }
 0x81b   :  { %v2707_v8 = vrot.slane %v2705_v12, 4  ;;  %v2742_v7 = vshrl.u32 %v2702_v4, 16  ;;  %v2729_v36 = vshrl.u32 %v2701_v13, 16  ;;  %v2624_v2 = vsel %vm6259_vm10, %v7075_v62, %v2623_v47  ;;  %v2577_v38 = vld [vmem:[#allocation2 + $0x24] sm:$0x7]  ;;  %v5970_v48 = vld [vmem:[%s8231_s0 + $0x18] sm:$0xff]  }
 0x81c   :  { %v2710_v24 = vrot.slane %v2708_v10, 5  ;;  %v7097_v60 = vrot.slane %v2738_v37, 5  ;;  %v2732_v56 = vshll.u32 %v2701_v13, 16  ;;  %2656 = vrot.lane.b32.xlu0 %v2624_v2, %s6064_s12  ;;  %v2726_v50 = vrot.slane %v2724_v3, 5  ;;  %v2773_v45 = vld [vmem:[#allocation2 + $0x24] sm:$0xf]  ;;  %5851 = vmatprep.subr.bf16.mxu0 %v5970_v48 }
 0x81d   :  { %2658 = vrot.lane.b32.xlu1 %v2633_v55, %s6064_s12  ;;  %v2744_v15 = vrot.slane %v2742_v7, 4  ;;  %v2731_v33 = vrot.slane %v2729_v36, 4  ;;  %v5600_v43 = vrot.slane %v2572_v29, 11  ;;  %v2748_v57 = vshll.u32 %v2703_v9, 16  ;;  %v5971_v17 = vld [vmem:[%s8231_s0 + $0x10] sm:$0xff]   ;;  %5852 = vmatpush3.bf16.msra.mxu0 %v5970_v48 }
 0x81e   :  { %v2711_v26 = vor.u32 %v2710_v24, %v2707_v8  ;;  %v2734_v30 = vrot.slane %v2732_v56, 5  ;;  %v5601_v51 = vrot.slane %v2575_v54, 11  ;;  %v2655_v62 = vsel %vm6259_vm10, %v2647_v53, %v2654_v44  ;;  %v2774_v12 = vld [vmem:[#allocation2 + $0x28] sm:$0x1]  ;;  %5853 = vmatprep.subr.bf16.mxu0 %v5971_v17  ;;  %v2772_v44 = vld [vmem:[#allocation2 + $0x20] sm:$0xe] }
 0x81f   :  { %v2646_v49 = vsel %vm6259_vm10, %v5603_v0, %v2645_v59  ;;  %v2722_v11 = vrot.slane %v2721_v61, 4  ;;  %v2586_v40 = vrot.slane %v2573_v18, 7  ;;  %v2745_v3 = vor.u32 %v2744_v15, %v7097_v60  ;;  %v5973_v8 = vld [vmem:[%s8231_s0] sm:$0xff]  }
 0x820   :  { %v2712_v1 = vrot.slane %v2711_v26, 4  ;;  %v2735_v23 = vor.u32 %v2734_v30, %v2731_v33  ;;  %v2593_v58 = vrot.slane %v2576_v52, 7  ;;  %2660 = vrot.lane.b32.xlu0 %v2646_v49, %s6064_s12  ;;  %v2589_v14 = vrot.slane %v2574_v63, 7 }
 0x821   :  { %2662 = vrot.lane.b32.xlu1 %v2655_v62, %s6064_s12  ;;  %v2588_v28 = vrot.slane %v2586_v40, 4  ;;  %v2587_v42 = vsel %vm6243_vm5, %v5600_v43, %v2586_v40  ;;  %v2596_v22 = vrot.slane %v2577_v38, 7  ;;  %v2727_v6 = vsel %vm6282_vm12, %v2722_v11, %v2726_v50  ;;  %5854 = vmatpush3.bf16.msra.mxu0 %v5971_v17 }
 0x822   :  { %2602 = vst.msk [vmem:[#allocation3] sm:$0xf] %vm8232_vm14, %v2587_v42  ;;  %v2595_v27 = vrot.slane %v2593_v58, 4  ;;  %v2594_v4 = vsel %vm6243_vm5, %v5601_v51, %v2593_v58  ;;  %v2750_v47 = vrot.slane %v2748_v57, 5  ;;  %v2790_v39 = vrot.slane %v2773_v45, 5 }
 0x823   :  { %v2590_v13 = vsel %vm6243_vm5, %v2588_v28, %v2589_v14  ;;  %2604 = vst.msk [vmem:[#allocation3 + $0x8] sm:$0xf] %vm8233_vm2, %v2594_v4  ;;  %v2717_v53 = vsel %vm6282_vm12, %v2712_v1, %v7087_v16  ;;  %v2746_v0 = vrot.slane %v2745_v3, 4  ;;  %v2736_v59 = vrot.slane %v2735_v23, 4  ;;  %v5972_v16 = vld [vmem:[%s8231_s0 + $0x8] sm:$0xff]  }
 0x824   :  { %2603 = vst.msk [vmem:[#allocation3 + $0x4] sm:$0xf] %vm8234_vm3, %v2590_v13  ;;  %v2597_v55 = vsel %vm6243_vm5, %v2595_v27, %v2596_v22  ;;  %2752 = vrot.lane.b32.xlu0 %v2717_v53, %s6071_s30  ;;  %v2793_v10 = vrot.slane %v2774_v12, 5  ;;  %v2792_v29 = vrot.slane %v2790_v39, 4  ;;  %v5605_v61 = vrot.slane %v2772_v44, 9  ;;  %5855 = vmatprep.subr.bf16.mxu0 %v5972_v16  ;;  %vm8236_vm3 = vmmov %vm8235_vm1 }
 0x825   :  { %2754 = vrot.lane.b32.xlu1 %v2727_v6, %s6071_s30  ;;  %2605 = vst.msk [vmem:[#allocation3 + $0xc] sm:$0xf] %vm8235_vm1, %v2597_v55  ;;  %v2751_v9 = vsel %vm6282_vm12, %v2746_v0, %v2750_v47  ;;  %v2741_v37 = vsel %vm6282_vm12, %v2736_v59, %v7097_v60  ;;  %5856 = vmatpush3.bf16.msra.mxu0 %v5972_v16  ;;  %vm8181_vm14 = vcmask 650752   ;;  %vm8175_vm2 = vcmask 654336  }
 0x826   :  { %v2794_v7 = vsel %vm6291_vm13, %v2792_v29, %v2793_v10  ;;  %v2791_v36 = vsel %vm6291_vm13, %v5605_v61, %v2790_v39  ;;  %5857 = vmatprep.subr.bf16.mxu0 %v5973_v8 }
 0x828   :  { %2756 = vrot.lane.b32.xlu0 %v2741_v37, %s6071_s30 }
 0x829   :  { %2758 = vrot.lane.b32.xlu1 %v2751_v9, %s6071_s30  ;;  %5858 = vmatpush3.bf16.msra.mxu0 %v5973_v8 }
 0x82c   :  { %2799 = vrot.lane.b32.xlu0 %v2791_v36, %s6073_s11 }
 0x82d   :  { %2801 = vrot.lane.b32.xlu1 %v2794_v7, %s6073_s11 }
 0x882   :  { %v2682_v2 = vpop.permute.xlu0 %2681 }
 0x883   :  { %v2684_v54 = vpop.permute.xlu1 %2683 }
 0x886   :  { %v2686_v60 = vpop.permute.xlu0 %2685 }
 0x887   :  { %v2688_v24 = vpop.permute.xlu1 %2687 }
 0x88a   :  { %v2796_v18 = vpop.permute.xlu0 %2795 }
 0x88b   :  { %v2798_v56 = vpop.permute.xlu1 %2797 }
 0x88e   :  { %v2657_v15 = vpop.permute.xlu0 %2656 }
 0x88f   :  { %v2659_v50 = vpop.permute.xlu1 %2658  ;;  %2669 = vst.msk [vmem:[#allocation3] sm:$0xf] %vm2668_vm15, %v2657_v15 }
 0x890   :  { %2670 = vst.msk [vmem:[#allocation3 + $0x4] sm:$0xf] %vm2668_vm15, %v2659_v50 }
 0x891   :  { %2695 = vst.msk [vmem:[#allocation3 + $0x4] sm:$0xf] %vm8183_vm0, %v2684_v54  ;;  %2694 = vst.msk [vmem:[#allocation3] sm:$0xf] %vm8183_vm0, %v2682_v2 }
 0x892   :  { %v2661_v43 = vpop.permute.xlu0 %2660 }
 0x893   :  { %v2663_v33 = vpop.permute.xlu1 %2662  ;;  %2671 = vst.msk [vmem:[#allocation3 + $0x8] sm:$0xf] %vm2668_vm15, %v2661_v43 }
 0x894   :  { %2672 = vst.msk [vmem:[#allocation3 + $0xc] sm:$0xf] %vm2668_vm15, %v2663_v33 }
 0x895   :  { %2696 = vst.msk [vmem:[#allocation3 + $0x8] sm:$0xf] %vm8183_vm0, %v2686_v60  ;;  %2697 = vst.msk [vmem:[#allocation3 + $0xc] sm:$0xf] %vm8183_vm0, %v2688_v24 }
 0x896   :  { %v2753_v26 = vpop.permute.xlu0 %2752 }
 0x897   :  { %v2755_v52 = vpop.permute.xlu1 %2754  ;;  %2765 = vst.msk [vmem:[#allocation3] sm:$0xf] %vm8182_vm11, %v2753_v26  ;;  %v5615_v26 = vld [vmem:[%s8150_s15] ss:$0 sm:$0xff]  ;;  %s6074_s15 = smov 80  }
 0x898   :  { %2766 = vst.msk [vmem:[#allocation3 + $0x4] sm:$0xf] %vm8182_vm11, %v2755_v52 }
 0x899   :  { %2809 = vst.msk [vmem:[#allocation3 + $0x4] sm:$0xf] %vm8181_vm14, %v2798_v56  ;;  %2808 = vst.msk [vmem:[#allocation3] sm:$0xf] %vm8181_vm14, %v2796_v18 }
 0x89a   :  { %v2757_v30 = vpop.permute.xlu0 %2756 }
 0x89b   :  { %v2759_v57 = vpop.permute.xlu1 %2758  ;;  %2767 = vst.msk [vmem:[#allocation3 + $0x8] sm:$0xf] %vm8182_vm11, %v2757_v30 }
 0x89c   :  { %2768 = vst.msk [vmem:[#allocation3 + $0xc] sm:$0xf] %vm8182_vm11, %v2759_v57 }
 0x89e   :  { %v2800_v51 = vpop.permute.xlu0 %2799 }
 0x89f   :  { %v2802_v63 = vpop.permute.xlu1 %2801  ;;  %2810 = vst.msk [vmem:[#allocation3 + $0x8] sm:$0xf] %vm8181_vm14, %v2800_v51 }
 0x8a0   :  { %v2813_v62 = vld [vmem:[#allocation3 + $0x4] sm:$0xf]  ;;  %v2812_v49 = vld [vmem:[#allocation3] sm:$0xf]  ;;  %2811 = vst.msk [vmem:[#allocation3 + $0xc] sm:$0xf] %vm8181_vm14, %v2802_v63 }
 0x8a1   :  { %v5606_v11 = vcombine.low %v2812_v49, %v2813_v62  ;;  %v5616_v62 = vld [vmem:[%s8151_s16] ss:$0 sm:$0xff] }
 0x8a3   :  { %5859 = vmatprep.mubr.msk.bf16.mxu0 %vm8175_vm2, %v5606_v11 }
 0x8a6   :  { %v2814_v38 = vld [vmem:[#allocation3 + $0x8] sm:$0xf] }
 0x8a7   :  { %v2815_v40 = vld [vmem:[#allocation3 + $0xc] sm:$0xf] }
 0x8a8   :  { %v5607_v1 = vcombine.low %v2814_v38, %v2815_v40 }
 0x8aa   :  { %5860 = vmatmul.mubr.msk.bf16.vlgmr.msra.gmra.mxu0 %vm8175_vm2, %v5607_v1  ;;  %vm8237_vm2 = vmmov %vm8235_vm1 }
 0x96a   :  { %v5861_v3 = vpop.f32.mrf.mxu0 }
 0x96b   :  { %v2917_v28 = vsel %vm8177_vm6, %v5861_v3, 0.0 }
 0x96c   :  { %v2897_v23 = vpop.f32.mrf.mxu0 }
 0x96d   :  { %v2914_v48 = vsel %vm8177_vm6, %v2897_v23, 0.0 }
 0x96e   :  { %v5862_v45 = vpop.f32.mrf.mxu0 }
 0x96f   :  { %v2919_v27 = vsel %vm8177_vm6, %v5862_v45, 0.0 }
 0x970   :  { %v2900_v58 = vpop.f32.mrf.mxu0 }
 0x971   :  { %v2915_v17 = vsel %vm8177_vm6, %v2900_v58, 0.0 }
 0x972   :  { %v2916_v14 = vadd.f32 %v2915_v17, %v2914_v48 }
 0x974   :  { %v2918_v42 = vadd.f32 %v2917_v28, %v2916_v14 }
 0x976   :  { %v2920_v22 = vadd.f32 %v2919_v27, %v2918_v42 }
 0x978   :  { %v2921_v4 = vrot.slane %v2920_v22, 4 }
 0x97a   :  { %v2922_v6 = vadd.f32 %v2921_v4, %v2920_v22  ;;  %v3128_v4 = vld [vmem:[#allocation2 + $0x4] sm:$0x8] }
 0x97c   :  { %v2923_v47 = vrot.slane %v2922_v6, 2 }
 0x97e   :  { %v2924_v39 = vadd.f32 %v2923_v47, %v2922_v6  ;;  %v3086_v6 = vld [vmem:[#allocation2 + $0x4] sm:$0x8]  ;;  %v7188_v47 = vld [vmem:[#allocation2 + $0x1c] sm:$0x8] }
 0x980   :  { %v2925_v13 = vrot.slane %v2924_v39, 1 }
 0x982   :  { %v2926_v53 = vadd.f32 %v2925_v13, %v2924_v39  ;;  %v3016_v39 = vld [vmem:[#allocation2 + $0x4] sm:$0xc]  ;;  %v7190_v13 = vld [vmem:[#allocation2 + $0x10] sm:$0x1] }
 0x984   :  { %v2927_v0 = vmul.f32 0.03125, %v2926_v53  ;;  %v7192_v53 = vld [vmem:[#allocation2 + $0x28] sm:$0x1] }
 0x986   :  { %v2928_v59 = vsub.f32 %v2897_v23, %v2927_v0  ;;  %v2929_v12 = vsub.f32 %v2900_v58, %v2927_v0  ;;  %v2930_v55 = vsub.f32 %v5861_v3, %v2927_v0  ;;  %v2931_v44 = vsub.f32 %v5862_v45, %v2927_v0  ;;  %v7194_v0 = vld [vmem:[#allocation2 + $0x10] sm:$0x3] }
 0x988   :  { %v2932_v10 = vmul.f32 %v2928_v59, %v2928_v59  ;;  %v2933_v16 = vmul.f32 %v2929_v12, %v2929_v12  ;;  %v2934_v9 = vmul.f32 %v2930_v55, %v2930_v55  ;;  %v2935_v37 = vmul.f32 %v2931_v44, %v2931_v44 }
 0x98a   :  { %v2936_v29 = vsel %vm8177_vm6, %v2932_v10, 0.0  ;;  %v2937_v61 = vsel %vm8177_vm6, %v2933_v16, 0.0  ;;  %v2939_v7 = vsel %vm8177_vm6, %v2934_v9, 0.0  ;;  %v2941_v54 = vsel %vm8177_vm6, %v2935_v37, 0.0 }
 0x98b   :  { %v2938_v8 = vadd.f32 %v2937_v61, %v2936_v29  ;;  %v3023_v10 = vshrl.u32 %v3016_v39, 16  ;;  %v3026_v16 = vshll.u32 %v3016_v39, 16  ;;  %v3305_v9 = vrot.slane %v7190_v13, 5  ;;  %v3131_v29 = vld [vmem:[#allocation2 + $0x1c] sm:$0x8] }
 0x98c   :  { %v3312_v37 = vrot.slane %v7192_v53, 5  ;;  %v3220_v61 = vld [vmem:[#allocation2 + $0x10] sm:$0x1] }
 0x98d   :  { %v2940_v36 = vadd.f32 %v2939_v7, %v2938_v8  ;;  %v3427_v8 = vrot.slane %v7194_v0, 6  ;;  %v3333_v7 = vld [vmem:[#allocation2 + $0x10] sm:$0x3] }
 0x98f   :  { %v2942_v2 = vadd.f32 %v2941_v54, %v2940_v36  ;;  %v7200_v36 = vld [vmem:[#allocation2 + $0x28] sm:$0x3] }
 0x991   :  { %v2943_v24 = vrot.slane %v2942_v2, 4 }
 0x993   :  { %v2944_v60 = vadd.f32 %v2943_v24, %v2942_v2 }
 0x995   :  { %v2945_v56 = vrot.slane %v2944_v60, 2 }
 0x997   :  { %v2946_v18 = vadd.f32 %v2945_v56, %v2944_v60 }
 0x999   :  { %v2947_v50 = vrot.slane %v2946_v18, 1 }
 0x99b   :  { %v2948_v15 = vadd.f32 %v2947_v50, %v2946_v18  ;;  %v3157_v50 = vshrl.u32 %v3131_v29, 16 }
 0x99d   :  { %v2949_v33 = vmul.f32 0.03125, %v2948_v15  ;;  %v3244_v15 = vshll.u32 %v3220_v61, 16 }
 0x99f   :  { %v2950_v43 = vadd.f32 1e-05, %v2949_v33  ;;  %v3025_v33 = vrot.slane %v3023_v10, 6 }
 0x9a1   :  { %6020 = vrsqrt.f32 %v2950_v43  ;;  %v3028_v43 = vrot.slane %v3026_v16, 7 }
 0x9ae   :  { %v6021_v52 = vpop.eup %6020 }
 0x9af   :  { %v2952_v57 = vmul.f32 %v6021_v52, %v2928_v59  ;;  %v2953_v30 = vmul.f32 %v6021_v52, %v2929_v12  ;;  %v2954_v63 = vmul.f32 %v6021_v52, %v2930_v55  ;;  %v2955_v51 = vmul.f32 %v6021_v52, %v2931_v44  ;;  %v3019_v12 = vld [vmem:[#allocation2 + $0x1c] sm:$0xc] }
 0x9b0   :  { %v3135_v59 = vshrl.u32 %v3128_v4, 16  ;;  %v5621_v55 = vrot.slane %v3086_v6, 11  ;;  %v5622_v44 = vrot.slane %v7188_v47, 11  ;;  %v3051_v54 = vshrl.u32 %v3019_v12, 16 }
 0x9b1   :  { %v2962_v49 = vmul.f32 %v5615_v26, %v2952_v57  ;;  %v2963_v11 = vmul.f32 %v5615_v26, %v2953_v30  ;;  %v2964_v40 = vmul.f32 %v5615_v26, %v2954_v63  ;;  %v2965_v38 = vmul.f32 %v5615_v26, %v2955_v51 }
 0x9b2   :  { %v7202_v60 = vrot.slane %v3135_v59, 11  ;;  %v3054_v56 = vshll.u32 %v3019_v12, 16  ;;  %v3357_v57 = vshrl.u32 %v3333_v7, 16  ;;  %v3360_v30 = vshll.u32 %v3333_v7, 16 }
 0x9b3   :  { %v2972_v1 = vadd.f32 %v5616_v62, %v2962_v49  ;;  %v2973_v3 = vadd.f32 %v5616_v62, %v2963_v11  ;;  %v2974_v23 = vadd.f32 %v5616_v62, %v2964_v40  ;;  %v2975_v45 = vadd.f32 %v5616_v62, %v2965_v38  ;;  %v7207_v49 = vld [vmem:[#allocation2 + $0x28] sm:$0x1] }
 0x9b4   :  { %v3385_v63 = vshrl.u32 %v7200_v36, 16  ;;  %v7219_v6 = vrot.slane %v3051_v54, 6  ;;  %v7221_v39 = vrot.slane %v3054_v56, 7  ;;  %v7231_v7 = vrot.slane %v3360_v30, 6 }
 0x9b5   :  { %v2976_v58 = vmax.f32 %v2972_v1, 0.0  ;;  %v2977_v48 = vmax.f32 %v2973_v3, 0.0  ;;  %v2978_v17 = vmax.f32 %v2974_v23, 0.0  ;;  %v2979_v14 = vmax.f32 %v2975_v45, 0.0 }
 0x9b7   :  { %v5726_v28 = vpack.c.bf16 %v2976_v58, %v2976_v58  ;;  %v5727_v42 = vpack.c.bf16 %v2977_v48, %v2977_v48  ;;  %v5728_v27 = vpack.c.bf16 %v2978_v17, %v2978_v17  ;;  %v5729_v22 = vpack.c.bf16 %v2979_v14, %v2979_v14 }
 0x9b8   :  { %v3388_v58 = vshll.u32 %v7200_v36, 16  ;;  %v3029_v48 = vor.u32 %v3028_v43, %v3025_v33  ;;  %v7212_v14 = vrot.slane %v3157_v50, 11 }
 0x9b9   :  { %3012 = vst.msk [vmem:[#allocation2 + $0x8] sm:$0xf] %vm8236_vm3, %v5726_v28  ;;  %v7214_v28 = vrot.slane %v3244_v15, 5  ;;  %vm8242_vm3 = vmmov %vm8235_vm1 }
 0x9ba   :  { %3013 = vst.msk [vmem:[#allocation2 + $0xc] sm:$0xf] %vm8235_vm1, %v5727_v42  ;;  %v3268_v42 = vshll.u32 %v7207_v49, 16  ;;  %v7233_v54 = vrot.slane %v3029_v48, 4 }
 0x9bb   :  { %3014 = vst.msk [vmem:[#allocation2 + $0x20] sm:$0xf] %vm8237_vm2, %v5728_v27  ;;  %vm8241_vm2 = vmmov %vm8235_vm1 }
 0x9bc   :  { %3015 = vst.msk [vmem:[#allocation2 + $0x24] sm:$0xf] %vm8238_vm7, %v5729_v22  ;;  %v7300_v0 = vrot.slane %v3268_v42, 5  ;;  %vm8240_vm7 = vmmov %vm8235_vm1 }
 0x9c0   :  { %v3194_v24 = vld [vmem:[#allocation2 + $0x8] sm:$0xf] }
 0x9c1   :  { %v3195_v2 = vld [vmem:[#allocation2 + $0xc] sm:$0xf]  ;;  %3202 = vrot.lane.b32.xlu0 %v3194_v24, %s6071_s30  ;;  %v3087_v18 = vld [vmem:[#allocation2 + $0x8] sm:$0xf] }
 0x9c2   :  { %3204 = vrot.lane.b32.xlu1 %v3195_v2, %s6071_s30  ;;  %v3100_v52 = vrot.slane %v3087_v18, 7  ;;  %v3090_v26 = vld [vmem:[#allocation2 + $0x20] sm:$0xf]  ;;  %v3088_v51 = vld [vmem:[#allocation2 + $0xc] sm:$0x7] }
 0x9c3   :  { %v3289_v62 = vld [vmem:[#allocation2 + $0xc] sm:$0xf]  ;;  %v3197_v11 = vld [vmem:[#allocation2 + $0x24] sm:$0xf]  ;;  %v3196_v40 = vld [vmem:[#allocation2 + $0x20] sm:$0xf] }
 0x9c4   :  { %v3102_v38 = vrot.slane %v3100_v52, 4  ;;  %v3107_v1 = vrot.slane %v3090_v26, 7  ;;  %v3302_v3 = vrot.slane %v3289_v62, 5  ;;  %v3288_v23 = vld [vmem:[#allocation2 + $0x8] sm:$0xe]  ;;  %v3103_v17 = vrot.slane %v3088_v51, 7 }
 0x9c5   :  { %3206 = vrot.lane.b32.xlu0 %v3196_v40, %s6071_s30  ;;  %v3292_v45 = vld [vmem:[#allocation2 + $0x24] sm:$0xf]  ;;  %v3101_v27 = vsel %vm6243_vm5, %v5621_v55, %v3100_v52  ;;  %v3291_v4 = vld [vmem:[#allocation2 + $0x20] sm:$0xe]  ;;  %v5625_v10 = vrot.slane %v3288_v23, 9  ;;  %v7229_v55 = vrot.slane %v3357_v57, 5  ;;  %v3057_v52 = vor.u32 %v7221_v39, %v7219_v6 }
 0x9c6   :  { %3208 = vrot.lane.b32.xlu1 %v3197_v11, %s6071_s30  ;;  %v3091_v22 = vld [vmem:[#allocation2 + $0x24] sm:$0x7]  ;;  %v3104_v59 = vsel %vm6243_vm5, %v3102_v38, %v3103_v17  ;;  %v3109_v12 = vrot.slane %v3107_v1, 4  ;;  %v3309_v16 = vrot.slane %v3292_v45, 5  ;;  %v3304_v29 = vrot.slane %v3302_v3, 4 }
 0x9c7   :  { %v7227_v61 = vld [vmem:[#allocation2 + $0xc] sm:$0xf]  ;;  %v3110_v2 = vrot.slane %v3091_v22, 7  ;;  %v5626_v24 = vrot.slane %v3291_v4, 9  ;;  %v7235_v56 = vld [vmem:[#allocation2 + $0x8] sm:$0xc]  ;;  %v3108_v50 = vsel %vm6243_vm5, %v5622_v44, %v3107_v1  ;;  %v3303_v57 = vsel %vm6291_vm13, %v5625_v10, %v3302_v3 }
 0x9c8   :  { %v3219_v18 = vld [vmem:[#allocation2 + $0xc] sm:$0xf]  ;;  %v3129_v15 = vld [vmem:[#allocation2 + $0x8] sm:$0xf]  ;;  %v7241_v43 = vld [vmem:[#allocation2 + $0x20] sm:$0xf]  ;;  %v3306_v44 = vsel %vm6291_vm13, %v3304_v29, %v3305_v9 }
 0x9c9   :  { %3112 = vrot.lane.b32.xlu0 %v3101_v27, %s6064_s12  ;;  %v3130_v33 = vld [vmem:[#allocation2 + $0xc] sm:$0xf]  ;;  %v3111_v26 = vsel %vm6243_vm5, %v3109_v12, %v3110_v2  ;;  %v3311_v30 = vrot.slane %v3309_v16, 4  ;;  %v3424_v51 = vrot.slane %v7227_v61, 6  ;;  %v3133_v47 = vld [vmem:[#allocation2 + $0x24] sm:$0xf]  ;;  %v3310_v3 = vsel %vm6291_vm13, %v5626_v24, %v3309_v16 }
 0x9ca   :  { %3114 = vrot.lane.b32.xlu1 %v3104_v59, %s6064_s12  ;;  %v3218_v62 = vld [vmem:[#allocation2 + $0x8] sm:$0xf]  ;;  %v5627_v11 = vrot.slane %v7235_v56, 10  ;;  %v3234_v40 = vshll.u32 %v3219_v18, 16  ;;  %v3238_v38 = vshrl.u32 %v3219_v18, 16  ;;  %v3140_v23 = vshrl.u32 %v3129_v15, 16 }
 0x9cb   :  { %v3222_v1 = vld [vmem:[#allocation2 + $0x24] sm:$0xf]  ;;  %v3149_v45 = vshrl.u32 %v3130_v33, 16  ;;  %v3162_v48 = vshrl.u32 %v7241_v43, 16  ;;  %v3221_v17 = vld [vmem:[#allocation2 + $0x20] sm:$0xf]  ;;  %v3313_v9 = vsel %vm6291_vm13, %v3311_v30, %v3312_v37 }
 0x9cc   :  { %v3171_v27 = vshrl.u32 %v3133_v47, 16  ;;  %v7260_v22 = vrot.slane %v3234_v40, 5  ;;  %v3240_v13 = vrot.slane %v3238_v38, 4  ;;  %v3225_v4 = vshrl.u32 %v3218_v62, 16 }
 0x9cd   :  { %3116 = vrot.lane.b32.xlu0 %v3108_v50, %s6064_s12  ;;  %v3228_v59 = vshll.u32 %v3218_v62, 16  ;;  %v3258_v12 = vshll.u32 %v3222_v1, 16  ;;  %v3262_v10 = vshrl.u32 %v3222_v1, 16  ;;  %v3426_v16 = vrot.slane %v3424_v51, 4 }
 0x9ce   :  { %3118 = vrot.lane.b32.xlu1 %v3111_v26, %s6064_s12  ;;  %v3152_v29 = vshll.u32 %v3130_v33, 16  ;;  %v3249_v2 = vshrl.u32 %v3221_v17, 16  ;;  %v3252_v24 = vshll.u32 %v3221_v17, 16  ;;  %v3142_v56 = vrot.slane %v3140_v23, 7  ;;  %v3332_v26 = vld [vmem:[#allocation2 + $0xc] sm:$0xf] }
 0x9cf   :  { %v3151_v18 = vrot.slane %v3149_v45, 7  ;;  %v3143_v53 = vshll.u32 %v3129_v15, 16  ;;  %v3164_v50 = vrot.slane %v3162_v48, 7  ;;  %v3173_v37 = vrot.slane %v3171_v27, 7  ;;  %v3331_v23 = vld [vmem:[#allocation2 + $0x8] sm:$0xe] }
 0x9d0   :  { %v3241_v30 = vor.u32 %v3240_v13, %v7260_v22  ;;  %v3227_v62 = vrot.slane %v3225_v4, 4  ;;  %v3230_v40 = vrot.slane %v3228_v59, 5  ;;  %v3165_v38 = vshll.u32 %v7241_v43, 16  ;;  %v5975_v27 = vld [vmem:[%s8239_s8 + $0x30] sm:$0xff]  }
 0x9d1   :  { %3314 = vrot.lane.b32.xlu0 %v3303_v57, %s6074_s15  ;;  %v5974_v57 = vld [vmem:[%s8239_s8 + $0x38] sm:$0xff]   ;;  %v7275_v33 = vrot.slane %v3258_v12, 5  ;;  %v3264_v1 = vrot.slane %v3262_v10, 4  ;;  %v3251_v15 = vrot.slane %v3249_v2, 4  ;;  %v3254_v45 = vrot.slane %v3252_v24, 5 }
 0x9d2   :  { %3316 = vrot.lane.b32.xlu1 %v3306_v44, %s6074_s15  ;;  %v3174_v44 = vshll.u32 %v3133_v47, 16  ;;  %v3347_v48 = vshrl.u32 %v3332_v26, 16  ;;  %v3350_v17 = vshll.u32 %v3332_v26, 16  ;;  %v3147_v13 = vrot.slane %v3142_v56, 4  ;;  %5863 = vmatprep.subr.bf16.mxu1 %v5974_v57  ;;  %v3017_v26 = vld [vmem:[#allocation2 + $0x8] sm:$0xf] }
 0x9d3   :  { %v3154_v47 = vor.u32 %v3152_v29, %v3151_v18  ;;  %v3145_v4 = vor.u32 %v3143_v53, %v3142_v56  ;;  %v3169_v43 = vrot.slane %v3164_v50, 4  ;;  %v3167_v12 = vor.u32 %v3165_v38, %v3164_v50  ;;  %5864 = vmatpush3.bf16.msra.mxu1 %v5974_v57  ;;  %v5976_v56 = vld [vmem:[%s8239_s8 + $0x28] sm:$0xff]   ;;  %v3335_v50 = vld [vmem:[#allocation2 + $0x24] sm:$0xf] }
 0x9d4   :  { %v3176_v59 = vor.u32 %v3174_v44, %v3173_v37  ;;  %v7282_v10 = vrot.slane %v3241_v30, 4  ;;  %v3425_v2 = vsel %vm6383_vm9, %v5627_v11, %v3424_v51  ;;  %v3265_v29 = vor.u32 %v3264_v1, %v7275_v33  ;;  %5865 = vmatprep.subr.bf16.mxu1 %v5975_v27  ;;  %v3018_v11 = vld [vmem:[#allocation2 + $0xc] sm:$0x7]  ;;  %v5977_v44 = vld [vmem:[%s8239_s8 + $0x20] sm:$0xff]  }
 0x9d5   :  { %3318 = vrot.lane.b32.xlu0 %v3310_v3, %s6074_s15  ;;  %v3428_v3 = vsel %vm6383_vm9, %v3426_v16, %v3427_v8  ;;  %v3338_v24 = vshrl.u32 %v3331_v23, 16  ;;  %v3255_v8 = vor.u32 %v3254_v45, %v3251_v15  ;;  %v3349_v61 = vrot.slane %v3347_v48, 5 }
 0x9d6   :  { %3320 = vrot.lane.b32.xlu1 %v3313_v9, %s6074_s15  ;;  %v3231_v9 = vor.u32 %v3230_v40, %v3227_v62  ;;  %v3352_v51 = vrot.slane %v3350_v17, 6  ;;  %v3155_v16 = vsel %vm6259_vm10, %v3147_v13, %v3154_v47  ;;  %v3146_v18 = vsel %vm6259_vm10, %v7202_v60, %v3145_v4  ;;  %v3334_v62 = vld [vmem:[#allocation2 + $0x20] sm:$0xe] }
 0x9d7   :  { %v3341_v53 = vshll.u32 %v3331_v23, 16  ;;  %v7310_v49 = vrot.slane %v3057_v52, 4  ;;  %v3177_v42 = vsel %vm6259_vm10, %v3169_v43, %v3176_v59  ;;  %v3168_v37 = vsel %vm6259_vm10, %v7212_v14, %v3167_v12  ;;  %v3020_v40 = vld [vmem:[#allocation2 + $0x20] sm:$0xf]  ;;  %5866 = vmatpush3.bf16.msra.mxu1 %v5975_v27  ;;  %v3021_v23 = vld [vmem:[#allocation2 + $0x24] sm:$0x7] }
 0x9d8   :  { %v3247_v60 = vsel %vm6282_vm12, %v7282_v10, %v7214_v28  ;;  %v3232_v30 = vrot.slane %v3231_v9, 4  ;;  %v7321_v57 = vrot.slane %v3265_v29, 4  ;;  %v3340_v6 = vrot.slane %v3338_v24, 5  ;;  %5867 = vmatprep.subr.bf16.mxu1 %v5976_v56 }
 0x9d9   :  { %3436 = vrot.lane.b32.xlu0 %v3425_v2, %s6075_s7  ;;  %v3042_v39 = vshrl.u32 %v3018_v11, 16  ;;  %v3045_v52 = vshll.u32 %v3018_v11, 16  ;;  %v3256_v14 = vrot.slane %v3255_v8, 4  ;;  %v7328_v28 = vor.u32 %v3352_v51, %v3349_v61 }
 0x9da   :  { %3438 = vrot.lane.b32.xlu1 %v3428_v3, %s6075_s7  ;;  %v3375_v38 = vshrl.u32 %v3335_v50, 16  ;;  %v3032_v1 = vshrl.u32 %v3017_v26, 16  ;;  %v3343_v15 = vrot.slane %v3341_v53, 6  ;;  %v3378_v45 = vshll.u32 %v3335_v50, 16 }
 0x9db   :  { %v3366_v48 = vshrl.u32 %v3334_v62, 16  ;;  %v3035_v17 = vshll.u32 %v3017_v26, 16  ;;  %v3369_v27 = vshll.u32 %v3334_v62, 16  ;;  %v3060_v47 = vshrl.u32 %v3020_v40, 16  ;;  %5868 = vmatpush3.bf16.msra.mxu1 %v5976_v56 }
 0x9dc   :  { %v3034_v13 = vrot.slane %v3032_v1, 6  ;;  %v3063_v4 = vshll.u32 %v3020_v40, 16  ;;  %v3044_v43 = vrot.slane %v3042_v39, 6  ;;  %v3047_v59 = vrot.slane %v3045_v52, 7  ;;  %5869 = vmatprep.subr.bf16.mxu1 %v5977_v44 }
 0x9dd   :  { %3178 = vrot.lane.b32.xlu0 %v3146_v18, %s6068_s4  ;;  %v3037_v12 = vrot.slane %v3035_v17, 7  ;;  %v3070_v10 = vshrl.u32 %v3021_v23, 16  ;;  %v3237_v9 = vsel %vm6282_vm12, %v3232_v30, %v7260_v22  ;;  %v3062_v3 = vrot.slane %v3060_v47, 6  ;;  %v5981_v47 = vld [vmem:[%s8239_s8] sm:$0xff]  }
 0x9de   :  { %3180 = vrot.lane.b32.xlu1 %v3155_v16, %s6068_s4  ;;  %v3065_v2 = vrot.slane %v3063_v4, 7  ;;  %v3073_v29 = vshll.u32 %v3021_v23, 16  ;;  %v3344_v24 = vor.u32 %v3343_v15, %v3340_v6  ;;  %v3377_v8 = vrot.slane %v3375_v38, 5  ;;  %v3415_v23 = vld [vmem:[#allocation2 + $0x28] sm:$0x3] }
 0x9df   :  { %v3038_v61 = vor.u32 %v3037_v12, %v3034_v13  ;;  %v3072_v56 = vrot.slane %v3070_v10, 6  ;;  %v3380_v51 = vrot.slane %v3378_v45, 6  ;;  %v3368_v11 = vrot.slane %v3366_v48, 5  ;;  %5870 = vmatpush3.bf16.msra.mxu1 %v5977_v44  ;;  %v3414_v44 = vld [vmem:[#allocation2 + $0x24] sm:$0xf]  ;;  %v5980_v48 = vld [vmem:[%s8239_s8 + $0x8] sm:$0xff]  }
 0x9e0   :  { %v3066_v16 = vor.u32 %v3065_v2, %v3062_v3  ;;  %v3075_v18 = vrot.slane %v3073_v29, 7  ;;  %v3371_v53 = vrot.slane %v3369_v27, 6  ;;  %v3048_v50 = vor.u32 %v3047_v59, %v3044_v43  ;;  %v3413_v15 = vld [vmem:[#allocation2 + $0x20] sm:$0xc]  ;;  %v6034_v59 = vld [vmem:[%s8148_s13] ss:$0 sm:$0xff] }
 0x9e1   :  { %3182 = vrot.lane.b32.xlu0 %v3168_v37, %s6068_s4  ;;  %v3040_v26 = vrot.slane %v3038_v61, 4  ;;  %v3387_v62 = vrot.slane %v3385_v63, 5  ;;  %v3390_v40 = vrot.slane %v3388_v58, 6  ;;  %v3363_v63 = vor.u32 %v7231_v7, %v7229_v55  ;;  %v5979_v55 = vld [vmem:[%s8239_s8 + $0x10] sm:$0xff]   ;;  %v6035_v12 = vld [vmem:[%s8149_s14] ss:$0 sm:$0xff] }
 0x9e2   :  { %3184 = vrot.lane.b32.xlu1 %v3177_v42, %s6068_s4  ;;  %v3039_v42 = vsel %vm6377_vm8, %v7233_v54, %v3038_v61  ;;  %v3068_v22 = vrot.slane %v3066_v16, 4  ;;  %v3076_v37 = vor.u32 %v3075_v18, %v3072_v56  ;;  %v3067_v30 = vsel %vm6377_vm8, %v7310_v49, %v3066_v16 }
 0x9e3   :  { %3082 = vst.msk [vmem:[#allocation3] sm:$0xf] %vm8240_vm7, %v3039_v42  ;;  %v3049_v54 = vsel %vm6377_vm8, %v3040_v26, %v3048_v50  ;;  %v3261_v49 = vsel %vm6282_vm12, %v3256_v14, %v7275_v33  ;;  %v3355_v58 = vrot.slane %v7328_v28, 4  ;;  %v3345_v6 = vrot.slane %v3344_v24, 4  ;;  %v5978_v33 = vld [vmem:[%s8239_s8 + $0x18] sm:$0xff]  }
 0x9e4   :  { %3084 = vst.msk [vmem:[#allocation3 + $0x8] sm:$0xf] %vm8241_vm2, %v3067_v30  ;;  %v3077_v36 = vsel %vm6377_vm8, %v3068_v22, %v3076_v37  ;;  %v3381_v39 = vor.u32 %v3380_v51, %v3377_v8  ;;  %v3372_v52 = vor.u32 %v3371_v53, %v3368_v11  ;;  %5871 = vmatprep.subr.bf16.mxu1 %v5978_v33  ;;  %v3434_v45 = vrot.slane %v3415_v23, 6 }
 0x9e5   :  { %3272 = vrot.lane.b32.xlu0 %v3237_v9, %s6073_s11  ;;  %3083 = vst.msk [vmem:[#allocation3 + $0x4] sm:$0xf] %vm8242_vm3, %v3049_v54  ;;  %v3391_v7 = vor.u32 %v3390_v40, %v3387_v62  ;;  %5872 = vmatpush3.bf16.msra.mxu1 %v5978_v33  ;;  %v3354_v14 = vsel %vm6337_vm4, %v3345_v6, %v7328_v28  ;;  %v5628_v13 = vrot.slane %v3413_v15, 10  ;;  %vm8179_vm7 = vcmask 781952  }
 0x9e6   :  { %3274 = vrot.lane.b32.xlu1 %v3247_v60, %s6073_s11  ;;  %v3271_v60 = vsel %vm6282_vm12, %v7321_v57, %v7300_v0  ;;  %3085 = vst.msk [vmem:[#allocation3 + $0xc] sm:$0xf] %vm8235_vm1, %v3077_v36  ;;  %v3431_v0 = vrot.slane %v3414_v44, 6  ;;  %v3364_v57 = vsel %vm6337_vm4, %v3355_v58, %v3363_v63  ;;  %v3383_v38 = vrot.slane %v3381_v39, 4  ;;  %5873 = vmatprep.subr.bf16.mxu1 %v5979_v55 }
 0x9e7   :  { %v3373_v1 = vrot.slane %v3372_v52, 4  ;;  %vm8178_vm2 = vcmask 913152   ;;  %vm8180_vm3 = vcmask 1044352  }
 0x9e8   :  { %v3392_v17 = vsel %vm6337_vm4, %v3383_v38, %v3391_v7  ;;  %v3433_v27 = vrot.slane %v3431_v0, 4  ;;  %v3432_v43 = vsel %vm6383_vm9, %v5628_v13, %v3431_v0 }
 0x9e9   :  { %3276 = vrot.lane.b32.xlu0 %v3261_v49, %s6073_s11  ;;  %5874 = vmatpush3.bf16.msra.mxu1 %v5979_v55  ;;  %v3382_v28 = vsel %vm6337_vm4, %v3373_v1, %v3381_v39 }
 0x9ea   :  { %3278 = vrot.lane.b32.xlu1 %v3271_v60, %s6073_s11  ;;  %5875 = vmatprep.subr.bf16.mxu1 %v5980_v48  ;;  %v3435_v4 = vsel %vm6383_vm9, %v3433_v27, %v3434_v45 }
 0x9ed   :  { %3393 = vrot.lane.b32.xlu0 %v3354_v14, %s6076_s5  ;;  %5876 = vmatpush3.bf16.msra.mxu1 %v5980_v48 }
 0x9ee   :  { %3395 = vrot.lane.b32.xlu1 %v3364_v57, %s6076_s5  ;;  %5877 = vmatprep.subr.bf16.mxu1 %v5981_v47 }
 0x9f1   :  { %3397 = vrot.lane.b32.xlu0 %v3382_v28, %s6076_s5  ;;  %5878 = vmatpush3.bf16.msra.mxu1 %v5981_v47 }
 0x9f2   :  { %3399 = vrot.lane.b32.xlu1 %v3392_v17, %s6076_s5 }
 0x9f5   :  { %3440 = vrot.lane.b32.xlu0 %v3432_v43, %s6075_s7 }
 0x9f6   :  { %3442 = vrot.lane.b32.xlu1 %v3435_v4, %s6075_s7 }
 0x9f9   :  { %2528 = vrot.lane.b32.xlu0 %v6034_v59, %s6064_s12 }
 0x9fa   :  { %2535 = vrot.lane.b32.xlu1 %v6035_v12, %s6064_s12 }
 0xa33   :  { %v3203_v9 = vpop.permute.xlu0 %3202 }
 0xa34   :  { %v3205_v10 = vpop.permute.xlu1 %3204 }
 0xa37   :  { %v3207_v2 = vpop.permute.xlu0 %3206 }
 0xa38   :  { %v3209_v3 = vpop.permute.xlu1 %3208 }
 0xa3b   :  { %v3113_v24 = vpop.permute.xlu0 %3112 }
 0xa3c   :  { %v3115_v29 = vpop.permute.xlu1 %3114  ;;  %3124 = vst.msk [vmem:[#allocation3] sm:$0xf] %vm2668_vm15, %v3113_v24 }
 0xa3d   :  { %3125 = vst.msk [vmem:[#allocation3 + $0x4] sm:$0xf] %vm2668_vm15, %v3115_v29 }
 0xa3f   :  { %v3117_v61 = vpop.permute.xlu0 %3116 }
 0xa40   :  { %v3119_v8 = vpop.permute.xlu1 %3118  ;;  %3126 = vst.msk [vmem:[#allocation3 + $0x8] sm:$0xf] %vm2668_vm15, %v3117_v61 }
 0xa41   :  { %3127 = vst.msk [vmem:[#allocation3 + $0xc] sm:$0xf] %vm2668_vm15, %v3119_v8 }
 0xa43   :  { %v3315_v51 = vpop.permute.xlu0 %3314 }
 0xa44   :  { %v3317_v56 = vpop.permute.xlu1 %3316 }
 0xa47   :  { %v3319_v16 = vpop.permute.xlu0 %3318 }
 0xa48   :  { %v3321_v11 = vpop.permute.xlu1 %3320 }
 0xa4b   :  { %v3437_v53 = vpop.permute.xlu0 %3436 }
 0xa4c   :  { %v3439_v18 = vpop.permute.xlu1 %3438 }
 0xa4f   :  { %v3179_v26 = vpop.permute.xlu0 %3178 }
 0xa50   :  { %v3181_v50 = vpop.permute.xlu1 %3180  ;;  %3190 = vst.msk [vmem:[#allocation3] sm:$0xf] %vm8183_vm0, %v3179_v26 }
 0xa51   :  { %3191 = vst.msk [vmem:[#allocation3 + $0x4] sm:$0xf] %vm8183_vm0, %v3181_v50 }
 0xa52   :  { %3215 = vst.msk [vmem:[#allocation3 + $0x4] sm:$0xf] %vm8182_vm11, %v3205_v10  ;;  %3214 = vst.msk [vmem:[#allocation3] sm:$0xf] %vm8182_vm11, %v3203_v9 }
 0xa53   :  { %v3183_v22 = vpop.permute.xlu0 %3182 }
 0xa54   :  { %v3185_v42 = vpop.permute.xlu1 %3184  ;;  %3192 = vst.msk [vmem:[#allocation3 + $0x8] sm:$0xf] %vm8183_vm0, %v3183_v22 }
 0xa55   :  { %3193 = vst.msk [vmem:[#allocation3 + $0xc] sm:$0xf] %vm8183_vm0, %v3185_v42 }
 0xa56   :  { %3217 = vst.msk [vmem:[#allocation3 + $0xc] sm:$0xf] %vm8182_vm11, %v3209_v3  ;;  %3216 = vst.msk [vmem:[#allocation3 + $0x8] sm:$0xf] %vm8182_vm11, %v3207_v2 }
 0xa57   :  { %v3273_v30 = vpop.permute.xlu0 %3272 }
 0xa58   :  { %v3275_v37 = vpop.permute.xlu1 %3274  ;;  %3284 = vst.msk [vmem:[#allocation3] sm:$0xf] %vm8181_vm14, %v3273_v30 }
 0xa59   :  { %3285 = vst.msk [vmem:[#allocation3 + $0x4] sm:$0xf] %vm8181_vm14, %v3275_v37 }
 0xa5a   :  { %3328 = vst.msk [vmem:[#allocation3 + $0x4] sm:$0xf] %vm8179_vm7, %v3317_v56  ;;  %3327 = vst.msk [vmem:[#allocation3] sm:$0xf] %vm8179_vm7, %v3315_v51 }
 0xa5b   :  { %v3277_v40 = vpop.permute.xlu0 %3276 }
 0xa5c   :  { %v3279_v62 = vpop.permute.xlu1 %3278  ;;  %3286 = vst.msk [vmem:[#allocation3 + $0x8] sm:$0xf] %vm8181_vm14, %v3277_v40 }
 0xa5d   :  { %3287 = vst.msk [vmem:[#allocation3 + $0xc] sm:$0xf] %vm8181_vm14, %v3279_v62 }
 0xa5e   :  { %3329 = vst.msk [vmem:[#allocation3 + $0x8] sm:$0xf] %vm8179_vm7, %v3319_v16  ;;  %3330 = vst.msk [vmem:[#allocation3 + $0xc] sm:$0xf] %vm8179_vm7, %v3321_v11 }
 0xa5f   :  { %v3394_v60 = vpop.permute.xlu0 %3393 }
 0xa60   :  { %v3396_v54 = vpop.permute.xlu1 %3395  ;;  %3406 = vst.msk [vmem:[#allocation3] sm:$0xf] %vm8178_vm2, %v3394_v60  ;;  %v5639_v60 = vld [vmem:[%s8152_s17] ss:$0 sm:$0xff] }
 0xa61   :  { %3407 = vst.msk [vmem:[#allocation3 + $0x4] sm:$0xf] %vm8178_vm2, %v3396_v54 }
 0xa62   :  { %3450 = vst.msk [vmem:[#allocation3 + $0x4] sm:$0xf] %vm8180_vm3, %v3439_v18  ;;  %3449 = vst.msk [vmem:[#allocation3] sm:$0xf] %vm8180_vm3, %v3437_v53 }
 0xa63   :  { %v3398_v63 = vpop.permute.xlu0 %3397 }
 0xa64   :  { %v3400_v49 = vpop.permute.xlu1 %3399  ;;  %3408 = vst.msk [vmem:[#allocation3 + $0x8] sm:$0xf] %vm8178_vm2, %v3398_v63 }
 0xa65   :  { %3409 = vst.msk [vmem:[#allocation3 + $0xc] sm:$0xf] %vm8178_vm2, %v3400_v49 }
 0xa67   :  { %v3441_v58 = vpop.permute.xlu0 %3440 }
 0xa68   :  { %v3443_v36 = vpop.permute.xlu1 %3442  ;;  %3451 = vst.msk [vmem:[#allocation3 + $0x8] sm:$0xf] %vm8180_vm3, %v3441_v58 }
 0xa69   :  { %v3454_v6 = vld [vmem:[#allocation3 + $0x4] sm:$0xf]  ;;  %v3453_v39 = vld [vmem:[#allocation3] sm:$0xf]  ;;  %3452 = vst.msk [vmem:[#allocation3 + $0xc] sm:$0xf] %vm8180_vm3, %v3443_v36 }
 0xa6a   :  { %v5629_v52 = vcombine.low %v3453_v39, %v3454_v6  ;;  %v5640_v6 = vld [vmem:[%s8153_s18] ss:$0 sm:$0xff] }
 0xa6c   :  { %5879 = vmatprep.mubr.bf16.mxu1 %v5629_v52 }
 0xa6f   :  { %v3455_v33 = vld [vmem:[#allocation3 + $0x8] sm:$0xf] }
 0xa70   :  { %v3456_v44 = vld [vmem:[#allocation3 + $0xc] sm:$0xf] }
 0xa71   :  { %v5630_v55 = vcombine.low %v3455_v33, %v3456_v44 }
 0xa73   :  { %5880 = vmatmul.mubr.bf16.vlgmr.msra.gmra.mxu1 %v5630_v55 }
 0xb33   :  { %v5881_v7 = vpop.f32.mrf.mxu1 }
 0xb34   :  { %v3571_v15 = vsel %vm8177_vm6, %v5881_v7, 0.0 }
 0xb35   :  { %v3551_v0 = vpop.f32.mrf.mxu1 }
 0xb36   :  { %v3568_v38 = vsel %vm8177_vm6, %v3551_v0, 0.0 }
 0xb37   :  { %v5882_v57 = vpop.f32.mrf.mxu1 }
 0xb38   :  { %v3573_v48 = vsel %vm8177_vm6, %v5882_v57, 0.0 }
 0xb39   :  { %v3554_v14 = vpop.f32.mrf.mxu1 }
 0xb3a   :  { %v3569_v1 = vsel %vm8177_vm6, %v3554_v14, 0.0 }
 0xb3b   :  { %v3570_v23 = vadd.f32 %v3569_v1, %v3568_v38 }
 0xb3d   :  { %v3572_v45 = vadd.f32 %v3571_v15, %v3570_v23  ;;  %v2536_v23 = vpop.permute.xlu1 %2535 }
 0xb3f   :  { %v3574_v17 = vadd.f32 %v3573_v48, %v3572_v45 }
 0xb41   :  { %v3575_v28 = vrot.slane %v3574_v17, 4 }
 0xb43   :  { %v3576_v27 = vadd.f32 %v3575_v28, %v3574_v17 }
 0xb45   :  { %v3577_v13 = vrot.slane %v3576_v27, 2 }
 0xb47   :  { %v3578_v47 = vadd.f32 %v3577_v13, %v3576_v27 }
 0xb49   :  { %v3579_v4 = vrot.slane %v3578_v47, 1 }
 0xb4b   :  { %v3580_v43 = vadd.f32 %v3579_v4, %v3578_v47 }
 0xb4d   :  { %v3581_v59 = vmul.f32 0.03125, %v3580_v43 }
 0xb4f   :  { %v3582_v12 = vsub.f32 %v3551_v0, %v3581_v59  ;;  %v3583_v10 = vsub.f32 %v3554_v14, %v3581_v59  ;;  %v3584_v9 = vsub.f32 %v5881_v7, %v3581_v59  ;;  %v3585_v3 = vsub.f32 %v5882_v57, %v3581_v59  ;;  %v2529_v14 = vpop.permute.xlu0 %2528 }
 0xb50   :  { %v2532_v38 = vmul.f32 %v2529_v14, %v7059_v46  ;;  %v2531_v1 = vmul.f32 %v2529_v14, %v7061_v21  ;;  %v2534_v48 = vmul.f32 %v2529_v14, %v7063_v31  ;;  %v2533_v17 = vmul.f32 %v2529_v14, %v7065_v20 }
 0xb51   :  { %v3586_v2 = vmul.f32 %v3582_v12, %v3582_v12  ;;  %v3587_v29 = vmul.f32 %v3583_v10, %v3583_v10  ;;  %v3588_v24 = vmul.f32 %v3584_v9, %v3584_v9  ;;  %v3589_v8 = vmul.f32 %v3585_v3, %v3585_v3 }
 0xb52   :  { %v2539_v15 = vadd.f32 %v2536_v23, %v2532_v38  ;;  %v2538_v45 = vadd.f32 %v2536_v23, %v2531_v1  ;;  %v2541_v59 = vadd.f32 %v2536_v23, %v2534_v48 }
 0xb53   :  { %v3590_v61 = vsel %vm8177_vm6, %v3586_v2, 0.0  ;;  %v3591_v56 = vsel %vm8177_vm6, %v3587_v29, 0.0  ;;  %v3593_v11 = vsel %vm8177_vm6, %v3588_v24, 0.0  ;;  %v3595_v18 = vsel %vm8177_vm6, %v3589_v8, 0.0  ;;  %v3698_v8 = vld [vmem:[#allocation2 + $0x4] sm:$0xc]  ;;  %vm8243_vm6 = vmmov %vm8235_vm1 }
 0xb54   :  { %v3592_v51 = vadd.f32 %v3591_v56, %v3590_v61 }
 0xb56   :  { %v3594_v16 = vadd.f32 %v3593_v11, %v3592_v51  ;;  %v3810_v51 = vld [vmem:[#allocation2 + $0x4] sm:$0x8]  ;;  %v3705_v11 = vshrl.u32 %v3698_v8, 16 }
 0xb58   :  { %v3596_v53 = vadd.f32 %v3595_v18, %v3594_v16  ;;  %v3708_v16 = vshll.u32 %v3698_v8, 16  ;;  %v7462_v18 = vld [vmem:[#allocation2 + $0x4] sm:$0x8] }
 0xb5a   :  { %v3597_v50 = vrot.slane %v3596_v53, 4 }
 0xb5c   :  { %v3598_v26 = vadd.f32 %v3597_v50, %v3596_v53  ;;  %v7464_v53 = vld [vmem:[#allocation2 + $0x1c] sm:$0x8]  ;;  %v7466_v50 = vld [vmem:[#allocation2 + $0x10] sm:$0x1] }
 0xb5e   :  { %v3599_v42 = vrot.slane %v3598_v26, 2 }
 0xb60   :  { %v3600_v22 = vadd.f32 %v3599_v42, %v3598_v26  ;;  %v7468_v26 = vld [vmem:[#allocation2 + $0x28] sm:$0x1]  ;;  %v3817_v42 = vshrl.u32 %v3810_v51, 16 }
 0xb62   :  { %v3601_v37 = vrot.slane %v3600_v22, 1 }
 0xb64   :  { %v3602_v30 = vadd.f32 %v3601_v37, %v3600_v22  ;;  %v3813_v22 = vld [vmem:[#allocation2 + $0x1c] sm:$0x8] }
 0xb66   :  { %v3603_v62 = vmul.f32 0.03125, %v3602_v30 }
 0xb68   :  { %v3604_v40 = vadd.f32 1e-05, %v3603_v62  ;;  %v7470_v62 = vld [vmem:[#allocation2 + $0x10] sm:$0x3] }
 0xb6a   :  { %6022 = vrsqrt.f32 %v3604_v40  ;;  %v3902_v40 = vld [vmem:[#allocation2 + $0x10] sm:$0x1] }
 0xb77   :  { %v6023_v54 = vpop.eup %6022 }
 0xb78   :  { %v3607_v49 = vmul.f32 %v6023_v54, %v3583_v10  ;;  %v3606_v63 = vmul.f32 %v6023_v54, %v3582_v12  ;;  %v3609_v36 = vmul.f32 %v6023_v54, %v3585_v3  ;;  %v3608_v58 = vmul.f32 %v6023_v54, %v3584_v9  ;;  %v4014_v54 = vld [vmem:[#allocation2 + $0x10] sm:$0x3] }
 0xb79   :  { %v2540_v12 = vadd.f32 %v2536_v23, %v2533_v17  ;;  %v4041_v1 = vshll.u32 %v4014_v54, 16  ;;  %v7485_v17 = vld [vmem:[#allocation2 + $0x28] sm:$0x1] }
 0xb7a   :  { %v3617_v39 = vmul.f32 %v5639_v60, %v3607_v49  ;;  %v3616_v52 = vmul.f32 %v5639_v60, %v3606_v63  ;;  %v3619_v55 = vmul.f32 %v5639_v60, %v3609_v36  ;;  %v3618_v7 = vmul.f32 %v5639_v60, %v3608_v58 }
 0xb7b   :  { %v5645_v60 = vrot.slane %v7462_v18, 11  ;;  %v3707_v49 = vrot.slane %v3705_v11, 6  ;;  %v3710_v63 = vrot.slane %v3708_v16, 7  ;;  %v5646_v36 = vrot.slane %v7464_v53, 11 }
 0xb7c   :  { %v3627_v44 = vadd.f32 %v5640_v6, %v3617_v39  ;;  %v3626_v33 = vadd.f32 %v5640_v6, %v3616_v52  ;;  %v3629_v0 = vadd.f32 %v5640_v6, %v3619_v55  ;;  %v3628_v57 = vadd.f32 %v5640_v6, %v3618_v7  ;;  %v3701_v52 = vld [vmem:[#allocation2 + $0x1c] sm:$0xc] }
 0xb7d   :  { %v3987_v58 = vrot.slane %v7466_v50, 5  ;;  %v3994_v6 = vrot.slane %v7468_v26, 5  ;;  %v3839_v39 = vshrl.u32 %v3813_v22, 16  ;;  %v3926_v55 = vshll.u32 %v3902_v40, 16 }
 0xb7e   :  { %3636 = vrot.lane.b32.xlu1 %v3627_v44, %s6064_s12  ;;  %3634 = vrot.lane.b32.xlu0 %v3626_v33, %s6064_s12  ;;  %v4107_v44 = vrot.slane %v7470_v62, 6  ;;  %v7479_v33 = vrot.slane %v3817_v42, 11  ;;  %v4038_v7 = vshrl.u32 %v4014_v54, 16  ;;  %v3711_v23 = vor.u32 %v3710_v63, %v3707_v49 }
 0xb7f   :  { %v7483_v48 = vrot.slane %v3839_v39, 11 }
 0xb82   :  { %3640 = vrot.lane.b32.xlu1 %v3629_v0, %s6064_s12  ;;  %3638 = vrot.lane.b32.xlu0 %v3628_v57, %s6064_s12 }
 0xbf0   :  { %v3637_v28 = vpop.permute.xlu1 %3636  ;;  %v3635_v27 = vpop.permute.xlu0 %3634 }
 0xbf1   :  { %v3647_v13 = vadd.f32 %v3637_v28, %v2539_v15  ;;  %v3646_v47 = vadd.f32 %v3635_v27, %v2538_v45  ;;  %v3733_v15 = vshrl.u32 %v3701_v52, 16  ;;  %v3736_v28 = vshll.u32 %v3701_v52, 16 }
 0xbf3   :  { %v3651_v4 = vmax.f32 %v3647_v13, 0.0  ;;  %v3650_v43 = vmax.f32 %v3646_v47, 0.0 }
 0xbf4   :  { %v3641_v10 = vpop.permute.xlu1 %3640  ;;  %v3639_v9 = vpop.permute.xlu0 %3638 }
 0xbf5   :  { %v5731_v46 = vpack.c.bf16 %v3651_v4, %v3651_v4  ;;  %v5730_v3 = vpack.c.bf16 %v3650_v43, %v3650_v43  ;;  %v3649_v21 = vadd.f32 %v3641_v10, %v2541_v59  ;;  %v3648_v2 = vadd.f32 %v3639_v9, %v2540_v12 }
 0xbf6   :  { %v7489_v4 = vrot.slane %v3926_v55, 5  ;;  %v7493_v9 = vrot.slane %v4038_v7, 5 }
 0xbf7   :  { %v3653_v29 = vmax.f32 %v3649_v21, 0.0  ;;  %v3652_v24 = vmax.f32 %v3648_v2, 0.0  ;;  %3684 = vrot.lane.b32.xlu1 %v5731_v46, %s6075_s7  ;;  %3682 = vrot.lane.b32.xlu0 %v5730_v3, %s6075_s7  ;;  %v7495_v46 = vrot.slane %v4041_v1, 6  ;;  %v7497_v3 = vld [vmem:[#allocation2 + $0x28] sm:$0x3]  ;;  %v7499_v21 = vrot.slane %v3711_v23, 4 }
 0xbf8   :  { %v4066_v42 = vshrl.u32 %v7497_v3, 16  ;;  %v4069_v40 = vshll.u32 %v7497_v3, 16 }
 0xbf9   :  { %v5733_v31 = vpack.c.bf16 %v3653_v29, %v3653_v29  ;;  %v5732_v20 = vpack.c.bf16 %v3652_v24, %v3652_v24  ;;  %v3950_v24 = vshll.u32 %v7485_v17, 16 }
 0xbfb   :  { %3688 = vrot.lane.b32.xlu1 %v5733_v31, %s6075_s7  ;;  %3686 = vrot.lane.b32.xlu0 %v5732_v20, %s6075_s7  ;;  %v7502_v31 = vrot.slane %v3733_v15, 6  ;;  %v7504_v20 = vrot.slane %v3736_v28, 7  ;;  %v7575_v62 = vrot.slane %v3950_v24, 5 }
 0xbfd   :  { %v3739_v53 = vor.u32 %v7504_v20, %v7502_v31 }
 0xc69   :  { %v3685_v61 = vpop.permute.xlu1 %3684  ;;  %v3683_v56 = vpop.permute.xlu0 %3682 }
 0xc6a   :  { %3695 = vst.msk [vmem:[#allocation2 + $0xc] sm:$0xf] %vm8235_vm1, %v3685_v61 }
 0xc6b   :  { %3694 = vst.msk [vmem:[#allocation2 + $0x8] sm:$0xf] %vm8243_vm6, %v3683_v56  ;;  %vm8244_vm6 = vmmov %vm8235_vm1 }
 0xc6d   :  { %v3689_v37 = vpop.permute.xlu1 %3688  ;;  %v3687_v30 = vpop.permute.xlu0 %3686 }
 0xc6e   :  { %3697 = vst.msk [vmem:[#allocation2 + $0x24] sm:$0xf] %vm8235_vm1, %v3689_v37 }
 0xc6f   :  { %3696 = vst.msk [vmem:[#allocation2 + $0x20] sm:$0xf] %vm8244_vm6, %v3687_v30  ;;  %vm8245_vm6 = vmmov %vm8235_vm1 }
 0xc71   :  { %v3877_v0 = vld [vmem:[#allocation2 + $0xc] sm:$0xf] }
 0xc72   :  { %v3876_v57 = vld [vmem:[#allocation2 + $0x8] sm:$0xf]  ;;  %3886 = vrot.lane.b32.xlu1 %v3877_v0, %s6071_s30  ;;  %v3770_v45 = vld [vmem:[#allocation2 + $0xc] sm:$0x7] }
 0xc73   :  { %v3769_v14 = vld [vmem:[#allocation2 + $0x8] sm:$0xf]  ;;  %3884 = vrot.lane.b32.xlu0 %v3876_v57, %s6071_s30  ;;  %v3971_v13 = vld [vmem:[#allocation2 + $0xc] sm:$0xf]  ;;  %v3785_v2 = vrot.slane %v3770_v45, 7 }
 0xc74   :  { %v3782_v38 = vrot.slane %v3769_v14, 7  ;;  %v7487_v47 = vld [vmem:[#allocation2 + $0xc] sm:$0xf]  ;;  %v3970_v29 = vld [vmem:[#allocation2 + $0x8] sm:$0xe]  ;;  %v3984_v61 = vrot.slane %v3971_v13, 5 }
 0xc75   :  { %v3879_v43 = vld [vmem:[#allocation2 + $0x24] sm:$0xf]  ;;  %v4104_v51 = vrot.slane %v7487_v47, 6  ;;  %v5649_v22 = vrot.slane %v3970_v29, 9  ;;  %v3901_v30 = vld [vmem:[#allocation2 + $0xc] sm:$0xf] }
 0xc76   :  { %v3784_v27 = vrot.slane %v3782_v38, 4  ;;  %v3878_v59 = vld [vmem:[#allocation2 + $0x20] sm:$0xf]  ;;  %3890 = vrot.lane.b32.xlu1 %v3879_v43, %s6071_s30  ;;  %v3773_v8 = vld [vmem:[#allocation2 + $0x24] sm:$0x7]  ;;  %v3783_v16 = vsel %vm6243_vm5, %v5645_v60, %v3782_v38  ;;  %v3986_v52 = vrot.slane %v3984_v61, 4 }
 0xc77   :  { %v3772_v12 = vld [vmem:[#allocation2 + $0x20] sm:$0xf]  ;;  %3888 = vrot.lane.b32.xlu0 %v3878_v59, %s6071_s30  ;;  %v3974_v56 = vld [vmem:[#allocation2 + $0x24] sm:$0xf]  ;;  %v3792_v54 = vrot.slane %v3773_v8, 7  ;;  %v7519_v60 = vrot.slane %v4104_v51, 4  ;;  %v3985_v23 = vsel %vm6291_vm13, %v5649_v22, %v3984_v61 }
 0xc78   :  { %v3789_v10 = vrot.slane %v3772_v12, 7  ;;  %v3786_v11 = vsel %vm6243_vm5, %v3784_v27, %v3785_v2  ;;  %v3973_v37 = vld [vmem:[#allocation2 + $0x20] sm:$0xe]  ;;  %v3991_v49 = vrot.slane %v3974_v56, 5  ;;  %v7515_v63 = vld [vmem:[#allocation2 + $0x8] sm:$0xc] }
 0xc79   :  { %v3811_v39 = vld [vmem:[#allocation2 + $0x8] sm:$0xf]  ;;  %v3812_v55 = vld [vmem:[#allocation2 + $0xc] sm:$0xf]  ;;  %v3814_v7 = vld [vmem:[#allocation2 + $0x20] sm:$0xf] }
 0xc7a   :  { %v3791_v18 = vrot.slane %v3789_v10, 4  ;;  %3796 = vrot.lane.b32.xlu1 %v3786_v11, %s6064_s12  ;;  %v3790_v57 = vsel %vm6243_vm5, %v5646_v36, %v3789_v10  ;;  %v5650_v14 = vrot.slane %v3973_v37, 9  ;;  %v3815_v38 = vld [vmem:[#allocation2 + $0x24] sm:$0xf]  ;;  %v3916_v1 = vshll.u32 %v3901_v30, 16  ;;  %v5984_v47 = vld [vmem:[%s8154_s19 + $0x28] sm:$0xff]  }
 0xc7b   :  { %3794 = vrot.lane.b32.xlu0 %v3783_v16, %s6064_s12  ;;  %v3822_v15 = vshrl.u32 %v3811_v39, 16  ;;  %v3920_v45 = vshrl.u32 %v3901_v30, 16  ;;  %v3900_v28 = vld [vmem:[#allocation2 + $0x8] sm:$0xf]  ;;  %v3904_v27 = vld [vmem:[#allocation2 + $0x24] sm:$0xf]  ;;  %v3988_v10 = vsel %vm6291_vm13, %v3986_v52, %v3987_v58 }
 0xc7c   :  { %v3793_v0 = vsel %vm6243_vm5, %v3791_v18, %v3792_v54  ;;  %v3993_v13 = vrot.slane %v3991_v49, 4  ;;  %v5651_v36 = vrot.slane %v7515_v63, 10  ;;  %v3831_v43 = vshrl.u32 %v3812_v55, 16  ;;  %v3903_v12 = vld [vmem:[#allocation2 + $0x20] sm:$0xf] }
 0xc7d   :  { %v3844_v59 = vshrl.u32 %v3814_v7, 16  ;;  %v3853_v2 = vshrl.u32 %v3815_v38, 16  ;;  %v7538_v29 = vrot.slane %v3916_v1, 5  ;;  %v3922_v8 = vrot.slane %v3920_v45, 4 }
 0xc7e   :  { %3800 = vrot.lane.b32.xlu1 %v3793_v0, %s6064_s12  ;;  %v3907_v61 = vshrl.u32 %v3900_v28, 16  ;;  %v3910_v56 = vshll.u32 %v3900_v28, 16  ;;  %v3940_v11 = vshll.u32 %v3904_v27, 16  ;;  %v3944_v16 = vshrl.u32 %v3904_v27, 16 }
 0xc7f   :  { %3798 = vrot.lane.b32.xlu0 %v3790_v57, %s6064_s12  ;;  %v3992_v31 = vsel %vm6291_vm13, %v5650_v14, %v3991_v49  ;;  %v3824_v20 = vrot.slane %v3822_v15, 7  ;;  %v3931_v50 = vshrl.u32 %v3903_v12, 16  ;;  %v3934_v18 = vshll.u32 %v3903_v12, 16  ;;  %v5982_v49 = vld [vmem:[%s8154_s19 + $0x38] sm:$0xff]   ;;  %v5983_v15 = vld [vmem:[%s8154_s19 + $0x30] sm:$0xff]  }
 0xc80   :  { %v3995_v58 = vsel %vm6291_vm13, %v3993_v13, %v3994_v6  ;;  %v3833_v22 = vrot.slane %v3831_v43, 7  ;;  %v3834_v37 = vshll.u32 %v3812_v55, 16  ;;  %v3846_v30 = vrot.slane %v3844_v59, 7  ;;  %v4012_v43 = vld [vmem:[#allocation2 + $0x8] sm:$0xe]  ;;  %5883 = vmatprep.subr.bf16.mxu0 %v5982_v49 }
 0xc81   :  { %v3825_v54 = vshll.u32 %v3811_v39, 16  ;;  %v3855_v63 = vrot.slane %v3853_v2, 7  ;;  %v3847_v52 = vshll.u32 %v3814_v7, 16  ;;  %v3923_v0 = vor.u32 %v3922_v8, %v7538_v29  ;;  %5884 = vmatpush3.bf16.msra.mxu0 %v5982_v49 }
 0xc82   :  { %3998 = vrot.lane.b32.xlu1 %v3988_v10, %s6074_s15  ;;  %v3909_v57 = vrot.slane %v3907_v61, 4  ;;  %v3912_v14 = vrot.slane %v3910_v56, 5  ;;  %v7552_v1 = vrot.slane %v3940_v11, 5  ;;  %v3946_v26 = vrot.slane %v3944_v16, 4  ;;  %5885 = vmatprep.subr.bf16.mxu0 %v5983_v15 }
 0xc83   :  { %3996 = vrot.lane.b32.xlu0 %v3985_v23, %s6074_s15  ;;  %v4013_v23 = vld [vmem:[#allocation2 + $0xc] sm:$0xf]  ;;  %v3829_v6 = vrot.slane %v3824_v20, 4  ;;  %v3856_v39 = vshll.u32 %v3815_v38, 16  ;;  %v3933_v55 = vrot.slane %v3931_v50, 4  ;;  %v3936_v7 = vrot.slane %v3934_v18, 5 }
 0xc84   :  { %v3836_v45 = vor.u32 %v3834_v37, %v3833_v22  ;;  %v3827_v28 = vor.u32 %v3825_v54, %v3824_v20  ;;  %v3851_v27 = vrot.slane %v3846_v30, 4  ;;  %v3849_v13 = vor.u32 %v3847_v52, %v3846_v30  ;;  %v3699_v20 = vld [vmem:[#allocation2 + $0x8] sm:$0xf]  ;;  %v4015_v22 = vld [vmem:[#allocation2 + $0x20] sm:$0xe] }
 0xc85   :  { %v3858_v59 = vor.u32 %v3856_v39, %v3855_v63  ;;  %v7559_v12 = vrot.slane %v3923_v0, 4  ;;  %v4028_v10 = vshrl.u32 %v4013_v23, 16  ;;  %v4031_v2 = vshll.u32 %v4013_v23, 16  ;;  %v3703_v37 = vld [vmem:[#allocation2 + $0x24] sm:$0x7]  ;;  %5886 = vmatpush3.bf16.msra.mxu0 %v5983_v15 }
 0xc86   :  { %4002 = vrot.lane.b32.xlu1 %v3995_v58, %s6074_s15  ;;  %v4108_v38 = vsel %vm6383_vm9, %v7519_v60, %v4107_v44  ;;  %v4105_v8 = vsel %vm6383_vm9, %v5651_v36, %v4104_v51  ;;  %v3913_v61 = vor.u32 %v3912_v14, %v3909_v57  ;;  %v3947_v56 = vor.u32 %v3946_v26, %v7552_v1  ;;  %v3700_v44 = vld [vmem:[#allocation2 + $0xc] sm:$0x7]  ;;  %v3702_v63 = vld [vmem:[#allocation2 + $0x20] sm:$0xf] }
 0xc87   :  { %4000 = vrot.lane.b32.xlu0 %v3992_v31, %s6074_s15  ;;  %v3937_v11 = vor.u32 %v3936_v7, %v3933_v55  ;;  %v4019_v16 = vshrl.u32 %v4012_v43, 16  ;;  %v7577_v60 = vrot.slane %v3739_v53, 4  ;;  %v3837_v51 = vsel %vm6259_vm10, %v3829_v6, %v3836_v45  ;;  %v4016_v31 = vld [vmem:[#allocation2 + $0x24] sm:$0xf]  ;;  %5887 = vmatprep.subr.bf16.mxu0 %v5984_v47 }
 0xc88   :  { %v3828_v36 = vsel %vm6259_vm10, %v7479_v33, %v3827_v28  ;;  %v3850_v17 = vsel %vm6259_vm10, %v7483_v48, %v3849_v13  ;;  %v4022_v24 = vshll.u32 %v4012_v43, 16  ;;  %v3859_v53 = vsel %vm6259_vm10, %v3851_v27, %v3858_v59  ;;  %v5985_v57 = vld [vmem:[%s8154_s19 + $0x20] sm:$0xff]  }
 0xc89   :  { %v3929_v50 = vsel %vm6282_vm12, %v7559_v12, %v7489_v4  ;;  %v4030_v18 = vrot.slane %v4028_v10, 5  ;;  %v4033_v58 = vrot.slane %v4031_v2, 6  ;;  %v3914_v33 = vrot.slane %v3913_v61, 4  ;;  %5888 = vmatpush3.bf16.msra.mxu0 %v5984_v47  ;;  %v5986_v2 = vld [vmem:[%s8154_s19 + $0x18] sm:$0xff]  }
 0xc8a   :  { %4118 = vrot.lane.b32.xlu1 %v4108_v38, %s6075_s7  ;;  %v7596_v30 = vrot.slane %v3947_v56, 4  ;;  %v3724_v48 = vshrl.u32 %v3700_v44, 16  ;;  %v3727_v54 = vshll.u32 %v3700_v44, 16  ;;  %v7600_v52 = vrot.slane %v3937_v11, 4  ;;  %5889 = vmatprep.subr.bf16.mxu0 %v5985_v57 }
 0xc8b   :  { %4116 = vrot.lane.b32.xlu0 %v4105_v8, %s6075_s7  ;;  %v4021_v0 = vrot.slane %v4019_v16, 5  ;;  %v4056_v4 = vshrl.u32 %v4016_v31, 16  ;;  %v3714_v49 = vshrl.u32 %v3699_v20, 16  ;;  %v4024_v14 = vrot.slane %v4022_v24, 6  ;;  %v5987_v24 = vld [vmem:[%s8154_s19 + $0x10] sm:$0xff]  }
 0xc8c   :  { %v4059_v26 = vshll.u32 %v4016_v31, 16  ;;  %v4047_v23 = vshrl.u32 %v4015_v22, 16  ;;  %v3717_v6 = vshll.u32 %v3699_v20, 16  ;;  %v4050_v39 = vshll.u32 %v4015_v22, 16 }
 0xc8d   :  { %v3716_v55 = vrot.slane %v3714_v49, 6  ;;  %v3752_v7 = vshrl.u32 %v3703_v37, 16  ;;  %v3755_v15 = vshll.u32 %v3703_v37, 16  ;;  %v3726_v45 = vrot.slane %v3724_v48, 6  ;;  %5890 = vmatpush3.bf16.msra.mxu0 %v5985_v57  ;;  %v4094_v37 = vld [vmem:[#allocation2 + $0x24] sm:$0xf] }
 0xc8e   :  { %3862 = vrot.lane.b32.xlu1 %v3837_v51, %s6068_s4  ;;  %v3729_v28 = vrot.slane %v3727_v54, 7  ;;  %v3719_v27 = vrot.slane %v3717_v6, 7  ;;  %v3742_v13 = vshrl.u32 %v3702_v63, 16  ;;  %v3919_v43 = vsel %vm6282_vm12, %v3914_v33, %v7538_v29  ;;  %5891 = vmatprep.subr.bf16.mxu0 %v5986_v2  ;;  %v5988_v49 = vld [vmem:[%s8154_s19 + $0x8] sm:$0xff]   ;;  %v5990_v6 = vld [vmem:[%s8154_s19] sm:$0xff]  }
 0xc8f   :  { %3860 = vrot.lane.b32.xlu0 %v3828_v36, %s6068_s4  ;;  %v4034_v59 = vor.u32 %v4033_v58, %v4030_v18  ;;  %v4058_v12 = vrot.slane %v4056_v4, 5  ;;  %v3745_v10 = vshll.u32 %v3702_v63, 16  ;;  %v4025_v38 = vor.u32 %v4024_v14, %v4021_v0  ;;  %v4093_v0 = vld [vmem:[#allocation2 + $0x20] sm:$0xc] }
 0xc90   :  { %v4061_v8 = vrot.slane %v4059_v26, 6  ;;  %v3720_v61 = vor.u32 %v3719_v27, %v3716_v55  ;;  %v3744_v56 = vrot.slane %v3742_v13, 6  ;;  %v4049_v11 = vrot.slane %v4047_v23, 5 }
 0xc91   :  { %v3754_v16 = vrot.slane %v3752_v7, 6  ;;  %v3757_v44 = vrot.slane %v3755_v15, 7  ;;  %v3747_v47 = vrot.slane %v3745_v10, 7  ;;  %v4052_v51 = vrot.slane %v4050_v39, 6  ;;  %5892 = vmatpush3.bf16.msra.mxu0 %v5986_v2 }
 0xc92   :  { %3866 = vrot.lane.b32.xlu1 %v3859_v53, %s6068_s4  ;;  %v3730_v36 = vor.u32 %v3729_v28, %v3726_v45  ;;  %v3721_v29 = vsel %vm6377_vm8, %v7499_v21, %v3720_v61  ;;  %v4044_v31 = vor.u32 %v7495_v46, %v7493_v9  ;;  %v3953_v21 = vsel %vm6282_vm12, %v7596_v30, %v7575_v62 }
 0xc93   :  { %3864 = vrot.lane.b32.xlu0 %v3850_v17, %s6068_s4  ;;  %v3722_v17 = vrot.slane %v3720_v61, 4  ;;  %3764 = vst.msk [vmem:[#allocation3] sm:$0xf] %vm8235_vm1, %v3721_v29  ;;  %v3748_v20 = vor.u32 %v3747_v47, %v3744_v56  ;;  %v4068_v53 = vrot.slane %v4066_v42, 5  ;;  %v4071_v18 = vrot.slane %v4069_v40, 6  ;;  %5893 = vmatprep.subr.bf16.mxu0 %v5987_v24 }
 0xc94   :  { %v3943_v9 = vsel %vm6282_vm12, %v7600_v52, %v7552_v1  ;;  %v3758_v46 = vor.u32 %v3757_v44, %v3754_v16  ;;  %v4036_v42 = vrot.slane %v4034_v59, 4  ;;  %v4026_v3 = vrot.slane %v4025_v38, 4  ;;  %v4095_v52 = vld [vmem:[#allocation2 + $0x28] sm:$0x3] }
 0xc95   :  { %v3750_v58 = vrot.slane %v3748_v20, 4  ;;  %v3749_v62 = vsel %vm6377_vm8, %v7577_v60, %v3748_v20  ;;  %v4062_v40 = vor.u32 %v4061_v8, %v4058_v12  ;;  %v4053_v22 = vor.u32 %v4052_v51, %v4049_v11  ;;  %5894 = vmatpush3.bf16.msra.mxu0 %v5987_v24 }
 0xc96   :  { %3956 = vrot.lane.b32.xlu1 %v3929_v50, %s6073_s11  ;;  %v3731_v50 = vsel %vm6377_vm8, %v3722_v17, %v3730_v36  ;;  %3766 = vst.msk [vmem:[#allocation3 + $0x8] sm:$0xf] %vm8235_vm1, %v3749_v62  ;;  %v4072_v33 = vor.u32 %v4071_v18, %v4068_v53  ;;  %v4111_v60 = vrot.slane %v4094_v37, 6  ;;  %v4045_v30 = vsel %vm6337_vm4, %v4036_v42, %v4044_v31 }
 0xc97   :  { %3954 = vrot.lane.b32.xlu0 %v3919_v43, %s6073_s11  ;;  %3765 = vst.msk [vmem:[#allocation3 + $0x4] sm:$0xf] %vm8245_vm6, %v3731_v50  ;;  %v3759_v1 = vsel %vm6377_vm8, %v3750_v58, %v3758_v46  ;;  %vm8246_vm6 = vmmov %vm8235_vm1  ;;  %v4035_v48 = vsel %vm6337_vm4, %v4026_v3, %v4034_v59  ;;  %v4064_v54 = vrot.slane %v4062_v40, 4  ;;  %v4054_v63 = vrot.slane %v4053_v22, 4  ;;  %5895 = vmatprep.subr.bf16.mxu0 %v5988_v49 }
 0xc98   :  { %3767 = vst.msk [vmem:[#allocation3 + $0xc] sm:$0xf] %vm8246_vm6, %v3759_v1  ;;  %v4114_v4 = vrot.slane %v4095_v52, 6  ;;  %v4113_v26 = vrot.slane %v4111_v60, 4  ;;  %v5652_v23 = vrot.slane %v4093_v0, 10  ;;  %vm8247_vm1 = vcmask 130048  }
 0xc99   :  { %v4073_v57 = vsel %vm6337_vm4, %v4064_v54, %v4072_v33  ;;  %v4063_v14 = vsel %vm6337_vm4, %v4054_v63, %v4062_v40  ;;  %5896 = vmatpush3.bf16.msra.mxu0 %v5988_v49  ;;  %vm8248_vm6 = vcmask 261248  }
 0xc9a   :  { %3960 = vrot.lane.b32.xlu1 %v3953_v21, %s6073_s11  ;;  %v4115_v39 = vsel %vm6383_vm9, %v4113_v26, %v4114_v4  ;;  %v4112_v55 = vsel %vm6383_vm9, %v5652_v23, %v4111_v60  ;;  %5897 = vmatprep.subr.bf16.mxu0 %v5990_v6 }
 0xc9b   :  { %3958 = vrot.lane.b32.xlu0 %v3943_v9, %s6073_s11 }
 0xc9d   :  { %5898 = vmatpush3.bf16.msra.mxu0 %v5990_v6 }
 0xc9e   :  { %4076 = vrot.lane.b32.xlu1 %v4045_v30, %s6076_s5 }
 0xc9f   :  { %4074 = vrot.lane.b32.xlu0 %v4035_v48, %s6076_s5 }
 0xca2   :  { %4080 = vrot.lane.b32.xlu1 %v4073_v57, %s6076_s5 }
 0xca3   :  { %4078 = vrot.lane.b32.xlu0 %v4063_v14, %s6076_s5 }
 0xca6   :  { %4122 = vrot.lane.b32.xlu1 %v4115_v39, %s6075_s7 }
 0xca7   :  { %4120 = vrot.lane.b32.xlu0 %v4112_v55, %s6075_s7 }
 0xce4   :  { %v3887_v7 = vpop.permute.xlu1 %3886 }
 0xce5   :  { %v3885_v15 = vpop.permute.xlu0 %3884 }
 0xce8   :  { %v3891_v45 = vpop.permute.xlu1 %3890 }
 0xce9   :  { %v3889_v28 = vpop.permute.xlu0 %3888 }
 0xcec   :  { %v3797_v27 = vpop.permute.xlu1 %3796 }
 0xced   :  { %v3795_v13 = vpop.permute.xlu0 %3794  ;;  %3807 = vst.msk [vmem:[#allocation3 + $0x4] sm:$0xf] %vm2668_vm15, %v3797_v27 }
 0xcee   :  { %3806 = vst.msk [vmem:[#allocation3] sm:$0xf] %vm2668_vm15, %v3795_v13 }
 0xcf0   :  { %v3801_v43 = vpop.permute.xlu1 %3800 }
 0xcf1   :  { %v3799_v59 = vpop.permute.xlu0 %3798  ;;  %3809 = vst.msk [vmem:[#allocation3 + $0xc] sm:$0xf] %vm2668_vm15, %v3801_v43 }
 0xcf2   :  { %3808 = vst.msk [vmem:[#allocation3 + $0x8] sm:$0xf] %vm2668_vm15, %v3799_v59 }
 0xcf4   :  { %v3999_v12 = vpop.permute.xlu1 %3998 }
 0xcf5   :  { %v3997_v10 = vpop.permute.xlu0 %3996 }
 0xcf8   :  { %v4003_v2 = vpop.permute.xlu1 %4002 }
 0xcf9   :  { %v4001_v38 = vpop.permute.xlu0 %4000 }
 0xcfc   :  { %v4119_v8 = vpop.permute.xlu1 %4118 }
 0xcfd   :  { %v4117_v61 = vpop.permute.xlu0 %4116 }
 0xd00   :  { %v3863_v56 = vpop.permute.xlu1 %3862 }
 0xd01   :  { %v3861_v11 = vpop.permute.xlu0 %3860  ;;  %3873 = vst.msk [vmem:[#allocation3 + $0x4] sm:$0xf] %vm8183_vm0, %v3863_v56 }
 0xd02   :  { %3872 = vst.msk [vmem:[#allocation3] sm:$0xf] %vm8183_vm0, %v3861_v11 }
 0xd03   :  { %3897 = vst.msk [vmem:[#allocation3 + $0x4] sm:$0xf] %vm8182_vm11, %v3887_v7  ;;  %3896 = vst.msk [vmem:[#allocation3] sm:$0xf] %vm8182_vm11, %v3885_v15 }
 0xd04   :  { %v3867_v16 = vpop.permute.xlu1 %3866 }
 0xd05   :  { %v3865_v44 = vpop.permute.xlu0 %3864  ;;  %3875 = vst.msk [vmem:[#allocation3 + $0xc] sm:$0xf] %vm8183_vm0, %v3867_v16 }
 0xd06   :  { %3874 = vst.msk [vmem:[#allocation3 + $0x8] sm:$0xf] %vm8183_vm0, %v3865_v44  ;;  %vm8254_vm0 = vmmov %vm8248_vm6 }
 0xd07   :  { %3899 = vst.msk [vmem:[#allocation3 + $0xc] sm:$0xf] %vm8182_vm11, %v3891_v45  ;;  %3898 = vst.msk [vmem:[#allocation3 + $0x8] sm:$0xf] %vm8182_vm11, %v3889_v28 }
 0xd08   :  { %v3957_v47 = vpop.permute.xlu1 %3956  ;;  %vm8253_vm11 = vmmov %vm8247_vm1 }
 0xd09   :  { %v3955_v51 = vpop.permute.xlu0 %3954  ;;  %3967 = vst.msk [vmem:[#allocation3 + $0x4] sm:$0xf] %vm8181_vm14, %v3957_v47 }
 0xd0a   :  { %3966 = vst.msk [vmem:[#allocation3] sm:$0xf] %vm8181_vm14, %v3955_v51 }
 0xd0b   :  { %4009 = vst.msk [vmem:[#allocation3 + $0x4] sm:$0xf] %vm8179_vm7, %v3999_v12  ;;  %4008 = vst.msk [vmem:[#allocation3] sm:$0xf] %vm8179_vm7, %v3997_v10 }
 0xd0c   :  { %v3961_v36 = vpop.permute.xlu1 %3960 }
 0xd0d   :  { %v3959_v17 = vpop.permute.xlu0 %3958  ;;  %3969 = vst.msk [vmem:[#allocation3 + $0xc] sm:$0xf] %vm8181_vm14, %v3961_v36 }
 0xd0e   :  { %3968 = vst.msk [vmem:[#allocation3 + $0x8] sm:$0xf] %vm8181_vm14, %v3959_v17  ;;  %vm8252_vm14 = vmmov %vm8248_vm6 }
 0xd0f   :  { %4011 = vst.msk [vmem:[#allocation3 + $0xc] sm:$0xf] %vm8179_vm7, %v4003_v2  ;;  %4010 = vst.msk [vmem:[#allocation3 + $0x8] sm:$0xf] %vm8179_vm7, %v4001_v38 }
 0xd10   :  { %v4077_v29 = vpop.permute.xlu1 %4076  ;;  %vm8250_vm7 = vmmov %vm8248_vm6 }
 0xd11   :  { %v4075_v24 = vpop.permute.xlu0 %4074  ;;  %4087 = vst.msk [vmem:[#allocation3 + $0x4] sm:$0xf] %vm8178_vm2, %v4077_v29 }
 0xd12   :  { %4086 = vst.msk [vmem:[#allocation3] sm:$0xf] %vm8178_vm2, %v4075_v24 }
 0xd13   :  { %4129 = vst.msk [vmem:[#allocation3 + $0x4] sm:$0xf] %vm8180_vm3, %v4119_v8  ;;  %4128 = vst.msk [vmem:[#allocation3] sm:$0xf] %vm8180_vm3, %v4117_v61 }
 0xd14   :  { %v4081_v31 = vpop.permute.xlu1 %4080 }
 0xd15   :  { %v4079_v20 = vpop.permute.xlu0 %4078  ;;  %4089 = vst.msk [vmem:[#allocation3 + $0xc] sm:$0xf] %vm8178_vm2, %v4081_v31 }
 0xd16   :  { %4088 = vst.msk [vmem:[#allocation3 + $0x8] sm:$0xf] %vm8178_vm2, %v4079_v20  ;;  %vm8249_vm2 = vmmov %vm8247_vm1 }
 0xd18   :  { %v4123_v21 = vpop.permute.xlu1 %4122 }
 0xd19   :  { %v4121_v53 = vpop.permute.xlu0 %4120  ;;  %4131 = vst.msk [vmem:[#allocation3 + $0xc] sm:$0xf] %vm8180_vm3, %v4123_v21 }
 0xd1a   :  { %4130 = vst.msk [vmem:[#allocation3 + $0x8] sm:$0xf] %vm8180_vm3, %v4121_v53  ;;  %v5989_v18 = vld [vmem:[#allocation3] sm:$0xff]   ;;  %vm8251_vm3 = vmmov %vm8247_vm1 }
 0xd1b   :  { %5899 = vmatprep.mubr.bf16.mxu0 %v5989_v18 }
 0xd20   :  { %v4135_v50 = vld [vmem:[#allocation3 + $0xc] sm:$0xf] }
 0xd21   :  { %v4134_v9 = vld [vmem:[#allocation3 + $0x8] sm:$0xf] }
 0xd22   :  { %v5654_v46 = vcombine.low %v4134_v9, %v4135_v50 }
 0xd24   :  { %5900 = vmatmul.mubr.bf16.vlgmr.msra.gmra.mxu0 %v5654_v46 }
 0xde4   :  { %v5901_v58 = vpop.f32.mrf.mxu0 }
 0xde5   :  { %v4250_v30 = vsel %vm8251_vm3, %v5901_v58, 0.0  ;;  %v4316_v48 = vsel %vm8252_vm14, %v5901_v58, 0.0  ;;  %vm8257_vm14 = vmmov %vm8248_vm6 }
 0xde6   :  { %v4230_v62 = vpop.f32.mrf.mxu0  ;;  %vm8260_vm3 = vmmov %vm8248_vm6 }
 0xde7   :  { %v4247_v40 = vsel %vm8247_vm1, %v4230_v62, 0.0  ;;  %v4313_v22 = vsel %vm8248_vm6, %v4230_v62, 0.0 }
 0xde8   :  { %v5902_v42 = vpop.f32.mrf.mxu0 }
 0xde9   :  { %v4252_v52 = vsel %vm8253_vm11, %v5902_v42, 0.0  ;;  %v4318_v0 = vsel %vm8254_vm0, %v5902_v42, 0.0  ;;  %vm8255_vm0 = vmmov %vm8247_vm1 }
 0xdea   :  { %v4233_v3 = vpop.f32.mrf.mxu0  ;;  %vm8256_vm11 = vmmov %vm8255_vm0 }
 0xdeb   :  { %v4248_v37 = vsel %vm8249_vm2, %v4233_v3, 0.0  ;;  %v4314_v1 = vsel %vm8250_vm7, %v4233_v3, 0.0  ;;  %vm8258_vm7 = vmmov %vm8248_vm6 }
 0xdec   :  { %v4249_v33 = vadd.f32 %v4248_v37, %v4247_v40  ;;  %v4315_v60 = vadd.f32 %v4314_v1, %v4313_v22  ;;  %vm8259_vm2 = vmmov %vm8255_vm0 }
 0xded   :  { %vm8261_vm1 = vmmov %vm8255_vm0 }
 0xdee   :  { %v4251_v54 = vadd.f32 %v4250_v30, %v4249_v33  ;;  %v4317_v63 = vadd.f32 %v4316_v48, %v4315_v60  ;;  %vm8262_vm6 = vmmov %vm8260_vm3 }
 0xdf0   :  { %v4253_v4 = vadd.f32 %v4252_v52, %v4251_v54  ;;  %v4319_v49 = vadd.f32 %v4318_v0, %v4317_v63 }
 0xdf2   :  { %v4254_v57 = vrot.slane %v4253_v4, 4  ;;  %v4320_v14 = vrot.slane %v4319_v49, 4 }
 0xdf4   :  { %v4255_v26 = vadd.f32 %v4254_v57, %v4253_v4  ;;  %v4321_v23 = vadd.f32 %v4320_v14, %v4319_v49 }
 0xdf6   :  { %v4256_v6 = vrot.slane %v4255_v26, 2  ;;  %v4322_v39 = vrot.slane %v4321_v23, 2 }
 0xdf8   :  { %v4257_v55 = vadd.f32 %v4256_v6, %v4255_v26  ;;  %v4323_v7 = vadd.f32 %v4322_v39, %v4321_v23  ;;  %v5663_v6 = vld [vmem:[%s8157_s22] ss:$0 sm:$0xff] }
 0xdfa   :  { %v4258_v15 = vrot.slane %v4257_v55, 1  ;;  %v4324_v45 = vrot.slane %v4323_v7, 1 }
 0xdfc   :  { %v4259_v28 = vadd.f32 %v4258_v15, %v4257_v55  ;;  %v4325_v27 = vadd.f32 %v4324_v45, %v4323_v7 }
 0xdfe   :  { %v4260_v13 = vmul.f32 0.03125, %v4259_v28  ;;  %v4326_v43 = vmul.f32 0.03125, %v4325_v27  ;;  %v5664_v28 = vld [vmem:[%s8158_s23] ss:$0 sm:$0xff] }
 0xe00   :  { %v4261_v59 = vsub.f32 %v4230_v62, %v4260_v13  ;;  %v4262_v12 = vsub.f32 %v4233_v3, %v4260_v13  ;;  %v4263_v10 = vsub.f32 %v5901_v58, %v4260_v13  ;;  %v4264_v2 = vsub.f32 %v5902_v42, %v4260_v13 }
 0xe01   :  { %v4327_v38 = vsub.f32 %v4230_v62, %v4326_v43  ;;  %v4328_v8 = vsub.f32 %v4233_v3, %v4326_v43  ;;  %v4329_v61 = vsub.f32 %v5901_v58, %v4326_v43  ;;  %v4330_v56 = vsub.f32 %v5902_v42, %v4326_v43 }
 0xe02   :  { %v4265_v11 = vmul.f32 %v4261_v59, %v4261_v59  ;;  %v4266_v16 = vmul.f32 %v4262_v12, %v4262_v12  ;;  %v4267_v44 = vmul.f32 %v4263_v10, %v4263_v10  ;;  %v4268_v17 = vmul.f32 %v4264_v2, %v4264_v2 }
 0xe03   :  { %v4331_v47 = vmul.f32 %v4327_v38, %v4327_v38  ;;  %v4332_v51 = vmul.f32 %v4328_v8, %v4328_v8  ;;  %v4333_v36 = vmul.f32 %v4329_v61, %v4329_v61  ;;  %v4334_v20 = vmul.f32 %v4330_v56, %v4330_v56 }
 0xe04   :  { %v4269_v29 = vsel %vm8255_vm0, %v4265_v11, 0.0  ;;  %v4270_v24 = vsel %vm8256_vm11, %v4266_v16, 0.0  ;;  %v4272_v18 = vsel %vm8259_vm2, %v4267_v44, 0.0  ;;  %v4274_v58 = vsel %vm8261_vm1, %v4268_v17, 0.0 }
 0xe05   :  { %v4271_v31 = vadd.f32 %v4270_v24, %v4269_v29  ;;  %v4335_v21 = vsel %vm8257_vm14, %v4331_v47, 0.0  ;;  %v4336_v53 = vsel %vm8258_vm7, %v4332_v51, 0.0  ;;  %v4338_v46 = vsel %vm8260_vm3, %v4333_v36, 0.0 }
 0xe06   :  { %v4337_v50 = vadd.f32 %v4336_v53, %v4335_v21  ;;  %v4340_v3 = vsel %vm8262_vm6, %v4334_v20, 0.0  ;;  %vm8263_vm0 = vcmask 125952   ;;  %v4595_v21 = vld [vmem:[#allocation2 + $0x10] sm:$0x1]  ;;  %v4436_v53 = vld [vmem:[#allocation2 + $0x1c] sm:$0x8] }
 0xe07   :  { %v4273_v9 = vadd.f32 %v4272_v18, %v4271_v31  ;;  %vm8264_vm11 = vmmov %vm8263_vm0  ;;  %v7734_v18 = vld [vmem:[#allocation2 + $0x10] sm:$0x1] }
 0xe08   :  { %v4339_v62 = vadd.f32 %v4338_v46, %v4337_v50  ;;  %vm8265_vm14 = vmmov %vm8263_vm0  ;;  %v4610_v46 = vrot.slane %v4595_v21, 5 }
 0xe09   :  { %v4275_v42 = vadd.f32 %v4274_v58, %v4273_v9  ;;  %vm8266_vm7 = vmmov %vm8263_vm0 }
 0xe0a   :  { %v4341_v40 = vadd.f32 %v4340_v3, %v4339_v62  ;;  %v4462_v3 = vshrl.u32 %v4436_v53, 16  ;;  %v4528_v53 = vld [vmem:[#allocation2 + $0x28] sm:$0x1]  ;;  %vm8267_vm2 = vmmov %vm8263_vm0 }
 0xe0b   :  { %v4276_v22 = vrot.slane %v4275_v42, 4  ;;  %vm8268_vm3 = vmmov %vm8263_vm0 }
 0xe0c   :  { %v4342_v37 = vrot.slane %v4341_v40, 4  ;;  %vm8269_vm1 = vmmov %vm8263_vm0 }
 0xe0d   :  { %v4277_v1 = vadd.f32 %v4276_v22, %v4275_v42  ;;  %vm8270_vm6 = vmmov %vm8263_vm0 }
 0xe0e   :  { %v4343_v33 = vadd.f32 %v4342_v37, %v4341_v40  ;;  %v4549_v40 = vshll.u32 %v7734_v18, 16 }
 0xe0f   :  { %v4278_v60 = vrot.slane %v4277_v1, 2 }
 0xe10   :  { %v4344_v30 = vrot.slane %v4343_v33, 2 }
 0xe11   :  { %v4279_v48 = vadd.f32 %v4278_v60, %v4277_v1 }
 0xe12   :  { %v4345_v54 = vadd.f32 %v4344_v30, %v4343_v33 }
 0xe13   :  { %v4280_v63 = vrot.slane %v4279_v48, 1 }
 0xe14   :  { %v4346_v52 = vrot.slane %v4345_v54, 1 }
 0xe15   :  { %v4281_v0 = vadd.f32 %v4280_v63, %v4279_v48 }
 0xe16   :  { %v4347_v4 = vadd.f32 %v4346_v52, %v4345_v54 }
 0xe17   :  { %v4282_v49 = vmul.f32 0.03125, %v4281_v0 }
 0xe18   :  { %v4348_v57 = vmul.f32 0.03125, %v4347_v4 }
 0xe19   :  { %v4283_v14 = vadd.f32 1e-05, %v4282_v49 }
 0xe1a   :  { %v4349_v26 = vadd.f32 1e-05, %v4348_v57 }
 0xe1b   :  { %6024 = vrsqrt.f32 %v4283_v14 }
 0xe1c   :  { %6026 = vrsqrt.f32 %v4349_v26 }
 0xe28   :  { %v6025_v23 = vpop.eup %6024 }
 0xe29   :  { %v6027_v39 = vpop.eup %6026  ;;  %v4285_v55 = vmul.f32 %v6025_v23, %v4261_v59  ;;  %v4286_v7 = vmul.f32 %v6025_v23, %v4262_v12  ;;  %v4287_v15 = vmul.f32 %v6025_v23, %v4263_v10  ;;  %v4288_v45 = vmul.f32 %v6025_v23, %v4264_v2 }
 0xe2a   :  { %v7722_v27 = vmul.f32 %v6027_v39, %v4328_v8  ;;  %v7724_v13 = vmul.f32 %v6027_v39, %v4327_v38  ;;  %v7726_v43 = vmul.f32 %v6027_v39, %v4330_v56  ;;  %v7728_v11 = vmul.f32 %v6027_v39, %v4329_v61  ;;  %v4433_v61 = vld [vmem:[#allocation2 + $0x4] sm:$0x8] }
 0xe2b   :  { %v4295_v16 = vmul.f32 %v5663_v6, %v4285_v55  ;;  %v4296_v44 = vmul.f32 %v5663_v6, %v4286_v7  ;;  %v4297_v47 = vmul.f32 %v5663_v6, %v4287_v15  ;;  %v4298_v51 = vmul.f32 %v5663_v6, %v4288_v45 }
 0xe2c   :  { %v4440_v56 = vshrl.u32 %v4433_v61, 16 }
 0xe2d   :  { %v4305_v59 = vadd.f32 %v5664_v28, %v4295_v16  ;;  %v4306_v12 = vadd.f32 %v5664_v28, %v4296_v44  ;;  %v4307_v10 = vadd.f32 %v5664_v28, %v4297_v47  ;;  %v4308_v2 = vadd.f32 %v5664_v28, %v4298_v51  ;;  %v5991_v16 = vld [vmem:[%s8155_s20 + $0x20] sm:$0xff]  }
 0xe2e   :  { %v7736_v58 = vrot.slane %v4440_v56, 11  ;;  %5903 = vmatprep.subr.bf16.mxu1 %v5991_v16 }
 0xe2f   :  { %v4309_v36 = vmax.f32 %v4305_v59, 0.0  ;;  %v4310_v17 = vmax.f32 %v4306_v12, 0.0  ;;  %v4311_v29 = vmax.f32 %v4307_v10, 0.0  ;;  %v4312_v24 = vmax.f32 %v4308_v2, 0.0  ;;  %5904 = vmatpush3.bf16.msra.mxu1 %v5991_v16  ;;  %v5994_v16 = vld [vmem:[%s8155_s20 + $0x8] sm:$0xff]  }
 0xe31   :  { %v5734_v8 = vpack.c.bf16 %v4309_v36, %v4309_v36  ;;  %v5735_v31 = vpack.c.bf16 %v4310_v17, %v4310_v17  ;;  %v5736_v38 = vpack.c.bf16 %v4311_v29, %v4311_v29  ;;  %v5737_v20 = vpack.c.bf16 %v4312_v24, %v4312_v24 }
 0xe33   :  { %4395 = vst.msk [vmem:[#allocation2 + $0x8] sm:$0xf] %vm8263_vm0, %v5734_v8  ;;  %v5672_v8 = vrot.slane %v4462_v3, 11  ;;  %vm8271_vm0 = vcmask 388352  }
 0xe34   :  { %4396 = vst.msk [vmem:[#allocation2 + $0xc] sm:$0xf] %vm8264_vm11, %v5735_v31  ;;  %vm8272_vm11 = vmmov %vm8271_vm0 }
 0xe35   :  { %4397 = vst.msk [vmem:[#allocation2 + $0x20] sm:$0xf] %vm8265_vm14, %v5736_v38  ;;  %vm8273_vm14 = vmmov %vm8271_vm0 }
 0xe36   :  { %4398 = vst.msk [vmem:[#allocation2 + $0x24] sm:$0xf] %vm8266_vm7, %v5737_v20  ;;  %v5992_v20 = vld [vmem:[%s8155_s20 + $0x18] sm:$0xff]   ;;  %vm8274_vm7 = vmmov %vm8271_vm0 }
 0xe37   :  { %5905 = vmatprep.subr.bf16.mxu1 %v5992_v20 }
 0xe38   :  { %5906 = vmatpush3.bf16.msra.mxu1 %v5992_v20 }
 0xe3a   :  { %v4499_v9 = vld [vmem:[#allocation2 + $0x8] sm:$0xf] }
 0xe3b   :  { %v4500_v50 = vld [vmem:[#allocation2 + $0xc] sm:$0xf]  ;;  %4507 = vrot.lane.b32.xlu0 %v4499_v9, %s6068_s4  ;;  %v4593_v42 = vld [vmem:[#allocation2 + $0x8] sm:$0xe]  ;;  %v4399_v9 = vld [vmem:[#allocation2 + $0x4] sm:$0x8] }
 0xe3c   :  { %4509 = vrot.lane.b32.xlu1 %v4500_v50, %s6068_s4  ;;  %v4594_v62 = vld [vmem:[#allocation2 + $0xc] sm:$0xf]  ;;  %v5673_v1 = vrot.slane %v4593_v42, 9  ;;  %v4434_v33 = vld [vmem:[#allocation2 + $0x8] sm:$0xf] }
 0xe3d   :  { %v4502_v22 = vld [vmem:[#allocation2 + $0x24] sm:$0xf]  ;;  %v4607_v37 = vrot.slane %v4594_v62, 5  ;;  %v4435_v60 = vld [vmem:[#allocation2 + $0xc] sm:$0xf]  ;;  %v4445_v48 = vshrl.u32 %v4434_v33, 16 }
 0xe3e   :  { %v4501_v30 = vld [vmem:[#allocation2 + $0x20] sm:$0xf]  ;;  %v4454_v54 = vshrl.u32 %v4435_v60, 16  ;;  %v4457_v0 = vshll.u32 %v4435_v60, 16  ;;  %v4448_v4 = vshll.u32 %v4434_v33, 16 }
 0xe3f   :  { %v4437_v63 = vld [vmem:[#allocation2 + $0x20] sm:$0xf]  ;;  %v4609_v52 = vrot.slane %v4607_v37, 4  ;;  %v4438_v49 = vld [vmem:[#allocation2 + $0x24] sm:$0xf]  ;;  %4511 = vrot.lane.b32.xlu0 %v4501_v30, %s6068_s4  ;;  %v4447_v14 = vrot.slane %v4445_v48, 7  ;;  %v4608_v55 = vsel %vm6291_vm13, %v5673_v1, %v4607_v37 }
 0xe40   :  { %v4467_v57 = vshrl.u32 %v4437_v63, 16  ;;  %4513 = vrot.lane.b32.xlu1 %v4502_v22, %s6068_s4  ;;  %v4456_v26 = vrot.slane %v4454_v54, 7  ;;  %v4476_v23 = vshrl.u32 %v4438_v49, 16  ;;  %v4470_v6 = vshll.u32 %v4437_v63, 16  ;;  %v4524_v39 = vld [vmem:[#allocation2 + $0xc] sm:$0xf] }
 0xe41   :  { %v4539_v15 = vshll.u32 %v4524_v39, 16  ;;  %v4543_v45 = vshrl.u32 %v4524_v39, 16  ;;  %v4523_v28 = vld [vmem:[#allocation2 + $0x8] sm:$0xf]  ;;  %v4452_v44 = vrot.slane %v4447_v14, 4  ;;  %v4479_v59 = vshll.u32 %v4438_v49, 16 }
 0xe42   :  { %v4469_v7 = vrot.slane %v4467_v57, 7  ;;  %v4459_v47 = vor.u32 %v4457_v0, %v4456_v26  ;;  %v4478_v51 = vrot.slane %v4476_v23, 7  ;;  %v4527_v12 = vld [vmem:[#allocation2 + $0x24] sm:$0xf]  ;;  %v4611_v10 = vsel %vm6291_vm13, %v4609_v52, %v4610_v46  ;;  %v4526_v29 = vld [vmem:[#allocation2 + $0x20] sm:$0xf] }
 0xe43   :  { %v4450_v2 = vor.u32 %v4448_v4, %v4447_v14  ;;  %v7750_v36 = vrot.slane %v4539_v15, 5  ;;  %v4545_v17 = vrot.slane %v4543_v45, 4  ;;  %4619 = vrot.lane.b32.xlu0 %v4608_v55, %s6073_s11  ;;  %v4530_v38 = vshrl.u32 %v4523_v28, 16  ;;  %v4402_v22 = vld [vmem:[#allocation2 + $0x1c] sm:$0x8]  ;;  %v5993_v48 = vld [vmem:[%s8155_s20 + $0x10] sm:$0xff]  }
 0xe44   :  { %4621 = vrot.lane.b32.xlu1 %v4611_v10, %s6073_s11  ;;  %v4474_v24 = vrot.slane %v4469_v7, 4  ;;  %v4472_v31 = vor.u32 %v4470_v6, %v4469_v7  ;;  %v4460_v61 = vsel %vm6259_vm10, %v4452_v44, %v4459_v47  ;;  %v4481_v56 = vor.u32 %v4479_v59, %v4478_v51  ;;  %v4400_v30 = vld [vmem:[#allocation2 + $0x8] sm:$0xf]  ;;  %v4401_v14 = vld [vmem:[#allocation2 + $0xc] sm:$0x7]  ;;  %5907 = vmatprep.subr.bf16.mxu1 %v5993_v48 }
 0xe45   :  { %v4533_v21 = vshll.u32 %v4523_v28, 16  ;;  %v4563_v50 = vshll.u32 %v4527_v12, 16  ;;  %v4546_v46 = vor.u32 %v4545_v17, %v7750_v36  ;;  %v4532_v62 = vrot.slane %v4530_v38, 4  ;;  %v4404_v18 = vld [vmem:[#allocation2 + $0x24] sm:$0x7]  ;;  %5908 = vmatpush3.bf16.msra.mxu1 %v5993_v48 }
 0xe46   :  { %v4567_v42 = vshrl.u32 %v4527_v12, 16  ;;  %v4554_v3 = vshrl.u32 %v4526_v29, 16  ;;  %v4451_v37 = vsel %vm6259_vm10, %v7736_v58, %v4450_v2  ;;  %v4557_v60 = vshll.u32 %v4526_v29, 16  ;;  %v4403_v58 = vld [vmem:[#allocation2 + $0x20] sm:$0xf]  ;;  %5909 = vmatprep.subr.bf16.mxu1 %v5994_v16 }
 0xe47   :  { %v4535_v1 = vrot.slane %v4533_v21, 5  ;;  %v7763_v33 = vrot.slane %v4563_v50, 5  ;;  %4483 = vrot.lane.b32.xlu0 %v4451_v37, %s6064_s12  ;;  %v4551_v54 = vrot.slane %v4549_v40, 5  ;;  %v5669_v0 = vrot.slane %v4399_v9, 11  ;;  %v4597_v45 = vld [vmem:[#allocation2 + $0x24] sm:$0xf] }
 0xe48   :  { %4485 = vrot.lane.b32.xlu1 %v4460_v61, %s6064_s12  ;;  %v4569_v63 = vrot.slane %v4567_v42, 4  ;;  %v4556_v52 = vrot.slane %v4554_v3, 4  ;;  %v4573_v49 = vshll.u32 %v4528_v53, 16  ;;  %v4559_v57 = vrot.slane %v4557_v60, 5  ;;  %v4598_v61 = vld [vmem:[#allocation2 + $0x28] sm:$0x1] }
 0xe49   :  { %v4536_v4 = vor.u32 %v4535_v1, %v4532_v62  ;;  %v5670_v26 = vrot.slane %v4402_v22, 11  ;;  %v4482_v23 = vsel %vm6259_vm10, %v4474_v24, %v4481_v56  ;;  %v4473_v6 = vsel %vm6259_vm10, %v5672_v8, %v4472_v31  ;;  %v5996_v8 = vld [vmem:[%s8155_s20] sm:$0xff]   ;;  %5910 = vmatpush3.bf16.msra.mxu1 %v5994_v16 }
 0xe4a   :  { %v4547_v39 = vrot.slane %v4546_v46, 4  ;;  %v4413_v55 = vrot.slane %v4400_v30, 7  ;;  %v4570_v7 = vor.u32 %v4569_v63, %v7763_v33  ;;  %v4560_v15 = vor.u32 %v4559_v57, %v4556_v52  ;;  %v4596_v21 = vld [vmem:[#allocation2 + $0x20] sm:$0xe]  ;;  %5911 = vmatprep.subr.bf16.mxu1 %v5996_v8 }
 0xe4b   :  { %v4537_v40 = vrot.slane %v4536_v4, 4  ;;  %v4420_v28 = vrot.slane %v4403_v58, 7  ;;  %4487 = vrot.lane.b32.xlu0 %v4473_v6, %s6064_s12  ;;  %v4416_v44 = vrot.slane %v4401_v14, 7  ;;  %v4423_v12 = vrot.slane %v4404_v18, 7 }
 0xe4c   :  { %4489 = vrot.lane.b32.xlu1 %v4482_v23, %s6064_s12  ;;  %v4415_v47 = vrot.slane %v4413_v55, 4  ;;  %v4414_v51 = vsel %vm6243_vm5, %v5669_v0, %v4413_v55  ;;  %v4552_v2 = vsel %vm6282_vm12, %v4547_v39, %v4551_v54  ;;  %v4575_v17 = vrot.slane %v4573_v49, 5 }
 0xe4d   :  { %4429 = vst.msk [vmem:[#allocation3] sm:$0xf] %vm8267_vm2, %v4414_v51  ;;  %v4422_v59 = vrot.slane %v4420_v28, 4  ;;  %v4421_v10 = vsel %vm6243_vm5, %v5670_v26, %v4420_v28  ;;  %v4614_v29 = vrot.slane %v4597_v45, 5  ;;  %v4542_v31 = vsel %vm6282_vm12, %v4537_v40, %v7750_v36  ;;  %5912 = vmatpush3.bf16.msra.mxu1 %v5996_v8 }
 0xe4e   :  { %v4417_v24 = vsel %vm6243_vm5, %v4415_v47, %v4416_v44  ;;  %4431 = vst.msk [vmem:[#allocation3 + $0x8] sm:$0xf] %vm8268_vm3, %v4421_v10  ;;  %v4571_v38 = vrot.slane %v4570_v7, 4  ;;  %v4561_v20 = vrot.slane %v4560_v15, 4  ;;  %v4617_v53 = vrot.slane %v4598_v61, 5 }
 0xe4f   :  { %4430 = vst.msk [vmem:[#allocation3 + $0x4] sm:$0xf] %vm8269_vm1, %v4417_v24  ;;  %v4424_v56 = vsel %vm6243_vm5, %v4422_v59, %v4423_v12  ;;  %4577 = vrot.lane.b32.xlu0 %v4542_v31, %s6071_s30  ;;  %v4616_v9 = vrot.slane %v4614_v29, 4  ;;  %v5674_v46 = vrot.slane %v4596_v21, 9  ;;  %vm8275_vm2 = vcmask 519552  }
 0xe50   :  { %4579 = vrot.lane.b32.xlu1 %v4552_v2, %s6071_s30  ;;  %4432 = vst.msk [vmem:[#allocation3 + $0xc] sm:$0xf] %vm8270_vm6, %v4424_v56  ;;  %v4576_v36 = vsel %vm6282_vm12, %v4571_v38, %v4575_v17  ;;  %v4566_v50 = vsel %vm6282_vm12, %v4561_v20, %v7763_v33  ;;  %vm8276_vm3 = vmmov %vm8275_vm2  ;;  %vm8277_vm1 = vcmask 650752  }
 0xe51   :  { %v4618_v62 = vsel %vm6291_vm13, %v4616_v9, %v4617_v53  ;;  %v4615_v42 = vsel %vm6291_vm13, %v5674_v46, %v4614_v29  ;;  %vm8278_vm6 = vmmov %vm8277_vm1 }
 0xe53   :  { %4581 = vrot.lane.b32.xlu0 %v4566_v50, %s6071_s30 }
 0xe54   :  { %4583 = vrot.lane.b32.xlu1 %v4576_v36, %s6071_s30 }
 0xe57   :  { %4623 = vrot.lane.b32.xlu0 %v4615_v42, %s6073_s11 }
 0xe58   :  { %4625 = vrot.lane.b32.xlu1 %v4618_v62, %s6073_s11 }
 0xead   :  { %v4508_v22 = vpop.permute.xlu0 %4507 }
 0xeae   :  { %v4510_v3 = vpop.permute.xlu1 %4509 }
 0xeb1   :  { %v4512_v1 = vpop.permute.xlu0 %4511 }
 0xeb2   :  { %v4514_v37 = vpop.permute.xlu1 %4513 }
 0xeb5   :  { %v4620_v60 = vpop.permute.xlu0 %4619 }
 0xeb6   :  { %v4622_v33 = vpop.permute.xlu1 %4621 }
 0xeb9   :  { %v4484_v48 = vpop.permute.xlu0 %4483 }
 0xeba   :  { %v4486_v30 = vpop.permute.xlu1 %4485  ;;  %4495 = vst.msk [vmem:[#allocation3] sm:$0xf] %vm2668_vm15, %v4484_v48  ;;  %v5684_v48 = vld [vmem:[%s8159_s24] ss:$0 sm:$0xff] }
 0xebb   :  { %4496 = vst.msk [vmem:[#allocation3 + $0x4] sm:$0xf] %vm2668_vm15, %v4486_v30 }
 0xebc   :  { %4520 = vst.msk [vmem:[#allocation3 + $0x4] sm:$0xf] %vm8271_vm0, %v4510_v3  ;;  %vm8279_vm0 = vmmov %vm8275_vm2 }
 0xebd   :  { %4519 = vst.msk [vmem:[#allocation3] sm:$0xf] %vm8272_vm11, %v4508_v22  ;;  %v4488_v63 = vpop.permute.xlu0 %4487  ;;  %vm8280_vm11 = vmmov %vm8279_vm0 }
 0xebe   :  { %v4490_v54 = vpop.permute.xlu1 %4489  ;;  %4497 = vst.msk [vmem:[#allocation3 + $0x8] sm:$0xf] %vm2668_vm15, %v4488_v63 }
 0xebf   :  { %4498 = vst.msk [vmem:[#allocation3 + $0xc] sm:$0xf] %vm2668_vm15, %v4490_v54 }
 0xec0   :  { %4522 = vst.msk [vmem:[#allocation3 + $0xc] sm:$0xf] %vm8273_vm14, %v4514_v37  ;;  %vm8281_vm14 = vmmov %vm8277_vm1 }
 0xec1   :  { %4521 = vst.msk [vmem:[#allocation3 + $0x8] sm:$0xf] %vm8274_vm7, %v4512_v1  ;;  %v4578_v0 = vpop.permute.xlu0 %4577  ;;  %vm8282_vm7 = vmmov %vm8277_vm1 }
 0xec2   :  { %v4580_v52 = vpop.permute.xlu1 %4579  ;;  %4589 = vst.msk [vmem:[#allocation3] sm:$0xf] %vm8276_vm3, %v4578_v0 }
 0xec3   :  { %4590 = vst.msk [vmem:[#allocation3 + $0x4] sm:$0xf] %vm8275_vm2, %v4580_v52  ;;  %vm8283_vm2 = vcmask 654336  }
 0xec4   :  { %4632 = vst.msk [vmem:[#allocation3 + $0x4] sm:$0xf] %vm8277_vm1, %v4622_v33  ;;  %vm8284_vm3 = vmmov %vm8283_vm2  ;;  %vm8285_vm1 = vcmask 130048  }
 0xec5   :  { %4631 = vst.msk [vmem:[#allocation3] sm:$0xf] %vm8278_vm6, %v4620_v60  ;;  %v4582_v4 = vpop.permute.xlu0 %4581  ;;  %vm8286_vm6 = vmmov %vm8285_vm1 }
 0xec6   :  { %v4584_v58 = vpop.permute.xlu1 %4583  ;;  %4591 = vst.msk [vmem:[#allocation3 + $0x8] sm:$0xf] %vm8280_vm11, %v4582_v4 }
 0xec7   :  { %4592 = vst.msk [vmem:[#allocation3 + $0xc] sm:$0xf] %vm8279_vm0, %v4584_v58  ;;  %vm8287_vm0 = vmmov %vm8285_vm1  ;;  %v5685_v58 = vld [vmem:[%s8160_s25] ss:$0 sm:$0xff] }
 0xec8   :  { %vm8288_vm11 = vmmov %vm8287_vm0 }
 0xec9   :  { %v4624_v57 = vpop.permute.xlu0 %4623 }
 0xeca   :  { %v4626_v49 = vpop.permute.xlu1 %4625  ;;  %4633 = vst.msk [vmem:[#allocation3 + $0x8] sm:$0xf] %vm8282_vm7, %v4624_v57  ;;  %vm8290_vm7 = vmmov %vm8287_vm0 }
 0xecb   :  { %4634 = vst.msk [vmem:[#allocation3 + $0xc] sm:$0xf] %vm8281_vm14, %v4626_v49  ;;  %vm8289_vm14 = vmmov %vm8287_vm0 }
 0xecc   :  { %v5995_v14 = vld [vmem:[#allocation3] sm:$0xff]  }
 0xecd   :  { %5913 = vmatprep.mubr.msk.bf16.mxu1 %vm8283_vm2, %v5995_v14  ;;  %vm8291_vm2 = vmmov %vm8287_vm0 }
 0xed2   :  { %v5997_v26 = vld [vmem:[#allocation3 + $0x8] sm:$0xff]  }
 0xed3   :  { %5914 = vmatmul.mubr.msk.bf16.vlgmr.msra.gmra.mxu1 %vm8284_vm3, %v5997_v26  ;;  %vm8292_vm3 = vmmov %vm8287_vm0 }
 0xf93   :  { %v5915_v23 = vpop.f32.mrf.mxu1 }
 0xf94   :  { %v4739_v15 = vsel %vm8287_vm0, %v5915_v23, 0.0 }
 0xf95   :  { %v4719_v6 = vpop.f32.mrf.mxu1 }
 0xf96   :  { %v4736_v18 = vsel %vm8285_vm1, %v4719_v6, 0.0  ;;  %vm8293_vm1 = vcmask 125952  }
 0xf97   :  { %v5916_v39 = vpop.f32.mrf.mxu1  ;;  %vm8295_vm0 = vmmov %vm8293_vm1 }
 0xf98   :  { %v4741_v28 = vsel %vm8288_vm11, %v5916_v39, 0.0  ;;  %vm8296_vm11 = vmmov %vm8295_vm0 }
 0xf99   :  { %v4722_v55 = vpop.f32.mrf.mxu1 }
 0xf9a   :  { %v4737_v40 = vsel %vm8286_vm6, %v4722_v55, 0.0  ;;  %vm8294_vm6 = vmmov %vm8293_vm1 }
 0xf9b   :  { %v4738_v7 = vadd.f32 %v4737_v40, %v4736_v18 }
 0xf9d   :  { %v4740_v45 = vadd.f32 %v4739_v15, %v4738_v7 }
 0xf9f   :  { %v4742_v16 = vadd.f32 %v4741_v28, %v4740_v45 }
 0xfa1   :  { %v4743_v44 = vrot.slane %v4742_v16, 4 }
 0xfa3   :  { %v4744_v47 = vadd.f32 %v4743_v44, %v4742_v16  ;;  %v4950_v44 = vld [vmem:[#allocation2 + $0x4] sm:$0x8] }
 0xfa5   :  { %v4745_v51 = vrot.slane %v4744_v47, 2 }
 0xfa7   :  { %v4746_v59 = vadd.f32 %v4745_v51, %v4744_v47  ;;  %v4908_v47 = vld [vmem:[#allocation2 + $0x4] sm:$0x8]  ;;  %v7853_v51 = vld [vmem:[#allocation2 + $0x1c] sm:$0x8] }
 0xfa9   :  { %v4747_v12 = vrot.slane %v4746_v59, 1 }
 0xfab   :  { %v4748_v10 = vadd.f32 %v4747_v12, %v4746_v59  ;;  %v4838_v59 = vld [vmem:[#allocation2 + $0x4] sm:$0xc]  ;;  %v7855_v12 = vld [vmem:[#allocation2 + $0x10] sm:$0x1] }
 0xfad   :  { %v4749_v2 = vmul.f32 0.03125, %v4748_v10  ;;  %v7857_v10 = vld [vmem:[#allocation2 + $0x28] sm:$0x1] }
 0xfaf   :  { %v4750_v17 = vsub.f32 %v4719_v6, %v4749_v2  ;;  %v4751_v29 = vsub.f32 %v4722_v55, %v4749_v2  ;;  %v4752_v24 = vsub.f32 %v5915_v23, %v4749_v2  ;;  %v4753_v8 = vsub.f32 %v5916_v39, %v4749_v2  ;;  %v7859_v2 = vld [vmem:[#allocation2 + $0x10] sm:$0x3] }
 0xfb1   :  { %v4754_v31 = vmul.f32 %v4750_v17, %v4750_v17  ;;  %v4755_v38 = vmul.f32 %v4751_v29, %v4751_v29  ;;  %v4756_v20 = vmul.f32 %v4752_v24, %v4752_v24  ;;  %v4757_v61 = vmul.f32 %v4753_v8, %v4753_v8 }
 0xfb3   :  { %v4758_v56 = vsel %vm8289_vm14, %v4754_v31, 0.0  ;;  %v4759_v21 = vsel %vm8290_vm7, %v4755_v38, 0.0  ;;  %v4761_v36 = vsel %vm8291_vm2, %v4756_v20, 0.0  ;;  %v4763_v9 = vsel %vm8292_vm3, %v4757_v61, 0.0  ;;  %vm8300_vm14 = vmmov %vm8295_vm0 }
 0xfb4   :  { %v4760_v53 = vadd.f32 %v4759_v21, %v4758_v56  ;;  %v4845_v31 = vshrl.u32 %v4838_v59, 16  ;;  %v4848_v38 = vshll.u32 %v4838_v59, 16  ;;  %v5127_v20 = vrot.slane %v7855_v12, 5  ;;  %v4953_v56 = vld [vmem:[#allocation2 + $0x1c] sm:$0x8] }
 0xfb5   :  { %v5134_v61 = vrot.slane %v7857_v10, 5  ;;  %v5042_v21 = vld [vmem:[#allocation2 + $0x10] sm:$0x1] }
 0xfb6   :  { %v4762_v50 = vadd.f32 %v4761_v36, %v4760_v53  ;;  %v5247_v53 = vrot.slane %v7859_v2, 6  ;;  %v5154_v36 = vld [vmem:[#allocation2 + $0x10] sm:$0x3] }
 0xfb8   :  { %v4764_v46 = vadd.f32 %v4763_v9, %v4762_v50  ;;  %v7865_v50 = vld [vmem:[#allocation2 + $0x28] sm:$0x3] }
 0xfba   :  { %v4765_v62 = vrot.slane %v4764_v46, 4 }
 0xfbc   :  { %v4766_v42 = vadd.f32 %v4765_v62, %v4764_v46 }
 0xfbe   :  { %v4767_v3 = vrot.slane %v4766_v42, 2 }
 0xfc0   :  { %v4768_v22 = vadd.f32 %v4767_v3, %v4766_v42 }
 0xfc2   :  { %v4769_v37 = vrot.slane %v4768_v22, 1 }
 0xfc4   :  { %v4770_v1 = vadd.f32 %v4769_v37, %v4768_v22  ;;  %v4979_v37 = vshrl.u32 %v4953_v56, 16 }
 0xfc6   :  { %v4771_v33 = vmul.f32 0.03125, %v4770_v1  ;;  %v5066_v1 = vshll.u32 %v5042_v21, 16 }
 0xfc8   :  { %v4772_v60 = vadd.f32 1e-05, %v4771_v33  ;;  %v4847_v33 = vrot.slane %v4845_v31, 6 }
 0xfca   :  { %6028 = vrsqrt.f32 %v4772_v60  ;;  %v4850_v60 = vrot.slane %v4848_v38, 7 }
 0xfd7   :  { %v6029_v30 = vpop.eup %6028 }
 0xfd8   :  { %v4774_v54 = vmul.f32 %v6029_v30, %v4750_v17  ;;  %v4775_v63 = vmul.f32 %v6029_v30, %v4751_v29  ;;  %v4776_v52 = vmul.f32 %v6029_v30, %v4752_v24  ;;  %v4777_v0 = vmul.f32 %v6029_v30, %v4753_v8  ;;  %v4841_v29 = vld [vmem:[#allocation2 + $0x1c] sm:$0xc] }
 0xfd9   :  { %v4957_v17 = vshrl.u32 %v4950_v44, 16  ;;  %v5690_v24 = vrot.slane %v4908_v47, 11  ;;  %v5691_v8 = vrot.slane %v7853_v51, 11  ;;  %v4873_v9 = vshrl.u32 %v4841_v29, 16 }
 0xfda   :  { %v4784_v4 = vmul.f32 %v5684_v48, %v4774_v54  ;;  %v4785_v49 = vmul.f32 %v5684_v48, %v4775_v63  ;;  %v4786_v57 = vmul.f32 %v5684_v48, %v4776_v52  ;;  %v4787_v14 = vmul.f32 %v5684_v48, %v4777_v0 }
 0xfdb   :  { %v7867_v42 = vrot.slane %v4957_v17, 11  ;;  %v4876_v3 = vshll.u32 %v4841_v29, 16  ;;  %v5178_v54 = vshrl.u32 %v5154_v36, 16  ;;  %v5181_v63 = vshll.u32 %v5154_v36, 16 }
 0xfdc   :  { %v4794_v26 = vadd.f32 %v5685_v58, %v4784_v4  ;;  %v4795_v23 = vadd.f32 %v5685_v58, %v4785_v49  ;;  %v4796_v6 = vadd.f32 %v5685_v58, %v4786_v57  ;;  %v4797_v39 = vadd.f32 %v5685_v58, %v4787_v14  ;;  %v7872_v4 = vld [vmem:[#allocation2 + $0x28] sm:$0x1] }
 0xfdd   :  { %v5206_v52 = vshrl.u32 %v7865_v50, 16  ;;  %v7884_v47 = vrot.slane %v4873_v9, 6  ;;  %v7886_v59 = vrot.slane %v4876_v3, 7  ;;  %v7896_v36 = vrot.slane %v5181_v63, 6 }
 0xfde   :  { %v4798_v55 = vmax.f32 %v4794_v26, 0.0  ;;  %v4799_v18 = vmax.f32 %v4795_v23, 0.0  ;;  %v4800_v40 = vmax.f32 %v4796_v6, 0.0  ;;  %v4801_v7 = vmax.f32 %v4797_v39, 0.0 }
 0xfe0   :  { %v5738_v15 = vpack.c.bf16 %v4798_v55, %v4798_v55  ;;  %v5739_v45 = vpack.c.bf16 %v4799_v18, %v4799_v18  ;;  %v5740_v28 = vpack.c.bf16 %v4800_v40, %v4800_v40  ;;  %v5741_v16 = vpack.c.bf16 %v4801_v7, %v4801_v7 }
 0xfe1   :  { %v5209_v55 = vshll.u32 %v7865_v50, 16  ;;  %v4851_v18 = vor.u32 %v4850_v60, %v4847_v33  ;;  %v7877_v7 = vrot.slane %v4979_v37, 11 }
 0xfe2   :  { %4834 = vst.msk [vmem:[#allocation2 + $0x8] sm:$0xf] %vm8293_vm1, %v5738_v15  ;;  %v7879_v15 = vrot.slane %v5066_v1, 5  ;;  %vm8309_vm1 = vcmask 650752  }
 0xfe3   :  { %4835 = vst.msk [vmem:[#allocation2 + $0xc] sm:$0xf] %vm8294_vm6, %v5739_v45  ;;  %v5090_v45 = vshll.u32 %v7872_v4, 16  ;;  %v7898_v9 = vrot.slane %v4851_v18, 4  ;;  %vm8310_vm6 = vmmov %vm8309_vm1 }
 0xfe4   :  { %4836 = vst.msk [vmem:[#allocation2 + $0x20] sm:$0xf] %vm8295_vm0, %v5740_v28 }
 0xfe5   :  { %4837 = vst.msk [vmem:[#allocation2 + $0x24] sm:$0xf] %vm8296_vm11, %v5741_v16 }
 0xfe9   :  { %v5016_v62 = vld [vmem:[#allocation2 + $0x8] sm:$0xf] }
 0xfea   :  { %v5017_v46 = vld [vmem:[#allocation2 + $0xc] sm:$0xf]  ;;  %5024 = vrot.lane.b32.xlu0 %v5016_v62, %s6071_s30  ;;  %v4909_v22 = vld [vmem:[#allocation2 + $0x8] sm:$0xf] }
 0xfeb   :  { %5026 = vrot.lane.b32.xlu1 %v5017_v46, %s6071_s30  ;;  %v4922_v30 = vrot.slane %v4909_v22, 7  ;;  %v4912_v48 = vld [vmem:[#allocation2 + $0x20] sm:$0xf]  ;;  %v4910_v0 = vld [vmem:[#allocation2 + $0xc] sm:$0x7] }
 0xfec   :  { %v5111_v58 = vld [vmem:[#allocation2 + $0xc] sm:$0xf]  ;;  %v5019_v49 = vld [vmem:[#allocation2 + $0x24] sm:$0xf]  ;;  %v5018_v57 = vld [vmem:[#allocation2 + $0x20] sm:$0xf] }
 0xfed   :  { %v4924_v14 = vrot.slane %v4922_v30, 4  ;;  %v4929_v26 = vrot.slane %v4912_v48, 7  ;;  %v5124_v23 = vrot.slane %v5111_v58, 5  ;;  %v5110_v6 = vld [vmem:[#allocation2 + $0x8] sm:$0xe]  ;;  %v4925_v40 = vrot.slane %v4910_v0, 7 }
 0xfee   :  { %5028 = vrot.lane.b32.xlu0 %v5018_v57, %s6071_s30  ;;  %v5114_v39 = vld [vmem:[#allocation2 + $0x24] sm:$0xf]  ;;  %v4923_v28 = vsel %vm6243_vm5, %v5690_v24, %v4922_v30  ;;  %v5113_v44 = vld [vmem:[#allocation2 + $0x20] sm:$0xe]  ;;  %v5694_v31 = vrot.slane %v5110_v6, 9  ;;  %v7894_v24 = vrot.slane %v5178_v54, 5  ;;  %v4879_v30 = vor.u32 %v7886_v59, %v7884_v47 }
 0xfef   :  { %5030 = vrot.lane.b32.xlu1 %v5019_v49, %s6071_s30  ;;  %v4913_v16 = vld [vmem:[#allocation2 + $0x24] sm:$0x7]  ;;  %v4926_v17 = vsel %vm6243_vm5, %v4924_v14, %v4925_v40  ;;  %v4931_v29 = vrot.slane %v4929_v26, 4  ;;  %v5131_v38 = vrot.slane %v5114_v39, 5  ;;  %v5126_v56 = vrot.slane %v5124_v23, 4 }
 0xff0   :  { %v7892_v21 = vld [vmem:[#allocation2 + $0xc] sm:$0xf]  ;;  %v4932_v46 = vrot.slane %v4913_v16, 7  ;;  %v5695_v62 = vrot.slane %v5113_v44, 9  ;;  %v7900_v3 = vld [vmem:[#allocation2 + $0x8] sm:$0xc]  ;;  %v4930_v37 = vsel %vm6243_vm5, %v5691_v8, %v4929_v26  ;;  %v5125_v54 = vsel %vm6291_vm13, %v5694_v31, %v5124_v23 }
 0xff1   :  { %v5041_v22 = vld [vmem:[#allocation2 + $0xc] sm:$0xf]  ;;  %v4951_v1 = vld [vmem:[#allocation2 + $0x8] sm:$0xf]  ;;  %v7906_v60 = vld [vmem:[#allocation2 + $0x20] sm:$0xf]  ;;  %v5128_v8 = vsel %vm6291_vm13, %v5126_v56, %v5127_v20 }
 0xff2   :  { %4934 = vrot.lane.b32.xlu0 %v4923_v28, %s6064_s12  ;;  %v4952_v33 = vld [vmem:[#allocation2 + $0xc] sm:$0xf]  ;;  %v4933_v48 = vsel %vm6243_vm5, %v4931_v29, %v4932_v46  ;;  %v5133_v63 = vrot.slane %v5131_v38, 4  ;;  %v5244_v0 = vrot.slane %v7892_v21, 6  ;;  %v4955_v51 = vld [vmem:[#allocation2 + $0x24] sm:$0xf]  ;;  %v5132_v26 = vsel %vm6291_vm13, %v5695_v62, %v5131_v38  ;;  %vm8297_vm5 = vmmov %vm8295_vm0 }
 0xff3   :  { %4936 = vrot.lane.b32.xlu1 %v4926_v17, %s6064_s12  ;;  %v5040_v58 = vld [vmem:[#allocation2 + $0x8] sm:$0xf]  ;;  %v5696_v5 = vrot.slane %v7900_v3, 10  ;;  %v5056_v49 = vshll.u32 %v5041_v22, 16  ;;  %v5060_v57 = vshrl.u32 %v5041_v22, 16  ;;  %v4962_v23 = vshrl.u32 %v4951_v1, 16 }
 0xff4   :  { %v5044_v14 = vld [vmem:[#allocation2 + $0x24] sm:$0xf]  ;;  %v4971_v6 = vshrl.u32 %v4952_v33, 16  ;;  %v4984_v39 = vshrl.u32 %v7906_v60, 16  ;;  %v5043_v18 = vld [vmem:[#allocation2 + $0x20] sm:$0xf]  ;;  %v5135_v20 = vsel %vm6291_vm13, %v5133_v63, %v5134_v61  ;;  %vm8299_vm13 = vmmov %vm8295_vm0 }
 0xff5   :  { %v4993_v40 = vshrl.u32 %v4955_v51, 16  ;;  %v7925_v28 = vrot.slane %v5056_v49, 5  ;;  %v5062_v12 = vrot.slane %v5060_v57, 4  ;;  %v5047_v16 = vshrl.u32 %v5040_v58, 16  ;;  %v5152_v57 = vld [vmem:[#allocation2 + $0x8] sm:$0xe] }
 0xff6   :  { %4938 = vrot.lane.b32.xlu0 %v4930_v37, %s6064_s12  ;;  %v5050_v44 = vshll.u32 %v5040_v58, 16  ;;  %v5080_v17 = vshll.u32 %v5044_v14, 16  ;;  %v5084_v29 = vshrl.u32 %v5044_v14, 16  ;;  %v5246_v31 = vrot.slane %v5244_v0, 4  ;;  %v5153_v37 = vld [vmem:[#allocation2 + $0xc] sm:$0xf] }
 0xff7   :  { %4940 = vrot.lane.b32.xlu1 %v4933_v48, %s6064_s12  ;;  %v4974_v38 = vshll.u32 %v4952_v33, 16  ;;  %v5071_v56 = vshrl.u32 %v5043_v18, 16  ;;  %v5074_v46 = vshll.u32 %v5043_v18, 16  ;;  %v4964_v62 = vrot.slane %v4962_v23, 7  ;;  %v6000_v21 = vld [vmem:[%s8156_s21 + $0x28] sm:$0xff]  }
 0xff8   :  { %v4973_v3 = vrot.slane %v4971_v6, 7  ;;  %v4965_v22 = vshll.u32 %v4951_v1, 16  ;;  %v4986_v10 = vrot.slane %v4984_v39, 7  ;;  %v4995_v34 = vrot.slane %v4993_v40, 7  ;;  %v5999_v39 = vld [vmem:[%s8156_s21 + $0x30] sm:$0xff]  }
 0xff9   :  { %v5063_v61 = vor.u32 %v5062_v12, %v7925_v28  ;;  %v5049_v48 = vrot.slane %v5047_v16, 4  ;;  %v5052_v63 = vrot.slane %v5050_v44, 5  ;;  %v4996_v58 = vshll.u32 %v4955_v51, 16  ;;  %v4839_v4 = vld [vmem:[#allocation2 + $0x8] sm:$0xf] }
 0xffa   :  { %5136 = vrot.lane.b32.xlu0 %v5125_v54, %s6074_s15  ;;  %v5998_v54 = vld [vmem:[%s8156_s21 + $0x38] sm:$0xff]   ;;  %v7940_v33 = vrot.slane %v5080_v17, 5  ;;  %v5086_v49 = vrot.slane %v5084_v29, 4  ;;  %v5073_v1 = vrot.slane %v5071_v56, 4  ;;  %v5076_v14 = vrot.slane %v5074_v46, 5 }
 0xffb   :  { %5138 = vrot.lane.b32.xlu1 %v5128_v8, %s6074_s15  ;;  %v4987_v8 = vshll.u32 %v7906_v60, 16  ;;  %v5168_v23 = vshrl.u32 %v5153_v37, 16  ;;  %v5171_v6 = vshll.u32 %v5153_v37, 16  ;;  %v4969_v18 = vrot.slane %v4964_v62, 4  ;;  %5917 = vmatprep.subr.bf16.mxu0 %v5998_v54 }
 0xffc   :  { %v4976_v51 = vor.u32 %v4974_v38, %v4973_v3  ;;  %v4967_v40 = vor.u32 %v4965_v22, %v4964_v62  ;;  %v4991_v60 = vrot.slane %v4986_v10, 4  ;;  %v4998_v12 = vor.u32 %v4996_v58, %v4995_v34  ;;  %5918 = vmatpush3.bf16.msra.mxu0 %v5998_v54  ;;  %v5156_v3 = vld [vmem:[#allocation2 + $0x24] sm:$0xf]  ;;  %v5155_v34 = vld [vmem:[#allocation2 + $0x20] sm:$0xe] }
 0xffd   :  { %v4989_v16 = vor.u32 %v4987_v8, %v4986_v10  ;;  %v7947_v44 = vrot.slane %v5063_v61, 4  ;;  %v5245_v17 = vsel %vm6383_vm9, %v5696_v5, %v5244_v0  ;;  %v5087_v29 = vor.u32 %v5086_v49, %v7940_v33  ;;  %5919 = vmatprep.subr.bf16.mxu0 %v5999_v39  ;;  %v4843_v54 = vld [vmem:[#allocation2 + $0x24] sm:$0x7] }
 0xffe   :  { %5140 = vrot.lane.b32.xlu0 %v5132_v26, %s6074_s15  ;;  %v5248_v26 = vsel %vm6383_vm9, %v5246_v31, %v5247_v53  ;;  %v5159_v38 = vshrl.u32 %v5152_v57, 16  ;;  %v7962_v56 = vrot.slane %v5090_v45, 5  ;;  %v5077_v2 = vor.u32 %v5076_v14, %v5073_v1  ;;  %v4840_v31 = vld [vmem:[#allocation2 + $0xc] sm:$0x7]  ;;  %v6001_v58 = vld [vmem:[%s8156_s21 + $0x20] sm:$0xff]  }
 0xfff   :  { %5142 = vrot.lane.b32.xlu1 %v5135_v20, %s6074_s15  ;;  %v5053_v20 = vor.u32 %v5052_v63, %v5049_v48  ;;  %v5170_v46 = vrot.slane %v5168_v23, 5  ;;  %v5173_v53 = vrot.slane %v5171_v6, 6  ;;  %v4977_v0 = vsel %vm6259_vm10, %v4969_v18, %v4976_v51  ;;  %v4842_v48 = vld [vmem:[#allocation2 + $0x20] sm:$0xf] }
0x1000   :  { %v4968_v5 = vsel %vm6259_vm10, %v7867_v42, %v4967_v40  ;;  %v5162_v62 = vshll.u32 %v5152_v57, 16  ;;  %v7975_v45 = vrot.slane %v4879_v30, 4  ;;  %v4999_v22 = vsel %vm6259_vm10, %v4991_v60, %v4998_v12  ;;  %5920 = vmatpush3.bf16.msra.mxu0 %v5999_v39 }
0x1001   :  { %v4990_v10 = vsel %vm6259_vm10, %v7877_v7, %v4989_v16  ;;  %v5069_v42 = vsel %vm6282_vm12, %v7947_v44, %v7879_v15  ;;  %v5054_v37 = vrot.slane %v5053_v20, 4  ;;  %v7986_v61 = vrot.slane %v5087_v29, 4  ;;  %5921 = vmatprep.subr.bf16.mxu0 %v6000_v21  ;;  %vm8298_vm10 = vmmov %vm8295_vm0 }
0x1002   :  { %5256 = vrot.lane.b32.xlu0 %v5245_v17, %s6075_s7  ;;  %v7988_v47 = vrot.slane %v5159_v38, 5  ;;  %v4864_v59 = vshrl.u32 %v4840_v31, 16  ;;  %v4867_v30 = vshll.u32 %v4840_v31, 16  ;;  %v7992_v41 = vrot.slane %v5077_v2, 4 }
0x1003   :  { %5258 = vrot.lane.b32.xlu1 %v5248_v26, %s6075_s7  ;;  %v7994_v7 = vor.u32 %v5173_v53, %v5170_v46  ;;  %v5196_v15 = vshrl.u32 %v5156_v3, 16  ;;  %v4854_v63 = vshrl.u32 %v4839_v4, 16  ;;  %v5164_v8 = vrot.slane %v5162_v62, 6  ;;  %v6002_v26 = vld [vmem:[%s8156_s21 + $0x18] sm:$0xff]  }
0x1004   :  { %v5199_v49 = vshll.u32 %v5156_v3, 16  ;;  %v5187_v57 = vshrl.u32 %v5155_v34, 16  ;;  %v4857_v1 = vshll.u32 %v4839_v4, 16  ;;  %v5190_v14 = vshll.u32 %v5155_v34, 16  ;;  %5922 = vmatpush3.bf16.msra.mxu0 %v6000_v21  ;;  %v6003_v3 = vld [vmem:[%s8156_s21 + $0x10] sm:$0xff]  }
0x1005   :  { %v4856_v23 = vrot.slane %v4854_v63, 6  ;;  %v4882_v6 = vshrl.u32 %v4842_v48, 16  ;;  %v4885_v39 = vshll.u32 %v4842_v48, 16  ;;  %v4866_v18 = vrot.slane %v4864_v59, 6  ;;  %5923 = vmatprep.subr.bf16.mxu0 %v6001_v58  ;;  %v5233_v63 = vld [vmem:[#allocation2 + $0x20] sm:$0xc] }
0x1006   :  { %5000 = vrot.lane.b32.xlu0 %v4968_v5, %s6068_s4  ;;  %v4869_v51 = vrot.slane %v4867_v30, 7  ;;  %v4859_v40 = vrot.slane %v4857_v1, 7  ;;  %v4892_v60 = vshrl.u32 %v4843_v54, 16  ;;  %v5059_v12 = vsel %vm6282_vm12, %v5054_v37, %v7925_v28 }
0x1007   :  { %5002 = vrot.lane.b32.xlu1 %v4977_v0, %s6068_s4  ;;  %v4884_v16 = vrot.slane %v4882_v6, 6  ;;  %v4887_v44 = vrot.slane %v4885_v39, 7  ;;  %v4895_v20 = vshll.u32 %v4843_v54, 16  ;;  %v5165_v17 = vor.u32 %v5164_v8, %v7988_v47 }
0x1008   :  { %v5198_v29 = vrot.slane %v5196_v15, 5  ;;  %v4860_v38 = vor.u32 %v4859_v40, %v4856_v23  ;;  %v4894_v2 = vrot.slane %v4892_v60, 6  ;;  %v5201_v46 = vrot.slane %v5199_v49, 6  ;;  %5924 = vmatpush3.bf16.msra.mxu0 %v6001_v58  ;;  %v6006_v15 = vld [vmem:[%s8156_s21] sm:$0xff]  }
0x1009   :  { %v5189_v53 = vrot.slane %v5187_v57, 5  ;;  %v4888_v31 = vor.u32 %v4887_v44, %v4884_v16  ;;  %v4897_v21 = vrot.slane %v4895_v20, 7  ;;  %v5192_v0 = vrot.slane %v5190_v14, 6  ;;  %5925 = vmatprep.subr.bf16.mxu0 %v6002_v26  ;;  %v6037_v14 = vld [vmem:[%s8158_s23] ss:$0 sm:$0xff] }
0x100a   :  { %5004 = vrot.lane.b32.xlu0 %v4990_v10, %s6068_s4  ;;  %v4870_v5 = vor.u32 %v4869_v51, %v4866_v18  ;;  %v4862_v28 = vrot.slane %v4860_v38, 4  ;;  %v4861_v62 = vsel %vm6377_vm8, %v7898_v9, %v4860_v38  ;;  %v5208_v9 = vrot.slane %v5206_v52, 5 }
0x100b   :  { %5006 = vrot.lane.b32.xlu1 %v4999_v22, %s6068_s4  ;;  %4904 = vst.msk [vmem:[#allocation3] sm:$0xf] %vm8297_vm5, %v4861_v62  ;;  %v4890_v4 = vrot.slane %v4888_v31, 4  ;;  %v4898_v22 = vor.u32 %v4897_v21, %v4894_v2  ;;  %v4889_v10 = vsel %vm6377_vm8, %v7975_v45, %v4888_v31  ;;  %v5211_v37 = vrot.slane %v5209_v55, 6  ;;  %vm8313_vm5 = vmmov %vm8309_vm1 }
0x100c   :  { %v4871_v34 = vsel %vm6377_vm8, %v4862_v28, %v4870_v5  ;;  %4906 = vst.msk [vmem:[#allocation3 + $0x8] sm:$0xf] %vm8298_vm10, %v4889_v10  ;;  %v5083_v45 = vsel %vm6282_vm12, %v7992_v41, %v7940_v33  ;;  %v5184_v52 = vor.u32 %v7896_v36, %v7894_v24  ;;  %5926 = vmatpush3.bf16.msra.mxu0 %v6002_v26  ;;  %v5176_v55 = vrot.slane %v7994_v7, 4  ;;  %v5235_v41 = vld [vmem:[#allocation2 + $0x28] sm:$0x3]  ;;  %vm8314_vm10 = vmmov %vm8309_vm1 }
0x100d   :  { %4905 = vst.msk [vmem:[#allocation3 + $0x4] sm:$0xf] %vm8299_vm13, %v4871_v34  ;;  %v4899_v50 = vsel %vm6377_vm8, %v4890_v4, %v4898_v22  ;;  %v5166_v47 = vrot.slane %v5165_v17, 4  ;;  %v5202_v59 = vor.u32 %v5201_v46, %v5198_v29  ;;  %v5193_v30 = vor.u32 %v5192_v0, %v5189_v53  ;;  %5927 = vmatprep.subr.bf16.mxu0 %v6003_v3 }
0x100e   :  { %5094 = vrot.lane.b32.xlu0 %v5059_v12, %s6073_s11  ;;  %4907 = vst.msk [vmem:[#allocation3 + $0xc] sm:$0xf] %vm8300_vm14, %v4899_v50  ;;  %v5212_v19 = vor.u32 %v5211_v37, %v5208_v9  ;;  %v5185_v36 = vsel %vm6337_vm4, %v5176_v55, %v5184_v52  ;;  %v5254_v54 = vrot.slane %v5235_v41, 6  ;;  %v5697_v49 = vrot.slane %v5233_v63, 10 }
0x100f   :  { %5096 = vrot.lane.b32.xlu1 %v5069_v42, %s6073_s11  ;;  %v5093_v42 = vsel %vm6282_vm12, %v7986_v61, %v7962_v56  ;;  %v5234_v56 = vld [vmem:[#allocation2 + $0x24] sm:$0xf]  ;;  %v5175_v33 = vsel %vm6337_vm4, %v5166_v47, %v7994_v7  ;;  %v5204_v61 = vrot.slane %v5202_v59, 4  ;;  %v5194_v48 = vrot.slane %v5193_v30, 4 }
0x1010   :  { %v5251_v24 = vrot.slane %v5234_v56, 6  ;;  %5928 = vmatpush3.bf16.msra.mxu0 %v6003_v3  ;;  %vm8301_vm12 = vcmask 388352   ;;  %vm8303_vm8 = vcmask 519552   ;;  %vm8311_vm0 = vcmask 781952  }
0x1011   :  { %5929 = vmatprep.subr.bf16.mxu0 %v6004_v25  ;;  %v5213_v58 = vsel %vm6337_vm4, %v5204_v61, %v5212_v19  ;;  %v5203_v7 = vsel %vm6337_vm4, %v5194_v48, %v5202_v59  ;;  %vm8302_vm4 = vmmov %vm8301_vm12 }
0x1012   :  { %5098 = vrot.lane.b32.xlu0 %v5083_v45, %s6073_s11  ;;  %v5253_v8 = vrot.slane %v5251_v24, 4  ;;  %v5252_v1 = vsel %vm6383_vm9, %v5697_v49, %v5251_v24  ;;  %vm8305_vm7 = vmmov %vm8302_vm4 }
0x1013   :  { %5100 = vrot.lane.b32.xlu1 %v5093_v42, %s6073_s11  ;;  %vm8307_vm2 = vmmov %vm8303_vm8 }
0x1014   :  { %5930 = vmatpush3.bf16.msra.mxu0 %v6004_v25  ;;  %v5255_v57 = vsel %vm6383_vm9, %v5253_v8, %v5254_v54  ;;  %vm8304_vm9 = vmmov %vm8303_vm8 }
0x1015   :  { %5931 = vmatprep.subr.bf16.mxu0 %v6006_v15  ;;  %vm8308_vm3 = vmmov %vm8307_vm2 }
0x1016   :  { %5214 = vrot.lane.b32.xlu0 %v5175_v33, %s6076_s5  ;;  %vm8312_vm11 = vmmov %vm8311_vm0 }
0x1017   :  { %5216 = vrot.lane.b32.xlu1 %v5185_v36, %s6076_s5  ;;  %vm8315_vm13 = vmmov %vm8311_vm0 }
0x1018   :  { %5932 = vmatpush3.bf16.msra.mxu0 %v6006_v15  ;;  %vm8316_vm14 = vmmov %vm8311_vm0 }
0x101a   :  { %5218 = vrot.lane.b32.xlu0 %v5203_v7, %s6076_s5 }
0x101b   :  { %5220 = vrot.lane.b32.xlu1 %v5213_v58, %s6076_s5 }
0x101e   :  { %5260 = vrot.lane.b32.xlu0 %v5252_v1, %s6075_s7 }
0x101f   :  { %5262 = vrot.lane.b32.xlu1 %v5255_v57, %s6075_s7 }
0x1022   :  { %4355 = vrot.lane.b32.xlu0 %v6036_v32, %s6064_s12 }
0x1023   :  { %4362 = vrot.lane.b32.xlu1 %v6037_v14, %s6064_s12 }
0x105c   :  { %v5025_v6 = vpop.permute.xlu0 %5024 }
0x105d   :  { %v5027_v23 = vpop.permute.xlu1 %5026 }
0x1060   :  { %v5029_v39 = vpop.permute.xlu0 %5028 }
0x1061   :  { %v5031_v35 = vpop.permute.xlu1 %5030 }
0x1064   :  { %v4935_v51 = vpop.permute.xlu0 %4934 }
0x1065   :  { %v4937_v18 = vpop.permute.xlu1 %4936  ;;  %4946 = vst.msk [vmem:[#allocation3] sm:$0xf] %vm2668_vm15, %v4935_v51 }
0x1066   :  { %4947 = vst.msk [vmem:[#allocation3 + $0x4] sm:$0xf] %vm2668_vm15, %v4937_v18 }
0x1068   :  { %v4939_v60 = vpop.permute.xlu0 %4938 }
0x1069   :  { %v4941_v40 = vpop.permute.xlu1 %4940  ;;  %4948 = vst.msk [vmem:[#allocation3 + $0x8] sm:$0xf] %vm2668_vm15, %v4939_v60 }
0x106a   :  { %4949 = vst.msk [vmem:[#allocation3 + $0xc] sm:$0xf] %vm2668_vm15, %v4941_v40  ;;  %vm8306_vm15 = vmmov %vm8302_vm4 }
0x106c   :  { %v5137_v16 = vpop.permute.xlu0 %5136 }
0x106d   :  { %v5139_v12 = vpop.permute.xlu1 %5138 }
0x1070   :  { %v5141_v20 = vpop.permute.xlu0 %5140 }
0x1071   :  { %v5143_v44 = vpop.permute.xlu1 %5142 }
0x1074   :  { %v5257_v17 = vpop.permute.xlu0 %5256 }
0x1075   :  { %v5259_v26 = vpop.permute.xlu1 %5258 }
0x1078   :  { %v5001_v38 = vpop.permute.xlu0 %5000 }
0x1079   :  { %v5003_v29 = vpop.permute.xlu1 %5002  ;;  %5012 = vst.msk [vmem:[#allocation3] sm:$0xf] %vm8302_vm4, %v5001_v38 }
0x107a   :  { %5013 = vst.msk [vmem:[#allocation3 + $0x4] sm:$0xf] %vm8301_vm12, %v5003_v29  ;;  %vm8317_vm12 = vcmask 913152  }
0x107b   :  { %5037 = vst.msk [vmem:[#allocation3 + $0x4] sm:$0xf] %vm8303_vm8, %v5027_v23  ;;  %vm8318_vm4 = vmmov %vm8317_vm12  ;;  %vm8319_vm8 = vcmask 1044352  }
0x107c   :  { %5036 = vst.msk [vmem:[#allocation3] sm:$0xf] %vm8304_vm9, %v5025_v6  ;;  %v5005_v46 = vpop.permute.xlu0 %5004  ;;  %vm8320_vm9 = vmmov %vm8319_vm8 }
0x107d   :  { %v5007_v2 = vpop.permute.xlu1 %5006  ;;  %5014 = vst.msk [vmem:[#allocation3 + $0x8] sm:$0xf] %vm8306_vm15, %v5005_v46  ;;  %vm8322_vm15 = vmmov %vm8318_vm4  ;;  %v5709_v46 = vld [vmem:[%s8162_s27] ss:$0 sm:$0xff] }
0x107e   :  { %5015 = vst.msk [vmem:[#allocation3 + $0xc] sm:$0xf] %vm8305_vm7, %v5007_v2  ;;  %vm8321_vm7 = vmmov %vm8318_vm4 }
0x107f   :  { %5039 = vst.msk [vmem:[#allocation3 + $0xc] sm:$0xf] %vm8307_vm2, %v5031_v35  ;;  %vm8323_vm2 = vmmov %vm8319_vm8 }
0x1080   :  { %5038 = vst.msk [vmem:[#allocation3 + $0x8] sm:$0xf] %vm8308_vm3, %v5029_v39  ;;  %v5095_v31 = vpop.permute.xlu0 %5094  ;;  %vm8324_vm3 = vmmov %vm8323_vm2 }
0x1081   :  { %v5097_v53 = vpop.permute.xlu1 %5096  ;;  %5106 = vst.msk [vmem:[#allocation3] sm:$0xf] %vm8310_vm6, %v5095_v31 }
0x1082   :  { %5107 = vst.msk [vmem:[#allocation3 + $0x4] sm:$0xf] %vm8309_vm1, %v5097_v53  ;;  %vm8325_vm1 = vcmask 130048  }
0x1083   :  { %5149 = vst.msk [vmem:[#allocation3 + $0x4] sm:$0xf] %vm8311_vm0, %v5139_v12  ;;  %vm8326_vm6 = vmmov %vm8325_vm1 }
0x1084   :  { %5148 = vst.msk [vmem:[#allocation3] sm:$0xf] %vm8312_vm11, %v5137_v16  ;;  %v5099_v0 = vpop.permute.xlu0 %5098  ;;  %vm8327_vm0 = vmmov %vm8325_vm1 }
0x1085   :  { %v5101_v21 = vpop.permute.xlu1 %5100  ;;  %5108 = vst.msk [vmem:[#allocation3 + $0x8] sm:$0xf] %vm8314_vm10, %v5099_v0  ;;  %vm8328_vm11 = vmmov %vm8327_vm0 }
0x1086   :  { %5109 = vst.msk [vmem:[#allocation3 + $0xc] sm:$0xf] %vm8313_vm5, %v5101_v21  ;;  %vm8329_vm5 = vmmov %vm8327_vm0 }
0x1087   :  { %5151 = vst.msk [vmem:[#allocation3 + $0xc] sm:$0xf] %vm8315_vm13, %v5143_v44  ;;  %vm8330_vm10 = vmmov %vm8327_vm0 }
0x1088   :  { %5150 = vst.msk [vmem:[#allocation3 + $0x8] sm:$0xf] %vm8316_vm14, %v5141_v20  ;;  %v5215_v28 = vpop.permute.xlu0 %5214  ;;  %vm8331_vm13 = vmmov %vm8327_vm0 }
0x1089   :  { %v5217_v5 = vpop.permute.xlu1 %5216  ;;  %5226 = vst.msk [vmem:[#allocation3] sm:$0xf] %vm8318_vm4, %v5215_v28  ;;  %vm8332_vm14 = vmmov %vm8327_vm0 }
0x108a   :  { %5227 = vst.msk [vmem:[#allocation3 + $0x4] sm:$0xf] %vm8317_vm12, %v5217_v5  ;;  %vm8333_vm12 = vcmask 261248  }
0x108b   :  { %5269 = vst.msk [vmem:[#allocation3 + $0x4] sm:$0xf] %vm8319_vm8, %v5259_v26  ;;  %v5708_v26 = vld [vmem:[%s8161_s26] ss:$0 sm:$0xff]  ;;  %vm8334_vm4 = vmmov %vm8333_vm12  ;;  %s6077_s26 = smov [#allocation4]  }
0x108c   :  { %5268 = vst.msk [vmem:[#allocation3] sm:$0xf] %vm8320_vm9, %v5257_v17  ;;  %v5219_v3 = vpop.permute.xlu0 %5218  ;;  %vm8335_vm8 = vmmov %vm8334_vm4  ;;  %s5509_s27 = sshll.u32 %s6077_s26, 4  ;;  %s5510_s27 = int_to_ptr.vmem [resolvable:$true] %s5509_s27 }
0x108d   :  { %v5221_v62 = vpop.permute.xlu1 %5220  ;;  %5228 = vst.msk [vmem:[#allocation3 + $0x8] sm:$0xf] %vm8322_vm15, %v5219_v3  ;;  %vm8336_vm9 = vmmov %vm8334_vm4  ;;  %vm5501_vm15 = vcmask 123904   ;;  %p6043_p1 = scmp.lt.s32.totalorder %s5510_s27, %s5510_s27 }
0x108e   :  { %5229 = vst.msk [vmem:[#allocation3 + $0xc] sm:$0xf] %vm8321_vm7, %v5221_v62  ;;  %vm5496_vm7 = vcmask 1041409  }
0x1090   :  { %v5261_v22 = vpop.permute.xlu0 %5260 }
0x1091   :  { %v5263_v4 = vpop.permute.xlu1 %5262  ;;  %5270 = vst.msk [vmem:[#allocation3 + $0x8] sm:$0xf] %vm8324_vm3, %v5261_v22 }
0x1092   :  { %5271 = vst.msk [vmem:[#allocation3 + $0xc] sm:$0xf] %vm8323_vm2, %v5263_v4 }
0x1093   :  { %v6005_v10 = vld [vmem:[#allocation3] sm:$0xff]  }
0x1094   :  { %5933 = vmatprep.mubr.bf16.mxu0 %v6005_v10  ;;  %v4356_v4 = vpop.permute.xlu0 %4355 }
0x1095   :  { %v4359_v22 = vmul.f32 %v4356_v4, %v7722_v27  ;;  %v4358_v10 = vmul.f32 %v4356_v4, %v7724_v13 }
0x1099   :  { %v6007_v9 = vld [vmem:[#allocation3 + $0x8] sm:$0xff]  }
0x109a   :  { %5934 = vmatmul.mubr.bf16.vlgmr.msra.gmra.mxu0 %v6007_v9  ;;  %v4363_v9 = vpop.permute.xlu1 %4362 }
0x115a   :  { %v5935_v37 = vpop.f32.mrf.mxu0 }
0x115b   :  { %v5390_v47 = vsel %vm8327_vm0, %v5935_v37, 0.0 }
0x115c   :  { %v5370_v34 = vpop.f32.mrf.mxu0 }
0x115d   :  { %v5387_v52 = vsel %vm8325_vm1, %v5370_v34, 0.0 }
0x115e   :  { %v5936_v42 = vpop.f32.mrf.mxu0 }
0x115f   :  { %v5392_v30 = vsel %vm8328_vm11, %v5936_v42, 0.0 }
0x1160   :  { %v5373_v45 = vpop.f32.mrf.mxu0 }
0x1161   :  { %v5388_v50 = vsel %vm8326_vm6, %v5373_v45, 0.0 }
0x1162   :  { %v5389_v55 = vadd.f32 %v5388_v50, %v5387_v52 }
0x1164   :  { %v5391_v59 = vadd.f32 %v5390_v47, %v5389_v55 }
0x1166   :  { %v5393_v56 = vadd.f32 %v5392_v30, %v5391_v59 }
0x1168   :  { %v5394_v25 = vrot.slane %v5393_v56, 4 }
0x116a   :  { %v5395_v19 = vadd.f32 %v5394_v25, %v5393_v56 }
0x116c   :  { %v5396_v24 = vrot.slane %v5395_v19, 2 }
0x116e   :  { %v5397_v36 = vadd.f32 %v5396_v24, %v5395_v19 }
0x1170   :  { %v5398_v33 = vrot.slane %v5397_v36, 1 }
0x1172   :  { %v5399_v61 = vadd.f32 %v5398_v33, %v5397_v36 }
0x1174   :  { %v5400_v48 = vmul.f32 0.03125, %v5399_v61 }
0x1176   :  { %v5401_v41 = vsub.f32 %v5370_v34, %v5400_v48  ;;  %v5402_v15 = vsub.f32 %v5373_v45, %v5400_v48  ;;  %v5403_v63 = vsub.f32 %v5935_v37, %v5400_v48  ;;  %v5404_v54 = vsub.f32 %v5936_v42, %v5400_v48 }
0x1177   :  { %v4366_v37 = vadd.f32 %v4363_v9, %v4359_v22  ;;  %v4365_v34 = vadd.f32 %v4363_v9, %v4358_v10  ;;  %v4361_v42 = vmul.f32 %v4356_v4, %v7726_v43  ;;  %v4360_v45 = vmul.f32 %v4356_v4, %v7728_v11 }
0x1178   :  { %v5405_v58 = vmul.f32 %v5401_v41, %v5401_v41  ;;  %v5406_v7 = vmul.f32 %v5402_v15, %v5402_v15  ;;  %v5407_v8 = vmul.f32 %v5403_v63, %v5403_v63  ;;  %v5408_v49 = vmul.f32 %v5404_v54, %v5404_v54 }
0x1179   :  { %v4368_v56 = vadd.f32 %v4363_v9, %v4361_v42  ;;  %v4367_v25 = vadd.f32 %v4363_v9, %v4360_v45 }
0x117a   :  { %v5409_v57 = vsel %vm8329_vm5, %v5405_v58, 0.0  ;;  %v5410_v1 = vsel %vm8330_vm10, %v5406_v7, 0.0  ;;  %v5412_v14 = vsel %vm8331_vm13, %v5407_v8, 0.0  ;;  %v5414_v6 = vsel %vm8332_vm14, %v5408_v49, 0.0 }
0x117b   :  { %v5411_v32 = vadd.f32 %v5410_v1, %v5409_v57 }
0x117d   :  { %v5413_v23 = vadd.f32 %v5412_v14, %v5411_v32 }
0x117f   :  { %v5415_v35 = vadd.f32 %v5414_v6, %v5413_v23 }
0x1181   :  { %v5416_v39 = vrot.slane %v5415_v35, 4 }
0x1183   :  { %v5417_v18 = vadd.f32 %v5416_v39, %v5415_v35 }
0x1185   :  { %v5418_v51 = vrot.slane %v5417_v18, 2 }
0x1187   :  { %v5419_v40 = vadd.f32 %v5418_v51, %v5417_v18 }
0x1189   :  { %v5420_v60 = vrot.slane %v5419_v40, 1 }
0x118b   :  { %v5421_v12 = vadd.f32 %v5420_v60, %v5419_v40 }
0x118d   :  { %v5422_v16 = vmul.f32 0.03125, %v5421_v12 }
0x118f   :  { %v5423_v44 = vadd.f32 1e-05, %v5422_v16 }
0x1191   :  { %6030 = vrsqrt.f32 %v5423_v44 }
0x119e   :  { %v6031_v20 = vpop.eup %6030 }
0x119f   :  { %v5426_v17 = vmul.f32 %v6031_v20, %v5402_v15  ;;  %v5425_v29 = vmul.f32 %v6031_v20, %v5401_v41  ;;  %v5428_v38 = vmul.f32 %v6031_v20, %v5404_v54  ;;  %v5427_v2 = vmul.f32 %v6031_v20, %v5403_v63 }
0x11a1   :  { %v5436_v53 = vmul.f32 %v5708_v26, %v5426_v17  ;;  %v5435_v31 = vmul.f32 %v5708_v26, %v5425_v29  ;;  %v5438_v5 = vmul.f32 %v5708_v26, %v5428_v38  ;;  %v5437_v28 = vmul.f32 %v5708_v26, %v5427_v2 }
0x11a3   :  { %v5446_v21 = vadd.f32 %v5709_v46, %v5436_v53  ;;  %v5445_v0 = vadd.f32 %v5709_v46, %v5435_v31  ;;  %v5448_v62 = vadd.f32 %v5709_v46, %v5438_v5  ;;  %v5447_v3 = vadd.f32 %v5709_v46, %v5437_v28 }
0x11a5   :  { %5455 = vrot.lane.b32.xlu1 %v5446_v21, %s6064_s12  ;;  %5453 = vrot.lane.b32.xlu0 %v5445_v0, %s6064_s12 }
0x11a9   :  { %5459 = vrot.lane.b32.xlu1 %v5448_v62, %s6064_s12  ;;  %5457 = vrot.lane.b32.xlu0 %v5447_v3, %s6064_s12  ;;  %s6038_s12 = scalar_lea.vmem %s5510_s27, 32 }
0x11aa   :  { %p6039_p0 = scmp.ne.s32.totalorder %s5510_s27, %s6038_s12  ;;  %p6044_p2 = scmp.lt.s32.totalorder %s6038_s12, %s6038_s12 }
0x11ac   :  { %p6045_p3 = por %p6044_p2, %p6043_p1 }
0x11ae   :  { %p6046_p4 = pnand %p6045_p3, %p6039_p0 }
0x1217   :  { %v5456_v52 = vpop.permute.xlu1 %5455  ;;  %v5454_v50 = vpop.permute.xlu0 %5453 }
0x1218   :  { %v5466_v55 = vadd.f32 %v5456_v52, %v4366_v37  ;;  %v5465_v47 = vadd.f32 %v5454_v50, %v4365_v34 }
0x121a   :  { %v5470_v59 = vmax.f32 %v5466_v55, 0.0  ;;  %v5469_v30 = vmax.f32 %v5465_v47, 0.0 }
0x121b   :  { %v5460_v19 = vpop.permute.xlu1 %5459  ;;  %v5458_v24 = vpop.permute.xlu0 %5457 }
0x121c   :  { %v5474_v27 = vsel %vm8333_vm12, %v5470_v59, 0.0  ;;  %v5473_v13 = vsel %vm8334_vm4, %v5469_v30, 0.0  ;;  %v5468_v36 = vadd.f32 %v5460_v19, %v4368_v56  ;;  %v5467_v33 = vadd.f32 %v5458_v24, %v4367_v25 }
0x121d   :  { %v5475_v61 = vadd.f32 %v5474_v27, %v5473_v13 }
0x121e   :  { %v5472_v43 = vmax.f32 %v5468_v36, 0.0  ;;  %v5471_v48 = vmax.f32 %v5467_v33, 0.0 }
0x121f   :  { %v5476_v11 = vrot.slane %v5475_v61, 4 }
0x1220   :  { %v5483_v41 = vsel %vm8335_vm8, %v5472_v43, 0.0  ;;  %v5482_v15 = vsel %vm8336_vm9, %v5471_v48, 0.0 }
0x1221   :  { %v5477_v63 = vadd.f32 %v5476_v11, %v5475_v61  ;;  %v5484_v54 = vadd.f32 %v5483_v41, %v5482_v15 }
0x1223   :  { %v5478_v58 = vrot.slane %v5477_v63, 2  ;;  %v5485_v7 = vrot.slane %v5484_v54, 4 }
0x1225   :  { %v5479_v8 = vadd.f32 %v5478_v58, %v5477_v63  ;;  %v5486_v49 = vadd.f32 %v5485_v7, %v5484_v54 }
0x1227   :  { %v5480_v57 = vrot.slane %v5479_v8, 1  ;;  %v5487_v1 = vrot.slane %v5486_v49, 2 }
0x1229   :  { %v5488_v32 = vadd.f32 %v5487_v1, %v5486_v49  ;;  %v5481_v23 = vadd.f32 %v5480_v57, %v5479_v8 }
0x122b   :  { %v5489_v14 = vrot.slane %v5488_v32, 1  ;;  %v5492_v35 = vmul.f32 0.0625, %v5481_v23 }
0x122d   :  { %v5490_v6 = vadd.f32 %v5489_v14, %v5488_v32 }
0x122f   :  { %v5493_v39 = vmul.f32 0.0625, %v5490_v6 }
0x1231   :  { %v5497_v18 = vsel %vm5496_vm7, %v5493_v39, %v5492_v35 }
0x1232   :  { %5498 = vrot.lane.b32.xlu0 %v5497_v18, %s6075_s7 }
0x12a4   :  { %v5499_v51 = vpop.permute.xlu0 %5498 }
0x12a5   :  { %5502 = vst.msk [vmem:[#allocation4] sm:$0x3] %vm5501_vm15, %v5499_v51 }
0x12a6   :  { %6049 = shalt.err (!%p6046_p4)
}
0x12a7   :  { %5512 = dma.vmem_to_hbm [thread:$0]  %s5510_s27, 32, %s8163_s28, [#allocation5]  }
0x12a8   :  { %6058 = dma.done.wait [#allocation5], 32  }
0x12a9   :  { %6059 = vsyncadd [#allocation5], 4294967264 }
0x12aa   :  { %5516 = vsyncpa [#allocation5], 1 }

</bundles_post_ra>
